<compile_context>
chip_gen: v6e
topology: v6e:2x2x1
jax: 0.10.0
libtpu: 0.0.40
codegen_flags: <defaults>
</compile_context>

<pallas_src>
import numpy as np
import jax
import jax.numpy as jnp
from jax.experimental import pallas as pl
from jax.experimental.pallas import tpu as pltpu


# ----------------------------- Pallas kernels ------------------------------ #

def _conv1_kernel(cols_ref, w_ref, b_ref, o_ref):
    # cols_ref: (1, 9*Cin, S1*S1) bf16  (K on sublanes, spatial on lanes)
    # w_ref:    (16, 9*Cin) bf16, b_ref: (16, 1) f32, o_ref: (1, 16, S1*S1) bf16
    acc = jnp.dot(w_ref[...], cols_ref[0], preferred_element_type=jnp.float32)
    o_ref[0] = jnp.maximum(acc + b_ref[...], 0.0).astype(jnp.bfloat16)


def _tail_kernel(cols2_ref, w2_ref, b2_ref,
                 sel3_ref, w3_ref, b3_ref,
                 sel4_ref, w4_ref, b4_ref,
                 sel5_ref, w5_ref, b5_ref,
                 w1f_ref, b1f_ref, w2f_ref, b2f_ref, w3f_ref, b3f_ref,
                 o_ref, cols3_scr, cols4_scr, cols5_scr):
    """One image: conv2..conv5 (stride-2 pool folded in) + flatten + fc1/fc2/fc3.

    Activations are (channels, spatial) bf16; accumulation is f32 on the MXU.
    """
    # conv2: plain im2col matmul (columns built in XLA glue).
    a = jnp.dot(w2_ref[...], cols2_ref[0], preferred_element_type=jnp.float32)
    act = jnp.maximum(a + b2_ref[...], 0.0).astype(jnp.bfloat16)          # (32, 529)

    # conv3/4/5: exact bf16 one-hot gathers per 3x3 tap, stacked into a VMEM
    # scratch, then ONE consolidated (Cout, 9*Cin) @ (9*Cin, n_out) weight matmul.
    for sel_ref, w_ref, b_ref, col_scr in (
            (sel3_ref, w3_ref, b3_ref, cols3_scr),        # -> (64, 121)
            (sel4_ref, w4_ref, b4_ref, cols4_scr),        # -> (128, 25)
            (sel5_ref, w5_ref, b5_ref, cols5_scr)):       # -> (256, 4)
        cin = act.shape[0]
        for t in range(9):                                # static 3x3 taps
            g = jnp.dot(act, sel_ref[t], preferred_element_type=jnp.float32)
            col_scr[t * cin:(t + 1) * cin, :] = g.astype(jnp.bfloat16)
        a = jnp.dot(w_ref[...], col_scr[...], preferred_element_type=jnp.float32)
        act = jnp.maximum(a + b_ref[...], 0.0).astype(jnp.bfloat16)

    # fc1: the PyTorch NCHW flatten of (256, 2, 2) is folded into 4 per-position
    # weight blocks -> 4 static column matmuls, no in-kernel transpose/reshape.
    h = b1f_ref[...]                                       # (100, 1) f32
    for p in range(4):
        h = h + jnp.dot(w1f_ref[p], act[:, p:p + 1],
                        preferred_element_type=jnp.float32)
    h = jnp.maximum(h, 0.0).astype(jnp.bfloat16)
    h = jnp.dot(w2f_ref[...], h, preferred_element_type=jnp.float32) + b2f_ref[...]
    h = jnp.maximum(h, 0.0).astype(jnp.bfloat16)
    o_ref[0] = jnp.dot(w3f_ref[...], h, preferred_element_type=jnp.float32) + b3f_ref[...]


# ------------------------------ XLA-side glue ------------------------------ #

def _strided_im2col_chw(x, out_hw):
    """x: (B, C, H, W) -> (B, 9*C, out_hw*out_hw); K ordering = (tap, cin).

    3x3/VALID conv patches evaluated only at even output positions, i.e. with the
    MaxPool2d(kernel_size=1, stride=2) folded in.  Lane-dense: spatial on lanes.
    """
    b, c = x.shape[0], x.shape[1]
    span = 2 * out_hw - 1
    taps = [x[:, :, dy:dy + span:2, dx:dx + span:2]
            for dy in range(3) for dx in range(3)]
    cols = jnp.stack(taps, axis=1)                  # (B, 9, C, out, out)
    return cols.reshape(b, 9 * c, out_hw * out_hw)


def _conv_w_mat(w_oihw):
    """(O, I, 3, 3) -> (O, 9*I) bf16, K ordered (tap, cin) to match the im2col."""
    o = w_oihw.shape[0]
    return jnp.transpose(w_oihw, (0, 2, 3, 1)).reshape(o, -1).astype(jnp.bfloat16)


def _pool_conv_selectors_T(in_hw, out_hw):
    """(9, in_hw^2, out_hw^2) one-hot selectors: column p of tap (dy, dx) picks
    input position (2*oi+dy, 2*oj+dx).  0/1 are exact in bf16."""
    sel = np.zeros((9, in_hw * in_hw, out_hw * out_hw), np.float32)
    oi, oj = np.meshgrid(np.arange(out_hw), np.arange(out_hw), indexing="ij")
    cols = (oi * out_hw + oj).reshape(-1)
    for dy in range(3):
        for dx in range(3):
            src = ((2 * oi + dy) * in_hw + (2 * oj + dx)).reshape(-1)
            sel[dy * 3 + dx, src, cols] = 1.0
    return jnp.asarray(sel, jnp.bfloat16)


def _spatial_sizes(grid_size):
    sizes = [grid_size]
    for _ in range(5):
        conv = sizes[-1] - 2
        sizes.append((conv - 1) // 2 + 1)            # MaxPool2d(k=1, stride=2)
    return sizes                                     # [in, s1, s2, s3, s4, s5]


def _col_bias(b):
    return b.reshape(-1, 1).astype(jnp.float32)


# ---------------------------- parameter setup ------------------------------ #

def _uniform(key, shape, bound):
    return jax.random.uniform(key, shape, jnp.float32, minval=-bound, maxval=bound)


def init_params(input_channels, key):
    """PyTorch-default-style init: U(-1/sqrt(fan_in), 1/sqrt(fan_in))."""
    conv_channels = [input_channels, 16, 32, 64, 128, 256]
    fc_dims = [(1024, 100), (100, 30), (30, 1)]
    keys = jax.random.split(key, 2 * 5 + 2 * 3)
    ki = iter(range(len(keys)))

    convs = []
    for cin, cout in zip(conv_channels[:-1], conv_channels[1:]):
        bound = 1.0 / float(np.sqrt(cin * 9.0))
        w = _uniform(keys[next(ki)], (cout, cin, 3, 3), bound)      # PyTorch OIHW
        b = _uniform(keys[next(ki)], (cout,), bound)
        convs.append((w, b))

    fcs = []
    for fin, fout in fc_dims:
        bound = 1.0 / float(np.sqrt(fin))
        w = _uniform(keys[next(ki)], (fin, fout), bound)            # stored (in, out)
        b = _uniform(keys[next(ki)], (fout,), bound)
        fcs.append((w, b))
    return {"convs": convs, "fcs": fcs}


def prepare_params(params, grid_size):
    """Kernel-ready weights: bf16 matmul-form convs, transposed one-hot selectors,
    flatten-reordered fc weights, column-vector f32 biases."""
    sizes = _spatial_sizes(grid_size)
    (w1, b1), (w2, b2), (w3, b3), (w4, b4), (w5, b5) = params["convs"]
    (wf1, bf1), (wf2, bf2), (wf3, bf3) = params["fcs"]

    # fc1 input index k = c*4 + p (PyTorch NCHW flatten of (256, 2, 2)); reorder to
    # (p, out, c) so the kernel consumes the (256, 4) conv5 activation directly.
    wf1r = wf1.reshape(256, 4, 100).transpose(1, 2, 0).astype(jnp.bfloat16)

    return {
        "conv1": (_conv_w_mat(w1), _col_bias(b1)),
        "tail": (
            _conv_w_mat(w2), _col_bias(b2),
            _pool_conv_selectors_T(sizes[2], sizes[3]), _conv_w_mat(w3), _col_bias(b3),
            _pool_conv_selectors_T(sizes[3], sizes[4]), _conv_w_mat(w4), _col_bias(b4),
            _pool_conv_selectors_T(sizes[4], sizes[5]), _conv_w_mat(w5), _col_bias(b5),
            wf1r, _col_bias(bf1),
            jnp.transpose(wf2).astype(jnp.bfloat16), _col_bias(bf2),
            jnp.transpose(wf3).astype(jnp.bfloat16), _col_bias(bf3),
        ),
    }


# ------------------------------- forward ----------------------------------- #

def cnn_critic_forward(x_nchw, kp):
    """x_nchw: (B, C, H, W) float -> (B, 1) float32."""
    x = x_nchw.astype(jnp.bfloat16)
    batch = x.shape[0]
    sizes = _spatial_sizes(x.shape[2])

    w1m, b1 = kp["conv1"]
    c1 = w1m.shape[0]                                  # 16
    m1 = sizes[1] * sizes[1]                           # 2209

    def _const_spec(arr):
        # Grid-invariant input: constant index_map + single buffering.
        return pl.BlockSpec(arr.shape, lambda i, _nd=arr.ndim: (0,) * _nd,
                            pipeline_mode=pl.Buffered(1))

    # --- conv1 (+ folded stride-2 pool): lane-dense im2col + Pallas matmul ------ #
    cols1 = _strided_im2col_chw(x, sizes[1])           # (B, 9*Cin, 2209) bf16
    act1 = pl.pallas_call(
        _conv1_kernel,
        out_shape=jax.ShapeDtypeStruct((batch, c1, m1), jnp.bfloat16),
        grid=(batch,),
        in_specs=[
            pl.BlockSpec((1, cols1.shape[1], m1), lambda i: (i, 0, 0)),
            _const_spec(w1m),
            _const_spec(b1),
        ],
        out_specs=pl.BlockSpec((1, c1, m1), lambda i: (i, 0, 0)),
        compiler_params=pltpu.CompilerParams(dimension_semantics=("parallel",)),
    )(cols1, w1m, b1)

    # --- conv2 stride-2 im2col: cheap XLA glue on the bf16 act1 ----------------- #
    act1_chw = act1.reshape(batch, c1, sizes[1], sizes[1])
    cols2 = _strided_im2col_chw(act1_chw, sizes[2])    # (B, 144, 529) bf16

    # --- conv2..fc3 fully fused; weights/selectors single-buffered in VMEM ------ #
    tail = kp["tail"]
    in_specs = [pl.BlockSpec((1, cols2.shape[1], cols2.shape[2]), lambda i: (i, 0, 0))]
    in_specs += [_const_spec(arr) for arr in tail]

    n3 = sizes[3] * sizes[3]                           # 121
    n4 = sizes[4] * sizes[4]                           # 25
    n5 = sizes[5] * sizes[5]                           # 4
    q = pl.pallas_call(
        _tail_kernel,
        out_shape=jax.ShapeDtypeStruct((batch, 1, 1), jnp.float32),
        grid=(batch,),
        in_specs=in_specs,
        out_specs=pl.BlockSpec((1, 1, 1), lambda i: (i, 0, 0)),
        scratch_shapes=[
            pltpu.VMEM((9 * 32, n3), jnp.bfloat16),    # stacked conv3 tap columns
            pltpu.VMEM((9 * 64, n4), jnp.bfloat16),    # stacked conv4 tap columns
            pltpu.VMEM((9 * 128, n5), jnp.bfloat16),   # stacked conv5 tap columns
        ],
        compiler_params=pltpu.CompilerParams(
            dimension_semantics=("parallel",),
            vmem_limit_bytes=32 * 1024 * 1024,
        ),
    )(cols2, *tail)
    return q.reshape(batch, 1)


# ----------------------------- pure-JAX reference --------------------------- #

def reference_forward(x_nchw, params):
    x = x_nchw.astype(jnp.float32)
    for w, b in params["convs"]:
        x = jax.lax.conv_general_dilated(
            x, w, window_strides=(1, 1), padding="VALID",
            dimension_numbers=("NCHW", "OIHW", "NCHW"))
        x = jax.nn.relu(x + b.reshape(1, -1, 1, 1))
        x = x[:, :, ::2, ::2]                          # MaxPool2d(kernel_size=1, stride=2)
    x = x.reshape(x.shape[0], -1)
    (w1, b1), (w2, b2), (w3, b3) = params["fcs"]
    x = jax.nn.relu(x @ w1 + b1)
    x = jax.nn.relu(x @ w2 + b2)
    return x @ w3 + b3


# --------------------------------- main ------------------------------------ #

if __name__ == "__main__":
    input_channels = 4
    grid_size = 96      # fc1 expects 1024 = 256*2*2 inputs, which forces this size
    batch = 2

    key = jax.random.PRNGKey(0)
    k_param, k_x = jax.random.split(key)
    params = init_params(input_channels, k_param)
    kparams = prepare_params(params, grid_size)
    x = jax.random.normal(k_x, (batch, input_channels, grid_size, grid_size), jnp.float32)

    fwd = jax.jit(cnn_critic_forward)
    q = jax.block_until_ready(fwd(x, kparams))

    q_ref = jax.block_until_ready(reference_forward(x, params))
    assert q.shape == (batch, 1) and q.dtype == jnp.float32
    # bf16 operands / f32 accumulation vs the f32 reference: allow small drift.
    if not np.allclose(np.asarray(q), np.asarray(q_ref), atol=1e-3, rtol=2e-2):
        raise AssertionError(f"mismatch:\n{np.asarray(q)}\nvs\n{np.asarray(q_ref)}")
    print("KERNEL_OK")
</pallas_src>

<mosaic_0001>
module attributes {stable_mosaic.version = 11 : i64} {
  func.func @_conv1_kernel(%arg0: i32, %arg1: memref<1x36x2209xbf16, #tpu.memory_space<vmem>>, %arg2: memref<16x36xbf16, #tpu.memory_space<vmem>>, %arg3: memref<16x1xf32, #tpu.memory_space<vmem>>, %arg4: memref<1x16x2209xbf16, #tpu.memory_space<vmem>>) attributes {dimension_semantics = [#tpu.dimension_semantics<parallel>], iteration_bounds = array<i64: 2>, scalar_prefetch = 0 : i64, scratch_operands = 0 : i64, tpu.core_type = #tpu.core_type<tc>, window_params = [{transform_indices = @transform_0, window_bounds = array<i64: 1, 36, 2209>}, {pipeline_mode = #tpu.pipeline_mode<synchronous>, transform_indices = @transform_1, window_bounds = array<i64: 16, 36>}, {pipeline_mode = #tpu.pipeline_mode<synchronous>, transform_indices = @transform_2, window_bounds = array<i64: 16, 1>}, {transform_indices = @transform_3, window_bounds = array<i64: 1, 16, 2209>}]} {
    %c0 = arith.constant 0 : index
    %c0_0 = arith.constant 0 : index
    %0 = vector.load %arg2[%c0, %c0_0] : memref<16x36xbf16, #tpu.memory_space<vmem>>, vector<16x36xbf16>
    %c0_1 = arith.constant 0 : index
    %c0_2 = arith.constant 0 : index
    %c0_3 = arith.constant 0 : index
    %1 = vector.load %arg1[%c0_1, %c0_2, %c0_3] : memref<1x36x2209xbf16, #tpu.memory_space<vmem>>, vector<1x36x2209xbf16>
    %2 = vector.shape_cast %1 : vector<1x36x2209xbf16> to vector<36x2209xbf16>
    %cst = arith.constant dense<0.000000e+00> : vector<16x2209xf32>
    %3 = tpu.matmul %0, %2, %cst {dimension_numbers = #tpu.dot_dimension_numbers<[1], [0], [0], [1], [0, 0, 1, 1], [], []>} : vector<16x36xbf16>, vector<36x2209xbf16>, vector<16x2209xf32> -> vector<16x2209xf32>
    %c0_4 = arith.constant 0 : index
    %c0_5 = arith.constant 0 : index
    %4 = vector.load %arg3[%c0_4, %c0_5] : memref<16x1xf32, #tpu.memory_space<vmem>>, vector<16x1xf32>
    %5 = vector.broadcast %4 : vector<16x1xf32> to vector<16x2209xf32>
    %6 = arith.addf %3, %5 : vector<16x2209xf32>
    %cst_6 = arith.constant 0.000000e+00 : f32
    %7 = vector.broadcast %cst_6 : f32 to vector<16x2209xf32>
    %8 = arith.maximumf %6, %7 : vector<16x2209xf32>
    %9 = arith.truncf %8 : vector<16x2209xf32> to vector<16x2209xbf16>
    %c0_7 = arith.constant 0 : index
    %c0_8 = arith.constant 0 : index
    %c0_9 = arith.constant 0 : index
    %10 = vector.load %arg4[%c0_7, %c0_8, %c0_9] : memref<1x16x2209xbf16, #tpu.memory_space<vmem>>, vector<1x16x2209xbf16>
    %11 = vector.shape_cast %10 : vector<1x16x2209xbf16> to vector<16x2209xbf16>
    %12 = vector.shape_cast %9 : vector<16x2209xbf16> to vector<1x16x2209xbf16>
    tpu.vector_store %arg4[%c0_7, %c0_8, %c0_9], %12 {strides = array<i32>} : memref<1x16x2209xbf16, #tpu.memory_space<vmem>>, vector<1x16x2209xbf16>,
    return
  }
  func.func @transform_0(%arg0: i32) -> (i32, i32, i32) {
    %c0_i32 = arith.constant 0 : i32
    %c0_i32_0 = arith.constant 0 : i32
    %c0_i32_1 = arith.constant 0 : i32
    return %arg0, %c0_i32, %c0_i32_0 : i32, i32, i32
  }
  func.func @transform_1(%arg0: i32) -> (i32, i32) {
    %c0_i32 = arith.constant 0 : i32
    %c0_i32_0 = arith.constant 0 : i32
    %c0_i32_1 = arith.constant 0 : i32
    return %c0_i32, %c0_i32_0 : i32, i32
  }
  func.func @transform_2(%arg0: i32) -> (i32, i32) {
    %c0_i32 = arith.constant 0 : i32
    %c0_i32_0 = arith.constant 0 : i32
    %c0_i32_1 = arith.constant 0 : i32
    return %c0_i32, %c0_i32_0 : i32, i32
  }
  func.func @transform_3(%arg0: i32) -> (i32, i32, i32) {
    %c0_i32 = arith.constant 0 : i32
    %c0_i32_0 = arith.constant 0 : i32
    %c0_i32_1 = arith.constant 0 : i32
    return %arg0, %c0_i32, %c0_i32_0 : i32, i32, i32
  }
}

module attributes {stable_mosaic.version = 11 : i64} {
  func.func @_tail_kernel(%arg0: i32, %arg1: memref<1x144x529xbf16, #tpu.memory_space<vmem>>, %arg2: memref<32x144xbf16, #tpu.memory_space<vmem>>, %arg3: memref<32x1xf32, #tpu.memory_space<vmem>>, %arg4: memref<9x529x121xbf16, #tpu.memory_space<vmem>>, %arg5: memref<64x288xbf16, #tpu.memory_space<vmem>>, %arg6: memref<64x1xf32, #tpu.memory_space<vmem>>, %arg7: memref<9x121x25xbf16, #tpu.memory_space<vmem>>, %arg8: memref<128x576xbf16, #tpu.memory_space<vmem>>, %arg9: memref<128x1xf32, #tpu.memory_space<vmem>>, %arg10: memref<9x25x4xbf16, #tpu.memory_space<vmem>>, %arg11: memref<256x1152xbf16, #tpu.memory_space<vmem>>, %arg12: memref<256x1xf32, #tpu.memory_space<vmem>>, %arg13: memref<4x100x256xbf16, #tpu.memory_space<vmem>>, %arg14: memref<100x1xf32, #tpu.memory_space<vmem>>, %arg15: memref<30x100xbf16, #tpu.memory_space<vmem>>, %arg16: memref<30x1xf32, #tpu.memory_space<vmem>>, %arg17: memref<1x30xbf16, #tpu.memory_space<vmem>>, %arg18: memref<1x1xf32, #tpu.memory_space<vmem>>, %arg19: memref<1x1x1xf32, #tpu.memory_space<vmem>>, %arg20: memref<288x121xbf16, #tpu.memory_space<vmem>>, %arg21: memref<576x25xbf16, #tpu.memory_space<vmem>>, %arg22: memref<1152x4xbf16, #tpu.memory_space<vmem>>) attributes {dimension_semantics = [#tpu.dimension_semantics<parallel>], iteration_bounds = array<i64: 2>, scalar_prefetch = 0 : i64, scratch_operands = 3 : i64, tpu.core_type = #tpu.core_type<tc>, window_params = [{transform_indices = @transform_0, window_bounds = array<i64: 1, 144, 529>}, {pipeline_mode = #tpu.pipeline_mode<synchronous>, transform_indices = @transform_1, window_bounds = array<i64: 32, 144>}, {pipeline_mode = #tpu.pipeline_mode<synchronous>, transform_indices = @transform_2, window_bounds = array<i64: 32, 1>}, {pipeline_mode = #tpu.pipeline_mode<synchronous>, transform_indices = @transform_3, window_bounds = array<i64: 9, 529, 121>}, {pipeline_mode = #tpu.pipeline_mode<synchronous>, transform_indices = @transform_4, window_bounds = array<i64: 64, 288>}, {pipeline_mode = #tpu.pipeline_mode<synchronous>, transform_indices = @transform_5, window_bounds = array<i64: 64, 1>}, {pipeline_mode = #tpu.pipeline_mode<synchronous>, transform_indices = @transform_6, window_bounds = array<i64: 9, 121, 25>}, {pipeline_mode = #tpu.pipeline_mode<synchronous>, transform_indices = @transform_7, window_bounds = array<i64: 128, 576>}, {pipeline_mode = #tpu.pipeline_mode<synchronous>, transform_indices = @transform_8, window_bounds = array<i64: 128, 1>}, {pipeline_mode = #tpu.pipeline_mode<synchronous>, transform_indices = @transform_9, window_bounds = array<i64: 9, 25, 4>}, {pipeline_mode = #tpu.pipeline_mode<synchronous>, transform_indices = @transform_10, window_bounds = array<i64: 256, 1152>}, {pipeline_mode = #tpu.pipeline_mode<synchronous>, transform_indices = @transform_11, window_bounds = array<i64: 256, 1>}, {pipeline_mode = #tpu.pipeline_mode<synchronous>, transform_indices = @transform_12, window_bounds = array<i64: 4, 100, 256>}, {pipeline_mode = #tpu.pipeline_mode<synchronous>, transform_indices = @transform_13, window_bounds = array<i64: 100, 1>}, {pipeline_mode = #tpu.pipeline_mode<synchronous>, transform_indices = @transform_14, window_bounds = array<i64: 30, 100>}, {pipeline_mode = #tpu.pipeline_mode<synchronous>, transform_indices = @transform_15, window_bounds = array<i64: 30, 1>}, {pipeline_mode = #tpu.pipeline_mode<synchronous>, transform_indices = @transform_16, window_bounds = array<i64: 1, 30>}, {pipeline_mode = #tpu.pipeline_mode<synchronous>, transform_indices = @transform_17, window_bounds = array<i64: 1, 1>}, {transform_indices = @transform_18, window_bounds = array<i64: 1, 1, 1>}]} {
    %c0 = arith.constant 0 : index
    %c0_0 = arith.constant 0 : index
    %0 = vector.load %arg2[%c0, %c0_0] : memref<32x144xbf16, #tpu.memory_space<vmem>>, vector<32x144xbf16>
    %c0_1 = arith.constant 0 : index
    %c0_2 = arith.constant 0 : index
    %c0_3 = arith.constant 0 : index
    %1 = vector.load %arg1[%c0_1, %c0_2, %c0_3] : memref<1x144x529xbf16, #tpu.memory_space<vmem>>, vector<1x144x529xbf16>
    %2 = vector.shape_cast %1 : vector<1x144x529xbf16> to vector<144x529xbf16>
    %cst = arith.constant dense<0.000000e+00> : vector<32x529xf32>
    %3 = tpu.matmul %0, %2, %cst {dimension_numbers = #tpu.dot_dimension_numbers<[1], [0], [0], [1], [0, 0, 1, 1], [], []>} : vector<32x144xbf16>, vector<144x529xbf16>, vector<32x529xf32> -> vector<32x529xf32>
    %c0_4 = arith.constant 0 : index
    %c0_5 = arith.constant 0 : index
    %4 = vector.load %arg3[%c0_4, %c0_5] : memref<32x1xf32, #tpu.memory_space<vmem>>, vector<32x1xf32>
    %5 = vector.broadcast %4 : vector<32x1xf32> to vector<32x529xf32>
    %6 = arith.addf %3, %5 : vector<32x529xf32>
    %cst_6 = arith.constant 0.000000e+00 : f32
    %7 = vector.broadcast %cst_6 : f32 to vector<32x529xf32>
    %8 = arith.maximumf %6, %7 : vector<32x529xf32>
    %9 = arith.truncf %8 : vector<32x529xf32> to vector<32x529xbf16>
    %c0_7 = arith.constant 0 : index
    %c0_8 = arith.constant 0 : index
    %c0_9 = arith.constant 0 : index
    %10 = vector.load %arg4[%c0_7, %c0_8, %c0_9] : memref<9x529x121xbf16, #tpu.memory_space<vmem>>, vector<1x529x121xbf16>
    %11 = vector.shape_cast %10 : vector<1x529x121xbf16> to vector<529x121xbf16>
    %cst_10 = arith.constant dense<0.000000e+00> : vector<32x121xf32>
    %12 = tpu.matmul %9, %11, %cst_10 {dimension_numbers = #tpu.dot_dimension_numbers<[1], [0], [0], [1], [0, 0, 1, 1], [], []>} : vector<32x529xbf16>, vector<529x121xbf16>, vector<32x121xf32> -> vector<32x121xf32>
    %13 = arith.truncf %12 : vector<32x121xf32> to vector<32x121xbf16>
    %c0_11 = arith.constant 0 : index
    %c0_12 = arith.constant 0 : index
    %14 = vector.load %arg20[%c0_11, %c0_12] : memref<288x121xbf16, #tpu.memory_space<vmem>>, vector<32x121xbf16>
    tpu.vector_store %arg20[%c0_11, %c0_12], %13 {strides = array<i32>} : memref<288x121xbf16, #tpu.memory_space<vmem>>, vector<32x121xbf16>,
    %c1 = arith.constant 1 : index
    %c0_13 = arith.constant 0 : index
    %c0_14 = arith.constant 0 : index
    %15 = vector.load %arg4[%c1, %c0_13, %c0_14] : memref<9x529x121xbf16, #tpu.memory_space<vmem>>, vector<1x529x121xbf16>
    %16 = vector.shape_cast %15 : vector<1x529x121xbf16> to vector<529x121xbf16>
    %cst_15 = arith.constant dense<0.000000e+00> : vector<32x121xf32>
    %17 = tpu.matmul %9, %16, %cst_15 {dimension_numbers = #tpu.dot_dimension_numbers<[1], [0], [0], [1], [0, 0, 1, 1], [], []>} : vector<32x529xbf16>, vector<529x121xbf16>, vector<32x121xf32> -> vector<32x121xf32>
    %18 = arith.truncf %17 : vector<32x121xf32> to vector<32x121xbf16>
    %c32 = arith.constant 32 : index
    %c0_16 = arith.constant 0 : index
    %19 = vector.load %arg20[%c32, %c0_16] : memref<288x121xbf16, #tpu.memory_space<vmem>>, vector<32x121xbf16>
    tpu.vector_store %arg20[%c32, %c0_16], %18 {strides = array<i32>} : memref<288x121xbf16, #tpu.memory_space<vmem>>, vector<32x121xbf16>,
    %c2 = arith.constant 2 : index
    %c0_17 = arith.constant 0 : index
    %c0_18 = arith.constant 0 : index
    %20 = vector.load %arg4[%c2, %c0_17, %c0_18] : memref<9x529x121xbf16, #tpu.memory_space<vmem>>, vector<1x529x121xbf16>
    %21 = vector.shape_cast %20 : vector<1x529x121xbf16> to vector<529x121xbf16>
    %cst_19 = arith.constant dense<0.000000e+00> : vector<32x121xf32>
    %22 = tpu.matmul %9, %21, %cst_19 {dimension_numbers = #tpu.dot_dimension_numbers<[1], [0], [0], [1], [0, 0, 1, 1], [], []>} : vector<32x529xbf16>, vector<529x121xbf16>, vector<32x121xf32> -> vector<32x121xf32>
    %23 = arith.truncf %22 : vector<32x121xf32> to vector<32x121xbf16>
    %c64 = arith.constant 64 : index
    %c0_20 = arith.constant 0 : index
    %24 = vector.load %arg20[%c64, %c0_20] : memref<288x121xbf16, #tpu.memory_space<vmem>>, vector<32x121xbf16>
    tpu.vector_store %arg20[%c64, %c0_20], %23 {strides = array<i32>} : memref<288x121xbf16, #tpu.memory_space<vmem>>, vector<32x121xbf16>,
    %c3 = arith.constant 3 : index
    %c0_21 = arith.constant 0 : index
    %c0_22 = arith.constant 0 : index
    %25 = vector.load %arg4[%c3, %c0_21, %c0_22] : memref<9x529x121xbf16, #tpu.memory_space<vmem>>, vector<1x529x121xbf16>
    %26 = vector.shape_cast %25 : vector<1x529x121xbf16> to vector<529x121xbf16>
    %cst_23 = arith.constant dense<0.000000e+00> : vector<32x121xf32>
    %27 = tpu.matmul %9, %26, %cst_23 {dimension_numbers = #tpu.dot_dimension_numbers<[1], [0], [0], [1], [0, 0, 1, 1], [], []>} : vector<32x529xbf16>, vector<529x121xbf16>, vector<32x121xf32> -> vector<32x121xf32>
    %28 = arith.truncf %27 : vector<32x121xf32> to vector<32x121xbf16>
    %c96 = arith.constant 96 : index
    %c0_24 = arith.constant 0 : index
    %29 = vector.load %arg20[%c96, %c0_24] : memref<288x121xbf16, #tpu.memory_space<vmem>>, vector<32x121xbf16>
    tpu.vector_store %arg20[%c96, %c0_24], %28 {strides = array<i32>} : memref<288x121xbf16, #tpu.memory_space<vmem>>, vector<32x121xbf16>,
    %c4 = arith.constant 4 : index
    %c0_25 = arith.constant 0 : index
    %c0_26 = arith.constant 0 : index
    %30 = vector.load %arg4[%c4, %c0_25, %c0_26] : memref<9x529x121xbf16, #tpu.memory_space<vmem>>, vector<1x529x121xbf16>
    %31 = vector.shape_cast %30 : vector<1x529x121xbf16> to vector<529x121xbf16>
    %cst_27 = arith.constant dense<0.000000e+00> : vector<32x121xf32>
    %32 = tpu.matmul %9, %31, %cst_27 {dimension_numbers = #tpu.dot_dimension_numbers<[1], [0], [0], [1], [0, 0, 1, 1], [], []>} : vector<32x529xbf16>, vector<529x121xbf16>, vector<32x121xf32> -> vector<32x121xf32>
    %33 = arith.truncf %32 : vector<32x121xf32> to vector<32x121xbf16>
    %c128 = arith.constant 128 : index
    %c0_28 = arith.constant 0 : index
    %34 = vector.load %arg20[%c128, %c0_28] : memref<288x121xbf16, #tpu.memory_space<vmem>>, vector<32x121xbf16>
    tpu.vector_store %arg20[%c128, %c0_28], %33 {strides = array<i32>} : memref<288x121xbf16, #tpu.memory_space<vmem>>, vector<32x121xbf16>,
    %c5 = arith.constant 5 : index
    %c0_29 = arith.constant 0 : index
    %c0_30 = arith.constant 0 : index
    %35 = vector.load %arg4[%c5, %c0_29, %c0_30] : memref<9x529x121xbf16, #tpu.memory_space<vmem>>, vector<1x529x121xbf16>
    %36 = vector.shape_cast %35 : vector<1x529x121xbf16> to vector<529x121xbf16>
    %cst_31 = arith.constant dense<0.000000e+00> : vector<32x121xf32>
    %37 = tpu.matmul %9, %36, %cst_31 {dimension_numbers = #tpu.dot_dimension_numbers<[1], [0], [0], [1], [0, 0, 1, 1], [], []>} : vector<32x529xbf16>, vector<529x121xbf16>, vector<32x121xf32> -> vector<32x121xf32>
    %38 = arith.truncf %37 : vector<32x121xf32> to vector<32x121xbf16>
    %c160 = arith.constant 160 : index
    %c0_32 = arith.constant 0 : index
    %39 = vector.load %arg20[%c160, %c0_32] : memref<288x121xbf16, #tpu.memory_space<vmem>>, vector<32x121xbf16>
    tpu.vector_store %arg20[%c160, %c0_32], %38 {strides = array<i32>} : memref<288x121xbf16, #tpu.memory_space<vmem>>, vector<32x121xbf16>,
    %c6 = arith.constant 6 : index
    %c0_33 = arith.constant 0 : index
    %c0_34 = arith.constant 0 : index
    %40 = vector.load %arg4[%c6, %c0_33, %c0_34] : memref<9x529x121xbf16, #tpu.memory_space<vmem>>, vector<1x529x121xbf16>
    %41 = vector.shape_cast %40 : vector<1x529x121xbf16> to vector<529x121xbf16>
    %cst_35 = arith.constant dense<0.000000e+00> : vector<32x121xf32>
    %42 = tpu.matmul %9, %41, %cst_35 {dimension_numbers = #tpu.dot_dimension_numbers<[1], [0], [0], [1], [0, 0, 1, 1], [], []>} : vector<32x529xbf16>, vector<529x121xbf16>, vector<32x121xf32> -> vector<32x121xf32>
    %43 = arith.truncf %42 : vector<32x121xf32> to vector<32x121xbf16>
    %c192 = arith.constant 192 : index
    %c0_36 = arith.constant 0 : index
    %44 = vector.load %arg20[%c192, %c0_36] : memref<288x121xbf16, #tpu.memory_space<vmem>>, vector<32x121xbf16>
    tpu.vector_store %arg20[%c192, %c0_36], %43 {strides = array<i32>} : memref<288x121xbf16, #tpu.memory_space<vmem>>, vector<32x121xbf16>,
    %c7 = arith.constant 7 : index
    %c0_37 = arith.constant 0 : index
    %c0_38 = arith.constant 0 : index
    %45 = vector.load %arg4[%c7, %c0_37, %c0_38] : memref<9x529x121xbf16, #tpu.memory_space<vmem>>, vector<1x529x121xbf16>
    %46 = vector.shape_cast %45 : vector<1x529x121xbf16> to vector<529x121xbf16>
    %cst_39 = arith.constant dense<0.000000e+00> : vector<32x121xf32>
    %47 = tpu.matmul %9, %46, %cst_39 {dimension_numbers = #tpu.dot_dimension_numbers<[1], [0], [0], [1], [0, 0, 1, 1], [], []>} : vector<32x529xbf16>, vector<529x121xbf16>, vector<32x121xf32> -> vector<32x121xf32>
    %48 = arith.truncf %47 : vector<32x121xf32> to vector<32x121xbf16>
    %c224 = arith.constant 224 : index
    %c0_40 = arith.constant 0 : index
    %49 = vector.load %arg20[%c224, %c0_40] : memref<288x121xbf16, #tpu.memory_space<vmem>>, vector<32x121xbf16>
    tpu.vector_store %arg20[%c224, %c0_40], %48 {strides = array<i32>} : memref<288x121xbf16, #tpu.memory_space<vmem>>, vector<32x121xbf16>,
    %c8 = arith.constant 8 : index
    %c0_41 = arith.constant 0 : index
    %c0_42 = arith.constant 0 : index
    %50 = vector.load %arg4[%c8, %c0_41, %c0_42] : memref<9x529x121xbf16, #tpu.memory_space<vmem>>, vector<1x529x121xbf16>
    %51 = vector.shape_cast %50 : vector<1x529x121xbf16> to vector<529x121xbf16>
    %cst_43 = arith.constant dense<0.000000e+00> : vector<32x121xf32>
    %52 = tpu.matmul %9, %51, %cst_43 {dimension_numbers = #tpu.dot_dimension_numbers<[1], [0], [0], [1], [0, 0, 1, 1], [], []>} : vector<32x529xbf16>, vector<529x121xbf16>, vector<32x121xf32> -> vector<32x121xf32>
    %53 = arith.truncf %52 : vector<32x121xf32> to vector<32x121xbf16>
    %c256 = arith.constant 256 : index
    %c0_44 = arith.constant 0 : index
    %54 = vector.load %arg20[%c256, %c0_44] : memref<288x121xbf16, #tpu.memory_space<vmem>>, vector<32x121xbf16>
    tpu.vector_store %arg20[%c256, %c0_44], %53 {strides = array<i32>} : memref<288x121xbf16, #tpu.memory_space<vmem>>, vector<32x121xbf16>,
    %c0_45 = arith.constant 0 : index
    %c0_46 = arith.constant 0 : index
    %55 = vector.load %arg5[%c0_45, %c0_46] : memref<64x288xbf16, #tpu.memory_space<vmem>>, vector<64x288xbf16>
    %c0_47 = arith.constant 0 : index
    %c0_48 = arith.constant 0 : index
    %56 = vector.load %arg20[%c0_47, %c0_48] : memref<288x121xbf16, #tpu.memory_space<vmem>>, vector<288x121xbf16>
    %cst_49 = arith.constant dense<0.000000e+00> : vector<64x121xf32>
    %57 = tpu.matmul %55, %56, %cst_49 {dimension_numbers = #tpu.dot_dimension_numbers<[1], [0], [0], [1], [0, 0, 1, 1], [], []>} : vector<64x288xbf16>, vector<288x121xbf16>, vector<64x121xf32> -> vector<64x121xf32>
    %c0_50 = arith.constant 0 : index
    %c0_51 = arith.constant 0 : index
    %58 = vector.load %arg6[%c0_50, %c0_51] : memref<64x1xf32, #tpu.memory_space<vmem>>, vector<64x1xf32>
    %59 = vector.broadcast %58 : vector<64x1xf32> to vector<64x121xf32>
    %60 = arith.addf %57, %59 : vector<64x121xf32>
    %cst_52 = arith.constant 0.000000e+00 : f32
    %61 = vector.broadcast %cst_52 : f32 to vector<64x121xf32>
    %62 = arith.maximumf %60, %61 : vector<64x121xf32>
    %63 = arith.truncf %62 : vector<64x121xf32> to vector<64x121xbf16>
    %c0_53 = arith.constant 0 : index
    %c0_54 = arith.constant 0 : index
    %c0_55 = arith.constant 0 : index
    %64 = vector.load %arg7[%c0_53, %c0_54, %c0_55] : memref<9x121x25xbf16, #tpu.memory_space<vmem>>, vector<1x121x25xbf16>
    %65 = vector.shape_cast %64 : vector<1x121x25xbf16> to vector<121x25xbf16>
    %cst_56 = arith.constant dense<0.000000e+00> : vector<64x25xf32>
    %66 = tpu.matmul %63, %65, %cst_56 {dimension_numbers = #tpu.dot_dimension_numbers<[1], [0], [0], [1], [0, 0, 1, 1], [], []>} : vector<64x121xbf16>, vector<121x25xbf16>, vector<64x25xf32> -> vector<64x25xf32>
    %67 = arith.truncf %66 : vector<64x25xf32> to vector<64x25xbf16>
    %c0_57 = arith.constant 0 : index
    %c0_58 = arith.constant 0 : index
    %68 = vector.load %arg21[%c0_57, %c0_58] : memref<576x25xbf16, #tpu.memory_space<vmem>>, vector<64x25xbf16>
    tpu.vector_store %arg21[%c0_57, %c0_58], %67 {strides = array<i32>} : memref<576x25xbf16, #tpu.memory_space<vmem>>, vector<64x25xbf16>,
    %c1_59 = arith.constant 1 : index
    %c0_60 = arith.constant 0 : index
    %c0_61 = arith.constant 0 : index
    %69 = vector.load %arg7[%c1_59, %c0_60, %c0_61] : memref<9x121x25xbf16, #tpu.memory_space<vmem>>, vector<1x121x25xbf16>
    %70 = vector.shape_cast %69 : vector<1x121x25xbf16> to vector<121x25xbf16>
    %cst_62 = arith.constant dense<0.000000e+00> : vector<64x25xf32>
    %71 = tpu.matmul %63, %70, %cst_62 {dimension_numbers = #tpu.dot_dimension_numbers<[1], [0], [0], [1], [0, 0, 1, 1], [], []>} : vector<64x121xbf16>, vector<121x25xbf16>, vector<64x25xf32> -> vector<64x25xf32>
    %72 = arith.truncf %71 : vector<64x25xf32> to vector<64x25xbf16>
    %c64_63 = arith.constant 64 : index
    %c0_64 = arith.constant 0 : index
    %73 = vector.load %arg21[%c64_63, %c0_64] : memref<576x25xbf16, #tpu.memory_space<vmem>>, vector<64x25xbf16>
    tpu.vector_store %arg21[%c64_63, %c0_64], %72 {strides = array<i32>} : memref<576x25xbf16, #tpu.memory_space<vmem>>, vector<64x25xbf16>,
    %c2_65 = arith.constant 2 : index
    %c0_66 = arith.constant 0 : index
    %c0_67 = arith.constant 0 : index
    %74 = vector.load %arg7[%c2_65, %c0_66, %c0_67] : memref<9x121x25xbf16, #tpu.memory_space<vmem>>, vector<1x121x25xbf16>
    %75 = vector.shape_cast %74 : vector<1x121x25xbf16> to vector<121x25xbf16>
    %cst_68 = arith.constant dense<0.000000e+00> : vector<64x25xf32>
    %76 = tpu.matmul %63, %75, %cst_68 {dimension_numbers = #tpu.dot_dimension_numbers<[1], [0], [0], [1], [0, 0, 1, 1], [], []>} : vector<64x121xbf16>, vector<121x25xbf16>, vector<64x25xf32> -> vector<64x25xf32>
    %77 = arith.truncf %76 : vector<64x25xf32> to vector<64x25xbf16>
    %c128_69 = arith.constant 128 : index
    %c0_70 = arith.constant 0 : index
    %78 = vector.load %arg21[%c128_69, %c0_70] : memref<576x25xbf16, #tpu.memory_space<vmem>>, vector<64x25xbf16>
    tpu.vector_store %arg21[%c128_69, %c0_70], %77 {strides = array<i32>} : memref<576x25xbf16, #tpu.memory_space<vmem>>, vector<64x25xbf16>,
    %c3_71 = arith.constant 3 : index
    %c0_72 = arith.constant 0 : index
    %c0_73 = arith.constant 0 : index
    %79 = vector.load %arg7[%c3_71, %c0_72, %c0_73] : memref<9x121x25xbf16, #tpu.memory_space<vmem>>, vector<1x121x25xbf16>
    %80 = vector.shape_cast %79 : vector<1x121x25xbf16> to vector<121x25xbf16>
    %cst_74 = arith.constant dense<0.000000e+00> : vector<64x25xf32>
    %81 = tpu.matmul %63, %80, %cst_74 {dimension_numbers = #tpu.dot_dimension_numbers<[1], [0], [0], [1], [0, 0, 1, 1], [], []>} : vector<64x121xbf16>, vector<121x25xbf16>, vector<64x25xf32> -> vector<64x25xf32>
    %82 = arith.truncf %81 : vector<64x25xf32> to vector<64x25xbf16>
    %c192_75 = arith.constant 192 : index
    %c0_76 = arith.constant 0 : index
    %83 = vector.load %arg21[%c192_75, %c0_76] : memref<576x25xbf16, #tpu.memory_space<vmem>>, vector<64x25xbf16>
    tpu.vector_store %arg21[%c192_75, %c0_76], %82 {strides = array<i32>} : memref<576x25xbf16, #tpu.memory_space<vmem>>, vector<64x25xbf16>,
    %c4_77 = arith.constant 4 : index
    %c0_78 = arith.constant 0 : index
    %c0_79 = arith.constant 0 : index
    %84 = vector.load %arg7[%c4_77, %c0_78, %c0_79] : memref<9x121x25xbf16, #tpu.memory_space<vmem>>, vector<1x121x25xbf16>
    %85 = vector.shape_cast %84 : vector<1x121x25xbf16> to vector<121x25xbf16>
    %cst_80 = arith.constant dense<0.000000e+00> : vector<64x25xf32>
    %86 = tpu.matmul %63, %85, %cst_80 {dimension_numbers = #tpu.dot_dimension_numbers<[1], [0], [0], [1], [0, 0, 1, 1], [], []>} : vector<64x121xbf16>, vector<121x25xbf16>, vector<64x25xf32> -> vector<64x25xf32>
    %87 = arith.truncf %86 : vector<64x25xf32> to vector<64x25xbf16>
    %c256_81 = arith.constant 256 : index
    %c0_82 = arith.constant 0 : index
    %88 = vector.load %arg21[%c256_81, %c0_82] : memref<576x25xbf16, #tpu.memory_space<vmem>>, vector<64x25xbf16>
    tpu.vector_store %arg21[%c256_81, %c0_82], %87 {strides = array<i32>} : memref<576x25xbf16, #tpu.memory_space<vmem>>, vector<64x25xbf16>,
    %c5_83 = arith.constant 5 : index
    %c0_84 = arith.constant 0 : index
    %c0_85 = arith.constant 0 : index
    %89 = vector.load %arg7[%c5_83, %c0_84, %c0_85] : memref<9x121x25xbf16, #tpu.memory_space<vmem>>, vector<1x121x25xbf16>
    %90 = vector.shape_cast %89 : vector<1x121x25xbf16> to vector<121x25xbf16>
    %cst_86 = arith.constant dense<0.000000e+00> : vector<64x25xf32>
    %91 = tpu.matmul %63, %90, %cst_86 {dimension_numbers = #tpu.dot_dimension_numbers<[1], [0], [0], [1], [0, 0, 1, 1], [], []>} : vector<64x121xbf16>, vector<121x25xbf16>, vector<64x25xf32> -> vector<64x25xf32>
    %92 = arith.truncf %91 : vector<64x25xf32> to vector<64x25xbf16>
    %c320 = arith.constant 320 : index
    %c0_87 = arith.constant 0 : index
    %93 = vector.load %arg21[%c320, %c0_87] : memref<576x25xbf16, #tpu.memory_space<vmem>>, vector<64x25xbf16>
    tpu.vector_store %arg21[%c320, %c0_87], %92 {strides = array<i32>} : memref<576x25xbf16, #tpu.memory_space<vmem>>, vector<64x25xbf16>,
    %c6_88 = arith.constant 6 : index
    %c0_89 = arith.constant 0 : index
    %c0_90 = arith.constant 0 : index
    %94 = vector.load %arg7[%c6_88, %c0_89, %c0_90] : memref<9x121x25xbf16, #tpu.memory_space<vmem>>, vector<1x121x25xbf16>
    %95 = vector.shape_cast %94 : vector<1x121x25xbf16> to vector<121x25xbf16>
    %cst_91 = arith.constant dense<0.000000e+00> : vector<64x25xf32>
    %96 = tpu.matmul %63, %95, %cst_91 {dimension_numbers = #tpu.dot_dimension_numbers<[1], [0], [0], [1], [0, 0, 1, 1], [], []>} : vector<64x121xbf16>, vector<121x25xbf16>, vector<64x25xf32> -> vector<64x25xf32>
    %97 = arith.truncf %96 : vector<64x25xf32> to vector<64x25xbf16>
    %c384 = arith.constant 384 : index
    %c0_92 = arith.constant 0 : index
    %98 = vector.load %arg21[%c384, %c0_92] : memref<576x25xbf16, #tpu.memory_space<vmem>>, vector<64x25xbf16>
    tpu.vector_store %arg21[%c384, %c0_92], %97 {strides = array<i32>} : memref<576x25xbf16, #tpu.memory_space<vmem>>, vector<64x25xbf16>,
    %c7_93 = arith.constant 7 : index
    %c0_94 = arith.constant 0 : index
    %c0_95 = arith.constant 0 : index
    %99 = vector.load %arg7[%c7_93, %c0_94, %c0_95] : memref<9x121x25xbf16, #tpu.memory_space<vmem>>, vector<1x121x25xbf16>
    %100 = vector.shape_cast %99 : vector<1x121x25xbf16> to vector<121x25xbf16>
    %cst_96 = arith.constant dense<0.000000e+00> : vector<64x25xf32>
    %101 = tpu.matmul %63, %100, %cst_96 {dimension_numbers = #tpu.dot_dimension_numbers<[1], [0], [0], [1], [0, 0, 1, 1], [], []>} : vector<64x121xbf16>, vector<121x25xbf16>, vector<64x25xf32> -> vector<64x25xf32>
    %102 = arith.truncf %101 : vector<64x25xf32> to vector<64x25xbf16>
    %c448 = arith.constant 448 : index
    %c0_97 = arith.constant 0 : index
    %103 = vector.load %arg21[%c448, %c0_97] : memref<576x25xbf16, #tpu.memory_space<vmem>>, vector<64x25xbf16>
    tpu.vector_store %arg21[%c448, %c0_97], %102 {strides = array<i32>} : memref<576x25xbf16, #tpu.memory_space<vmem>>, vector<64x25xbf16>,
    %c8_98 = arith.constant 8 : index
    %c0_99 = arith.constant 0 : index
    %c0_100 = arith.constant 0 : index
    %104 = vector.load %arg7[%c8_98, %c0_99, %c0_100] : memref<9x121x25xbf16, #tpu.memory_space<vmem>>, vector<1x121x25xbf16>
    %105 = vector.shape_cast %104 : vector<1x121x25xbf16> to vector<121x25xbf16>
    %cst_101 = arith.constant dense<0.000000e+00> : vector<64x25xf32>
    %106 = tpu.matmul %63, %105, %cst_101 {dimension_numbers = #tpu.dot_dimension_numbers<[1], [0], [0], [1], [0, 0, 1, 1], [], []>} : vector<64x121xbf16>, vector<121x25xbf16>, vector<64x25xf32> -> vector<64x25xf32>
    %107 = arith.truncf %106 : vector<64x25xf32> to vector<64x25xbf16>
    %c512 = arith.constant 512 : index
    %c0_102 = arith.constant 0 : index
    %108 = vector.load %arg21[%c512, %c0_102] : memref<576x25xbf16, #tpu.memory_space<vmem>>, vector<64x25xbf16>
    tpu.vector_store %arg21[%c512, %c0_102], %107 {strides = array<i32>} : memref<576x25xbf16, #tpu.memory_space<vmem>>, vector<64x25xbf16>,
    %c0_103 = arith.constant 0 : index
    %c0_104 = arith.constant 0 : index
    %109 = vector.load %arg8[%c0_103, %c0_104] : memref<128x576xbf16, #tpu.memory_space<vmem>>, vector<128x576xbf16>
    %c0_105 = arith.constant 0 : index
    %c0_106 = arith.constant 0 : index
    %110 = vector.load %arg21[%c0_105, %c0_106] : memref<576x25xbf16, #tpu.memory_space<vmem>>, vector<576x25xbf16>
    %cst_107 = arith.constant dense<0.000000e+00> : vector<128x25xf32>
    %111 = tpu.matmul %109, %110, %cst_107 {dimension_numbers = #tpu.dot_dimension_numbers<[1], [0], [0], [1], [0, 0, 1, 1], [], []>} : vector<128x576xbf16>, vector<576x25xbf16>, vector<128x25xf32> -> vector<128x25xf32>
    %c0_108 = arith.constant 0 : index
    %c0_109 = arith.constant 0 : index
    %112 = vector.load %arg9[%c0_108, %c0_109] : memref<128x1xf32, #tpu.memory_space<vmem>>, vector<128x1xf32>
    %113 = vector.broadcast %112 : vector<128x1xf32> to vector<128x25xf32>
    %114 = arith.addf %111, %113 : vector<128x25xf32>
    %cst_110 = arith.constant 0.000000e+00 : f32
    %115 = vector.broadcast %cst_110 : f32 to vector<128x25xf32>
    %116 = arith.maximumf %114, %115 : vector<128x25xf32>
    %117 = arith.truncf %116 : vector<128x25xf32> to vector<128x25xbf16>
    %c0_111 = arith.constant 0 : index
    %c0_112 = arith.constant 0 : index
    %c0_113 = arith.constant 0 : index
    %118 = vector.load %arg10[%c0_111, %c0_112, %c0_113] : memref<9x25x4xbf16, #tpu.memory_space<vmem>>, vector<1x25x4xbf16>
    %119 = vector.shape_cast %118 : vector<1x25x4xbf16> to vector<25x4xbf16>
    %cst_114 = arith.constant dense<0.000000e+00> : vector<128x4xf32>
    %120 = tpu.matmul %117, %119, %cst_114 {dimension_numbers = #tpu.dot_dimension_numbers<[1], [0], [0], [1], [0, 0, 1, 1], [], []>} : vector<128x25xbf16>, vector<25x4xbf16>, vector<128x4xf32> -> vector<128x4xf32>
    %121 = arith.truncf %120 : vector<128x4xf32> to vector<128x4xbf16>
    %c0_115 = arith.constant 0 : index
    %c0_116 = arith.constant 0 : index
    %122 = vector.load %arg22[%c0_115, %c0_116] : memref<1152x4xbf16, #tpu.memory_space<vmem>>, vector<128x4xbf16>
    tpu.vector_store %arg22[%c0_115, %c0_116], %121 {strides = array<i32>} : memref<1152x4xbf16, #tpu.memory_space<vmem>>, vector<128x4xbf16>,
    %c1_117 = arith.constant 1 : index
    %c0_118 = arith.constant 0 : index
    %c0_119 = arith.constant 0 : index
    %123 = vector.load %arg10[%c1_117, %c0_118, %c0_119] : memref<9x25x4xbf16, #tpu.memory_space<vmem>>, vector<1x25x4xbf16>
    %124 = vector.shape_cast %123 : vector<1x25x4xbf16> to vector<25x4xbf16>
    %cst_120 = arith.constant dense<0.000000e+00> : vector<128x4xf32>
    %125 = tpu.matmul %117, %124, %cst_120 {dimension_numbers = #tpu.dot_dimension_numbers<[1], [0], [0], [1], [0, 0, 1, 1], [], []>} : vector<128x25xbf16>, vector<25x4xbf16>, vector<128x4xf32> -> vector<128x4xf32>
    %126 = arith.truncf %125 : vector<128x4xf32> to vector<128x4xbf16>
    %c128_121 = arith.constant 128 : index
    %c0_122 = arith.constant 0 : index
    %127 = vector.load %arg22[%c128_121, %c0_122] : memref<1152x4xbf16, #tpu.memory_space<vmem>>, vector<128x4xbf16>
    tpu.vector_store %arg22[%c128_121, %c0_122], %126 {strides = array<i32>} : memref<1152x4xbf16, #tpu.memory_space<vmem>>, vector<128x4xbf16>,
    %c2_123 = arith.constant 2 : index
    %c0_124 = arith.constant 0 : index
    %c0_125 = arith.constant 0 : index
    %128 = vector.load %arg10[%c2_123, %c0_124, %c0_125] : memref<9x25x4xbf16, #tpu.memory_space<vmem>>, vector<1x25x4xbf16>
    %129 = vector.shape_cast %128 : vector<1x25x4xbf16> to vector<25x4xbf16>
    %cst_126 = arith.constant dense<0.000000e+00> : vector<128x4xf32>
    %130 = tpu.matmul %117, %129, %cst_126 {dimension_numbers = #tpu.dot_dimension_numbers<[1], [0], [0], [1], [0, 0, 1, 1], [], []>} : vector<128x25xbf16>, vector<25x4xbf16>, vector<128x4xf32> -> vector<128x4xf32>
    %131 = arith.truncf %130 : vector<128x4xf32> to vector<128x4xbf16>
    %c256_127 = arith.constant 256 : index
    %c0_128 = arith.constant 0 : index
    %132 = vector.load %arg22[%c256_127, %c0_128] : memref<1152x4xbf16, #tpu.memory_space<vmem>>, vector<128x4xbf16>
    tpu.vector_store %arg22[%c256_127, %c0_128], %131 {strides = array<i32>} : memref<1152x4xbf16, #tpu.memory_space<vmem>>, vector<128x4xbf16>,
    %c3_129 = arith.constant 3 : index
    %c0_130 = arith.constant 0 : index
    %c0_131 = arith.constant 0 : index
    %133 = vector.load %arg10[%c3_129, %c0_130, %c0_131] : memref<9x25x4xbf16, #tpu.memory_space<vmem>>, vector<1x25x4xbf16>
    %134 = vector.shape_cast %133 : vector<1x25x4xbf16> to vector<25x4xbf16>
    %cst_132 = arith.constant dense<0.000000e+00> : vector<128x4xf32>
    %135 = tpu.matmul %117, %134, %cst_132 {dimension_numbers = #tpu.dot_dimension_numbers<[1], [0], [0], [1], [0, 0, 1, 1], [], []>} : vector<128x25xbf16>, vector<25x4xbf16>, vector<128x4xf32> -> vector<128x4xf32>
    %136 = arith.truncf %135 : vector<128x4xf32> to vector<128x4xbf16>
    %c384_133 = arith.constant 384 : index
    %c0_134 = arith.constant 0 : index
    %137 = vector.load %arg22[%c384_133, %c0_134] : memref<1152x4xbf16, #tpu.memory_space<vmem>>, vector<128x4xbf16>
    tpu.vector_store %arg22[%c384_133, %c0_134], %136 {strides = array<i32>} : memref<1152x4xbf16, #tpu.memory_space<vmem>>, vector<128x4xbf16>,
    %c4_135 = arith.constant 4 : index
    %c0_136 = arith.constant 0 : index
    %c0_137 = arith.constant 0 : index
    %138 = vector.load %arg10[%c4_135, %c0_136, %c0_137] : memref<9x25x4xbf16, #tpu.memory_space<vmem>>, vector<1x25x4xbf16>
    %139 = vector.shape_cast %138 : vector<1x25x4xbf16> to vector<25x4xbf16>
    %cst_138 = arith.constant dense<0.000000e+00> : vector<128x4xf32>
    %140 = tpu.matmul %117, %139, %cst_138 {dimension_numbers = #tpu.dot_dimension_numbers<[1], [0], [0], [1], [0, 0, 1, 1], [], []>} : vector<128x25xbf16>, vector<25x4xbf16>, vector<128x4xf32> -> vector<128x4xf32>
    %141 = arith.truncf %140 : vector<128x4xf32> to vector<128x4xbf16>
    %c512_139 = arith.constant 512 : index
    %c0_140 = arith.constant 0 : index
    %142 = vector.load %arg22[%c512_139, %c0_140] : memref<1152x4xbf16, #tpu.memory_space<vmem>>, vector<128x4xbf16>
    tpu.vector_store %arg22[%c512_139, %c0_140], %141 {strides = array<i32>} : memref<1152x4xbf16, #tpu.memory_space<vmem>>, vector<128x4xbf16>,
    %c5_141 = arith.constant 5 : index
    %c0_142 = arith.constant 0 : index
    %c0_143 = arith.constant 0 : index
    %143 = vector.load %arg10[%c5_141, %c0_142, %c0_143] : memref<9x25x4xbf16, #tpu.memory_space<vmem>>, vector<1x25x4xbf16>
    %144 = vector.shape_cast %143 : vector<1x25x4xbf16> to vector<25x4xbf16>
    %cst_144 = arith.constant dense<0.000000e+00> : vector<128x4xf32>
    %145 = tpu.matmul %117, %144, %cst_144 {dimension_numbers = #tpu.dot_dimension_numbers<[1], [0], [0], [1], [0, 0, 1, 1], [], []>} : vector<128x25xbf16>, vector<25x4xbf16>, vector<128x4xf32> -> vector<128x4xf32>
    %146 = arith.truncf %145 : vector<128x4xf32> to vector<128x4xbf16>
    %c640 = arith.constant 640 : index
    %c0_145 = arith.constant 0 : index
    %147 = vector.load %arg22[%c640, %c0_145] : memref<1152x4xbf16, #tpu.memory_space<vmem>>, vector<128x4xbf16>
    tpu.vector_store %arg22[%c640, %c0_145], %146 {strides = array<i32>} : memref<1152x4xbf16, #tpu.memory_space<vmem>>, vector<128x4xbf16>,
    %c6_146 = arith.constant 6 : index
    %c0_147 = arith.constant 0 : index
    %c0_148 = arith.constant 0 : index
    %148 = vector.load %arg10[%c6_146, %c0_147, %c0_148] : memref<9x25x4xbf16, #tpu.memory_space<vmem>>, vector<1x25x4xbf16>
    %149 = vector.shape_cast %148 : vector<1x25x4xbf16> to vector<25x4xbf16>
    %cst_149 = arith.constant dense<0.000000e+00> : vector<128x4xf32>
    %150 = tpu.matmul %117, %149, %cst_149 {dimension_numbers = #tpu.dot_dimension_numbers<[1], [0], [0], [1], [0, 0, 1, 1], [], []>} : vector<128x25xbf16>, vector<25x4xbf16>, vector<128x4xf32> -> vector<128x4xf32>
    %151 = arith.truncf %150 : vector<128x4xf32> to vector<128x4xbf16>
    %c768 = arith.constant 768 : index
    %c0_150 = arith.constant 0 : index
    %152 = vector.load %arg22[%c768, %c0_150] : memref<1152x4xbf16, #tpu.memory_space<vmem>>, vector<128x4xbf16>
    tpu.vector_store %arg22[%c768, %c0_150], %151 {strides = array<i32>} : memref<1152x4xbf16, #tpu.memory_space<vmem>>, vector<128x4xbf16>,
    %c7_151 = arith.constant 7 : index
    %c0_152 = arith.constant 0 : index
    %c0_153 = arith.constant 0 : index
    %153 = vector.load %arg10[%c7_151, %c0_152, %c0_153] : memref<9x25x4xbf16, #tpu.memory_space<vmem>>, vector<1x25x4xbf16>
    %154 = vector.shape_cast %153 : vector<1x25x4xbf16> to vector<25x4xbf16>
    %cst_154 = arith.constant dense<0.000000e+00> : vector<128x4xf32>
    %155 = tpu.matmul %117, %154, %cst_154 {dimension_numbers = #tpu.dot_dimension_numbers<[1], [0], [0], [1], [0, 0, 1, 1], [], []>} : vector<128x25xbf16>, vector<25x4xbf16>, vector<128x4xf32> -> vector<128x4xf32>
    %156 = arith.truncf %155 : vector<128x4xf32> to vector<128x4xbf16>
    %c896 = arith.constant 896 : index
    %c0_155 = arith.constant 0 : index
    %157 = vector.load %arg22[%c896, %c0_155] : memref<1152x4xbf16, #tpu.memory_space<vmem>>, vector<128x4xbf16>
    tpu.vector_store %arg22[%c896, %c0_155], %156 {strides = array<i32>} : memref<1152x4xbf16, #tpu.memory_space<vmem>>, vector<128x4xbf16>,
    %c8_156 = arith.constant 8 : index
    %c0_157 = arith.constant 0 : index
    %c0_158 = arith.constant 0 : index
    %158 = vector.load %arg10[%c8_156, %c0_157, %c0_158] : memref<9x25x4xbf16, #tpu.memory_space<vmem>>, vector<1x25x4xbf16>
    %159 = vector.shape_cast %158 : vector<1x25x4xbf16> to vector<25x4xbf16>
    %cst_159 = arith.constant dense<0.000000e+00> : vector<128x4xf32>
    %160 = tpu.matmul %117, %159, %cst_159 {dimension_numbers = #tpu.dot_dimension_numbers<[1], [0], [0], [1], [0, 0, 1, 1], [], []>} : vector<128x25xbf16>, vector<25x4xbf16>, vector<128x4xf32> -> vector<128x4xf32>
    %161 = arith.truncf %160 : vector<128x4xf32> to vector<128x4xbf16>
    %c1024 = arith.constant 1024 : index
    %c0_160 = arith.constant 0 : index
    %162 = vector.load %arg22[%c1024, %c0_160] : memref<1152x4xbf16, #tpu.memory_space<vmem>>, vector<128x4xbf16>
    tpu.vector_store %arg22[%c1024, %c0_160], %161 {strides = array<i32>} : memref<1152x4xbf16, #tpu.memory_space<vmem>>, vector<128x4xbf16>,
    %c0_161 = arith.constant 0 : index
    %c0_162 = arith.constant 0 : index
    %163 = vector.load %arg11[%c0_161, %c0_162] : memref<256x1152xbf16, #tpu.memory_space<vmem>>, vector<256x1152xbf16>
    %c0_163 = arith.constant 0 : index
    %c0_164 = arith.constant 0 : index
    %164 = vector.load %arg22[%c0_163, %c0_164] : memref<1152x4xbf16, #tpu.memory_space<vmem>>, vector<1152x4xbf16>
    %cst_165 = arith.constant dense<0.000000e+00> : vector<256x4xf32>
    %165 = tpu.matmul %163, %164, %cst_165 {dimension_numbers = #tpu.dot_dimension_numbers<[1], [0], [0], [1], [0, 0, 1, 1], [], []>} : vector<256x1152xbf16>, vector<1152x4xbf16>, vector<256x4xf32> -> vector<256x4xf32>
    %c0_166 = arith.constant 0 : index
    %c0_167 = arith.constant 0 : index
    %166 = vector.load %arg12[%c0_166, %c0_167] : memref<256x1xf32, #tpu.memory_space<vmem>>, vector<256x1xf32>
    %167 = vector.broadcast %166 : vector<256x1xf32> to vector<256x4xf32>
    %168 = arith.addf %165, %167 : vector<256x4xf32>
    %cst_168 = arith.constant 0.000000e+00 : f32
    %169 = vector.broadcast %cst_168 : f32 to vector<256x4xf32>
    %170 = arith.maximumf %168, %169 : vector<256x4xf32>
    %171 = arith.truncf %170 : vector<256x4xf32> to vector<256x4xbf16>
    %c0_169 = arith.constant 0 : index
    %c0_170 = arith.constant 0 : index
    %172 = vector.load %arg14[%c0_169, %c0_170] : memref<100x1xf32, #tpu.memory_space<vmem>>, vector<100x1xf32>
    %c0_171 = arith.constant 0 : index
    %c0_172 = arith.constant 0 : index
    %c0_173 = arith.constant 0 : index
    %173 = vector.load %arg13[%c0_171, %c0_172, %c0_173] : memref<4x100x256xbf16, #tpu.memory_space<vmem>>, vector<1x100x256xbf16>
    %174 = vector.shape_cast %173 : vector<1x100x256xbf16> to vector<100x256xbf16>
    %175 = vector.extract_strided_slice %171 {offsets = [0, 0], sizes = [256, 1], strides = [1, 1]} : vector<256x4xbf16> to vector<256x1xbf16>
    %cst_174 = arith.constant dense<0.000000e+00> : vector<100x1xf32>
    %176 = tpu.matmul %174, %175, %cst_174 {dimension_numbers = #tpu.dot_dimension_numbers<[1], [0], [0], [1], [0, 0, 1, 1], [], []>} : vector<100x256xbf16>, vector<256x1xbf16>, vector<100x1xf32> -> vector<100x1xf32>
    %177 = arith.addf %172, %176 : vector<100x1xf32>
    %c1_175 = arith.constant 1 : index
    %c0_176 = arith.constant 0 : index
    %c0_177 = arith.constant 0 : index
    %178 = vector.load %arg13[%c1_175, %c0_176, %c0_177] : memref<4x100x256xbf16, #tpu.memory_space<vmem>>, vector<1x100x256xbf16>
    %179 = vector.shape_cast %178 : vector<1x100x256xbf16> to vector<100x256xbf16>
    %180 = vector.extract_strided_slice %171 {offsets = [0, 1], sizes = [256, 1], strides = [1, 1]} : vector<256x4xbf16> to vector<256x1xbf16>
    %cst_178 = arith.constant dense<0.000000e+00> : vector<100x1xf32>
    %181 = tpu.matmul %179, %180, %cst_178 {dimension_numbers = #tpu.dot_dimension_numbers<[1], [0], [0], [1], [0, 0, 1, 1], [], []>} : vector<100x256xbf16>, vector<256x1xbf16>, vector<100x1xf32> -> vector<100x1xf32>
    %182 = arith.addf %177, %181 : vector<100x1xf32>
    %c2_179 = arith.constant 2 : index
    %c0_180 = arith.constant 0 : index
    %c0_181 = arith.constant 0 : index
    %183 = vector.load %arg13[%c2_179, %c0_180, %c0_181] : memref<4x100x256xbf16, #tpu.memory_space<vmem>>, vector<1x100x256xbf16>
    %184 = vector.shape_cast %183 : vector<1x100x256xbf16> to vector<100x256xbf16>
    %185 = vector.extract_strided_slice %171 {offsets = [0, 2], sizes = [256, 1], strides = [1, 1]} : vector<256x4xbf16> to vector<256x1xbf16>
    %cst_182 = arith.constant dense<0.000000e+00> : vector<100x1xf32>
    %186 = tpu.matmul %184, %185, %cst_182 {dimension_numbers = #tpu.dot_dimension_numbers<[1], [0], [0], [1], [0, 0, 1, 1], [], []>} : vector<100x256xbf16>, vector<256x1xbf16>, vector<100x1xf32> -> vector<100x1xf32>
    %187 = arith.addf %182, %186 : vector<100x1xf32>
    %c3_183 = arith.constant 3 : index
    %c0_184 = arith.constant 0 : index
    %c0_185 = arith.constant 0 : index
    %188 = vector.load %arg13[%c3_183, %c0_184, %c0_185] : memref<4x100x256xbf16, #tpu.memory_space<vmem>>, vector<1x100x256xbf16>
    %189 = vector.shape_cast %188 : vector<1x100x256xbf16> to vector<100x256xbf16>
    %190 = vector.extract_strided_slice %171 {offsets = [0, 3], sizes = [256, 1], strides = [1, 1]} : vector<256x4xbf16> to vector<256x1xbf16>
    %cst_186 = arith.constant dense<0.000000e+00> : vector<100x1xf32>
    %191 = tpu.matmul %189, %190, %cst_186 {dimension_numbers = #tpu.dot_dimension_numbers<[1], [0], [0], [1], [0, 0, 1, 1], [], []>} : vector<100x256xbf16>, vector<256x1xbf16>, vector<100x1xf32> -> vector<100x1xf32>
    %192 = arith.addf %187, %191 : vector<100x1xf32>
    %cst_187 = arith.constant 0.000000e+00 : f32
    %193 = vector.broadcast %cst_187 : f32 to vector<100x1xf32>
    %194 = arith.maximumf %192, %193 : vector<100x1xf32>
    %195 = arith.truncf %194 : vector<100x1xf32> to vector<100x1xbf16>
    %c0_188 = arith.constant 0 : index
    %c0_189 = arith.constant 0 : index
    %196 = vector.load %arg15[%c0_188, %c0_189] : memref<30x100xbf16, #tpu.memory_space<vmem>>, vector<30x100xbf16>
    %cst_190 = arith.constant dense<0.000000e+00> : vector<30x1xf32>
    %197 = tpu.matmul %196, %195, %cst_190 {dimension_numbers = #tpu.dot_dimension_numbers<[1], [0], [0], [1], [0, 0, 1, 1], [], []>} : vector<30x100xbf16>, vector<100x1xbf16>, vector<30x1xf32> -> vector<30x1xf32>
    %c0_191 = arith.constant 0 : index
    %c0_192 = arith.constant 0 : index
    %198 = vector.load %arg16[%c0_191, %c0_192] : memref<30x1xf32, #tpu.memory_space<vmem>>, vector<30x1xf32>
    %199 = arith.addf %197, %198 : vector<30x1xf32>
    %cst_193 = arith.constant 0.000000e+00 : f32
    %200 = vector.broadcast %cst_193 : f32 to vector<30x1xf32>
    %201 = arith.maximumf %199, %200 : vector<30x1xf32>
    %202 = arith.truncf %201 : vector<30x1xf32> to vector<30x1xbf16>
    %c0_194 = arith.constant 0 : index
    %c0_195 = arith.constant 0 : index
    %203 = vector.load %arg17[%c0_194, %c0_195] : memref<1x30xbf16, #tpu.memory_space<vmem>>, vector<1x30xbf16>
    %cst_196 = arith.constant dense<0.000000e+00> : vector<1x1xf32>
    %204 = tpu.matmul %203, %202, %cst_196 {dimension_numbers = #tpu.dot_dimension_numbers<[1], [0], [0], [1], [0, 0, 1, 1], [], []>} : vector<1x30xbf16>, vector<30x1xbf16>, vector<1x1xf32> -> vector<1x1xf32>
    %c0_197 = arith.constant 0 : index
    %c0_198 = arith.constant 0 : index
    %205 = vector.load %arg18[%c0_197, %c0_198] : memref<1x1xf32, #tpu.memory_space<vmem>>, vector<1x1xf32>
    %206 = arith.addf %204, %205 : vector<1x1xf32>
    %c0_199 = arith.constant 0 : index
    %c0_200 = arith.constant 0 : index
    %c0_201 = arith.constant 0 : index
    %207 = vector.load %arg19[%c0_199, %c0_200, %c0_201] : memref<1x1x1xf32, #tpu.memory_space<vmem>>, vector<1x1x1xf32>
    %208 = vector.shape_cast %207 : vector<1x1x1xf32> to vector<1x1xf32>
    %209 = vector.shape_cast %206 : vector<1x1xf32> to vector<1x1x1xf32>
    tpu.vector_store %arg19[%c0_199, %c0_200, %c0_201], %209 {strides = array<i32>} : memref<1x1x1xf32, #tpu.memory_space<vmem>>, vector<1x1x1xf32>,
    return
  }
  func.func @transform_0(%arg0: i32) -> (i32, i32, i32) {
    %c0_i32 = arith.constant 0 : i32
    %c0_i32_0 = arith.constant 0 : i32
    %c0_i32_1 = arith.constant 0 : i32
    return %arg0, %c0_i32, %c0_i32_0 : i32, i32, i32
  }
  func.func @transform_1(%arg0: i32) -> (i32, i32) {
    %c0_i32 = arith.constant 0 : i32
    %c0_i32_0 = arith.constant 0 : i32
    %c0_i32_1 = arith.constant 0 : i32
    return %c0_i32, %c0_i32_0 : i32, i32
  }
  func.func @transform_2(%arg0: i32) -> (i32, i32) {
    %c0_i32 = arith.constant 0 : i32
    %c0_i32_0 = arith.constant 0 : i32
    %c0_i32_1 = arith.constant 0 : i32
    return %c0_i32, %c0_i32_0 : i32, i32
  }
  func.func @transform_3(%arg0: i32) -> (i32, i32, i32) {
    %c0_i32 = arith.constant 0 : i32
    %c0_i32_0 = arith.constant 0 : i32
    %c0_i32_1 = arith.constant 0 : i32
    %c0_i32_2 = arith.constant 0 : i32
    return %c0_i32, %c0_i32_0, %c0_i32_1 : i32, i32, i32
  }
  func.func @transform_4(%arg0: i32) -> (i32, i32) {
    %c0_i32 = arith.constant 0 : i32
    %c0_i32_0 = arith.constant 0 : i32
    %c0_i32_1 = arith.constant 0 : i32
    return %c0_i32, %c0_i32_0 : i32, i32
  }
  func.func @transform_5(%arg0: i32) -> (i32, i32) {
    %c0_i32 = arith.constant 0 : i32
    %c0_i32_0 = arith.constant 0 : i32
    %c0_i32_1 = arith.constant 0 : i32
    return %c0_i32, %c0_i32_0 : i32, i32
  }
  func.func @transform_6(%arg0: i32) -> (i32, i32, i32) {
    %c0_i32 = arith.constant 0 : i32
    %c0_i32_0 = arith.constant 0 : i32
    %c0_i32_1 = arith.constant 0 : i32
    %c0_i32_2 = arith.constant 0 : i32
    return %c0_i32, %c0_i32_0, %c0_i32_1 : i32, i32, i32
  }
  func.func @transform_7(%arg0: i32) -> (i32, i32) {
    %c0_i32 = arith.constant 0 : i32
    %c0_i32_0 = arith.constant 0 : i32
    %c0_i32_1 = arith.constant 0 : i32
    return %c0_i32, %c0_i32_0 : i32, i32
  }
  func.func @transform_8(%arg0: i32) -> (i32, i32) {
    %c0_i32 = arith.constant 0 : i32
    %c0_i32_0 = arith.constant 0 : i32
    %c0_i32_1 = arith.constant 0 : i32
    return %c0_i32, %c0_i32_0 : i32, i32
  }
  func.func @transform_9(%arg0: i32) -> (i32, i32, i32) {
    %c0_i32 = arith.constant 0 : i32
    %c0_i32_0 = arith.constant 0 : i32
    %c0_i32_1 = arith.constant 0 : i32
    %c0_i32_2 = arith.constant 0 : i32
    return %c0_i32, %c0_i32_0, %c0_i32_1 : i32, i32, i32
  }
  func.func @transform_10(%arg0: i32) -> (i32, i32) {
    %c0_i32 = arith.constant 0 : i32
    %c0_i32_0 = arith.constant 0 : i32
    %c0_i32_1 = arith.constant 0 : i32
    return %c0_i32, %c0_i32_0 : i32, i32
  }
  func.func @transform_11(%arg0: i32) -> (i32, i32) {
    %c0_i32 = arith.constant 0 : i32
    %c0_i32_0 = arith.constant 0 : i32
    %c0_i32_1 = arith.constant 0 : i32
    return %c0_i32, %c0_i32_0 : i32, i32
  }
  func.func @transform_12(%arg0: i32) -> (i32, i32, i32) {
    %c0_i32 = arith.constant 0 : i32
    %c0_i32_0 = arith.constant 0 : i32
    %c0_i32_1 = arith.constant 0 : i32
    %c0_i32_2 = arith.constant 0 : i32
    return %c0_i32, %c0_i32_0, %c0_i32_1 : i32, i32, i32
  }
  func.func @transform_13(%arg0: i32) -> (i32, i32) {
    %c0_i32 = arith.constant 0 : i32
    %c0_i32_0 = arith.constant 0 : i32
    %c0_i32_1 = arith.constant 0 : i32
    return %c0_i32, %c0_i32_0 : i32, i32
  }
  func.func @transform_14(%arg0: i32) -> (i32, i32) {
    %c0_i32 = arith.constant 0 : i32
    %c0_i32_0 = arith.constant 0 : i32
    %c0_i32_1 = arith.constant 0 : i32
    return %c0_i32, %c0_i32_0 : i32, i32
  }
  func.func @transform_15(%arg0: i32) -> (i32, i32) {
    %c0_i32 = arith.constant 0 : i32
    %c0_i32_0 = arith.constant 0 : i32
    %c0_i32_1 = arith.constant 0 : i32
    return %c0_i32, %c0_i32_0 : i32, i32
  }
  func.func @transform_16(%arg0: i32) -> (i32, i32) {
    %c0_i32 = arith.constant 0 : i32
    %c0_i32_0 = arith.constant 0 : i32
    %c0_i32_1 = arith.constant 0 : i32
    return %c0_i32, %c0_i32_0 : i32, i32
  }
  func.func @transform_17(%arg0: i32) -> (i32, i32) {
    %c0_i32 = arith.constant 0 : i32
    %c0_i32_0 = arith.constant 0 : i32
    %c0_i32_1 = arith.constant 0 : i32
    return %c0_i32, %c0_i32_0 : i32, i32
  }
  func.func @transform_18(%arg0: i32) -> (i32, i32, i32) {
    %c0_i32 = arith.constant 0 : i32
    %c0_i32_0 = arith.constant 0 : i32
    %c0_i32_1 = arith.constant 0 : i32
    return %arg0, %c0_i32, %c0_i32_0 : i32, i32, i32
  }
}

</mosaic_0001>

<bundles_post_ra>
// kernel: cnn_critic_forward.2
= control target key start
LH: loop header
LB: loop body
LE: loop exit
PB: predicated region body
PF: predicated region fallthrough
CT: control target
= control target key end

     0   :  { %s1359_s12 = smov 0   ;;  %s1544_s0 = inlined_call_operand.vmem [shape: bf16[2,36,2209], index: 0, kind: input, shape index: {}]   ;;  %s1545_s1 = inlined_call_operand.vmem [shape: bf16[16,36], index: 1, kind: input, shape index: {}]   ;;  %s1546_s2 = inlined_call_operand.vmem [shape: f32[16,1], index: 2, kind: input, shape index: {}]   ;;  %s1547_s3 = inlined_call_operand.vmem [shape: bf16[2,16,2209], index: 3, kind: output, shape index: {}]  }
   0x1 LB: > { %s1127_s13 = sadd.s32 4294967295, %s1336_s12   ;;  %p1131_p0 = scmp.ge.s32.totalorder %s1336_s12, 1  ;;  %s1336_s12 = sphi %s1359_s12, %s13_s12  }
   0x2   : > { %p137_p1 = scmp.lt.s32.totalorder %s1336_s12, 3 }
   0x4   : > { %p138_p2 = pnand %p1131_p0, %p137_p1 }
   0x5   : > { %p161_p3 = scmp.lt.s32.totalorder (!%p138_p2), %s1127_s13, 1 }
   0x6   : > { %141 = sbr.rel (%p138_p2) target bundleno = 284 (0x11c), region = 32 }
   0xb   : > { %v1338_v0 = vmov 0   ;;  %v219_v1 = vld [vmem:[%s1546_s2] sm:$0xff]  ;;  %s1549_s13 = smov (!%p161_p3, %s1127_s13), 1  ;;  %v220_v2 = vld [vmem:[%s1546_s2 + $0x8] sm:$0xff]  ;;  %vm465_vm0 = vcmask 1041408   ;;  %vm461_vm1 = vcmask 293888  }
   0xc   : > { %552 = vmatprep.mubr.bf16.mxu0 %v1338_v0  ;;  %595 = vmatprep.mubr.bf16.mxu1 %v1338_v0  ;;  %s1245_s16 = smul.u32 360, %s1549_s13  ;;  %v1403_v25 = vld [vmem:[%s1545_s1] sm:$0xff]   ;;  %vm1059_vm2 = vcmask 1043456   ;;  %vm1060_vm3 = vcmask 269316  }
   0xd   : > { %1256 = vset.pattern.permute.xlu0 %v1338_v0  ;;  %s1246_s24 = smul.u32 144, %s1549_s13  ;;  %vm1061_vm4 = vmor %vm1060_vm3, %vm1059_vm2 }
   0xe   : > { %223 = vperm.xlu0 %1256, %v219_v1   ;;  %s1382_s21 = scalar_lea.vmem %s1544_s0, %s1245_s16 }
   0xf   : > { %v210_v3 = vld [vmem:[%s1382_s21 + $0x120] sm:$0x33]  ;;  %v1259_v6 = vld [vmem:[%s1382_s21 + $0x94] ss:$72 sps:$4 sm:$0xff]   ;;  %v211_v7 = vld [vmem:[%s1382_s21 + $0x128] sm:$0x33]  ;;  %s1490_s27 = scalar_lea.vmem %s1547_s3, %s1246_s24 }
  0x10   : > { %v1172_v4 = vcombine.high %v210_v3, %v210_v3  ;;  %v1171_v5 = vcombine.low %v210_v3, %v210_v3  ;;  %v1174_v8 = vcombine.high %v211_v7, %v211_v7  ;;  %v1173_v9 = vcombine.low %v211_v7, %v211_v7  ;;  %v1261_v11 = vld [vmem:[%s1382_s21 + $0x90] ss:$72 sps:$4 sm:$0xff]   ;;  %v1264_v13 = vld [vmem:[%s1382_s21 + $0x4] ss:$72 sps:$4 sm:$0xff]   ;;  %v1266_v19 = vld [vmem:[%s1382_s21] ss:$72 sps:$4 sm:$0xff]  }
  0x11   : > { %v1267_v14 = vld [vmem:[%s1382_s21 + $0x9c] ss:$72 sps:$4 sm:$0xff]   ;;  %v1269_v15 = vld [vmem:[%s1382_s21 + $0x98] ss:$72 sps:$4 sm:$0xff]   ;;  %v212_v16 = vld [vmem:[%s1382_s21 + $0x130] sm:$0x33] }
  0x12   : > { %228 = vperm.xlu0 %1256, %v220_v2   ;;  %1189 = vmatprep.subr.msk.bf16.mxu0 %vm465_vm0, %v1172_v4  ;;  %v467_v10 = vsel %vm465_vm0, %v1171_v5, 0  ;;  %v473_v12 = vsel %vm465_vm0, %v1173_v9, 0  ;;  %v1273_v17 = vld [vmem:[%s1382_s21 + $0xc] ss:$72 sps:$4 sm:$0xff]   ;;  %v213_v18 = vld [vmem:[%s1382_s21 + $0x138] sm:$0x33]  ;;  %v1176_v20 = vcombine.high %v212_v16, %v212_v16  ;;  %v1175_v21 = vcombine.low %v212_v16, %v212_v16 }
  0x13   : > { %531 = vmatpush1.bf16.msra.mxu0 %v467_v10  ;;  %1191 = vmatprep.subr.msk.bf16.mxu1 %vm465_vm0, %v1174_v8  ;;  %v1275_v22 = vld [vmem:[%s1382_s21 + $0x8] ss:$72 sps:$4 sm:$0xff]   ;;  %v1178_v23 = vcombine.high %v213_v18, %v213_v18  ;;  %v1177_v24 = vcombine.low %v213_v18, %v213_v18  ;;  %v1278_v27 = vld [vmem:[%s1382_s21 + $0xa4] ss:$72 sps:$4 sm:$0xff]   ;;  %v1283_v31 = vld [vmem:[%s1382_s21 + $0x14] ss:$72 sps:$4 sm:$0xff]  }
  0x14   : > { %532 = vmatprep.subr.bf16.mxu0 %v1259_v6  ;;  %574 = vmatpush1.bf16.msra.mxu1 %v473_v12  ;;  %v479_v26 = vsel %vm465_vm0, %v1175_v21, 0  ;;  %v1286_v29 = vld [vmem:[%s1382_s21 + $0xac] ss:$72 sps:$4 sm:$0xff]   ;;  %v1276_v30 = vld [vmem:[%s1382_s21 + $0xa0] ss:$72 sps:$4 sm:$0xff]  }
  0x15   : > { %575 = vmatprep.subr.bf16.mxu1 %v1267_v14  ;;  %v485_v28 = vsel %vm465_vm0, %v1177_v24, 0  ;;  %v1284_v32 = vld [vmem:[%s1382_s21 + $0xa8] ss:$72 sps:$4 sm:$0xff]   ;;  %v214_v33 = vld [vmem:[%s1382_s21 + $0x140] sm:$0x33] }
  0x16   : > { %v1291_v34 = vld [vmem:[%s1382_s21 + $0x1c] ss:$72 sps:$4 sm:$0xff]   ;;  %v215_v35 = vld [vmem:[%s1382_s21 + $0x148] sm:$0x33]  ;;  %v1281_v36 = vld [vmem:[%s1382_s21 + $0x10] ss:$72 sps:$4 sm:$0xff]   ;;  %v1180_v37 = vcombine.high %v214_v33, %v214_v33  ;;  %v1179_v38 = vcombine.low %v214_v33, %v214_v33 }
  0x17   : > { %533 = vmatpush1.bf16.msra.mxu0 %v1261_v11  ;;  %v1289_v39 = vld [vmem:[%s1382_s21 + $0x18] ss:$72 sps:$4 sm:$0xff]   ;;  %v1182_v40 = vcombine.high %v215_v35, %v215_v35  ;;  %v1181_v41 = vcombine.low %v215_v35, %v215_v35  ;;  %v1294_v43 = vld [vmem:[%s1382_s21 + $0xb4] ss:$72 sps:$4 sm:$0xff]   ;;  %v1299_v47 = vld [vmem:[%s1382_s21 + $0x24] ss:$72 sps:$4 sm:$0xff]  }
  0x18   : > { %534 = vmatprep.subr.bf16.mxu0 %v1264_v13  ;;  %576 = vmatpush1.bf16.msra.mxu1 %v1269_v15  ;;  %v491_v42 = vsel %vm465_vm0, %v1179_v38, 0  ;;  %v1302_v45 = vld [vmem:[%s1382_s21 + $0xbc] ss:$72 sps:$4 sm:$0xff]   ;;  %v1292_v46 = vld [vmem:[%s1382_s21 + $0xb0] ss:$72 sps:$4 sm:$0xff]  }
  0x19   : > { %577 = vmatprep.subr.bf16.mxu1 %v1273_v17  ;;  %v497_v44 = vsel %vm465_vm0, %v1181_v41, 0  ;;  %v1300_v48 = vld [vmem:[%s1382_s21 + $0xb8] ss:$72 sps:$4 sm:$0xff]   ;;  %v216_v49 = vld [vmem:[%s1382_s21 + $0x150] sm:$0x33] }
  0x1a   : > { %v1307_v50 = vld [vmem:[%s1382_s21 + $0x2c] ss:$72 sps:$4 sm:$0xff]   ;;  %v217_v51 = vld [vmem:[%s1382_s21 + $0x158] sm:$0x33]  ;;  %v1297_v52 = vld [vmem:[%s1382_s21 + $0x20] ss:$72 sps:$4 sm:$0xff]   ;;  %v1184_v53 = vcombine.high %v216_v49, %v216_v49  ;;  %v1183_v54 = vcombine.low %v216_v49, %v216_v49 }
  0x1b   : > { %535 = vmatpush1.bf16.msra.mxu0 %v1266_v19  ;;  %v1305_v55 = vld [vmem:[%s1382_s21 + $0x28] ss:$72 sps:$4 sm:$0xff]   ;;  %v1186_v56 = vcombine.high %v217_v51, %v217_v51  ;;  %v1185_v57 = vcombine.low %v217_v51, %v217_v51  ;;  %v1310_v59 = vld [vmem:[%s1382_s21 + $0xc4] ss:$72 sps:$4 sm:$0xff]   ;;  %v1315_v63 = vld [vmem:[%s1382_s21 + $0x34] ss:$72 sps:$4 sm:$0xff]  }
  0x1c   : > { %1193 = vmatprep.subr.msk.bf16.mxu0 %vm465_vm0, %v1176_v20  ;;  %578 = vmatpush1.bf16.msra.mxu1 %v1275_v22  ;;  %v503_v58 = vsel %vm465_vm0, %v1183_v54, 0  ;;  %v1318_v61 = vld [vmem:[%s1382_s21 + $0xcc] ss:$72 sps:$4 sm:$0xff]   ;;  %v1308_v62 = vld [vmem:[%s1382_s21 + $0xc0] ss:$72 sps:$4 sm:$0xff]  }
  0x1d   : > { %1195 = vmatprep.subr.msk.bf16.mxu1 %vm465_vm0, %v1178_v23  ;;  %v509_v60 = vsel %vm465_vm0, %v1185_v57, 0  ;;  %v1316_v1 = vld [vmem:[%s1382_s21 + $0xc8] ss:$72 sps:$4 sm:$0xff]   ;;  %v218_v2 = vld [vmem:[%s1382_s21 + $0x160] sm:$0x33] }
  0x1e   : > { %1190 = vmatmul.mubr.msk.bf16.vlgmr.msra.gmra.mxu0 %vm461_vm1, %v1403_v25  ;;  %v1323_v3 = vld [vmem:[%s1382_s21 + $0x3c] ss:$72 sps:$4 sm:$0xff]   ;;  %v1313_v4 = vld [vmem:[%s1382_s21 + $0x30] ss:$72 sps:$4 sm:$0xff]   ;;  %v1188_v5 = vcombine.high %v218_v2, %v218_v2  ;;  %v1187_v6 = vcombine.low %v218_v2, %v218_v2  ;;  %v1327_v12 = vld [vmem:[%s1382_s21 + $0x40] ss:$72 sps:$4 sm:$0xff]  }
  0x1f   : > { %617 = vmatpush1.bf16.msra.mxu0 %v479_v26  ;;  %1192 = vmatmul.mubr.msk.bf16.vlgmr.msra.gmra.mxu1 %vm461_vm1, %v1403_v25  ;;  %v1321_v7 = vld [vmem:[%s1382_s21 + $0x38] ss:$72 sps:$4 sm:$0xff]   ;;  %v1326_v9 = vld [vmem:[%s1382_s21 + $0xd4] ss:$72 sps:$4 sm:$0xff]   ;;  %v1329_v11 = vld [vmem:[%s1382_s21 + $0x44] ss:$72 sps:$4 sm:$0xff]  }
  0x20   : > { %618 = vmatprep.subr.bf16.mxu0 %v1278_v27  ;;  %660 = vmatpush1.bf16.msra.mxu1 %v485_v28  ;;  %v515_v8 = vsel %vm465_vm0, %v1187_v6, 0  ;;  %v1324_v10 = vld [vmem:[%s1382_s21 + $0xd0] ss:$72 sps:$4 sm:$0xff]  }
  0x21   : > { %661 = vmatprep.subr.bf16.mxu1 %v1286_v29  ;;  %638 = vmatprep.mubr.bf16.mxu0 %v1338_v0 }
  0x22   : > { %681 = vmatprep.mubr.bf16.mxu1 %v1338_v0 }
  0x23   : > { %619 = vmatpush1.bf16.msra.mxu0 %v1276_v30 }
  0x24   : > { %620 = vmatprep.subr.bf16.mxu0 %v1283_v31  ;;  %662 = vmatpush1.bf16.msra.mxu1 %v1284_v32 }
  0x25   : > { %663 = vmatprep.subr.bf16.mxu1 %v1291_v34 }
  0x27   : > { %621 = vmatpush1.bf16.msra.mxu0 %v1281_v36 }
  0x28   : > { %1197 = vmatprep.subr.msk.bf16.mxu0 %vm465_vm0, %v1180_v37  ;;  %664 = vmatpush1.bf16.msra.mxu1 %v1289_v39 }
  0x29   : > { %1199 = vmatprep.subr.msk.bf16.mxu1 %vm465_vm0, %v1182_v40 }
  0x2a   : > { %1194 = vmatmul.mubr.msk.bf16.vlgmr.msra.gmra.mxu0 %vm461_vm1, %v1403_v25 }
  0x2b   : > { %703 = vmatpush1.bf16.msra.mxu0 %v491_v42  ;;  %1196 = vmatmul.mubr.msk.bf16.vlgmr.msra.gmra.mxu1 %vm461_vm1, %v1403_v25 }
  0x2c   : > { %704 = vmatprep.subr.bf16.mxu0 %v1294_v43  ;;  %746 = vmatpush1.bf16.msra.mxu1 %v497_v44 }
  0x2d   : > { %747 = vmatprep.subr.bf16.mxu1 %v1302_v45  ;;  %724 = vmatprep.mubr.bf16.mxu0 %v1338_v0 }
  0x2e   : > { %767 = vmatprep.mubr.bf16.mxu1 %v1338_v0 }
  0x2f   : > { %705 = vmatpush1.bf16.msra.mxu0 %v1292_v46 }
  0x30   : > { %706 = vmatprep.subr.bf16.mxu0 %v1299_v47  ;;  %748 = vmatpush1.bf16.msra.mxu1 %v1300_v48 }
  0x31   : > { %749 = vmatprep.subr.bf16.mxu1 %v1307_v50 }
  0x33   : > { %707 = vmatpush1.bf16.msra.mxu0 %v1297_v52 }
  0x34   : > { %1201 = vmatprep.subr.msk.bf16.mxu0 %vm465_vm0, %v1184_v53  ;;  %750 = vmatpush1.bf16.msra.mxu1 %v1305_v55 }
  0x35   : > { %1203 = vmatprep.subr.msk.bf16.mxu1 %vm465_vm0, %v1186_v56 }
  0x36   : > { %1198 = vmatmul.mubr.msk.bf16.vlgmr.msra.gmra.mxu0 %vm461_vm1, %v1403_v25 }
  0x37   : > { %789 = vmatpush1.bf16.msra.mxu0 %v503_v58  ;;  %1200 = vmatmul.mubr.msk.bf16.vlgmr.msra.gmra.mxu1 %vm461_vm1, %v1403_v25 }
  0x38   : > { %790 = vmatprep.subr.bf16.mxu0 %v1310_v59  ;;  %832 = vmatpush1.bf16.msra.mxu1 %v509_v60 }
  0x39   : > { %833 = vmatprep.subr.bf16.mxu1 %v1318_v61  ;;  %810 = vmatprep.mubr.bf16.mxu0 %v1338_v0 }
  0x3a   : > { %853 = vmatprep.mubr.bf16.mxu1 %v1338_v0 }
  0x3b   : > { %791 = vmatpush1.bf16.msra.mxu0 %v1308_v62 }
  0x3c   : > { %792 = vmatprep.subr.bf16.mxu0 %v1315_v63  ;;  %834 = vmatpush1.bf16.msra.mxu1 %v1316_v1 }
  0x3d   : > { %835 = vmatprep.subr.bf16.mxu1 %v1323_v3 }
  0x3f   : > { %793 = vmatpush1.bf16.msra.mxu0 %v1313_v4 }
  0x40   : > { %1205 = vmatprep.subr.msk.bf16.mxu0 %vm465_vm0, %v1188_v5  ;;  %836 = vmatpush1.bf16.msra.mxu1 %v1321_v7 }
  0x42   : > { %1202 = vmatmul.mubr.msk.bf16.vlgmr.msra.gmra.mxu0 %vm461_vm1, %v1403_v25 }
  0x43   : > { %875 = vmatpush1.bf16.msra.mxu0 %v515_v8  ;;  %1204 = vmatmul.mubr.msk.bf16.vlgmr.msra.gmra.mxu1 %vm461_vm1, %v1403_v25 }
  0x44   : > { %876 = vmatprep.subr.bf16.mxu0 %v1326_v9  ;;  %896 = vmatprep.mubr.bf16.mxu0 %v1338_v0 }
  0x47   : > { %877 = vmatpush1.bf16.msra.mxu0 %v1324_v10 }
  0x48   : > { %878 = vmatprep.subr.bf16.mxu0 %v1329_v11 }
  0x4b   : > { %879 = vmatpush1.bf16.msra.mxu0 %v1327_v12 }
  0x4e   : > { %1206 = vmatmul.mubr.msk.bf16.vlgmr.msra.gmra.mxu0 %vm461_vm1, %v1403_v25 }
  0x89   : > { %v1477_v13 = vpop.permute.xlu0 %223 }
  0x8d   : > { %v1481_v18 = vpop.permute.xlu0 %228 }
  0xde   : > { %v554_v14 = vpop.f32.mrf.mxu0 }
  0xdf   : > { %v555_v15 = vadd.f32 %v554_v14, %v1477_v13  ;;  %v597_v16 = vpop.f32.mrf.mxu1 }
  0xe0   : > { %v556_v17 = vpop.f32.mrf.mxu0  ;;  %v598_v19 = vadd.f32 %v597_v16, %v1477_v13 }
  0xe1   : > { %v907_v0 = vmax.f32 %v555_v15, 0.0  ;;  %v557_v20 = vadd.f32 %v556_v17, %v1477_v13  ;;  %v599_v21 = vpop.f32.mrf.mxu1 }
  0xe2   : > { %v558_v22 = vpop.f32.mrf.mxu0  ;;  %v909_v23 = vmax.f32 %v598_v19, 0.0  ;;  %v600_v24 = vadd.f32 %v599_v21, %v1477_v13 }
  0xe3   : > { %v908_v25 = vmax.f32 %v557_v20, 0.0  ;;  %v559_v26 = vadd.f32 %v558_v22, %v1481_v18  ;;  %v601_v27 = vpop.f32.mrf.mxu1 }
  0xe4   : > { %v560_v28 = vpop.f32.mrf.mxu0  ;;  %v910_v29 = vmax.f32 %v600_v24, 0.0  ;;  %v602_v30 = vadd.f32 %v601_v27, %v1481_v18 }
  0xe5   : > { %v1227_v31 = vpack.c.bf16 %v908_v25, %v907_v0  ;;  %v561_v32 = vadd.f32 %v560_v28, %v1481_v18  ;;  %v603_v33 = vpop.f32.mrf.mxu1  ;;  %v925_v37 = vmax.f32 %v559_v26, 0.0 }
  0xe6   : > { %v1228_v34 = vpack.c.bf16 %v910_v29, %v909_v23  ;;  %v927_v35 = vmax.f32 %v602_v30, 0.0  ;;  %v604_v36 = vadd.f32 %v603_v33, %v1481_v18 }
  0xe7   : > { %1051 = vst [vmem:[%s1490_s27] sm:$0xff] %v1227_v31  ;;  %v926_v38 = vmax.f32 %v561_v32, 0.0 }
  0xe8   : > { %1052 = vst [vmem:[%s1490_s27 + $0x8] sm:$0xff] %v1228_v34  ;;  %v928_v39 = vmax.f32 %v604_v36, 0.0 }
  0xe9   : > { %v1236_v40 = vpack.c.bf16 %v926_v38, %v925_v37 }
  0xea   : > { %v640_v41 = vpop.f32.mrf.mxu0  ;;  %v1237_v42 = vpack.c.bf16 %v928_v39, %v927_v35 }
  0xeb   : > { %1063 = vst [vmem:[%s1490_s27 + $0x48] sm:$0xff] %v1236_v40  ;;  %v641_v43 = vadd.f32 %v640_v41, %v1477_v13  ;;  %v683_v44 = vpop.f32.mrf.mxu1 }
  0xec   : > { %1064 = vst [vmem:[%s1490_s27 + $0x50] sm:$0xff] %v1237_v42  ;;  %v642_v45 = vpop.f32.mrf.mxu0  ;;  %v684_v46 = vadd.f32 %v683_v44, %v1477_v13 }
  0xed   : > { %v911_v47 = vmax.f32 %v641_v43, 0.0  ;;  %v643_v48 = vadd.f32 %v642_v45, %v1477_v13  ;;  %v685_v49 = vpop.f32.mrf.mxu1 }
  0xee   : > { %v644_v50 = vpop.f32.mrf.mxu0  ;;  %v913_v51 = vmax.f32 %v684_v46, 0.0  ;;  %v686_v52 = vadd.f32 %v685_v49, %v1477_v13 }
  0xef   : > { %v912_v53 = vmax.f32 %v643_v48, 0.0  ;;  %v645_v54 = vadd.f32 %v644_v50, %v1481_v18  ;;  %v687_v55 = vpop.f32.mrf.mxu1 }
  0xf0   : > { %v646_v56 = vpop.f32.mrf.mxu0  ;;  %v914_v57 = vmax.f32 %v686_v52, 0.0  ;;  %v688_v58 = vadd.f32 %v687_v55, %v1481_v18 }
  0xf1   : > { %v1229_v59 = vpack.c.bf16 %v912_v53, %v911_v47  ;;  %v647_v60 = vadd.f32 %v646_v56, %v1481_v18  ;;  %v689_v61 = vpop.f32.mrf.mxu1  ;;  %v929_v2 = vmax.f32 %v645_v54, 0.0 }
  0xf2   : > { %v1230_v62 = vpack.c.bf16 %v914_v57, %v913_v51  ;;  %v931_v63 = vmax.f32 %v688_v58, 0.0  ;;  %v690_v1 = vadd.f32 %v689_v61, %v1481_v18 }
  0xf3   : > { %1053 = vst [vmem:[%s1490_s27 + $0x10] sm:$0xff] %v1229_v59  ;;  %v930_v3 = vmax.f32 %v647_v60, 0.0 }
  0xf4   : > { %1054 = vst [vmem:[%s1490_s27 + $0x18] sm:$0xff] %v1230_v62  ;;  %v932_v4 = vmax.f32 %v690_v1, 0.0 }
  0xf5   : > { %v1238_v5 = vpack.c.bf16 %v930_v3, %v929_v2 }
  0xf6   : > { %v726_v6 = vpop.f32.mrf.mxu0  ;;  %v1239_v7 = vpack.c.bf16 %v932_v4, %v931_v63 }
  0xf7   : > { %1065 = vst [vmem:[%s1490_s27 + $0x58] sm:$0xff] %v1238_v5  ;;  %v727_v8 = vadd.f32 %v726_v6, %v1477_v13  ;;  %v769_v9 = vpop.f32.mrf.mxu1 }
  0xf8   : > { %1066 = vst [vmem:[%s1490_s27 + $0x60] sm:$0xff] %v1239_v7  ;;  %v728_v10 = vpop.f32.mrf.mxu0  ;;  %v770_v11 = vadd.f32 %v769_v9, %v1477_v13 }
  0xf9   : > { %v915_v12 = vmax.f32 %v727_v8, 0.0  ;;  %v729_v14 = vadd.f32 %v728_v10, %v1477_v13  ;;  %v771_v15 = vpop.f32.mrf.mxu1 }
  0xfa   : > { %v730_v16 = vpop.f32.mrf.mxu0  ;;  %v917_v17 = vmax.f32 %v770_v11, 0.0  ;;  %v772_v19 = vadd.f32 %v771_v15, %v1477_v13 }
  0xfb   : > { %v916_v0 = vmax.f32 %v729_v14, 0.0  ;;  %v731_v20 = vadd.f32 %v730_v16, %v1481_v18  ;;  %v773_v21 = vpop.f32.mrf.mxu1 }
  0xfc   : > { %v732_v22 = vpop.f32.mrf.mxu0  ;;  %v918_v23 = vmax.f32 %v772_v19, 0.0  ;;  %v774_v24 = vadd.f32 %v773_v21, %v1481_v18 }
  0xfd   : > { %v1231_v25 = vpack.c.bf16 %v916_v0, %v915_v12  ;;  %v733_v26 = vadd.f32 %v732_v22, %v1481_v18  ;;  %v775_v27 = vpop.f32.mrf.mxu1  ;;  %v933_v31 = vmax.f32 %v731_v20, 0.0 }
  0xfe   : > { %v1232_v28 = vpack.c.bf16 %v918_v23, %v917_v17  ;;  %v935_v29 = vmax.f32 %v774_v24, 0.0  ;;  %v776_v30 = vadd.f32 %v775_v27, %v1481_v18 }
  0xff   : > { %1055 = vst [vmem:[%s1490_s27 + $0x20] sm:$0xff] %v1231_v25  ;;  %v934_v32 = vmax.f32 %v733_v26, 0.0 }
 0x100   : > { %1056 = vst [vmem:[%s1490_s27 + $0x28] sm:$0xff] %v1232_v28  ;;  %v936_v33 = vmax.f32 %v776_v30, 0.0 }
 0x101   : > { %v1240_v34 = vpack.c.bf16 %v934_v32, %v933_v31 }
 0x102   : > { %v812_v35 = vpop.f32.mrf.mxu0  ;;  %v1241_v36 = vpack.c.bf16 %v936_v33, %v935_v29 }
 0x103   : > { %1067 = vst [vmem:[%s1490_s27 + $0x68] sm:$0xff] %v1240_v34  ;;  %v813_v37 = vadd.f32 %v812_v35, %v1477_v13  ;;  %v855_v38 = vpop.f32.mrf.mxu1 }
 0x104   : > { %1068 = vst [vmem:[%s1490_s27 + $0x70] sm:$0xff] %v1241_v36  ;;  %v814_v39 = vpop.f32.mrf.mxu0  ;;  %v856_v40 = vadd.f32 %v855_v38, %v1477_v13 }
 0x105   : > { %v919_v41 = vmax.f32 %v813_v37, 0.0  ;;  %v815_v42 = vadd.f32 %v814_v39, %v1477_v13  ;;  %v857_v43 = vpop.f32.mrf.mxu1 }
 0x106   : > { %v816_v44 = vpop.f32.mrf.mxu0  ;;  %v921_v45 = vmax.f32 %v856_v40, 0.0  ;;  %v858_v46 = vadd.f32 %v857_v43, %v1477_v13 }
 0x107   : > { %v920_v47 = vmax.f32 %v815_v42, 0.0  ;;  %v817_v48 = vadd.f32 %v816_v44, %v1481_v18  ;;  %v859_v49 = vpop.f32.mrf.mxu1 }
 0x108   : > { %v818_v50 = vpop.f32.mrf.mxu0  ;;  %v922_v51 = vmax.f32 %v858_v46, 0.0  ;;  %v860_v52 = vadd.f32 %v859_v49, %v1481_v18 }
 0x109   : > { %v1233_v53 = vpack.c.bf16 %v920_v47, %v919_v41  ;;  %v819_v54 = vadd.f32 %v818_v50, %v1481_v18  ;;  %v861_v55 = vpop.f32.mrf.mxu1  ;;  %v937_v59 = vmax.f32 %v817_v48, 0.0 }
 0x10a   : > { %v1234_v56 = vpack.c.bf16 %v922_v51, %v921_v45  ;;  %v939_v57 = vmax.f32 %v860_v52, 0.0  ;;  %v862_v58 = vadd.f32 %v861_v55, %v1481_v18 }
 0x10b   : > { %1057 = vst [vmem:[%s1490_s27 + $0x30] sm:$0xff] %v1233_v53  ;;  %v938_v60 = vmax.f32 %v819_v54, 0.0 }
 0x10c   : > { %1058 = vst [vmem:[%s1490_s27 + $0x38] sm:$0xff] %v1234_v56  ;;  %v940_v61 = vmax.f32 %v862_v58, 0.0 }
 0x10d   : > { %v1242_v62 = vpack.c.bf16 %v938_v60, %v937_v59 }
 0x10e   : > { %v1243_v63 = vpack.c.bf16 %v940_v61, %v939_v57  ;;  %v898_v1 = vpop.f32.mrf.mxu0 }
 0x10f   : > { %1069 = vst [vmem:[%s1490_s27 + $0x78] sm:$0xff] %v1242_v62  ;;  %v899_v2 = vadd.f32 %v898_v1, %v1477_v13 }
 0x110   : > { %1070 = vst [vmem:[%s1490_s27 + $0x80] sm:$0xff] %v1243_v63  ;;  %v900_v3 = vpop.f32.mrf.mxu0 }
 0x111   : > { %v901_v4 = vadd.f32 %v900_v3, %v1477_v13  ;;  %v923_v6 = vmax.f32 %v899_v2, 0.0 }
 0x112   : > { %v902_v5 = vpop.f32.mrf.mxu0 }
 0x113   : > { %v924_v7 = vmax.f32 %v901_v4, 0.0  ;;  %v903_v8 = vadd.f32 %v902_v5, %v1481_v18 }
 0x114   : > { %v904_v9 = vpop.f32.mrf.mxu0 }
 0x115   : > { %v1235_v10 = vpack.c.bf16 %v924_v7, %v923_v6  ;;  %v905_v11 = vadd.f32 %v904_v9, %v1481_v18  ;;  %v941_v12 = vmax.f32 %v903_v8, 0.0 }
 0x117   : > { %1062 = vst.msk [vmem:[%s1490_s27 + $0x40] sm:$0xff] %vm1061_vm4, %v1235_v10  ;;  %v942_v14 = vmax.f32 %v905_v11, 0.0 }
 0x119   : > { %v1244_v15 = vpack.c.bf16 %v942_v14, %v941_v12 }
 0x11b   : > { %1071 = vst.msk [vmem:[%s1490_s27 + $0x88] sm:$0xff] %vm1061_vm4, %v1244_v15 }
 0x11c PF: > { %s13_s12 = sadd.s32 1, %s1336_s12  }
 0x11d   : > { %p10_p4 = scmp.ge.s32.totalorder %s13_s12, 4  }
 0x11f   :  { %12 = sbr.rel (!%p10_p4) target bundleno = 1 (0x1), region = 62 }

// kernel: cnn_critic_forward.3
= control target key start
LH: loop header
LB: loop body
LE: loop exit
PB: predicated region body
PF: predicated region fallthrough
CT: control target
= control target key end

     0   :  { %s18953_s29 = smov 0   ;;  %s22811_s0 = inlined_call_operand.vmem [shape: bf16[2,144,529], index: 0, kind: input, shape index: {}]   ;;  %s22812_s1 = inlined_call_operand.vmem [shape: bf16[32,144], index: 1, kind: input, shape index: {}]   ;;  %s22813_s2 = inlined_call_operand.vmem [shape: f32[32,1], index: 2, kind: input, shape index: {}]   ;;  %s22814_s3 = inlined_call_operand.vmem [shape: bf16[9,529,121], index: 3, kind: input, shape index: {}]   ;;  %s22815_s4 = inlined_call_operand.vmem [shape: bf16[64,288], index: 4, kind: input, shape index: {}]   ;;  %s22816_s5 = inlined_call_operand.vmem [shape: f32[64,1], index: 5, kind: input, shape index: {}]   ;;  %s22817_s6 = inlined_call_operand.vmem [shape: bf16[9,121,25], index: 6, kind: input, shape index: {}]   ;;  %s22818_s7 = inlined_call_operand.vmem [shape: bf16[128,576], index: 7, kind: input, shape index: {}]   ;;  %s22819_s8 = inlined_call_operand.vmem [shape: f32[128,1], index: 8, kind: input, shape index: {}]   ;;  %s22820_s9 = inlined_call_operand.vmem [shape: bf16[9,25,4], index: 9, kind: input, shape index: {}]   ;;  %s22821_s10 = inlined_call_operand.vmem [shape: bf16[256,1152], index: 10, kind: input, shape index: {}]   ;;  %s22822_s11 = inlined_call_operand.vmem [shape: f32[256,1], index: 11, kind: input, shape index: {}]   ;;  %s22823_s12 = inlined_call_operand.vmem [shape: bf16[4,100,256], index: 12, kind: input, shape index: {}]   ;;  %s22824_s13 = inlined_call_operand.vmem [shape: f32[100,1], index: 13, kind: input, shape index: {}]   ;;  %s22825_s14 = inlined_call_operand.vmem [shape: bf16[30,100], index: 14, kind: input, shape index: {}]   ;;  %s22826_s15 = inlined_call_operand.vmem [shape: f32[30,1], index: 15, kind: input, shape index: {}]   ;;  %s22827_s16 = inlined_call_operand.vmem [shape: bf16[1,30], index: 16, kind: input, shape index: {}]   ;;  %s22828_s17 = inlined_call_operand.<no memory space> [shape: f32[1,1], index: 17, kind: input, shape index: {}]   ;;  %s22829_s18 = inlined_call_operand.vmem [shape: f32[2,1,1], index: 18, kind: output, shape index: {}]  }
   0x1   :  { %22832 = sst [smem:[#allocation21_spill]] %s22811_s0  ;;  %v23_v0 = vstv %s22828_s17 }
   0x2   :  { %22833 = sst [smem:[#allocation22_spill]] %s22812_s1  ;;  %24 = vst [vmem:[#allocation5] sm:$0x1] %v23_v0 }
   0x3   :  { %22834 = sst [smem:[#allocation23_spill]] %s22813_s2 }
   0x4 LB: > { %s13431_s30 = sadd.s32 4294967295, %s18846_s29   ;;  %p13435_p0 = scmp.ge.s32.totalorder %s18846_s29, 1  ;;  %s18846_s29 = sphi %s18953_s29, %s30_s29  }
   0x5   : > { %p514_p1 = scmp.lt.s32.totalorder %s18846_s29, 3 }
   0x7   : > { %p515_p2 = pnand %p13435_p0, %p514_p1 }
   0x9   : > { %518 = sbr.rel (%p515_p2) target bundleno = 3315 (0xcf3), region = 92 }
   0xe   : > { %s22835_s1 = sld [smem:[#allocation23_spill]]  ;;  %p566_p3 = scmp.lt.s32.totalorder %s13431_s30, 1  ;;  %v18848_v2 = vmov 0   ;;  %vm909_vm0 = vcmask 130048   ;;  %v5114_v6 = vld [vmem:[%s22816_s5] sm:$0xff]  ;;  %v5115_v9 = vld [vmem:[%s22816_s5 + $0x8] sm:$0xff] }
   0xf   : > { %17885 = vset.pattern.permute.xlu0 %v18848_v2  ;;  %17886 = vset.pattern.permute.xlu1 %v18848_v2  ;;  %s22836_s0 = sld [smem:[#allocation21_spill]]  ;;  %v5116_v13 = vld [vmem:[%s22816_s5 + $0x10] sm:$0xff]  ;;  %v5117_v18 = vld [vmem:[%s22816_s5 + $0x18] sm:$0xff]  ;;  %v5118_v19 = vld [vmem:[%s22816_s5 + $0x20] sm:$0xff]  ;;  %vm1376_vm1 = vcmask 1040384   ;;  %vm1369_vm2 = vcmask 138240  }
  0x10   : > { %s22869_s30 = smov (!%p566_p3, %s13431_s30), 1  ;;  %s22837_s21 = sld [smem:[#allocation22_spill]]  ;;  %v5120_v26 = vld [vmem:[%s22816_s5 + $0x30] sm:$0xff]  ;;  %v5119_v27 = vld [vmem:[%s22816_s5 + $0x28] sm:$0xff]  ;;  %v7170_v32 = vld [vmem:[%s22819_s8] sm:$0xff]  ;;  %vm1545_vm3 = vcmask 986112  }
  0x11   : > { %s17869_s2 = smul.u32 360, %s22869_s30  ;;  %v5121_v35 = vld [vmem:[%s22816_s5 + $0x38] sm:$0xff]  ;;  %v7172_v38 = vld [vmem:[%s22819_s8 + $0x10] sm:$0xff]  ;;  %v7174_v43 = vld [vmem:[%s22819_s8 + $0x20] sm:$0xff]  ;;  %vm5330_vm4 = vcmask 261120   ;;  %vm5561_vm5 = vcmask 1043456   ;;  %s573_s28 = scalar_lea.vmem %s22829_s18, %s22869_s30 }
  0x12   : > { %v7171_v48 = vld [vmem:[%s22819_s8 + $0x8] sm:$0xff]  ;;  %v7176_v49 = vld [vmem:[%s22819_s8 + $0x30] sm:$0xff]  ;;  %v7173_v50 = vld [vmem:[%s22819_s8 + $0x18] sm:$0xff]  ;;  %vm5562_vm6 = vcmask 1044480   ;;  %vm5548_vm7 = vcmask 990208   ;;  %vm5665_vm8 = vcmask 199680  }
  0x13   : > { %v7178_v55 = vld [vmem:[%s22819_s8 + $0x40] sm:$0xff]  ;;  %v7175_v57 = vld [vmem:[%s22819_s8 + $0x28] sm:$0xff]  ;;  %v7177_v60 = vld [vmem:[%s22819_s8 + $0x38] sm:$0xff]  ;;  %vm7682_vm9 = vcmask 523264   ;;  %vm8037_vm10 = vcmask 203776   ;;  %vm8226_vm11 = vcmask 27648  }
  0x14   : > { %v633_v1 = vld [vmem:[%s22835_s1] sm:$0xff]  ;;  %v635_v3 = vld [vmem:[%s22835_s1 + $0x10] sm:$0xff]  ;;  %v634_v4 = vld [vmem:[%s22835_s1 + $0x8] sm:$0xff]  ;;  %s18850_s20 = smov 127   ;;  %s18851_s22 = smov 126   ;;  %vm13266_vm12 = vcmask 818176  }
  0x15   : > { %639 = vperm.xlu0 %17885, %v633_v1   ;;  %649 = vperm.xlu1 %17886, %v635_v3   ;;  %v636_v5 = vld [vmem:[%s22835_s1 + $0x18] sm:$0xff]  ;;  %s18984_s19 = scalar_lea.vmem %s22836_s0, %s17869_s2  ;;  %v7180_v61 = vld [vmem:[%s22819_s8 + $0x50] sm:$0xff]  ;;  %v7179_v0 = vld [vmem:[%s22819_s8 + $0x48] sm:$0xff]  ;;  %vm13273_vm13 = vcmask 1041408   ;;  %vm18854_vm14 = vmmov 0   ;;  %vm13338_vm15 = vcmask 1046528  }
  0x16   : > { %v18989_v7 = vld [vmem:[%s22837_s21 + $0x4] ss:$8 sps:$4 sm:$0xff]   ;;  %v17887_v8 = vld [vmem:[%s18984_s19 + $0x11c] ss:$20 sps:$4 sm:$0xff]   ;;  %v17892_v12 = vld [vmem:[%s18984_s19 + $0x120] ss:$20 sps:$4 sm:$0xff]  }
  0x17   : > { %v17889_v10 = vld [vmem:[%s18984_s19 + $0x124] ss:$20 sps:$4 sm:$0xff]   ;;  %13486 = vmatprep.mubr.msk.bf16.mxu0 %vm909_vm0, %v18989_v7  ;;  %13488 = vmatprep.mubr.msk.bf16.mxu1 %vm909_vm0, %v18989_v7  ;;  %v17893_v14 = vld [vmem:[%s18984_s19 + $0xf4] ss:$20 sps:$4 sm:$0xff]   ;;  %v17895_v15 = vld [vmem:[%s18984_s19 + $0xfc] ss:$20 sps:$4 sm:$0xff]  }
  0x18   : > { %916 = vmatprep.subr.bf16.mxu0 %v17887_v8  ;;  %v17891_v11 = vld [vmem:[%s18984_s19 + $0x118] ss:$20 sps:$4 sm:$0xff]   ;;  %969 = vmatprep.subr.bf16.mxu1 %v17889_v10  ;;  %v17897_v16 = vld [vmem:[%s18984_s19 + $0xf0] ss:$20 sps:$4 sm:$0xff]   ;;  %v17901_v21 = vld [vmem:[%s18984_s19 + $0xd4] ss:$20 sps:$4 sm:$0xff]  }
  0x19   : > { %644 = vperm.xlu0 %17885, %v634_v4   ;;  %654 = vperm.xlu1 %17886, %v636_v5   ;;  %v17898_v17 = vld [vmem:[%s18984_s19 + $0xf8] ss:$20 sps:$4 sm:$0xff]   ;;  %v17903_v22 = vld [vmem:[%s18984_s19 + $0xc8] ss:$20 sps:$4 sm:$0xff]   ;;  %v17904_v23 = vld [vmem:[%s18984_s19 + $0xd0] ss:$20 sps:$4 sm:$0xff]  }
  0x1a   : > { %917 = vmatpush1.bf16.msra.mxu0 %v17891_v11  ;;  %970 = vmatpush1.bf16.msra.mxu1 %v17892_v12  ;;  %v17899_v20 = vld [vmem:[%s18984_s19 + $0xcc] ss:$20 sps:$4 sm:$0xff]   ;;  %v17905_v24 = vld [vmem:[%s18984_s19 + $0xa4] ss:$20 sps:$4 sm:$0xff]   ;;  %v17910_v29 = vld [vmem:[%s18984_s19 + $0xa8] ss:$20 sps:$4 sm:$0xff]  }
  0x1b   : > { %918 = vmatprep.subr.bf16.mxu0 %v17893_v14  ;;  %971 = vmatprep.subr.bf16.mxu1 %v17895_v15  ;;  %v17907_v25 = vld [vmem:[%s18984_s19 + $0xac] ss:$20 sps:$4 sm:$0xff]   ;;  %v17911_v30 = vld [vmem:[%s18984_s19 + $0x7c] ss:$20 sps:$4 sm:$0xff]   ;;  %v17913_v31 = vld [vmem:[%s18984_s19 + $0x84] ss:$20 sps:$4 sm:$0xff]  }
  0x1c   : > { %v17909_v28 = vld [vmem:[%s18984_s19 + $0xa0] ss:$20 sps:$4 sm:$0xff]   ;;  %v17915_v33 = vld [vmem:[%s18984_s19 + $0x78] ss:$20 sps:$4 sm:$0xff]   ;;  %v17919_v37 = vld [vmem:[%s18984_s19 + $0x5c] ss:$20 sps:$4 sm:$0xff]  }
  0x1d   : > { %5124 = vperm.xlu0 %17885, %v5114_v6   ;;  %5129 = vperm.xlu1 %17886, %v5115_v9   ;;  %v17916_v34 = vld [vmem:[%s18984_s19 + $0x80] ss:$20 sps:$4 sm:$0xff]   ;;  %v17921_v39 = vld [vmem:[%s18984_s19 + $0x50] ss:$20 sps:$4 sm:$0xff]   ;;  %v17922_v40 = vld [vmem:[%s18984_s19 + $0x58] ss:$20 sps:$4 sm:$0xff]  }
  0x1e   : > { %919 = vmatpush1.bf16.msra.mxu0 %v17897_v16  ;;  %972 = vmatpush1.bf16.msra.mxu1 %v17898_v17  ;;  %v17917_v36 = vld [vmem:[%s18984_s19 + $0x54] ss:$20 sps:$4 sm:$0xff]   ;;  %v17923_v41 = vld [vmem:[%s18984_s19 + $0x2c] ss:$20 sps:$4 sm:$0xff]   ;;  %v17928_v45 = vld [vmem:[%s18984_s19 + $0x30] ss:$20 sps:$4 sm:$0xff]  }
  0x1f   : > { %920 = vmatprep.subr.bf16.mxu0 %v17899_v20  ;;  %973 = vmatprep.subr.bf16.mxu1 %v17901_v21  ;;  %v17925_v42 = vld [vmem:[%s18984_s19 + $0x34] ss:$20 sps:$4 sm:$0xff]   ;;  %v17929_v46 = vld [vmem:[%s18984_s19 + $0x4] ss:$20 sps:$4 sm:$0xff]   ;;  %v17931_v47 = vld [vmem:[%s18984_s19 + $0xc] ss:$20 sps:$4 sm:$0xff]  }
  0x20   : > { %v17927_v44 = vld [vmem:[%s18984_s19 + $0x28] ss:$20 sps:$4 sm:$0xff]   ;;  %v17933_v51 = vld [vmem:[%s18984_s19] ss:$20 sps:$4 sm:$0xff]   ;;  %v17935_v53 = vld [vmem:[%s18984_s19 + $0x144] ss:$20 sps:$4 sm:$0xff]  }
  0x21   : > { %5134 = vperm.xlu0 %17885, %v5116_v13   ;;  %5139 = vperm.xlu1 %17886, %v5117_v18   ;;  %v17934_v52 = vld [vmem:[%s18984_s19 + $0x8] ss:$20 sps:$4 sm:$0xff]   ;;  %v17937_v54 = vld [vmem:[%s18984_s19 + $0x14c] ss:$20 sps:$4 sm:$0xff]   ;;  %v19111_v4 = vld [vmem:[%s22837_s21 + $0x10] ss:$8 sps:$4 sm:$0xff]  }
  0x22   : > { %921 = vmatpush1.bf16.msra.mxu0 %v17903_v22  ;;  %974 = vmatpush1.bf16.msra.mxu1 %v17904_v23  ;;  %v17939_v56 = vld [vmem:[%s18984_s19 + $0x140] ss:$20 sps:$4 sm:$0xff]   ;;  %v17940_v58 = vld [vmem:[%s18984_s19 + $0x148] ss:$20 sps:$4 sm:$0xff]   ;;  %v17949_v8 = vld [vmem:[%s18984_s19 + $0xd8] ss:$20 sps:$4 sm:$0xff]  }
  0x23   : > { %922 = vmatprep.subr.bf16.mxu0 %v17905_v24  ;;  %975 = vmatprep.subr.bf16.mxu1 %v17907_v25  ;;  %v19079_v59 = vld [vmem:[%s22837_s21] ss:$8 sps:$4 sm:$0xff]   ;;  %v19092_v63 = vld [vmem:[%s22837_s21 + $0x14] ss:$8 sps:$4 sm:$0xff]   ;;  %v17950_v11 = vld [vmem:[%s18984_s19 + $0xb0] ss:$20 sps:$4 sm:$0xff]  }
  0x24   : > { %v17944_v62 = vld [vmem:[%s18984_s19 + $0x128] ss:$20 sps:$4 sm:$0xff]   ;;  %v7182_v1 = vld [vmem:[%s22819_s8 + $0x60] sm:$0xff]  ;;  %v7184_v6 = vld [vmem:[%s22819_s8 + $0x70] sm:$0xff] }
  0x25   : > { %5144 = vperm.xlu0 %17885, %v5118_v19   ;;  %5149 = vperm.xlu1 %17886, %v5119_v27   ;;  %v17945_v3 = vld [vmem:[%s18984_s19 + $0x100] ss:$20 sps:$4 sm:$0xff]   ;;  %v7181_v5 = vld [vmem:[%s22819_s8 + $0x58] sm:$0xff]  ;;  %v7183_v9 = vld [vmem:[%s22819_s8 + $0x68] sm:$0xff] }
  0x26   : > { %923 = vmatpush1.bf16.msra.mxu0 %v17909_v28  ;;  %976 = vmatpush1.bf16.msra.mxu1 %v17910_v29  ;;  %v10145_v10 = vld [vmem:[%s22822_s11 + $0xf0] sm:$0xff]  ;;  %v7185_v12 = vld [vmem:[%s22819_s8 + $0x78] sm:$0xff]  ;;  %v10127_v18 = vld [vmem:[%s22822_s11 + $0x60] sm:$0xff] }
  0x27   : > { %924 = vmatprep.subr.bf16.mxu0 %v17911_v30  ;;  %977 = vmatprep.subr.bf16.mxu1 %v17913_v31  ;;  %v10129_v13 = vld [vmem:[%s22822_s11 + $0x70] sm:$0xff]  ;;  %v17951_v14 = vld [vmem:[%s18984_s19 + $0x88] ss:$20 sps:$4 sm:$0xff]   ;;  %v17953_v19 = vld [vmem:[%s18984_s19 + $0x38] ss:$20 sps:$4 sm:$0xff]  }
  0x28   : > { %v10146_v15 = vld [vmem:[%s22822_s11 + $0xf8] sm:$0xff]  ;;  %v17952_v16 = vld [vmem:[%s18984_s19 + $0x60] ss:$20 sps:$4 sm:$0xff]   ;;  %v10144_v20 = vld [vmem:[%s22822_s11 + $0xe8] sm:$0xff] }
  0x29   : > { %5154 = vperm.xlu0 %17885, %v5120_v26   ;;  %5159 = vperm.xlu1 %17886, %v5121_v35   ;;  %v10130_v17 = vld [vmem:[%s22822_s11 + $0x78] sm:$0xff]  ;;  %v10141_v21 = vld [vmem:[%s22822_s11 + $0xd0] sm:$0xff]  ;;  %v10128_v23 = vld [vmem:[%s22822_s11 + $0x68] sm:$0xff] }
  0x2a   : > { %925 = vmatpush1.bf16.msra.mxu0 %v17915_v33  ;;  %978 = vmatpush1.bf16.msra.mxu1 %v17916_v34  ;;  %v17954_v22 = vld [vmem:[%s18984_s19 + $0x10] ss:$20 sps:$4 sm:$0xff]   ;;  %v10142_v26 = vld [vmem:[%s22822_s11 + $0xd8] sm:$0xff]  ;;  %v10140_v30 = vld [vmem:[%s22822_s11 + $0xc8] sm:$0xff] }
  0x2b   : > { %926 = vmatprep.subr.bf16.mxu0 %v17917_v36  ;;  %979 = vmatprep.subr.bf16.mxu1 %v17919_v37  ;;  %v10125_v24 = vld [vmem:[%s22822_s11 + $0x50] sm:$0xff]  ;;  %v10139_v27 = vld [vmem:[%s22822_s11 + $0xc0] sm:$0xff]  ;;  %v10126_v28 = vld [vmem:[%s22822_s11 + $0x58] sm:$0xff] }
  0x2c   : > { %v17955_v25 = vld [vmem:[%s18984_s19 + $0x150] ss:$20 sps:$4 sm:$0xff]   ;;  %v17956_v34 = vld [vmem:[%s22814_s3 + $0x78] sm:$0xff]   ;;  %s18852_s19 = smov 125  }
  0x2d   : > { %7188 = vperm.xlu0 %17885, %v7170_v32   ;;  %7193 = vperm.xlu1 %17886, %v7171_v48   ;;  %v10123_v29 = vld [vmem:[%s22822_s11 + $0x40] sm:$0xff]  ;;  %v10137_v31 = vld [vmem:[%s22822_s11 + $0xb0] sm:$0xff]  ;;  %v10124_v32 = vld [vmem:[%s22822_s11 + $0x48] sm:$0xff] }
  0x2e   : > { %927 = vmatpush1.bf16.msra.mxu0 %v17921_v39  ;;  %980 = vmatpush1.bf16.msra.mxu1 %v17922_v40  ;;  %v10121_v33 = vld [vmem:[%s22822_s11 + $0x30] sm:$0xff]  ;;  %v17957_v35 = vld [vmem:[%s22814_s3 + $0x38] sm:$0xff]   ;;  %v17958_v36 = vld [vmem:[%s22814_s3 + $0x184] sm:$0xff]  }
  0x2f   : > { %928 = vmatprep.subr.bf16.mxu0 %v17923_v41  ;;  %981 = vmatprep.subr.bf16.mxu1 %v17925_v42  ;;  %v10138_v37 = vld [vmem:[%s22822_s11 + $0xb8] sm:$0xff]  ;;  %v10135_v39 = vld [vmem:[%s22822_s11 + $0xa0] sm:$0xff]  ;;  %v17960_v40 = vld [vmem:[%s22814_s3 + $0x70] sm:$0xff]  }
  0x30   : > { %v17961_v41 = vld [vmem:[%s22814_s3 + $0x30] sm:$0xff]   ;;  %v17962_v42 = vld [vmem:[%s22814_s3 + $0x17c] sm:$0xff]  }
  0x31   : > { %7198 = vperm.xlu0 %17885, %v7172_v38   ;;  %7203 = vperm.xlu1 %17886, %v7173_v50   ;;  %v17959_v38 = vld [vmem:[%s22814_s3 + $0x144] sm:$0xff]   ;;  %v17966_v48 = vld [vmem:[%s22814_s3 + $0x174] sm:$0xff]  }
  0x32   : > { %929 = vmatpush1.bf16.msra.mxu0 %v17927_v44  ;;  %982 = vmatpush1.bf16.msra.mxu1 %v17928_v45  ;;  %v17963_v44 = vld [vmem:[%s22814_s3 + $0x13c] sm:$0xff]   ;;  %v17967_v50 = vld [vmem:[%s22814_s3 + $0x134] sm:$0xff]  }
  0x33   : > { %930 = vmatprep.subr.bf16.mxu0 %v17929_v46  ;;  %983 = vmatprep.subr.bf16.mxu1 %v17931_v47  ;;  %v10119_v45 = vld [vmem:[%s22822_s11 + $0x20] sm:$0xff]  ;;  %v17964_v46 = vld [vmem:[%s22814_s3 + $0x68] sm:$0xff]  }
  0x34   : > { %v17965_v47 = vld [vmem:[%s22814_s3 + $0x28] sm:$0xff]  }
  0x35   : > { %7208 = vperm.xlu0 %17885, %v7174_v43   ;;  %7213 = vperm.xlu1 %17886, %v7175_v57   ;;  %v10122_v43 = vld [vmem:[%s22822_s11 + $0x38] sm:$0xff]  ;;  %v10117_v57 = vld [vmem:[%s22822_s11 + $0x10] sm:$0xff] }
  0x36   : > { %931 = vmatpush1.bf16.msra.mxu0 %v17933_v51  ;;  %984 = vmatpush1.bf16.msra.mxu1 %v17934_v52  ;;  %v10133_v51 = vld [vmem:[%s22822_s11 + $0x90] sm:$0xff]  ;;  %v17968_v52 = vld [vmem:[%s22814_s3 + $0x60] sm:$0xff]  }
  0x37   : > { %946 = vmatprep.subr.bf16.mxu0 %v17935_v53  ;;  %999 = vmatprep.subr.bf16.mxu1 %v17937_v54  ;;  %v17969_v53 = vld [vmem:[%s22814_s3 + $0x20] sm:$0xff]   ;;  %v17970_v54 = vld [vmem:[%s22814_s3 + $0x16c] sm:$0xff]  }
  0x39   : > { %7218 = vperm.xlu0 %17885, %v7176_v49   ;;  %7223 = vperm.xlu1 %17886, %v7177_v60   ;;  %v10136_v49 = vld [vmem:[%s22822_s11 + $0xa8] sm:$0xff] }
  0x3a   : > { %947 = vmatpush2.bf16.msra.mxu0 %v17939_v56  ;;  %1000 = vmatpush2.bf16.msra.mxu1 %v17940_v58  ;;  %v17971_v56 = vld [vmem:[%s22814_s3 + $0x12c] sm:$0xff]   ;;  %v17972_v58 = vld [vmem:[%s22814_s3 + $0x58] sm:$0xff]   ;;  %v17974_v60 = vld [vmem:[%s22814_s3 + $0x164] sm:$0xff]  }
  0x3b   : > { %1022 = vmatprep.subr.bf16.mxu0 %v18848_v2  ;;  %15650 = vmatprep.subr.bf16.mxu1 %v17956_v34 }
  0x3d   : > { %7228 = vperm.xlu0 %17885, %v7178_v55   ;;  %949 = vmatmul.mubr.bf16.vlgmr.msra.gmra.mxu0 %v19079_v59  ;;  %v10120_v55 = vld [vmem:[%s22822_s11 + $0x28] sm:$0xff] }
  0x3e   : > { %1002 = vmatmul.mubr.bf16.vlgmr.msra.gmra.mxu1 %v19079_v59  ;;  %1023 = vmatpush1.bf16.msra.mxu0 %v17944_v62  ;;  %v17975_v62 = vld [vmem:[%s22814_s3 + $0x124] sm:$0xff]  }
  0x3f   : > { %1024 = vmatprep.subr.bf16.mxu0 %v18848_v2  ;;  %13487 = vmatprep.mubr.msk.bf16.mxu0 %vm909_vm0, %v19092_v63 }
  0x40   : > { %7233 = vperm.xlu1 %17886, %v7179_v0   ;;  %13489 = vmatprep.mubr.msk.bf16.mxu1 %vm909_vm0, %v19092_v63  ;;  %v17976_v0 = vld [vmem:[%s22814_s3 + $0x50] sm:$0xff]  }
  0x41   : > { %7238 = vperm.xlu0 %17885, %v7180_v61   ;;  %15651 = vmatpush3.bf16.msra.mxu1 %v17957_v35  ;;  %v10134_v61 = vld [vmem:[%s22822_s11 + $0x98] sm:$0xff] }
  0x42   : > { %1025 = vmatpush1.bf16.msra.mxu0 %v17945_v3  ;;  %15652 = vmatprep.subr.bf16.mxu1 %v17960_v40  ;;  %v17978_v3 = vld [vmem:[%s22814_s3 + $0x15c] sm:$0xff]  }
  0x43   : > { %1026 = vmatprep.subr.bf16.mxu0 %v18848_v2 }
  0x44   : > { %7243 = vperm.xlu1 %17886, %v7181_v5   ;;  %v17979_v5 = vld [vmem:[%s22814_s3 + $0x11c] sm:$0xff]  }
  0x45   : > { %7248 = vperm.xlu0 %17885, %v7182_v1   ;;  %959 = vmatmul.mubr.bf16.gmra.mxu0 %v19111_v4  ;;  %v17977_v1 = vld [vmem:[%s22814_s3 + $0x10] sm:$0xff]  }
  0x46   : > { %1027 = vmatpush1.bf16.msra.mxu0 %v17949_v8  ;;  %1012 = vmatmul.mubr.bf16.gmra.mxu1 %v19111_v4  ;;  %v17980_v8 = vld [vmem:[%s22814_s3 + $0x48] sm:$0xff]  }
  0x47   : > { %1028 = vmatprep.subr.bf16.mxu0 %v18848_v2  ;;  %13490 = vmatprep.mubr.msk.bf16.mxu0 %vm909_vm0, %v18989_v7  ;;  %v10143_v7 = vld [vmem:[%s22822_s11 + $0xe0] sm:$0xff] }
  0x48   : > { %7253 = vperm.xlu1 %17886, %v7183_v9   ;;  %15653 = vmatpush3.bf16.msra.mxu1 %v17961_v41  ;;  %v17981_v9 = vld [vmem:[%s22814_s3 + $0x8] sm:$0xff]  }
  0x49   : > { %7258 = vperm.xlu0 %17885, %v7184_v6   ;;  %15654 = vmatprep.subr.bf16.mxu1 %v17964_v46  ;;  %v10115_v6 = vld [vmem:[%s22822_s11] sm:$0xff] }
  0x4a   : > { %1029 = vmatpush1.bf16.msra.mxu0 %v17950_v11  ;;  %v10132_v11 = vld [vmem:[%s22822_s11 + $0x88] sm:$0xff] }
  0x4b   : > { %1030 = vmatprep.subr.bf16.mxu0 %v18848_v2 }
  0x4c   : > { %7263 = vperm.xlu1 %17886, %v7185_v12   ;;  %15655 = vmatpush3.bf16.msra.mxu1 %v17965_v47  ;;  %v17983_v12 = vld [vmem:[%s22814_s3 + $0x114] sm:$0xff]  }
  0x4d   : > { %10299 = vperm.xlu0 %17885, %v10145_v10   ;;  %15656 = vmatprep.subr.bf16.mxu1 %v17968_v52  ;;  %v17982_v10 = vld [vmem:[%s22814_s3 + $0x154] sm:$0xff]  }
  0x4e   : > { %1031 = vmatpush1.bf16.msra.mxu0 %v17951_v14  ;;  %v17985_v14 = vld [vmem:[%s22814_s3] sm:$0xff]   ;;  %v17991_v52 = vld [vmem:[%s22814_s3 + $0xb0] sm:$0xff]  }
  0x4f   : > { %1032 = vmatprep.subr.bf16.mxu0 %v18848_v2 }
  0x50   : > { %10304 = vperm.xlu1 %17886, %v10146_v15   ;;  %15657 = vmatpush3.bf16.msra.mxu1 %v17969_v53  ;;  %v17986_v15 = vld [vmem:[%s22814_s3 + $0x14c] sm:$0xff]  }
  0x51   : > { %10219 = vperm.xlu0 %17885, %v10129_v13   ;;  %15658 = vmatprep.subr.bf16.mxu1 %v17972_v58  ;;  %v17984_v13 = vld [vmem:[%s22814_s3 + $0x40] sm:$0xff]  }
  0x52   : > { %1033 = vmatpush1.bf16.msra.mxu0 %v17952_v16  ;;  %v17987_v16 = vld [vmem:[%s22814_s3 + $0x10c] sm:$0xff]  }
  0x53   : > { %1034 = vmatprep.subr.bf16.mxu0 %v18848_v2 }
  0x54   : > { %10224 = vperm.xlu1 %17886, %v10130_v17   ;;  %v17988_v17 = vld [vmem:[%s22814_s3 + $0xf8] sm:$0xff]  }
  0x55   : > { %10289 = vperm.xlu0 %17885, %v10143_v7   ;;  %v10116_v7 = vld [vmem:[%s22822_s11 + $0x8] sm:$0xff] }
  0x56   : > { %1035 = vmatpush1.bf16.msra.mxu0 %v17953_v19  ;;  %v19346_v19 = vsel %vm1376_vm1, 65535, %v18848_v2  ;;  %vm13382_vm1 = vcmask 0  }
  0x57   : > { %1036 = vmatprep.subr.bf16.mxu0 %v18848_v2 }
  0x58   : > { %10294 = vperm.xlu1 %17886, %v10144_v20  }
  0x59   : > { %10209 = vperm.xlu0 %17885, %v10127_v18   ;;  %v18004_v18 = vld [vmem:[%s22814_s3 + $0x214] ss:$0 sps:$4 sm:$0x11]  }
  0x5a   : > { %1037 = vmatpush1.bf16.msra.mxu0 %v17954_v22  ;;  %v1820_v20 = vand.u32 %v18004_v18, %v19346_v19 }
  0x5b   : > { %1052 = vmatprep.subr.bf16.mxu0 %v18848_v2 }
  0x5c   : > { %10214 = vperm.xlu1 %17886, %v10128_v23  }
  0x5d   : > { %10279 = vperm.xlu0 %17885, %v10141_v21  }
  0x5e   : > { %1053 = vmatpush2.bf16.msra.mxu0 %v17955_v25 }
  0x5f   : > { %15710 = vmatprep.subr.bf16.mxu0 %v17958_v36 }
  0x60   : > { %10284 = vperm.xlu1 %17886, %v10142_v26  }
  0x61   : > { %10199 = vperm.xlu0 %17885, %v10125_v24   ;;  %1055 = vmatmul.mubr.bf16.vlgmr.msra.gmra.mxu0 %v19079_v59  ;;  %v17973_v59 = vld [vmem:[%s22814_s3 + $0x18] sm:$0xff]  }
  0x62   : > { %13491 = vmatprep.mubr.msk.bf16.mxu0 %vm909_vm0, %v19092_v63  ;;  %15711 = vmatpush3.bf16.msra.mxu0 %v17959_v38  ;;  %v10131_v63 = vld [vmem:[%s22822_s11 + $0x80] sm:$0xff]  ;;  %v17989_v38 = vld [vmem:[%s22814_s3 + $0xb8] sm:$0xff]   ;;  %vm13334_vm0 = vcmask 244736  }
  0x63   : > { %15712 = vmatprep.subr.bf16.mxu0 %v17962_v42  ;;  %15659 = vmatpush3.bf16.msra.mxu1 %v17973_v59 }
  0x64   : > { %10204 = vperm.xlu1 %17886, %v10126_v28   ;;  %15660 = vmatprep.subr.bf16.mxu1 %v17976_v0 }
  0x65   : > { %10269 = vperm.xlu0 %17885, %v10139_v27  }
  0x66   : > { %15713 = vmatpush3.bf16.msra.mxu0 %v17963_v44 }
  0x67   : > { %15714 = vmatprep.subr.bf16.mxu0 %v17966_v48  ;;  %15661 = vmatpush3.bf16.msra.mxu1 %v17977_v1 }
  0x68   : > { %10274 = vperm.xlu1 %17886, %v10140_v30   ;;  %15662 = vmatprep.subr.bf16.mxu1 %v17980_v8  ;;  %v17995_v8 = vld [vmem:[%s22814_s3 + $0xa0] sm:$0xff]  }
  0x69   : > { %10189 = vperm.xlu0 %17885, %v10123_v29   ;;  %1063 = vmatmul.mubr.bf16.gmra.mxu0 %v19111_v4  ;;  %v10118_v4 = vld [vmem:[%s22822_s11 + $0x18] sm:$0xff] }
  0x6a   : > { %15715 = vmatpush3.bf16.msra.mxu0 %v17967_v50 }
  0x6b   : > { %15716 = vmatprep.subr.bf16.mxu0 %v17970_v54  ;;  %15663 = vmatpush3.bf16.msra.mxu1 %v17981_v9  ;;  %v17996_v9 = vld [vmem:[%s22814_s3 + $0xd8] sm:$0xff]  }
  0x6c   : > { %10194 = vperm.xlu1 %17886, %v10124_v32   ;;  %15664 = vmatprep.subr.bf16.mxu1 %v17984_v13 }
  0x6d   : > { %10259 = vperm.xlu0 %17885, %v10137_v31  }
  0x6e   : > { %15717 = vmatpush3.bf16.msra.mxu0 %v17971_v56 }
  0x6f   : > { %15718 = vmatprep.subr.bf16.mxu0 %v17974_v60  ;;  %15665 = vmatpush3.bf16.msra.mxu1 %v17985_v14  ;;  %v18007_v60 = vld [vmem:[%s22814_s3 + $0x310] sm:$0xff]  }
  0x70   : > { %10264 = vperm.xlu1 %17886, %v10138_v37   ;;  %15678 = vmatprep.subr.bf16.mxu1 %v17988_v17  ;;  %v17999_v14 = vld [vmem:[%s22814_s3 + $0x90] sm:$0xff]   ;;  %v18001_v17 = vld [vmem:[%s22814_s3 + $0x88] sm:$0xff]  }
  0x71   : > { %10179 = vperm.xlu0 %17885, %v10121_v33  }
  0x72   : > { %15719 = vmatpush3.bf16.msra.mxu0 %v17975_v62 }
  0x73   : > { %15720 = vmatprep.subr.bf16.mxu0 %v17978_v3  ;;  %v17993_v3 = vld [vmem:[%s22814_s3 + $0xa8] sm:$0xff]  }
  0x74   : > { %10184 = vperm.xlu1 %17886, %v10122_v43   ;;  %v17990_v43 = vld [vmem:[%s22814_s3 + $0xf0] sm:$0xff]  }
  0x75   : > { %10249 = vperm.xlu0 %17885, %v10135_v39  }
  0x76   : > { %15721 = vmatpush3.bf16.msra.mxu0 %v17979_v5 }
  0x77   : > { %15722 = vmatprep.subr.bf16.mxu0 %v17982_v10 }
  0x78   : > { %10254 = vperm.xlu1 %17886, %v10136_v49   ;;  %v18005_v49 = vld [vmem:[%s22814_s3 + $0x20c] sm:$0xff]  }
  0x79   : > { %10169 = vperm.xlu0 %17885, %v10119_v45  }
  0x7a   : > { %15723 = vmatpush3.bf16.msra.mxu0 %v17983_v12  ;;  %v17998_v12 = vld [vmem:[%s22814_s3 + $0xd0] sm:$0xff]  }
  0x7b   : > { %15724 = vmatprep.subr.bf16.mxu0 %v17986_v15  ;;  %v18000_v15 = vld [vmem:[%s22814_s3 + $0xc8] sm:$0xff]  }
  0x7c   : > { %10174 = vperm.xlu1 %17886, %v10120_v55   ;;  %v17992_v55 = vld [vmem:[%s22814_s3 + $0xe8] sm:$0xff]  }
  0x7d   : > { %10239 = vperm.xlu0 %17885, %v10133_v51  }
  0x7e   : > { %15725 = vmatpush3.bf16.msra.mxu0 %v17987_v16  ;;  %v18006_v16 = vld [vmem:[%s22814_s3 + $0x108] ss:$0 sps:$4 sm:$0x11]  }
  0x7f   : > { %17298 = vmatprep.subr.bf16.mxu0 %v1820_v20 }
  0x80   : > { %10244 = vperm.xlu1 %17886, %v10134_v61  }
  0x81   : > { %10159 = vperm.xlu0 %17885, %v10117_v57  }
  0x84   : > { %10164 = vperm.xlu1 %17886, %v10118_v4   ;;  %v17994_v4 = vld [vmem:[%s22814_s3 + $0xe0] sm:$0xff]  }
  0x85   : > { %10229 = vperm.xlu0 %17885, %v10131_v63  }
  0x88   : > { %10234 = vperm.xlu1 %17886, %v10132_v11   ;;  %v17997_v11 = vld [vmem:[%s22814_s3 + $0x98] sm:$0xff]  }
  0x89   : > { %10149 = vperm.xlu0 %17885, %v10115_v6  }
  0x8c   : > { %10154 = vperm.xlu1 %17886, %v10116_v7  }
  0x90   : > { %v19349_v21 = vpop.permute.xlu0 %639  ;;  %v19355_v28 = vpop.permute.xlu1 %649 }
  0x94   : > { %v19353_v26 = vpop.permute.xlu0 %644  ;;  %v19373_v46 = vpop.permute.xlu1 %654 }
  0xfd   : > { %v950_v22 = vpop.f32.mrf.mxu0 }
  0xfe   : > { %v19351_v23 = vpop.f32.mrf.mxu1  ;;  %v951_v30 = vadd.f32 %v950_v22, %v19349_v21  ;;  %v18002_v22 = vld [vmem:[%s22814_s3 + $0xc0] sm:$0xff]  }
  0xff   : > { %v952_v24 = vpop.f32.mrf.mxu0 }
 0x100   : > { %v1005_v25 = vpop.f32.mrf.mxu1  ;;  %v953_v29 = vadd.f32 %v952_v24, %v19349_v21  ;;  %v1071_v39 = vmax.f32 %v951_v30, 0.0  ;;  %v18003_v30 = vld [vmem:[%s22814_s3 + $0x80] sm:$0xff]  }
 0x101   : > { %v954_v27 = vpop.f32.mrf.mxu0  ;;  %v1006_v56 = vadd.f32 %v1005_v25, %v19349_v21 }
 0x102   : > { %v955_v2 = vadd.f32 %v954_v27, %v19353_v26  ;;  %v19360_v31 = vpop.f32.mrf.mxu1  ;;  %v1072_v36 = vmax.f32 %v953_v29, 0.0  ;;  %v1004_v27 = vadd.f32 %v19351_v23, %v19349_v21 }
 0x103   : > { %v956_v32 = vpop.f32.mrf.mxu0  ;;  %v1074_v0 = vmax.f32 %v1006_v56, 0.0  ;;  %v1008_v18 = vadd.f32 %v19360_v31, %v19353_v26 }
 0x104   : > { %v957_v33 = vadd.f32 %v956_v32, %v19353_v26  ;;  %v1076_v34 = vmax.f32 %v955_v2, 0.0  ;;  %v1009_v40 = vpop.f32.mrf.mxu1 }
 0x105   : > { %v960_v35 = vpop.f32.mrf.mxu0  ;;  %v1010_v50 = vadd.f32 %v1009_v40, %v19353_v26  ;;  %v1078_v31 = vmax.f32 %v1008_v18, 0.0  ;;  %v18030_v18 = vld [vmem:[%s22814_s3 + $0x2e0] sm:$0xff]  }
 0x106   : > { %v1077_v37 = vmax.f32 %v957_v33, 0.0  ;;  %v961_v41 = vadd.f32 %v960_v35, %v19355_v28  ;;  %v19375_v47 = vpack.c.bf16 %v1076_v34, %v1071_v39  ;;  %v1013_v6 = vpop.f32.mrf.mxu1  ;;  %v1380_v33 = vand.u32 %v18006_v16, %v19346_v19  ;;  %v18028_v16 = vld [vmem:[%s22814_s3 + $0x1e4] sm:$0xff]  }
 0x107   : > { %v962_v42 = vpop.f32.mrf.mxu0  ;;  %v1079_v61 = vmax.f32 %v1010_v50, 0.0  ;;  %v1014_v40 = vadd.f32 %v1013_v6, %v19355_v28  ;;  %v18017_v6 = vld [vmem:[%s22814_s3 + $0x1bc] sm:$0xff]  }
 0x108   : > { %v19370_v44 = vpack.c.bf16 %v1077_v37, %v1072_v36  ;;  %v963_v45 = vadd.f32 %v962_v42, %v19355_v28  ;;  %v1081_v53 = vmax.f32 %v961_v41, 0.0  ;;  %v1015_v10 = vpop.f32.mrf.mxu1  ;;  %v1073_v37 = vmax.f32 %v1004_v27, 0.0  ;;  %v18035_v27 = vld [vmem:[%s22814_s3 + $0x298] sm:$0xff]  }
 0x109   : > { %v964_v48 = vpop.f32.mrf.mxu0  ;;  %v19407_v5 = vpack.c.bf16 %v1079_v61, %v1074_v0  ;;  %v1016_v24 = vadd.f32 %v1015_v10, %v19355_v28  ;;  %v1083_v50 = vmax.f32 %v1014_v40, 0.0  ;;  %v18014_v61 = vld [vmem:[%s22814_s3 + $0x300] sm:$0xff]   ;;  %v18022_v10 = vld [vmem:[%s22814_s3 + $0x2f0] sm:$0xff]  }
 0x10a   : > { %v965_v51 = vadd.f32 %v964_v48, %v19373_v46  ;;  %1414 = vmatprep.mubr.bf16.mxu1 %v19370_v44  ;;  %1854 = vmatprep.mubr.bf16.mxu0 %v19370_v44  ;;  %v1082_v57 = vmax.f32 %v963_v45, 0.0  ;;  %v1017_v13 = vpop.f32.mrf.mxu1  ;;  %v18015_v0 = vld [vmem:[%s22814_s3 + $0x2c0] sm:$0xff]  }
 0x10b   : > { %v966_v54 = vpop.f32.mrf.mxu0  ;;  %1415 = vmatmul.mubr.bf16.vlgmr.msra.gmra.mxu1 %v19375_v47  ;;  %1855 = vmatmul.mubr.bf16.vlgmr.msra.gmra.mxu0 %v19375_v47  ;;  %v1084_v34 = vmax.f32 %v1016_v24, 0.0  ;;  %v1018_v41 = vadd.f32 %v1017_v13, %v19373_v46  ;;  %v18024_v13 = vld [vmem:[%s22814_s3 + $0x1ec] sm:$0xff]   ;;  %v18034_v24 = vld [vmem:[%s22814_s3 + $0x2d8] sm:$0xff]   ;;  %v18050_v40 = vld [vmem:[%s22814_s3 + $0x384] sm:$0xff]  }
 0x10c   : > { %v1086_v58 = vmax.f32 %v965_v51, 0.0  ;;  %v967_v59 = vadd.f32 %v966_v54, %v19373_v46  ;;  %15679 = vmatpush3.bf16.msra.mxu1 %v17989_v38  ;;  %17299 = vmatpush3.bf16.msra.mxu0 %v1820_v20  ;;  %v1019_v7 = vpop.f32.mrf.mxu1  ;;  %v18012_v54 = vld [vmem:[%s22814_s3 + $0x204] sm:$0xff]  }
 0x10d   : > { %15680 = vmatprep.subr.bf16.mxu1 %v17990_v43  ;;  %17300 = vmatprep.subr.bf16.mxu0 %v18005_v49  ;;  %v1020_v25 = vadd.f32 %v1019_v7, %v19373_v46  ;;  %v1088_v51 = vmax.f32 %v1018_v41, 0.0  ;;  %v18027_v7 = vld [vmem:[%s22814_s3 + $0x2a8] sm:$0xff]  }
 0x10e   : > { %v1087_v62 = vmax.f32 %v967_v59, 0.0  ;;  %v19397_v63 = vpack.c.bf16 %v1086_v58, %v1081_v53  ;;  %v18008_v58 = vld [vmem:[%s22814_s3 + $0x2d0] sm:$0xff]   ;;  %v18049_v41 = vld [vmem:[%s22814_s3 + $0x248] sm:$0xff]  }
 0x10f   : > { %v1089_v35 = vmax.f32 %v1020_v25, 0.0  ;;  %v18033_v25 = vld [vmem:[%s22814_s3 + $0x19c] sm:$0xff]  }
 0x110   : > { %v19399_v1 = vpack.c.bf16 %v1087_v62, %v1082_v57  ;;  %15681 = vmatpush3.bf16.msra.mxu1 %v17991_v52  ;;  %17301 = vmatpush3.bf16.msra.mxu0 %v18005_v49  ;;  %v18013_v62 = vld [vmem:[%s22814_s3 + $0x1c4] sm:$0xff]  }
 0x111   : > { %15682 = vmatprep.subr.bf16.mxu1 %v17992_v55  ;;  %15798 = vmatprep.subr.bf16.mxu0 %v18007_v60  ;;  %v19457_v43 = vpack.c.bf16 %v1089_v35, %v1084_v34  ;;  %v18011_v60 = vld [vmem:[%s22814_s3 + $0x2c8] sm:$0xff]   ;;  %v18042_v34 = vld [vmem:[%s22814_s3 + $0x394] sm:$0xff]  }
 0x112   : > { %1422 = vmatprep.mubr.bf16.mxu1 %v19399_v1  ;;  %1862 = vmatprep.mubr.bf16.mxu0 %v19399_v1  ;;  %v18043_v35 = vld [vmem:[%s22814_s3 + $0x354] sm:$0xff]  }
 0x113   : > { %1423 = vmatmul.mubr.bf16.gmra.mxu1 %v19397_v63  ;;  %1863 = vmatmul.mubr.bf16.gmra.mxu0 %v19397_v63 }
 0x114   : > { %15683 = vmatpush3.bf16.msra.mxu1 %v17993_v3  ;;  %1463 = vmatprep.mubr.bf16.mxu1 %v19407_v5  ;;  %v18016_v3 = vld [vmem:[%s22814_s3 + $0x1fc] sm:$0xff]  }
 0x115   : > { %15684 = vmatprep.subr.bf16.mxu1 %v17994_v4  ;;  %v18018_v4 = vld [vmem:[%s22814_s3 + $0x2f8] sm:$0xff]  }
 0x118   : > { %15685 = vmatpush3.bf16.msra.mxu1 %v17995_v8  ;;  %v18019_v8 = vld [vmem:[%s22814_s3 + $0x2b8] sm:$0xff]  }
 0x119   : > { %15686 = vmatprep.subr.bf16.mxu1 %v17996_v9  ;;  %v18020_v9 = vld [vmem:[%s22814_s3 + $0x1f4] sm:$0xff]  }
 0x11c   : > { %15687 = vmatpush3.bf16.msra.mxu1 %v17997_v11  ;;  %v18021_v11 = vld [vmem:[%s22814_s3 + $0x1b4] sm:$0xff]  }
 0x11d   : > { %15688 = vmatprep.subr.bf16.mxu1 %v17998_v12  ;;  %v18023_v12 = vld [vmem:[%s22814_s3 + $0x2b0] sm:$0xff]  }
 0x120   : > { %15689 = vmatpush3.bf16.msra.mxu1 %v17999_v14  ;;  %v18025_v14 = vld [vmem:[%s22814_s3 + $0x1ac] sm:$0xff]  }
 0x121   : > { %v1056_v20 = vpop.f32.mrf.mxu0  ;;  %15690 = vmatprep.subr.bf16.mxu1 %v18000_v15  ;;  %v18026_v15 = vld [vmem:[%s22814_s3 + $0x2e8] sm:$0xff]  }
 0x122   : > { %v1057_v2 = vadd.f32 %v1056_v20, %v19349_v21  ;;  %v19453_v21 = vpack.c.bf16 %v1078_v31, %v1073_v37  ;;  %v18031_v20 = vld [vmem:[%s22814_s3 + $0x2a0] sm:$0xff]   ;;  %v18046_v37 = vld [vmem:[%s22814_s3 + $0x38c] sm:$0xff]  }
 0x123   : > { %v1058_v29 = vpop.f32.mrf.mxu0  ;;  %v18039_v31 = vld [vmem:[%s22814_s3 + $0x35c] sm:$0xff]  }
 0x124   : > { %15691 = vmatpush3.bf16.msra.mxu1 %v18001_v17  ;;  %v1075_v23 = vmax.f32 %v1057_v2, 0.0  ;;  %v18029_v17 = vld [vmem:[%s22814_s3 + $0x1a4] sm:$0xff]   ;;  %v18036_v29 = vld [vmem:[%s22814_s3 + $0x1d4] sm:$0xff]  }
 0x125   : > { %v1059_v32 = vpop.f32.mrf.mxu0  ;;  %15692 = vmatprep.subr.bf16.mxu1 %v18002_v22  ;;  %v18032_v22 = vld [vmem:[%s22814_s3 + $0x1dc] sm:$0xff]   ;;  %v18037_v2 = vld [vmem:[%s22814_s3 + $0x194] sm:$0xff]  }
 0x126   : > { %v1060_v36 = vadd.f32 %v1059_v32, %v19353_v26  ;;  %v18009_v26 = vld [vmem:[%s22814_s3 + $0x100] sm:$0xff]   ;;  %v18040_v32 = vld [vmem:[%s22814_s3 + $0x1cc] sm:$0xff]  }
 0x127   : > { %v1061_v38 = vpop.f32.mrf.mxu0 }
 0x128   : > { %v1080_v39 = vmax.f32 %v1060_v36, 0.0  ;;  %15693 = vmatpush3.bf16.msra.mxu1 %v18003_v30  ;;  %v18038_v30 = vld [vmem:[%s22814_s3 + $0x39c] sm:$0xff]   ;;  %v18044_v36 = vld [vmem:[%s22814_s3 + $0x290] sm:$0xff]  }
 0x129   : > { %v1064_v42 = vpop.f32.mrf.mxu0  ;;  %17290 = vmatprep.subr.bf16.mxu1 %v1380_v33  ;;  %v18045_v38 = vld [vmem:[%s22814_s3 + $0x250] sm:$0xff]  }
 0x12a   : > { %v19459_v45 = vpack.c.bf16 %v1080_v39, %v1075_v23  ;;  %v1065_v49 = vadd.f32 %v1064_v42, %v19355_v28  ;;  %v19473_v28 = vpack.c.bf16 %v1088_v51, %v1083_v50  ;;  %v18048_v23 = vld [vmem:[%s22814_s3 + $0x288] sm:$0xff]   ;;  %v18052_v42 = vld [vmem:[%s22814_s3 + $0x280] sm:$0xff]   ;;  %v18056_v50 = vld [vmem:[%s22814_s3 + $0x278] sm:$0xff]  }
 0x12b   : > { %1464 = vmatmul.mubr.bf16.vlgmr.msra.gmra.mxu1 %v19453_v21  ;;  %v1066_v48 = vpop.f32.mrf.mxu0  ;;  %v18047_v39 = vld [vmem:[%s22814_s3 + $0x34c] sm:$0xff]   ;;  %v18055_v51 = vld [vmem:[%s22814_s3 + $0x33c] sm:$0xff]  }
 0x12c   : > { %1471 = vmatprep.mubr.bf16.mxu1 %v19457_v43  ;;  %17302 = vmatprep.mubr.msk.bf16.mxu0 %vm1369_vm2, %v19459_v45  ;;  %v1085_v56 = vmax.f32 %v1065_v49, 0.0  ;;  %v18054_v48 = vld [vmem:[%s22814_s3 + $0x37c] sm:$0xff]  }
 0x12d   : > { %v1067_v52 = vpop.f32.mrf.mxu0  ;;  %17291 = vmatpush3.bf16.msra.mxu1 %v1380_v33  ;;  %v18041_v33 = vld [vmem:[%s22814_s3 + $0x18c] sm:$0xff]   ;;  %v18053_v49 = vld [vmem:[%s22814_s3 + $0x240] sm:$0xff]  }
 0x12e   : > { %v1068_v53 = vadd.f32 %v1067_v52, %v19373_v46  ;;  %17292 = vmatprep.subr.bf16.mxu1 %v18009_v26  ;;  %v18010_v46 = vld [vmem:[%s22814_s3 + $0x308] sm:$0xff]   ;;  %v18058_v52 = vld [vmem:[%s22814_s3 + $0x374] sm:$0xff]  }
 0x12f   : > { %v1069_v55 = vpop.f32.mrf.mxu0 }
 0x130   : > { %v1090_v57 = vmax.f32 %v1068_v53, 0.0  ;;  %v18057_v53 = vld [vmem:[%s22814_s3 + $0x238] sm:$0xff]  }
 0x131   : > { %17293 = vmatpush3.bf16.msra.mxu1 %v18009_v26  ;;  %v18051_v26 = vld [vmem:[%s22814_s3 + $0x344] sm:$0xff]   ;;  %v18059_v55 = vld [vmem:[%s22814_s3 + $0x334] sm:$0xff]  }
 0x132   : > { %v19478_v59 = vpack.c.bf16 %v1090_v57, %v1085_v56  ;;  %15738 = vmatprep.subr.bf16.mxu1 %v18012_v54  ;;  %v18060_v54 = vld [vmem:[%s22814_s3 + $0x270] sm:$0xff]  }
 0x133   : > { %1472 = vmatmul.mubr.bf16.gmra.mxu1 %v19473_v28  ;;  %v18062_v56 = vld [vmem:[%s22814_s3 + $0x36c] sm:$0xff]  }
 0x134   : > { %17294 = vmatprep.mubr.msk.bf16.mxu1 %vm1369_vm2, %v19459_v45  ;;  %17303 = vmatmul.mubr.msk.bf16.vlgmr.msra.gmra.mxu0 %vm1369_vm2, %v19478_v59  ;;  %v18061_v57 = vld [vmem:[%s22814_s3 + $0x230] sm:$0xff]  }
 0x135   : > { %15799 = vmatpush3.bf16.msra.mxu0 %v18008_v58  ;;  %2342 = vmatprep.mubr.bf16.mxu0 %v19407_v5  ;;  %v18064_v58 = vld [vmem:[%s22814_s3 + $0x268] sm:$0xff]  }
 0x136   : > { %15800 = vmatprep.subr.bf16.mxu0 %v18010_v46  ;;  %v18072_v46 = vld [vmem:[%s22814_s3 + $0x42c] ss:$0 sps:$4 sm:$0x11]  }
 0x139   : > { %15801 = vmatpush3.bf16.msra.mxu0 %v18011_v60  ;;  %v18063_v60 = vld [vmem:[%s22814_s3 + $0x32c] sm:$0xff]  }
 0x13a   : > { %15802 = vmatprep.subr.bf16.mxu0 %v18014_v61  ;;  %v18066_v61 = vld [vmem:[%s22814_s3 + $0x364] sm:$0xff]  }
 0x13b   : > { %17295 = vmatmul.mubr.msk.bf16.vlgmr.msra.gmra.mxu1 %vm1369_vm2, %v19478_v59 }
 0x13c   : > { %15739 = vmatpush3.bf16.msra.mxu1 %v18013_v62  ;;  %1903 = vmatprep.mubr.bf16.mxu1 %v19407_v5  ;;  %v18065_v62 = vld [vmem:[%s22814_s3 + $0x228] sm:$0xff]  }
 0x13d   : > { %15803 = vmatpush3.bf16.msra.mxu0 %v18015_v0  ;;  %15740 = vmatprep.subr.bf16.mxu1 %v18016_v3  ;;  %v18068_v0 = vld [vmem:[%s22814_s3 + $0x260] sm:$0xff]  }
 0x13e   : > { %15804 = vmatprep.subr.bf16.mxu0 %v18018_v4  ;;  %v18067_v3 = vld [vmem:[%s22814_s3 + $0x324] sm:$0xff]   ;;  %v2698_v4 = vand.u32 %v18072_v46, %v19346_v19 }
 0x13f   : > { %v18116_v46 = vld [vmem:[%s22814_s3 + $0x4a0] sm:$0xff]  }
 0x140   : > { %15741 = vmatpush3.bf16.msra.mxu1 %v18017_v6  ;;  %v18074_v6 = vld [vmem:[%s22814_s3 + $0x320] ss:$0 sps:$4 sm:$0x11]  }
 0x141   : > { %15805 = vmatpush3.bf16.msra.mxu0 %v18019_v8  ;;  %15742 = vmatprep.subr.bf16.mxu1 %v18020_v9  ;;  %v18069_v8 = vld [vmem:[%s22814_s3 + $0x220] sm:$0xff]   ;;  %v18070_v9 = vld [vmem:[%s22814_s3 + $0x258] sm:$0xff]  }
 0x142   : > { %15806 = vmatprep.subr.bf16.mxu0 %v18022_v10  ;;  %v18073_v10 = vld [vmem:[%s22814_s3 + $0x424] sm:$0xff]  }
 0x144   : > { %15743 = vmatpush3.bf16.msra.mxu1 %v18021_v11  ;;  %v18071_v11 = vld [vmem:[%s22814_s3 + $0x218] sm:$0xff]  }
 0x145   : > { %15807 = vmatpush3.bf16.msra.mxu0 %v18023_v12  ;;  %15744 = vmatprep.subr.bf16.mxu1 %v18024_v13  ;;  %v2259_v12 = vand.u32 %v18074_v6, %v19346_v19  ;;  %v18075_v13 = vld [vmem:[%s22814_s3 + $0x528] sm:$0xff]   ;;  %v18121_v6 = vld [vmem:[%s22814_s3 + $0x458] sm:$0xff]  }
 0x146   : > { %15808 = vmatprep.subr.bf16.mxu0 %v18026_v15  ;;  %v18080_v15 = vld [vmem:[%s22814_s3 + $0x41c] sm:$0xff]  }
 0x148   : > { %15745 = vmatpush3.bf16.msra.mxu1 %v18025_v14  ;;  %v18077_v14 = vld [vmem:[%s22814_s3 + $0x318] sm:$0xff]  }
 0x149   : > { %15809 = vmatpush3.bf16.msra.mxu0 %v18027_v7  ;;  %15746 = vmatprep.subr.bf16.mxu1 %v18028_v16  ;;  %v18076_v7 = vld [vmem:[%s22814_s3 + $0x4e8] sm:$0xff]   ;;  %v18078_v16 = vld [vmem:[%s22814_s3 + $0x520] sm:$0xff]  }
 0x14a   : > { %15810 = vmatprep.subr.bf16.mxu0 %v18030_v18  ;;  %v18081_v18 = vld [vmem:[%s22814_s3 + $0x3dc] sm:$0xff]  }
 0x14c   : > { %15747 = vmatpush3.bf16.msra.mxu1 %v18029_v17  ;;  %v18079_v17 = vld [vmem:[%s22814_s3 + $0x4e0] sm:$0xff]  }
 0x14d   : > { %15811 = vmatpush3.bf16.msra.mxu0 %v18031_v20  ;;  %15748 = vmatprep.subr.bf16.mxu1 %v18032_v22  ;;  %v18082_v20 = vld [vmem:[%s22814_s3 + $0x518] sm:$0xff]  }
 0x14e   : > { %15812 = vmatprep.subr.bf16.mxu0 %v18034_v24  ;;  %v18083_v22 = vld [vmem:[%s22814_s3 + $0x4d8] sm:$0xff]  }
 0x14f   : > { %v18084_v24 = vld [vmem:[%s22814_s3 + $0x414] sm:$0xff]  }
 0x150   : > { %15749 = vmatpush3.bf16.msra.mxu1 %v18033_v25  ;;  %v18085_v25 = vld [vmem:[%s22814_s3 + $0x3d4] sm:$0xff]  }
 0x151   : > { %15813 = vmatpush3.bf16.msra.mxu0 %v18035_v27  ;;  %15750 = vmatprep.subr.bf16.mxu1 %v18036_v29  ;;  %v18086_v27 = vld [vmem:[%s22814_s3 + $0x510] sm:$0xff]  }
 0x152   : > { %15830 = vmatprep.subr.bf16.mxu0 %v18038_v30  ;;  %v18087_v29 = vld [vmem:[%s22814_s3 + $0x4d0] sm:$0xff]  }
 0x153   : > { %v18089_v30 = vld [vmem:[%s22814_s3 + $0x3cc] sm:$0xff]  }
 0x154   : > { %15751 = vmatpush3.bf16.msra.mxu1 %v18037_v2  ;;  %2343 = vmatmul.mubr.bf16.vlgmr.msra.gmra.mxu0 %v19453_v21  ;;  %v18088_v2 = vld [vmem:[%s22814_s3 + $0x40c] sm:$0xff]  }
 0x155   : > { %2350 = vmatprep.mubr.bf16.mxu0 %v19457_v43  ;;  %15831 = vmatpush3.bf16.msra.mxu0 %v18039_v31  ;;  %v18090_v31 = vld [vmem:[%s22814_s3 + $0x508] sm:$0xff]  }
 0x156   : > { %15752 = vmatprep.subr.bf16.mxu1 %v18040_v32  ;;  %15832 = vmatprep.subr.bf16.mxu0 %v18042_v34  ;;  %v18091_v32 = vld [vmem:[%s22814_s3 + $0x4c8] sm:$0xff]  }
 0x157   : > { %v18093_v34 = vld [vmem:[%s22814_s3 + $0x3c4] sm:$0xff]  }
 0x158   : > { %15753 = vmatpush3.bf16.msra.mxu1 %v18041_v33  ;;  %v18092_v33 = vld [vmem:[%s22814_s3 + $0x404] sm:$0xff]  }
 0x159   : > { %15833 = vmatpush3.bf16.msra.mxu0 %v18043_v35  ;;  %15770 = vmatprep.subr.bf16.mxu1 %v18044_v36  ;;  %v18094_v35 = vld [vmem:[%s22814_s3 + $0x500] sm:$0xff]  }
 0x15a   : > { %15834 = vmatprep.subr.bf16.mxu0 %v18046_v37  ;;  %v18095_v36 = vld [vmem:[%s22814_s3 + $0x4c0] sm:$0xff]  }
 0x15b   : > { %1904 = vmatmul.mubr.bf16.vlgmr.msra.gmra.mxu1 %v19453_v21  ;;  %v18096_v37 = vld [vmem:[%s22814_s3 + $0x3fc] sm:$0xff]  }
 0x15c   : > { %1911 = vmatprep.mubr.bf16.mxu1 %v19457_v43  ;;  %15771 = vmatpush3.bf16.msra.mxu1 %v18045_v38  ;;  %v18097_v38 = vld [vmem:[%s22814_s3 + $0x3bc] sm:$0xff]  }
 0x15d   : > { %2351 = vmatmul.mubr.bf16.gmra.mxu0 %v19473_v28  ;;  %15772 = vmatprep.subr.bf16.mxu1 %v18048_v23  ;;  %v18098_v23 = vld [vmem:[%s22814_s3 + $0x4f8] sm:$0xff]  }
 0x15e   : > { %15835 = vmatpush3.bf16.msra.mxu0 %v18047_v39  ;;  %2732 = vmatprep.mubr.bf16.mxu0 %v19370_v44  ;;  %v18099_v39 = vld [vmem:[%s22814_s3 + $0x4b8] sm:$0xff]  }
 0x15f   : > { %15836 = vmatprep.subr.bf16.mxu0 %v18050_v40  ;;  %v18100_v40 = vld [vmem:[%s22814_s3 + $0x3f4] sm:$0xff]  }
 0x160   : > { %15773 = vmatpush3.bf16.msra.mxu1 %v18049_v41  ;;  %v18102_v41 = vld [vmem:[%s22814_s3 + $0x4f0] sm:$0xff]  }
 0x161   : > { %15774 = vmatprep.subr.bf16.mxu1 %v18052_v42  ;;  %v18101_v42 = vld [vmem:[%s22814_s3 + $0x3b4] sm:$0xff]  }
 0x162   : > { %15837 = vmatpush3.bf16.msra.mxu0 %v18051_v26  ;;  %v18104_v26 = vld [vmem:[%s22814_s3 + $0x3ec] sm:$0xff]  }
 0x163   : > { %1912 = vmatmul.mubr.bf16.gmra.mxu1 %v19473_v28  ;;  %15838 = vmatprep.subr.bf16.mxu0 %v18054_v48  ;;  %v18103_v48 = vld [vmem:[%s22814_s3 + $0x4b0] sm:$0xff]  }
 0x164   : > { %15775 = vmatpush3.bf16.msra.mxu1 %v18053_v49  ;;  %2293 = vmatprep.mubr.bf16.mxu1 %v19370_v44  ;;  %v18105_v49 = vld [vmem:[%s22814_s3 + $0x3ac] sm:$0xff]  }
 0x165   : > { %15776 = vmatprep.subr.bf16.mxu1 %v18056_v50  ;;  %v18106_v50 = vld [vmem:[%s22814_s3 + $0x5b4] sm:$0xff]  }
 0x166   : > { %15839 = vmatpush3.bf16.msra.mxu0 %v18055_v51  ;;  %v18108_v51 = vld [vmem:[%s22814_s3 + $0x3e4] sm:$0xff]  }
 0x167   : > { %15840 = vmatprep.subr.bf16.mxu0 %v18058_v52  ;;  %v18107_v52 = vld [vmem:[%s22814_s3 + $0x574] sm:$0xff]  }
 0x168   : > { %15777 = vmatpush3.bf16.msra.mxu1 %v18057_v53  ;;  %v18109_v53 = vld [vmem:[%s22814_s3 + $0x3a4] sm:$0xff]  }
 0x169   : > { %15778 = vmatprep.subr.bf16.mxu1 %v18060_v54  ;;  %v18110_v54 = vld [vmem:[%s22814_s3 + $0x5ac] sm:$0xff]  }
 0x16a   : > { %15841 = vmatpush3.bf16.msra.mxu0 %v18059_v55  ;;  %v18111_v55 = vld [vmem:[%s22814_s3 + $0x56c] sm:$0xff]  }
 0x16b   : > { %15842 = vmatprep.subr.bf16.mxu0 %v18062_v56  ;;  %v18112_v56 = vld [vmem:[%s22814_s3 + $0x4a8] sm:$0xff]  }
 0x16c   : > { %15779 = vmatpush3.bf16.msra.mxu1 %v18061_v57  ;;  %v18114_v57 = vld [vmem:[%s22814_s3 + $0x5a4] sm:$0xff]  }
 0x16d   : > { %15780 = vmatprep.subr.bf16.mxu1 %v18064_v58  ;;  %v18113_v58 = vld [vmem:[%s22814_s3 + $0x468] sm:$0xff]  }
 0x16e   : > { %15843 = vmatpush3.bf16.msra.mxu0 %v18063_v60  ;;  %v18115_v60 = vld [vmem:[%s22814_s3 + $0x564] sm:$0xff]  }
 0x16f   : > { %15844 = vmatprep.subr.bf16.mxu0 %v18066_v61  ;;  %v18118_v61 = vld [vmem:[%s22814_s3 + $0x59c] sm:$0xff]  }
 0x170   : > { %15781 = vmatpush3.bf16.msra.mxu1 %v18065_v62  ;;  %v18117_v62 = vld [vmem:[%s22814_s3 + $0x460] sm:$0xff]  }
 0x171   : > { %15782 = vmatprep.subr.bf16.mxu1 %v18068_v0  ;;  %v18120_v0 = vld [vmem:[%s22814_s3 + $0x498] sm:$0xff]  }
 0x172   : > { %15845 = vmatpush3.bf16.msra.mxu0 %v18067_v3  ;;  %v18119_v3 = vld [vmem:[%s22814_s3 + $0x55c] sm:$0xff]  }
 0x173   : > { %17314 = vmatprep.subr.bf16.mxu0 %v2698_v4 }
 0x174   : > { %15783 = vmatpush3.bf16.msra.mxu1 %v18069_v8  ;;  %v18124_v8 = vld [vmem:[%s22814_s3 + $0x490] sm:$0xff]  }
 0x175   : > { %2733 = vmatmul.mubr.bf16.vlgmr.msra.gmra.mxu0 %v19375_v47  ;;  %15784 = vmatprep.subr.bf16.mxu1 %v18070_v9  ;;  %v18123_v9 = vld [vmem:[%s22814_s3 + $0x554] sm:$0xff]  }
 0x176   : > { %2740 = vmatprep.mubr.bf16.mxu0 %v19399_v1  ;;  %17315 = vmatpush3.bf16.msra.mxu0 %v2698_v4  ;;  %v18122_v4 = vld [vmem:[%s22814_s3 + $0x594] sm:$0xff]  }
 0x177   : > { %17316 = vmatprep.subr.bf16.mxu0 %v18073_v10 }
 0x178   : > { %15785 = vmatpush3.bf16.msra.mxu1 %v18071_v11  ;;  %v18125_v11 = vld [vmem:[%s22814_s3 + $0x450] sm:$0xff]  }
 0x179   : > { %17306 = vmatprep.subr.bf16.mxu1 %v2259_v12 }
 0x17a   : > { %17317 = vmatpush3.bf16.msra.mxu0 %v18073_v10  ;;  %v18126_v10 = vld [vmem:[%s22814_s3 + $0x58c] sm:$0xff]  }
 0x17b   : > { %2294 = vmatmul.mubr.bf16.vlgmr.msra.gmra.mxu1 %v19375_v47  ;;  %15918 = vmatprep.subr.bf16.mxu0 %v18075_v13  ;;  %v18127_v13 = vld [vmem:[%s22814_s3 + $0x54c] sm:$0xff]  }
 0x17c   : > { %2301 = vmatprep.mubr.bf16.mxu1 %v19399_v1  ;;  %17307 = vmatpush3.bf16.msra.mxu1 %v2259_v12  ;;  %v18128_v12 = vld [vmem:[%s22814_s3 + $0x488] sm:$0xff]  }
 0x17d   : > { %2741 = vmatmul.mubr.bf16.gmra.mxu0 %v19397_v63  ;;  %17308 = vmatprep.subr.bf16.mxu1 %v18077_v14 }
 0x17e   : > { %17318 = vmatprep.mubr.msk.bf16.mxu0 %vm1369_vm2, %v19459_v45 }
 0x180   : > { %17309 = vmatpush3.bf16.msra.mxu1 %v18077_v14  ;;  %v18130_v14 = vld [vmem:[%s22814_s3 + $0x584] sm:$0xff]  }
 0x181   : > { %15858 = vmatprep.subr.bf16.mxu1 %v18080_v15  ;;  %v18129_v15 = vld [vmem:[%s22814_s3 + $0x448] sm:$0xff]  }
 0x183   : > { %2302 = vmatmul.mubr.bf16.gmra.mxu1 %v19397_v63 }
 0x184   : > { %17310 = vmatprep.mubr.msk.bf16.mxu1 %vm1369_vm2, %v19459_v45 }
 0x185   : > { %17319 = vmatmul.mubr.msk.bf16.vlgmr.msra.gmra.mxu0 %vm1369_vm2, %v19478_v59 }
 0x186   : > { %15919 = vmatpush3.bf16.msra.mxu0 %v18076_v7  ;;  %3220 = vmatprep.mubr.bf16.mxu0 %v19407_v5  ;;  %v18132_v7 = vld [vmem:[%s22814_s3 + $0x480] sm:$0xff]  }
 0x187   : > { %15920 = vmatprep.subr.bf16.mxu0 %v18078_v16  ;;  %v18140_v16 = vld [vmem:[%s22814_s3 + $0x644] ss:$0 sps:$4 sm:$0x11]  }
 0x18a   : > { %15921 = vmatpush3.bf16.msra.mxu0 %v18079_v17  ;;  %v18131_v17 = vld [vmem:[%s22814_s3 + $0x544] sm:$0xff]  }
 0x18b   : > { %17311 = vmatmul.mubr.msk.bf16.vlgmr.msra.gmra.mxu1 %vm1369_vm2, %v19478_v59  ;;  %15922 = vmatprep.subr.bf16.mxu0 %v18082_v20  ;;  %v18133_v20 = vld [vmem:[%s22814_s3 + $0x440] sm:$0xff]  }
 0x18c   : > { %15859 = vmatpush3.bf16.msra.mxu1 %v18081_v18  ;;  %2781 = vmatprep.mubr.bf16.mxu1 %v19407_v5  ;;  %v18134_v18 = vld [vmem:[%s22814_s3 + $0x57c] sm:$0xff]  }
 0x18d   : > { %15860 = vmatprep.subr.bf16.mxu1 %v18084_v24  ;;  %v18135_v24 = vld [vmem:[%s22814_s3 + $0x53c] sm:$0xff]  }
 0x18e   : > { %15923 = vmatpush3.bf16.msra.mxu0 %v18083_v22  ;;  %v18136_v22 = vld [vmem:[%s22814_s3 + $0x478] sm:$0xff]  }
 0x18f   : > { %15924 = vmatprep.subr.bf16.mxu0 %v18086_v27  ;;  %v3576_v27 = vand.u32 %v18140_v16, %v19346_v19  ;;  %v18174_v16 = vld [vmem:[%s22814_s3 + $0x7cc] sm:$0xff]  }
 0x190   : > { %15861 = vmatpush3.bf16.msra.mxu1 %v18085_v25  ;;  %v18137_v25 = vld [vmem:[%s22814_s3 + $0x438] sm:$0xff]  }
 0x191   : > { %15862 = vmatprep.subr.bf16.mxu1 %v18088_v2  ;;  %v18142_v2 = vld [vmem:[%s22814_s3 + $0x538] ss:$0 sps:$4 sm:$0x11]  }
 0x192   : > { %15925 = vmatpush3.bf16.msra.mxu0 %v18087_v29  ;;  %v18138_v29 = vld [vmem:[%s22814_s3 + $0x470] sm:$0xff]  }
 0x193   : > { %15926 = vmatprep.subr.bf16.mxu0 %v18090_v31  ;;  %v18141_v31 = vld [vmem:[%s22814_s3 + $0x63c] sm:$0xff]  }
 0x194   : > { %15863 = vmatpush3.bf16.msra.mxu1 %v18089_v30  ;;  %v18139_v30 = vld [vmem:[%s22814_s3 + $0x430] sm:$0xff]  }
 0x195   : > { %15864 = vmatprep.subr.bf16.mxu1 %v18092_v33  ;;  %v18143_v33 = vld [vmem:[%s22814_s3 + $0x740] sm:$0xff]  }
 0x196   : > { %15927 = vmatpush3.bf16.msra.mxu0 %v18091_v32  ;;  %v3137_v32 = vand.u32 %v18142_v2, %v19346_v19  ;;  %v18180_v2 = vld [vmem:[%s22814_s3 + $0x6c0] sm:$0xff]  }
 0x197   : > { %15928 = vmatprep.subr.bf16.mxu0 %v18094_v35  ;;  %v18148_v35 = vld [vmem:[%s22814_s3 + $0x634] sm:$0xff]  }
 0x198   : > { %15865 = vmatpush3.bf16.msra.mxu1 %v18093_v34  ;;  %v18145_v34 = vld [vmem:[%s22814_s3 + $0x530] sm:$0xff]  }
 0x199   : > { %15866 = vmatprep.subr.bf16.mxu1 %v18096_v37  ;;  %v18144_v37 = vld [vmem:[%s22814_s3 + $0x700] sm:$0xff]  }
 0x19a   : > { %15929 = vmatpush3.bf16.msra.mxu0 %v18095_v36 }
 0x19b   : > { %15930 = vmatprep.subr.bf16.mxu0 %v18098_v23 }
 0x19c   : > { %15867 = vmatpush3.bf16.msra.mxu1 %v18097_v38  ;;  %v18146_v38 = vld [vmem:[%s22814_s3 + $0x738] sm:$0xff]  }
 0x19d   : > { %15868 = vmatprep.subr.bf16.mxu1 %v18100_v40  ;;  %v18149_v40 = vld [vmem:[%s22814_s3 + $0x5f4] sm:$0xff]  }
 0x19e   : > { %15931 = vmatpush3.bf16.msra.mxu0 %v18099_v39  ;;  %v18147_v39 = vld [vmem:[%s22814_s3 + $0x6f8] sm:$0xff]  }
 0x19f   : > { %15932 = vmatprep.subr.bf16.mxu0 %v18102_v41  ;;  %v18150_v41 = vld [vmem:[%s22814_s3 + $0x730] sm:$0xff]  }
 0x1a0   : > { %15869 = vmatpush3.bf16.msra.mxu1 %v18101_v42 }
 0x1a1   : > { %15870 = vmatprep.subr.bf16.mxu1 %v18104_v26  ;;  %v18151_v26 = vld [vmem:[%s22814_s3 + $0x6f0] sm:$0xff]  }
 0x1a2   : > { %15933 = vmatpush3.bf16.msra.mxu0 %v18103_v48  ;;  %v18152_v48 = vld [vmem:[%s22814_s3 + $0x62c] sm:$0xff]  }
 0x1a3   : > { %15950 = vmatprep.subr.bf16.mxu0 %v18106_v50  ;;  %v18153_v50 = vld [vmem:[%s22814_s3 + $0x5ec] sm:$0xff]  }
 0x1a4   : > { %15871 = vmatpush3.bf16.msra.mxu1 %v18105_v49  ;;  %v18154_v49 = vld [vmem:[%s22814_s3 + $0x728] sm:$0xff]  }
 0x1a5   : > { %3221 = vmatmul.mubr.bf16.vlgmr.msra.gmra.mxu0 %v19453_v21  ;;  %15872 = vmatprep.subr.bf16.mxu1 %v18108_v51 }
 0x1a6   : > { %3228 = vmatprep.mubr.bf16.mxu0 %v19457_v43  ;;  %15951 = vmatpush3.bf16.msra.mxu0 %v18107_v52  ;;  %v18155_v52 = vld [vmem:[%s22814_s3 + $0x6e8] sm:$0xff]  }
 0x1a7   : > { %15952 = vmatprep.subr.bf16.mxu0 %v18110_v54 }
 0x1a8   : > { %15873 = vmatpush3.bf16.msra.mxu1 %v18109_v53  ;;  %v18156_v53 = vld [vmem:[%s22814_s3 + $0x624] sm:$0xff]  }
 0x1a9   : > { %15890 = vmatprep.subr.bf16.mxu1 %v18112_v56  ;;  %v18157_v56 = vld [vmem:[%s22814_s3 + $0x5e4] sm:$0xff]  }
 0x1aa   : > { %15953 = vmatpush3.bf16.msra.mxu0 %v18111_v55  ;;  %v18158_v55 = vld [vmem:[%s22814_s3 + $0x720] sm:$0xff]  }
 0x1ab   : > { %2782 = vmatmul.mubr.bf16.vlgmr.msra.gmra.mxu1 %v19453_v21  ;;  %15954 = vmatprep.subr.bf16.mxu0 %v18114_v57  ;;  %v18159_v57 = vld [vmem:[%s22814_s3 + $0x6e0] sm:$0xff]  }
 0x1ac   : > { %2789 = vmatprep.mubr.bf16.mxu1 %v19457_v43  ;;  %15891 = vmatpush3.bf16.msra.mxu1 %v18113_v58  ;;  %v18160_v58 = vld [vmem:[%s22814_s3 + $0x61c] sm:$0xff]  }
 0x1ad   : > { %3229 = vmatmul.mubr.bf16.gmra.mxu0 %v19473_v28  ;;  %15892 = vmatprep.subr.bf16.mxu1 %v18116_v46 }
 0x1ae   : > { %15955 = vmatpush3.bf16.msra.mxu0 %v18115_v60  ;;  %3610 = vmatprep.mubr.bf16.mxu0 %v19370_v44  ;;  %v18162_v60 = vld [vmem:[%s22814_s3 + $0x718] sm:$0xff]  }
 0x1af   : > { %15956 = vmatprep.subr.bf16.mxu0 %v18118_v61  ;;  %v18161_v61 = vld [vmem:[%s22814_s3 + $0x5dc] sm:$0xff]  }
 0x1b0   : > { %15893 = vmatpush3.bf16.msra.mxu1 %v18117_v62  ;;  %v18163_v62 = vld [vmem:[%s22814_s3 + $0x6d8] sm:$0xff]  }
 0x1b1   : > { %15894 = vmatprep.subr.bf16.mxu1 %v18120_v0 }
 0x1b2   : > { %15957 = vmatpush3.bf16.msra.mxu0 %v18119_v3  ;;  %v18164_v3 = vld [vmem:[%s22814_s3 + $0x614] sm:$0xff]  }
 0x1b3   : > { %2790 = vmatmul.mubr.bf16.gmra.mxu1 %v19473_v28  ;;  %15958 = vmatprep.subr.bf16.mxu0 %v18122_v4  ;;  %v18166_v4 = vld [vmem:[%s22814_s3 + $0x710] sm:$0xff]  }
 0x1b4   : > { %15895 = vmatpush3.bf16.msra.mxu1 %v18121_v6  ;;  %3171 = vmatprep.mubr.bf16.mxu1 %v19370_v44  ;;  %v18165_v6 = vld [vmem:[%s22814_s3 + $0x5d4] sm:$0xff]  }
 0x1b5   : > { %15896 = vmatprep.subr.bf16.mxu1 %v18124_v8  ;;  %v18168_v8 = vld [vmem:[%s22814_s3 + $0x60c] sm:$0xff]  }
 0x1b6   : > { %15959 = vmatpush3.bf16.msra.mxu0 %v18123_v9  ;;  %v18167_v9 = vld [vmem:[%s22814_s3 + $0x6d0] sm:$0xff]  }
 0x1b7   : > { %15960 = vmatprep.subr.bf16.mxu0 %v18126_v10 }
 0x1b8   : > { %15897 = vmatpush3.bf16.msra.mxu1 %v18125_v11  ;;  %v18170_v11 = vld [vmem:[%s22814_s3 + $0x708] sm:$0xff]  }
 0x1b9   : > { %15898 = vmatprep.subr.bf16.mxu1 %v18128_v12  ;;  %v18169_v12 = vld [vmem:[%s22814_s3 + $0x5cc] sm:$0xff]  }
 0x1ba   : > { %15961 = vmatpush3.bf16.msra.mxu0 %v18127_v13 }
 0x1bb   : > { %15962 = vmatprep.subr.bf16.mxu0 %v18130_v14  ;;  %v18172_v14 = vld [vmem:[%s22814_s3 + $0x604] sm:$0xff]  }
 0x1bc   : > { %15899 = vmatpush3.bf16.msra.mxu1 %v18129_v15  ;;  %v18171_v15 = vld [vmem:[%s22814_s3 + $0x6c8] sm:$0xff]  }
 0x1bd   : > { %15900 = vmatprep.subr.bf16.mxu1 %v18132_v7 }
 0x1be   : > { %15963 = vmatpush3.bf16.msra.mxu0 %v18131_v17  ;;  %v18173_v17 = vld [vmem:[%s22814_s3 + $0x5c4] sm:$0xff]  }
 0x1bf   : > { %15964 = vmatprep.subr.bf16.mxu0 %v18134_v18 }
 0x1c0   : > { %15901 = vmatpush3.bf16.msra.mxu1 %v18133_v20  ;;  %v18176_v20 = vld [vmem:[%s22814_s3 + $0x5fc] sm:$0xff]  }
 0x1c1   : > { %15902 = vmatprep.subr.bf16.mxu1 %v18136_v22  ;;  %v18175_v22 = vld [vmem:[%s22814_s3 + $0x78c] sm:$0xff]  }
 0x1c2   : > { %15965 = vmatpush3.bf16.msra.mxu0 %v18135_v24 }
 0x1c3   : > { %17330 = vmatprep.subr.bf16.mxu0 %v3576_v27 }
 0x1c4   : > { %15903 = vmatpush3.bf16.msra.mxu1 %v18137_v25  ;;  %v18178_v25 = vld [vmem:[%s22814_s3 + $0x7c4] sm:$0xff]  }
 0x1c5   : > { %3611 = vmatmul.mubr.bf16.vlgmr.msra.gmra.mxu0 %v19375_v47  ;;  %15904 = vmatprep.subr.bf16.mxu1 %v18138_v29 }
 0x1c6   : > { %3618 = vmatprep.mubr.bf16.mxu0 %v19399_v1  ;;  %17331 = vmatpush3.bf16.msra.mxu0 %v3576_v27  ;;  %v18177_v27 = vld [vmem:[%s22814_s3 + $0x5bc] sm:$0xff]  }
 0x1c7   : > { %17332 = vmatprep.subr.bf16.mxu0 %v18141_v31 }
 0x1c8   : > { %15905 = vmatpush3.bf16.msra.mxu1 %v18139_v30  ;;  %v18179_v30 = vld [vmem:[%s22814_s3 + $0x784] sm:$0xff]  }
 0x1c9   : > { %17322 = vmatprep.subr.bf16.mxu1 %v3137_v32 }
 0x1ca   : > { %17333 = vmatpush3.bf16.msra.mxu0 %v18141_v31 }
 0x1cb   : > { %3172 = vmatmul.mubr.bf16.vlgmr.msra.gmra.mxu1 %v19375_v47  ;;  %16038 = vmatprep.subr.bf16.mxu0 %v18143_v33  ;;  %v19937_v36 = vpop.f32.mrf.mxu1 }
 0x1cc   : > { %3179 = vmatprep.mubr.bf16.mxu1 %v19399_v1  ;;  %17323 = vmatpush3.bf16.msra.mxu1 %v3137_v32  ;;  %v18182_v32 = vld [vmem:[%s22814_s3 + $0x7bc] sm:$0xff]  }
 0x1cd   : > { %3619 = vmatmul.mubr.bf16.gmra.mxu0 %v19397_v63  ;;  %17324 = vmatprep.subr.bf16.mxu1 %v18145_v34  ;;  %v19945_v23 = vpop.f32.mrf.mxu1 }
 0x1ce   : > { %17334 = vmatprep.mubr.msk.bf16.mxu0 %vm1369_vm2, %v19459_v45 }
 0x1cf   : > { %v19962_v42 = vpop.f32.mrf.mxu1 }
 0x1d0   : > { %17325 = vmatpush3.bf16.msra.mxu1 %v18145_v34  ;;  %v18181_v34 = vld [vmem:[%s22814_s3 + $0x680] sm:$0xff]  }
 0x1d1   : > { %15978 = vmatprep.subr.bf16.mxu1 %v18148_v35  ;;  %v19976_v51 = vpop.f32.mrf.mxu1 }
 0x1d3   : > { %3180 = vmatmul.mubr.bf16.gmra.mxu1 %v19397_v63  ;;  %v19987_v54 = vpop.f32.mrf.mxu1 }
 0x1d4   : > { %17326 = vmatprep.mubr.msk.bf16.mxu1 %vm1369_vm2, %v19459_v45 }
 0x1d5   : > { %17335 = vmatmul.mubr.msk.bf16.vlgmr.msra.gmra.mxu0 %vm1369_vm2, %v19478_v59  ;;  %v15673_v46 = vpop.f32.mrf.mxu1 }
 0x1d6   : > { %16039 = vmatpush3.bf16.msra.mxu0 %v18144_v37  ;;  %4098 = vmatprep.mubr.bf16.mxu0 %v19407_v5  ;;  %v18184_v37 = vld [vmem:[%s22814_s3 + $0x6b8] sm:$0xff]  }
 0x1d7   : > { %16040 = vmatprep.subr.bf16.mxu0 %v18146_v38  ;;  %v20010_v0 = vpop.f32.mrf.mxu1  ;;  %v15674_v38 = vadd.f32 %v15673_v46, %v19987_v54  ;;  %v15671_v46 = vadd.f32 %v19976_v51, %v19962_v42  ;;  %v18192_v51 = vld [vmem:[%s22814_s3 + $0x6a8] sm:$0xff]  }
 0x1d9   : > { %v15676_v10 = vpop.f32.mrf.mxu1 }
 0x1da   : > { %16041 = vmatpush3.bf16.msra.mxu0 %v18147_v39 }
 0x1db   : > { %17327 = vmatmul.mubr.msk.bf16.vlgmr.msra.gmra.mxu1 %vm1369_vm2, %v19478_v59  ;;  %16042 = vmatprep.subr.bf16.mxu0 %v18150_v41 }
 0x1dc   : > { %15979 = vmatpush3.bf16.msra.mxu1 %v18149_v40  ;;  %3659 = vmatprep.mubr.bf16.mxu1 %v19407_v5  ;;  %v18183_v40 = vld [vmem:[%s22814_s3 + $0x77c] sm:$0xff]  }
 0x1dd   : > { %15980 = vmatprep.subr.bf16.mxu1 %v18152_v48  ;;  %v15668_v48 = vadd.f32 %v19945_v23, %v19937_v36 }
 0x1de   : > { %16043 = vmatpush3.bf16.msra.mxu0 %v18151_v26  ;;  %v18186_v26 = vld [vmem:[%s22814_s3 + $0x7b4] sm:$0xff]  }
 0x1df   : > { %16044 = vmatprep.subr.bf16.mxu0 %v18154_v49 }
 0x1e0   : > { %15981 = vmatpush3.bf16.msra.mxu1 %v18153_v50 }
 0x1e1   : > { %15982 = vmatprep.subr.bf16.mxu1 %v18156_v53  ;;  %v15677_v53 = vadd.f32 %v15676_v10, %v20010_v0  ;;  %v18191_v10 = vld [vmem:[%s22814_s3 + $0x76c] sm:$0xff]  }
 0x1e2   : > { %16045 = vmatpush3.bf16.msra.mxu0 %v18155_v52  ;;  %v18185_v52 = vld [vmem:[%s22814_s3 + $0x678] sm:$0xff]  }
 0x1e3   : > { %16046 = vmatprep.subr.bf16.mxu0 %v18158_v55  ;;  %v18188_v55 = vld [vmem:[%s22814_s3 + $0x6b0] sm:$0xff]  }
 0x1e4   : > { %15983 = vmatpush3.bf16.msra.mxu1 %v18157_v56 }
 0x1e5   : > { %15984 = vmatprep.subr.bf16.mxu1 %v18160_v58  ;;  %v20095_v58 = vpop.f32.mrf.mxu0 }
 0x1e6   : > { %16047 = vmatpush3.bf16.msra.mxu0 %v18159_v57  ;;  %v18187_v57 = vld [vmem:[%s22814_s3 + $0x774] sm:$0xff]  }
 0x1e7   : > { %16048 = vmatprep.subr.bf16.mxu0 %v18162_v60 }
 0x1e8   : > { %15985 = vmatpush3.bf16.msra.mxu1 %v18161_v61  ;;  %v18190_v61 = vld [vmem:[%s22814_s3 + $0x7ac] sm:$0xff]  }
 0x1e9   : > { %15986 = vmatprep.subr.bf16.mxu1 %v18164_v3 }
 0x1ea   : > { %16049 = vmatpush3.bf16.msra.mxu0 %v18163_v62 }
 0x1eb   : > { %16050 = vmatprep.subr.bf16.mxu0 %v18166_v4  ;;  %v15694_v13 = vpop.f32.mrf.mxu1  ;;  %v18189_v4 = vld [vmem:[%s22814_s3 + $0x670] sm:$0xff]  }
 0x1ec   : > { %15987 = vmatpush3.bf16.msra.mxu1 %v18165_v6 }
 0x1ed   : > { %15988 = vmatprep.subr.bf16.mxu1 %v18168_v8  ;;  %v15695_v7 = vpop.f32.mrf.mxu1 }
 0x1ee   : > { %16051 = vmatpush3.bf16.msra.mxu0 %v18167_v9  ;;  %v15696_v39 = vadd.f32 %v15695_v7, %v15694_v13  ;;  %v18194_v13 = vld [vmem:[%s22814_s3 + $0x7a4] sm:$0xff]  }
 0x1ef   : > { %16052 = vmatprep.subr.bf16.mxu0 %v18170_v11  ;;  %v15697_v18 = vpop.f32.mrf.mxu1  ;;  %v20114_v11 = vpop.f32.mrf.mxu0  ;;  %v18193_v7 = vld [vmem:[%s22814_s3 + $0x668] sm:$0xff]  }
 0x1f0   : > { %15989 = vmatpush3.bf16.msra.mxu1 %v18169_v12  ;;  %v1466_v23 = vadd.f32 %v15696_v39, %v15668_v48  ;;  %v18206_v39 = vld [vmem:[%s22814_s3 + $0x688] sm:$0xff]  }
 0x1f1   : > { %15990 = vmatprep.subr.bf16.mxu1 %v18172_v14  ;;  %v15698_v24 = vpop.f32.mrf.mxu1  ;;  %v18207_v48 = vld [vmem:[%s22814_s3 + $0x648] sm:$0xff]  }
 0x1f2   : > { %16053 = vmatpush3.bf16.msra.mxu0 %v18171_v15  ;;  %v15699_v56 = vadd.f32 %v15698_v24, %v15697_v18  ;;  %v18195_v18 = vld [vmem:[%s22814_s3 + $0x764] sm:$0xff]  }
 0x1f3   : > { %16070 = vmatprep.subr.bf16.mxu0 %v18174_v16  ;;  %v15700_v29 = vpop.f32.mrf.mxu1  ;;  %v18196_v16 = vld [vmem:[%s22814_s3 + $0x6a0] sm:$0xff]  }
 0x1f4   : > { %15991 = vmatpush3.bf16.msra.mxu1 %v18173_v17  ;;  %v1469_v9 = vadd.f32 %v15699_v56, %v15671_v46  ;;  %v18197_v24 = vld [vmem:[%s22814_s3 + $0x660] sm:$0xff]  }
 0x1f5   : > { %4099 = vmatmul.mubr.bf16.vlgmr.msra.gmra.mxu0 %v19453_v21  ;;  %15992 = vmatprep.subr.bf16.mxu1 %v18176_v20  ;;  %v15701_v31 = vpop.f32.mrf.mxu1  ;;  %v20132_v20 = vpop.f32.mrf.mxu0 }
 0x1f6   : > { %4106 = vmatprep.mubr.bf16.mxu0 %v19457_v43  ;;  %16071 = vmatpush3.bf16.msra.mxu0 %v18175_v22  ;;  %v15702_v33 = vadd.f32 %v15701_v31, %v15700_v29  ;;  %v18198_v22 = vld [vmem:[%s22814_s3 + $0x79c] sm:$0xff]  }
 0x1f7   : > { %16072 = vmatprep.subr.bf16.mxu0 %v18178_v25  ;;  %v15703_v35 = vpop.f32.mrf.mxu1  ;;  %v18200_v25 = vld [vmem:[%s22814_s3 + $0x698] sm:$0xff]   ;;  %v15730_v29 = vpop.f32.mrf.mxu0 }
 0x1f8   : > { %15993 = vmatpush3.bf16.msra.mxu1 %v18177_v27  ;;  %v1474_v50 = vadd.f32 %v15702_v33, %v15674_v38  ;;  %v18199_v27 = vld [vmem:[%s22814_s3 + $0x75c] sm:$0xff]   ;;  %v18203_v33 = vld [vmem:[%s22814_s3 + $0x754] sm:$0xff]  }
 0x1f9   : > { %16010 = vmatprep.subr.bf16.mxu1 %v18180_v2  ;;  %v15704_v41 = vpop.f32.mrf.mxu1  ;;  %v18202_v2 = vld [vmem:[%s22814_s3 + $0x794] sm:$0xff]   ;;  %v20153_v31 = vpop.f32.mrf.mxu0 }
 0x1fa   : > { %16073 = vmatpush3.bf16.msra.mxu0 %v18179_v30  ;;  %v15705_v49 = vadd.f32 %v15704_v41, %v15703_v35  ;;  %v18201_v30 = vld [vmem:[%s22814_s3 + $0x658] sm:$0xff]   ;;  %v18205_v38 = vld [vmem:[%s22814_s3 + $0x650] sm:$0xff]  }
 0x1fb   : > { %3660 = vmatmul.mubr.bf16.vlgmr.msra.gmra.mxu1 %v19453_v21  ;;  %16074 = vmatprep.subr.bf16.mxu0 %v18182_v32  ;;  %v17296_v54 = vpop.f32.mrf.mxu1  ;;  %v18208_v32 = vld [vmem:[%s22814_s3 + $0x85c] ss:$0 sps:$4 sm:$0x11]   ;;  %v15733_v35 = vpop.f32.mrf.mxu0 }
 0x1fc   : > { %3667 = vmatprep.mubr.bf16.mxu1 %v19457_v43  ;;  %16011 = vmatpush3.bf16.msra.mxu1 %v18181_v34  ;;  %v1523_v36 = vadd.f32 %v17296_v54, %v1474_v50  ;;  %v1477_v3 = vadd.f32 %v15705_v49, %v15677_v53  ;;  %v18204_v34 = vld [vmem:[%s22814_s3 + $0x690] sm:$0xff]   ;;  %v18213_v54 = vld [vmem:[%s22814_s3 + $0x748] sm:$0xff]  }
 0x1fd   : > { %4107 = vmatmul.mubr.bf16.gmra.mxu0 %v19473_v28  ;;  %16012 = vmatprep.subr.bf16.mxu1 %v18184_v37  ;;  %v1514_v60 = vpop.f32.mrf.mxu1  ;;  %v4454_v37 = vand.u32 %v18208_v32, %v19346_v19  ;;  %v20174_v41 = vpop.f32.mrf.mxu0 }
 0x1fe   : > { %v15400_v62 = vpack.c.bf16 %v1523_v36, %v1523_v36  ;;  %16075 = vmatpush3.bf16.msra.mxu0 %v18183_v40  ;;  %4488 = vmatprep.mubr.bf16.mxu0 %v19370_v44  ;;  %v1515_v0 = vadd.f32 %v1514_v60, %v1466_v23  ;;  %v18210_v40 = vld [vmem:[%s22814_s3 + $0x750] ss:$0 sps:$4 sm:$0x11]  }
 0x1ff   : > { %16076 = vmatprep.subr.bf16.mxu0 %v18186_v26  ;;  %v17297_v42 = vpop.f32.mrf.mxu1  ;;  %v18209_v26 = vld [vmem:[%s22814_s3 + $0x854] sm:$0xff]   ;;  %v4015_v49 = vand.u32 %v18210_v40, %v19346_v19  ;;  %v15736_v50 = vpop.f32.mrf.mxu0  ;;  %v18216_v23 = vld [vmem:[%s22814_s3 + $0x84c] sm:$0xff]  }
 0x200   : > { %1548 = vst.msk [vmem:[#allocation2 + $0x8] sm:$0xf] %vm1545_vm3, %v15400_v62  ;;  %v15398_v6 = vpack.c.bf16 %v1515_v0, %v1515_v0  ;;  %16013 = vmatpush3.bf16.msra.mxu1 %v18185_v52  ;;  %v1526_v8 = vadd.f32 %v17297_v42, %v1477_v3  ;;  %v18211_v52 = vld [vmem:[%s22814_s3 + $0x958] sm:$0xff]   ;;  %v15731_v3 = vadd.f32 %v15730_v29, %v20132_v20  ;;  %v18217_v20 = vld [vmem:[%s22814_s3 + $0x80c] sm:$0xff]  }
 0x201   : > { %16014 = vmatprep.subr.bf16.mxu1 %v18188_v55  ;;  %v1517_v12 = vpop.f32.mrf.mxu1  ;;  %v17304_v53 = vpop.f32.mrf.mxu0 }
 0x202   : > { %1546 = vst.msk [vmem:[#allocation2] sm:$0xf] %vm1545_vm3, %v15398_v6  ;;  %v15401_v14 = vpack.c.bf16 %v1526_v8, %v1526_v8  ;;  %16077 = vmatpush3.bf16.msra.mxu0 %v18187_v57  ;;  %v1518_v15 = vadd.f32 %v1517_v12, %v1469_v9  ;;  %v15728_v57 = vadd.f32 %v20114_v11, %v20095_v58  ;;  %v18214_v6 = vld [vmem:[%s22814_s3 + $0x950] sm:$0xff]  }
 0x203   : > { %3668 = vmatmul.mubr.bf16.gmra.mxu1 %v19473_v28  ;;  %16078 = vmatprep.subr.bf16.mxu0 %v18190_v61  ;;  %v1954_v56 = vpop.f32.mrf.mxu0  ;;  %v15734_v12 = vadd.f32 %v15733_v35, %v20153_v31  ;;  %v18222_v31 = vld [vmem:[%s22814_s3 + $0x940] sm:$0xff]  }
 0x204   : > { %1549 = vst.msk [vmem:[#allocation2 + $0xc] sm:$0xf] %vm1545_vm3, %v15401_v14  ;;  %v15399_v17 = vpack.c.bf16 %v1518_v15, %v1518_v15  ;;  %16015 = vmatpush3.bf16.msra.mxu1 %v18189_v4  ;;  %4049 = vmatprep.mubr.bf16.mxu1 %v19370_v44  ;;  %v18215_v15 = vld [vmem:[%s22814_s3 + $0x910] sm:$0xff]   ;;  %v18224_v35 = vld [vmem:[%s22814_s3 + $0x83c] sm:$0xff]  }
 0x205   : > { %16016 = vmatprep.subr.bf16.mxu1 %v18192_v51  ;;  %v17305_v62 = vpop.f32.mrf.mxu0  ;;  %v18212_v51 = vld [vmem:[%s22814_s3 + $0x918] sm:$0xff]  }
 0x206   : > { %1547 = vst.msk [vmem:[#allocation2 + $0x4] sm:$0xf] %vm1545_vm3, %v15399_v17  ;;  %16079 = vmatpush3.bf16.msra.mxu0 %v18191_v10 }
 0x207   : > { %16080 = vmatprep.subr.bf16.mxu0 %v18194_v13  ;;  %v1957_v10 = vpop.f32.mrf.mxu0 }
 0x208   : > { %16017 = vmatpush3.bf16.msra.mxu1 %v18193_v7 }
 0x209   : > { %16018 = vmatprep.subr.bf16.mxu1 %v18196_v16  ;;  %v18218_v16 = vld [vmem:[%s22814_s3 + $0x948] sm:$0xff]  }
 0x20a   : > { %16081 = vmatpush3.bf16.msra.mxu0 %v18195_v18 }
 0x20b   : > { %16082 = vmatprep.subr.bf16.mxu0 %v18198_v22 }
 0x20c   : > { %16019 = vmatpush3.bf16.msra.mxu1 %v18197_v24  ;;  %v18220_v24 = vld [vmem:[%s22814_s3 + $0x844] sm:$0xff]  }
 0x20d   : > { %16020 = vmatprep.subr.bf16.mxu1 %v18200_v25  ;;  %v15737_v25 = vadd.f32 %v15736_v50, %v20174_v41  ;;  %v18225_v41 = vld [vmem:[%s22814_s3 + $0x7fc] sm:$0xff]   ;;  %v18230_v50 = vld [vmem:[%s22814_s3 + $0x930] sm:$0xff]  }
 0x20e   : > { %16083 = vmatpush3.bf16.msra.mxu0 %v18199_v27 }
 0x20f   : > { %16084 = vmatprep.subr.bf16.mxu0 %v18202_v2  ;;  %v18219_v2 = vld [vmem:[%s22814_s3 + $0x908] sm:$0xff]  }
 0x210   : > { %16021 = vmatpush3.bf16.msra.mxu1 %v18201_v30 }
 0x211   : > { %16022 = vmatprep.subr.bf16.mxu1 %v18204_v34  ;;  %v18221_v34 = vld [vmem:[%s22814_s3 + $0x804] sm:$0xff]  }
 0x212   : > { %16085 = vmatpush3.bf16.msra.mxu0 %v18203_v33 }
 0x213   : > { %17346 = vmatprep.subr.bf16.mxu0 %v4454_v37 }
 0x214   : > { %16023 = vmatpush3.bf16.msra.mxu1 %v18205_v38  ;;  %v20233_v30 = vpop.f32.mrf.mxu0  ;;  %v18223_v38 = vld [vmem:[%s22814_s3 + $0x900] sm:$0xff]  }
 0x215   : > { %4489 = vmatmul.mubr.bf16.vlgmr.msra.gmra.mxu0 %v19375_v47  ;;  %16024 = vmatprep.subr.bf16.mxu1 %v18206_v39 }
 0x216   : > { %4496 = vmatprep.mubr.bf16.mxu0 %v19399_v1  ;;  %17347 = vmatpush3.bf16.msra.mxu0 %v4454_v37  ;;  %v20251_v39 = vpop.f32.mrf.mxu0 }
 0x217   : > { %17348 = vmatprep.subr.bf16.mxu0 %v18209_v26 }
 0x218   : > { %16025 = vmatpush3.bf16.msra.mxu1 %v18207_v48  ;;  %v18227_v48 = vld [vmem:[%s22814_s3 + $0x8f8] sm:$0xff]  }
 0x219   : > { %17338 = vmatprep.subr.bf16.mxu1 %v4015_v49 }
 0x21a   : > { %17349 = vmatpush3.bf16.msra.mxu0 %v18209_v26  ;;  %v18228_v26 = vld [vmem:[%s22814_s3 + $0x834] sm:$0xff]  }
 0x21b   : > { %4050 = vmatmul.mubr.bf16.vlgmr.msra.gmra.mxu1 %v19375_v47  ;;  %v15754_v55 = vpop.f32.mrf.mxu1  ;;  %16158 = vmatprep.subr.bf16.mxu0 %v18211_v52  ;;  %v18229_v52 = vld [vmem:[%s22814_s3 + $0x7f4] sm:$0xff]  }
 0x21c   : > { %4057 = vmatprep.mubr.bf16.mxu1 %v19399_v1  ;;  %17339 = vmatpush3.bf16.msra.mxu1 %v4015_v49  ;;  %v20266_v49 = vpop.f32.mrf.mxu0 }
 0x21d   : > { %4497 = vmatmul.mubr.bf16.gmra.mxu0 %v19397_v63  ;;  %v15755_v36 = vpop.f32.mrf.mxu1  ;;  %17340 = vmatprep.subr.bf16.mxu1 %v18213_v54 }
 0x21e   : > { %17350 = vmatprep.mubr.msk.bf16.mxu0 %vm1369_vm2, %v19459_v45  ;;  %v15756_v46 = vadd.f32 %v15755_v36, %v15754_v55  ;;  %v20280_v55 = vpop.f32.mrf.mxu0  ;;  %v18233_v36 = vld [vmem:[%s22814_s3 + $0x7ec] sm:$0xff]  }
 0x21f   : > { %v15757_v60 = vpop.f32.mrf.mxu1 }
 0x220   : > { %v1906_v61 = vadd.f32 %v15756_v46, %v15728_v57  ;;  %17341 = vmatpush3.bf16.msra.mxu1 %v18213_v54  ;;  %v18231_v54 = vld [vmem:[%s22814_s3 + $0x8f0] sm:$0xff]   ;;  %v18235_v57 = vld [vmem:[%s22814_s3 + $0x8e8] sm:$0xff]   ;;  %v15820_v46 = vpop.f32.mrf.mxu0 }
 0x221   : > { %v15758_v0 = vpop.f32.mrf.mxu1  ;;  %16098 = vmatprep.subr.bf16.mxu1 %v18216_v23  ;;  %v18236_v23 = vld [vmem:[%s22814_s3 + $0x824] sm:$0xff]  }
 0x222   : > { %v1955_v4 = vadd.f32 %v1954_v56, %v1906_v61  ;;  %v15759_v42 = vadd.f32 %v15758_v0, %v15757_v60  ;;  %v18234_v56 = vld [vmem:[%s22814_s3 + $0x928] sm:$0xff]   ;;  %v18238_v61 = vld [vmem:[%s22814_s3 + $0x920] sm:$0xff]  }
 0x223   : > { %4058 = vmatmul.mubr.bf16.gmra.mxu1 %v19397_v63  ;;  %v15760_v58 = vpop.f32.mrf.mxu1 }
 0x224   : > { %v15402_v8 = vpack.c.bf16 %v1955_v4, %v1955_v4  ;;  %v1909_v9 = vadd.f32 %v15759_v42, %v15731_v3  ;;  %17342 = vmatprep.mubr.msk.bf16.mxu1 %vm1369_vm2, %v19459_v45  ;;  %v18240_v3 = vld [vmem:[%s22814_s3 + $0x81c] sm:$0xff]   ;;  %v15821_v42 = vpop.f32.mrf.mxu0 }
 0x225   : > { %17351 = vmatmul.mubr.msk.bf16.vlgmr.msra.gmra.mxu0 %vm1369_vm2, %v19478_v59  ;;  %v15761_v11 = vpop.f32.mrf.mxu1  ;;  %v18239_v4 = vld [vmem:[%s22814_s3 + $0x8e0] sm:$0xff]  }
 0x226   : > { %1985 = vst.msk [vmem:[#allocation2 + $0x10] sm:$0xf] %vm1545_vm3, %v15402_v8  ;;  %v1958_v13 = vadd.f32 %v1957_v10, %v1909_v9  ;;  %16159 = vmatpush3.bf16.msra.mxu0 %v18212_v51  ;;  %4976 = vmatprep.mubr.bf16.mxu0 %v19407_v5  ;;  %v15762_v14 = vadd.f32 %v15761_v11, %v15760_v58  ;;  %v18241_v58 = vld [vmem:[%s22814_s3 + $0x7dc] sm:$0xff]   ;;  %v18242_v8 = vld [vmem:[%s22814_s3 + $0x814] sm:$0xff]   ;;  %v15823_v9 = vpop.f32.mrf.mxu0 }
 0x227   : > { %16160 = vmatprep.subr.bf16.mxu0 %v18214_v6  ;;  %v15763_v7 = vpop.f32.mrf.mxu1  ;;  %v18243_v11 = vld [vmem:[%s22814_s3 + $0x7d4] sm:$0xff]  }
 0x228   : > { %v15403_v17 = vpack.c.bf16 %v1958_v13, %v1958_v13  ;;  %v1914_v18 = vadd.f32 %v15762_v14, %v15734_v12  ;;  %v18244_v13 = vld [vmem:[%s22814_s3 + $0x8d8] sm:$0xff]  }
 0x229   : > { %v15764_v22 = vpop.f32.mrf.mxu1 }
 0x22a   : > { %1986 = vst.msk [vmem:[#allocation2 + $0x14] sm:$0xf] %vm1545_vm3, %v15403_v17  ;;  %v1963_v27 = vadd.f32 %v17304_v53, %v1914_v18  ;;  %16161 = vmatpush3.bf16.msra.mxu0 %v18215_v15  ;;  %v15765_v29 = vadd.f32 %v15764_v22, %v15763_v7  ;;  %v18232_v53 = vld [vmem:[%s22814_s3 + $0x82c] sm:$0xff]   ;;  %v15824_v15 = vpop.f32.mrf.mxu0  ;;  %v18245_v18 = vld [vmem:[%s22814_s3 + $0x898] sm:$0xff]  }
 0x22b   : > { %17343 = vmatmul.mubr.msk.bf16.vlgmr.msra.gmra.mxu1 %vm1369_vm2, %v19478_v59  ;;  %16162 = vmatprep.subr.bf16.mxu0 %v18218_v16  ;;  %v15822_v16 = vadd.f32 %v15821_v42, %v15820_v46  ;;  %v18260_v42 = vld [vmem:[%s22814_s3 + $0x968] ss:$0 sps:$4 sm:$0x11]  }
 0x22c   : > { %v15404_v32 = vpack.c.bf16 %v1963_v27, %v1963_v27  ;;  %v1917_v33 = vadd.f32 %v15765_v29, %v15737_v25  ;;  %16099 = vmatpush3.bf16.msra.mxu1 %v18217_v20  ;;  %4537 = vmatprep.mubr.bf16.mxu1 %v19407_v5  ;;  %v18226_v5 = vld [vmem:[%s22814_s3 + $0x938] sm:$0xff]   ;;  %v15816_v25 = vadd.f32 %v20251_v39, %v20233_v30 }
 0x22d   : > { %16100 = vmatprep.subr.bf16.mxu1 %v18220_v24  ;;  %v18246_v24 = vld [vmem:[%s22814_s3 + $0x8d0] sm:$0xff]  }
 0x22e   : > { %1987 = vst.msk [vmem:[#allocation2 + $0x18] sm:$0xf] %vm1545_vm3, %v15404_v32  ;;  %v1966_v37 = vadd.f32 %v17305_v62, %v1917_v33  ;;  %16163 = vmatpush3.bf16.msra.mxu0 %v18219_v2  ;;  %v18237_v62 = vld [vmem:[%s22814_s3 + $0x7e4] sm:$0xff]   ;;  %v15825_v2 = vadd.f32 %v15824_v15, %v15823_v9 }
 0x22f   : > { %16164 = vmatprep.subr.bf16.mxu0 %v18222_v31  ;;  %v18261_v9 = vld [vmem:[%s22814_s3 + $0x960] sm:$0xff]  }
 0x230   : > { %v15405_v40 = vpack.c.bf16 %v1966_v37, %v1966_v37  ;;  %16101 = vmatpush3.bf16.msra.mxu1 %v18221_v34 }
 0x231   : > { %16102 = vmatprep.subr.bf16.mxu1 %v18224_v35  ;;  %v18247_v35 = vld [vmem:[%s22814_s3 + $0x890] sm:$0xff]  }
 0x232   : > { %1988 = vst.msk [vmem:[#allocation2 + $0x1c] sm:$0xf] %vm1545_vm3, %v15405_v40  ;;  %16165 = vmatpush3.bf16.msra.mxu0 %v18223_v38 }
 0x233   : > { %16166 = vmatprep.subr.bf16.mxu0 %v18226_v5 }
 0x234   : > { %16103 = vmatpush3.bf16.msra.mxu1 %v18225_v41 }
 0x235   : > { %16104 = vmatprep.subr.bf16.mxu1 %v18228_v26  ;;  %v20323_v20 = vpop.f32.mrf.mxu0 }
 0x236   : > { %16167 = vmatpush3.bf16.msra.mxu0 %v18227_v48 }
 0x237   : > { %16168 = vmatprep.subr.bf16.mxu0 %v18230_v50  ;;  %v20335_v37 = vpop.f32.mrf.mxu0  ;;  %v18249_v50 = vld [vmem:[%s22814_s3 + $0x888] sm:$0xff]  }
 0x238   : > { %16105 = vmatpush3.bf16.msra.mxu1 %v18229_v52 }
 0x239   : > { %16106 = vmatprep.subr.bf16.mxu1 %v18232_v53  ;;  %v15849_v52 = vpop.f32.mrf.mxu0 }
 0x23a   : > { %16169 = vmatpush3.bf16.msra.mxu0 %v18231_v54 }
 0x23b   : > { %16170 = vmatprep.subr.bf16.mxu0 %v18234_v56  ;;  %v15786_v60 = vpop.f32.mrf.mxu1 }
 0x23c   : > { %16107 = vmatpush3.bf16.msra.mxu1 %v18233_v36  ;;  %v18251_v36 = vld [vmem:[%s22814_s3 + $0x880] sm:$0xff]  }
 0x23d   : > { %16108 = vmatprep.subr.bf16.mxu1 %v18236_v23  ;;  %v15787_v0 = vpop.f32.mrf.mxu1  ;;  %v15850_v23 = vpop.f32.mrf.mxu0 }
 0x23e   : > { %16171 = vmatpush3.bf16.msra.mxu0 %v18235_v57  ;;  %v15788_v17 = vadd.f32 %v15787_v0, %v15786_v60  ;;  %v18252_v57 = vld [vmem:[%s22814_s3 + $0x8b8] sm:$0xff]   ;;  %v18255_v60 = vld [vmem:[%s22814_s3 + $0x870] sm:$0xff]   ;;  %v18257_v0 = vld [vmem:[%s22814_s3 + $0x868] sm:$0xff]  }
 0x23f   : > { %16172 = vmatprep.subr.bf16.mxu0 %v18238_v61  ;;  %v15789_v51 = vpop.f32.mrf.mxu1  ;;  %v15852_v46 = vpop.f32.mrf.mxu0 }
 0x240   : > { %16109 = vmatpush3.bf16.msra.mxu1 %v18237_v62  ;;  %v2345_v34 = vadd.f32 %v15816_v25, %v15788_v17  ;;  %v18256_v62 = vld [vmem:[%s22814_s3 + $0x8a8] sm:$0xff]   ;;  %v15851_v17 = vadd.f32 %v15850_v23, %v15849_v52 }
 0x241   : > { %16110 = vmatprep.subr.bf16.mxu1 %v18240_v3  ;;  %v15790_v6 = vpop.f32.mrf.mxu1  ;;  %v15853_v61 = vpop.f32.mrf.mxu0 }
 0x242   : > { %16173 = vmatpush3.bf16.msra.mxu0 %v18239_v4  ;;  %v15791_v32 = vadd.f32 %v15790_v6, %v15789_v51  ;;  %v18258_v4 = vld [vmem:[%s22814_s3 + $0x8a0] sm:$0xff]   ;;  %v4893_v6 = vand.u32 %v18260_v42, %v19346_v19 }
 0x243   : > { %v15792_v10 = vpop.f32.mrf.mxu1  ;;  %v15855_v3 = vpop.f32.mrf.mxu0  ;;  %v18259_v51 = vld [vmem:[%s22814_s3 + $0x860] sm:$0xff]  }
 0x244   : > { %16111 = vmatpush3.bf16.msra.mxu1 %v18241_v58 }
 0x245   : > { %4977 = vmatmul.mubr.bf16.vlgmr.msra.gmra.mxu0 %v19453_v21  ;;  %16112 = vmatprep.subr.bf16.mxu1 %v18242_v8  ;;  %v15793_v12 = vpop.f32.mrf.mxu1  ;;  %v15856_v58 = vpop.f32.mrf.mxu0 }
 0x246   : > { %4984 = vmatprep.mubr.bf16.mxu0 %v19457_v43  ;;  %v15794_v14 = vadd.f32 %v15793_v12, %v15792_v10 }
 0x247   : > { %v15795_v7 = vpop.f32.mrf.mxu1  ;;  %v17320_v8 = vpop.f32.mrf.mxu0 }
 0x248   : > { %16113 = vmatpush3.bf16.msra.mxu1 %v18243_v11  ;;  %v2353_v29 = vadd.f32 %v15822_v16, %v15794_v14 }
 0x249   : > { %16130 = vmatprep.subr.bf16.mxu1 %v18244_v13  ;;  %v15796_v22 = vpop.f32.mrf.mxu1  ;;  %v2832_v11 = vpop.f32.mrf.mxu0  ;;  %v15848_v13 = vadd.f32 %v20335_v37, %v20323_v20  ;;  %v15854_v20 = vadd.f32 %v15853_v61, %v15852_v46 }
 0x24a   : > { %v15797_v27 = vadd.f32 %v15796_v22, %v15795_v7 }
 0x24b   : > { %4538 = vmatmul.mubr.bf16.vlgmr.msra.gmra.mxu1 %v19453_v21  ;;  %v17312_v31 = vpop.f32.mrf.mxu1  ;;  %v18248_v21 = vld [vmem:[%s22814_s3 + $0x8c8] sm:$0xff]   ;;  %v17321_v7 = vpop.f32.mrf.mxu0 }
 0x24c   : > { %4545 = vmatprep.mubr.bf16.mxu1 %v19457_v43  ;;  %16131 = vmatpush3.bf16.msra.mxu1 %v18245_v18  ;;  %v2402_v33 = vadd.f32 %v17312_v31, %v2353_v29  ;;  %v15819_v43 = vadd.f32 %v20280_v55, %v20266_v49  ;;  %v2356_v5 = vadd.f32 %v15825_v2, %v15797_v27  ;;  %v18250_v49 = vld [vmem:[%s22814_s3 + $0x8c0] sm:$0xff]  }
 0x24d   : > { %4985 = vmatmul.mubr.bf16.gmra.mxu0 %v19473_v28  ;;  %16132 = vmatprep.subr.bf16.mxu1 %v18246_v24  ;;  %v2393_v30 = vpop.f32.mrf.mxu1  ;;  %v2835_v25 = vpop.f32.mrf.mxu0 }
 0x24e   : > { %v15408_v38 = vpack.c.bf16 %v2402_v33, %v2402_v33  ;;  %v2394_v39 = vadd.f32 %v2393_v30, %v2345_v34  ;;  %v2348_v48 = vadd.f32 %v15819_v43, %v15791_v32 }
 0x24f   : > { %v17313_v40 = vpop.f32.mrf.mxu1 }
 0x250   : > { %2426 = vst.msk [vmem:[#allocation2 + $0x28] sm:$0xf] %vm1545_vm3, %v15408_v38  ;;  %v15406_v41 = vpack.c.bf16 %v2394_v39, %v2394_v39  ;;  %16133 = vmatpush3.bf16.msra.mxu1 %v18247_v35  ;;  %v2405_v26 = vadd.f32 %v17313_v40, %v2356_v5  ;;  %v15857_v35 = vadd.f32 %v15856_v58, %v15855_v3 }
 0x251   : > { %16134 = vmatprep.subr.bf16.mxu1 %v18248_v21  ;;  %v2396_v53 = vpop.f32.mrf.mxu1 }
 0x252   : > { %2424 = vst.msk [vmem:[#allocation2 + $0x20] sm:$0xf] %vm1545_vm3, %v15406_v41  ;;  %v15409_v54 = vpack.c.bf16 %v2405_v26, %v2405_v26  ;;  %v2397_v55 = vadd.f32 %v2396_v53, %v2348_v48 }
 0x253   : > { %4546 = vmatmul.mubr.bf16.gmra.mxu1 %v19473_v28  ;;  %v18253_v28 = vld [vmem:[%s22814_s3 + $0x878] sm:$0xff]  }
 0x254   : > { %2427 = vst.msk [vmem:[#allocation2 + $0x2c] sm:$0xf] %vm1545_vm3, %v15409_v54  ;;  %v15407_v56 = vpack.c.bf16 %v2397_v55, %v2397_v55  ;;  %16135 = vmatpush3.bf16.msra.mxu1 %v18249_v50  ;;  %4927 = vmatprep.mubr.bf16.mxu1 %v19370_v44  ;;  %v18254_v44 = vld [vmem:[%s22814_s3 + $0x8b0] sm:$0xff]  }
 0x255   : > { %16136 = vmatprep.subr.bf16.mxu1 %v18250_v49 }
 0x256   : > { %2425 = vst.msk [vmem:[#allocation2 + $0x24] sm:$0xf] %vm1545_vm3, %v15407_v56 }
 0x258   : > { %16137 = vmatpush3.bf16.msra.mxu1 %v18251_v36 }
 0x259   : > { %16138 = vmatprep.subr.bf16.mxu1 %v18252_v57 }
 0x25c   : > { %16139 = vmatpush3.bf16.msra.mxu1 %v18253_v28 }
 0x25d   : > { %16140 = vmatprep.subr.bf16.mxu1 %v18254_v44 }
 0x260   : > { %16141 = vmatpush3.bf16.msra.mxu1 %v18255_v60 }
 0x261   : > { %16142 = vmatprep.subr.bf16.mxu1 %v18256_v62 }
 0x264   : > { %16143 = vmatpush3.bf16.msra.mxu1 %v18257_v0 }
 0x265   : > { %16144 = vmatprep.subr.bf16.mxu1 %v18258_v4  ;;  %v15934_v30 = vpop.f32.mrf.mxu0 }
 0x267   : > { %v15935_v38 = vpop.f32.mrf.mxu0 }
 0x268   : > { %16145 = vmatpush3.bf16.msra.mxu1 %v18259_v51  ;;  %v15936_v44 = vadd.f32 %v15935_v38, %v15934_v30 }
 0x269   : > { %17354 = vmatprep.subr.bf16.mxu1 %v4893_v6  ;;  %v15937_v5 = vpop.f32.mrf.mxu0 }
 0x26b   : > { %4928 = vmatmul.mubr.bf16.vlgmr.msra.gmra.mxu1 %v19375_v47  ;;  %v15874_v10 = vpop.f32.mrf.mxu1  ;;  %v15938_v40 = vpop.f32.mrf.mxu0 }
 0x26c   : > { %4935 = vmatprep.mubr.bf16.mxu1 %v19399_v1  ;;  %17355 = vmatpush3.bf16.msra.mxu1 %v4893_v6  ;;  %v15939_v6 = vadd.f32 %v15938_v40, %v15937_v5 }
 0x26d   : > { %v15875_v12 = vpop.f32.mrf.mxu1  ;;  %17356 = vmatprep.subr.bf16.mxu1 %v18261_v9  ;;  %v15940_v41 = vpop.f32.mrf.mxu0 }
 0x26e   : > { %v15876_v19 = vadd.f32 %v15875_v12, %v15874_v10 }
 0x26f   : > { %v15877_v14 = vpop.f32.mrf.mxu1  ;;  %v15941_v50 = vpop.f32.mrf.mxu0 }
 0x270   : > { %v2784_v15 = vadd.f32 %v15876_v19, %v15848_v13  ;;  %17357 = vmatpush3.bf16.msra.mxu1 %v18261_v9  ;;  %v15942_v23 = vadd.f32 %v15941_v50, %v15940_v41 }
 0x271   : > { %v15878_v16 = vpop.f32.mrf.mxu1  ;;  %v15943_v49 = vpop.f32.mrf.mxu0 }
 0x272   : > { %v2833_v18 = vadd.f32 %v2832_v11, %v2784_v15  ;;  %v15879_v22 = vadd.f32 %v15878_v16, %v15877_v14 }
 0x273   : > { %4936 = vmatmul.mubr.bf16.gmra.mxu1 %v19397_v63  ;;  %v15880_v47 = vpop.f32.mrf.mxu1  ;;  %v15944_v56 = vpop.f32.mrf.mxu0 }
 0x274   : > { %v15410_v1 = vpack.c.bf16 %v2833_v18, %v2833_v18  ;;  %v2787_v24 = vadd.f32 %v15879_v22, %v15851_v17  ;;  %17358 = vmatprep.mubr.msk.bf16.mxu1 %vm1369_vm2, %v19459_v45  ;;  %v15945_v0 = vadd.f32 %v15944_v56, %v15943_v49 }
 0x275   : > { %v15881_v27 = vpop.f32.mrf.mxu1 }
 0x276   : > { %2863 = vst.msk [vmem:[#allocation2 + $0x30] sm:$0xf] %vm1545_vm3, %v15410_v1  ;;  %v2836_v29 = vadd.f32 %v2835_v25, %v2787_v24  ;;  %v15882_v2 = vadd.f32 %v15881_v27, %v15880_v47 }
 0x277   : > { %v15883_v31 = vpop.f32.mrf.mxu1 }
 0x278   : > { %v15411_v32 = vpack.c.bf16 %v2836_v29, %v2836_v29  ;;  %v2792_v33 = vadd.f32 %v15882_v2, %v15854_v20 }
 0x279   : > { %v15884_v34 = vpop.f32.mrf.mxu1 }
 0x27a   : > { %2864 = vst.msk [vmem:[#allocation2 + $0x34] sm:$0xf] %vm1545_vm3, %v15411_v32  ;;  %v2841_v63 = vadd.f32 %v17320_v8, %v2792_v33  ;;  %v15885_v37 = vadd.f32 %v15884_v34, %v15883_v31 }
 0x27b   : > { %17359 = vmatmul.mubr.msk.bf16.vlgmr.msra.gmra.mxu1 %vm1369_vm2, %v19478_v59 }
 0x27c   : > { %v15412_v45 = vpack.c.bf16 %v2841_v63, %v2841_v63  ;;  %v2795_v21 = vadd.f32 %v15885_v37, %v15857_v35 }
 0x27e   : > { %2865 = vst.msk [vmem:[#allocation2 + $0x38] sm:$0xf] %vm1545_vm3, %v15412_v45  ;;  %v2844_v43 = vadd.f32 %v17321_v7, %v2795_v21 }
 0x280   : > { %v15413_v39 = vpack.c.bf16 %v2844_v43, %v2844_v43 }
 0x282   : > { %2866 = vst.msk [vmem:[#allocation2 + $0x3c] sm:$0xf] %vm1545_vm3, %v15413_v39 }
 0x285   : > { %v15966_v28 = vpop.f32.mrf.mxu0 }
 0x287   : > { %v15967_v51 = vpop.f32.mrf.mxu0 }
 0x288   : > { %v15968_v2 = vadd.f32 %v15967_v51, %v15966_v28 }
 0x289   : > { %v15969_v14 = vpop.f32.mrf.mxu0 }
 0x28b   : > { %v15906_v26 = vpop.f32.mrf.mxu1  ;;  %v15970_v18 = vpop.f32.mrf.mxu0 }
 0x28c   : > { %v15971_v63 = vadd.f32 %v15970_v18, %v15969_v14 }
 0x28d   : > { %v15907_v48 = vpop.f32.mrf.mxu1  ;;  %v15972_v22 = vpop.f32.mrf.mxu0 }
 0x28e   : > { %v15908_v57 = vadd.f32 %v15907_v48, %v15906_v26 }
 0x28f   : > { %v15909_v52 = vpop.f32.mrf.mxu1  ;;  %v15973_v47 = vpop.f32.mrf.mxu0 }
 0x290   : > { %v3223_v42 = vadd.f32 %v15936_v44, %v15908_v57  ;;  %v15974_v5 = vadd.f32 %v15973_v47, %v15972_v22 }
 0x291   : > { %v15910_v53 = vpop.f32.mrf.mxu1  ;;  %v15975_v1 = vpop.f32.mrf.mxu0 }
 0x292   : > { %v15911_v3 = vadd.f32 %v15910_v53, %v15909_v52  ;;  %v18280_v52 = vld [vmem:[%s22815_s4 + $0x4] ss:$12 sps:$4 sm:$0xff]  }
 0x293   : > { %v15912_v54 = vpop.f32.mrf.mxu1  ;;  %v15976_v24 = vpop.f32.mrf.mxu0  ;;  %5375 = vmatprep.mubr.bf16.mxu0 %v18280_v52 }
 0x294   : > { %v3226_v19 = vadd.f32 %v15939_v6, %v15911_v3  ;;  %v15977_v49 = vadd.f32 %v15976_v24, %v15975_v1 }
 0x295   : > { %v15913_v59 = vpop.f32.mrf.mxu1  ;;  %v17336_v25 = vpop.f32.mrf.mxu0 }
 0x296   : > { %v15914_v55 = vadd.f32 %v15913_v59, %v15912_v54 }
 0x297   : > { %v15915_v36 = vpop.f32.mrf.mxu1  ;;  %v3710_v20 = vpop.f32.mrf.mxu0 }
 0x298   : > { %v3231_v61 = vadd.f32 %v15942_v23, %v15914_v55 }
 0x299   : > { %v15916_v46 = vpop.f32.mrf.mxu1  ;;  %v17337_v34 = vpop.f32.mrf.mxu0 }
 0x29a   : > { %v15917_v60 = vadd.f32 %v15916_v46, %v15915_v36  ;;  %v18286_v46 = vld [vmem:[%s22815_s4 + $0x8] ss:$12 sps:$4 sm:$0xff]  }
 0x29b   : > { %v17328_v62 = vpop.f32.mrf.mxu1  ;;  %v3713_v38 = vpop.f32.mrf.mxu0  ;;  %17366 = vmatprep.mubr.msk.bf16.mxu1 %vm5330_vm4, %v18286_v46 }
 0x29c   : > { %v3280_v4 = vadd.f32 %v17328_v62, %v3231_v61  ;;  %v3234_v10 = vadd.f32 %v15945_v0, %v15917_v60 }
 0x29d   : > { %v3271_v58 = vpop.f32.mrf.mxu1 }
 0x29e   : > { %v15416_v8 = vpack.c.bf16 %v3280_v4, %v3280_v4  ;;  %v3272_v9 = vadd.f32 %v3271_v58, %v3223_v42 }
 0x29f   : > { %v17329_v11 = vpop.f32.mrf.mxu1 }
 0x2a0   : > { %3304 = vst.msk [vmem:[#allocation2 + $0x48] sm:$0xf] %vm1545_vm3, %v15416_v8  ;;  %v15414_v12 = vpack.c.bf16 %v3272_v9, %v3272_v9  ;;  %v3283_v13 = vadd.f32 %v17329_v11, %v3234_v10 }
 0x2a1   : > { %v3274_v15 = vpop.f32.mrf.mxu1 }
 0x2a2   : > { %3302 = vst.msk [vmem:[#allocation2 + $0x40] sm:$0xf] %vm1545_vm3, %v15414_v12  ;;  %v15417_v7 = vpack.c.bf16 %v3283_v13, %v3283_v13  ;;  %v3275_v16 = vadd.f32 %v3274_v15, %v3226_v19 }
 0x2a4   : > { %3305 = vst.msk [vmem:[#allocation2 + $0x4c] sm:$0xf] %vm1545_vm3, %v15417_v7  ;;  %v15415_v17 = vpack.c.bf16 %v3275_v16, %v3275_v16 }
 0x2a6   : > { %3303 = vst.msk [vmem:[#allocation2 + $0x44] sm:$0xf] %vm1545_vm3, %v15415_v17 }
 0x2b5   : > { %v16054_v55 = vpop.f32.mrf.mxu0 }
 0x2b7   : > { %v16055_v57 = vpop.f32.mrf.mxu0 }
 0x2b8   : > { %v16056_v14 = vadd.f32 %v16055_v57, %v16054_v55 }
 0x2b9   : > { %v16057_v44 = vpop.f32.mrf.mxu0 }
 0x2bb   : > { %v15994_v27 = vpop.f32.mrf.mxu1  ;;  %v16058_v60 = vpop.f32.mrf.mxu0 }
 0x2bd   : > { %v15995_v29 = vpop.f32.mrf.mxu1  ;;  %v16060_v61 = vpop.f32.mrf.mxu0 }
 0x2be   : > { %v15996_v31 = vadd.f32 %v15995_v29, %v15994_v27 }
 0x2bf   : > { %v15997_v32 = vpop.f32.mrf.mxu1  ;;  %v16061_v3 = vpop.f32.mrf.mxu0 }
 0x2c0   : > { %v3662_v33 = vadd.f32 %v15996_v31, %v15968_v2  ;;  %v16062_v11 = vadd.f32 %v16061_v3, %v16060_v61 }
 0x2c1   : > { %v15998_v35 = vpop.f32.mrf.mxu1  ;;  %v16063_v51 = vpop.f32.mrf.mxu0 }
 0x2c2   : > { %v3711_v37 = vadd.f32 %v3710_v20, %v3662_v33  ;;  %v15999_v30 = vadd.f32 %v15998_v35, %v15997_v32 }
 0x2c3   : > { %v16000_v45 = vpop.f32.mrf.mxu1  ;;  %v16064_v9 = vpop.f32.mrf.mxu0 }
 0x2c4   : > { %v15418_v21 = vpack.c.bf16 %v3711_v37, %v3711_v37  ;;  %v3665_v43 = vadd.f32 %v15999_v30, %v15971_v63  ;;  %v16065_v17 = vadd.f32 %v16064_v9, %v16063_v51 }
 0x2c5   : > { %v16001_v39 = vpop.f32.mrf.mxu1 }
 0x2c6   : > { %3741 = vst.msk [vmem:[#allocation2 + $0x50] sm:$0xf] %vm1545_vm3, %v15418_v21  ;;  %v3714_v40 = vadd.f32 %v3713_v38, %v3665_v43  ;;  %v16002_v41 = vadd.f32 %v16001_v39, %v16000_v45 }
 0x2c7   : > { %v16003_v26 = vpop.f32.mrf.mxu1 }
 0x2c8   : > { %v15419_v48 = vpack.c.bf16 %v3714_v40, %v3714_v40  ;;  %v3670_v50 = vadd.f32 %v16002_v41, %v15974_v5 }
 0x2c9   : > { %v16004_v53 = vpop.f32.mrf.mxu1 }
 0x2ca   : > { %3742 = vst.msk [vmem:[#allocation2 + $0x54] sm:$0xf] %vm1545_vm3, %v15419_v48  ;;  %v3719_v54 = vadd.f32 %v17336_v25, %v3670_v50  ;;  %v16005_v59 = vadd.f32 %v16004_v53, %v16003_v26  ;;  %v16059_v25 = vadd.f32 %v16058_v60, %v16057_v44 }
 0x2cc   : > { %v15420_v56 = vpack.c.bf16 %v3719_v54, %v3719_v54  ;;  %v3673_v36 = vadd.f32 %v16005_v59, %v15977_v49 }
 0x2ce   : > { %3743 = vst.msk [vmem:[#allocation2 + $0x58] sm:$0xf] %vm1545_vm3, %v15420_v56  ;;  %v3722_v23 = vadd.f32 %v17337_v34, %v3673_v36 }
 0x2d0   : > { %v15421_v28 = vpack.c.bf16 %v3722_v23, %v3722_v23 }
 0x2d2   : > { %3744 = vst.msk [vmem:[#allocation2 + $0x5c] sm:$0xf] %vm1545_vm3, %v15421_v28 }
 0x2d5   : > { %v16086_v13 = vpop.f32.mrf.mxu0 }
 0x2d7   : > { %v16087_v1 = vpop.f32.mrf.mxu0 }
 0x2d8   : > { %v16088_v48 = vadd.f32 %v16087_v1, %v16086_v13 }
 0x2d9   : > { %v16089_v34 = vpop.f32.mrf.mxu0 }
 0x2db   : > { %v16026_v62 = vpop.f32.mrf.mxu1  ;;  %v16090_v45 = vpop.f32.mrf.mxu0 }
 0x2dc   : > { %v16091_v59 = vadd.f32 %v16090_v45, %v16089_v34 }
 0x2dd   : > { %v16027_v0 = vpop.f32.mrf.mxu1  ;;  %v16092_v21 = vpop.f32.mrf.mxu0 }
 0x2de   : > { %v16028_v12 = vadd.f32 %v16027_v0, %v16026_v62 }
 0x2df   : > { %v16029_v4 = vpop.f32.mrf.mxu1  ;;  %v16093_v43 = vpop.f32.mrf.mxu0 }
 0x2e0   : > { %v4101_v47 = vadd.f32 %v16056_v14, %v16028_v12  ;;  %v16094_v44 = vadd.f32 %v16093_v43, %v16092_v21 }
 0x2e1   : > { %v16030_v42 = vpop.f32.mrf.mxu1  ;;  %v16095_v38 = vpop.f32.mrf.mxu0 }
 0x2e2   : > { %v16031_v18 = vadd.f32 %v16030_v42, %v16029_v4 }
 0x2e3   : > { %v16032_v58 = vpop.f32.mrf.mxu1  ;;  %v16096_v39 = vpop.f32.mrf.mxu0 }
 0x2e4   : > { %v4104_v33 = vadd.f32 %v16059_v25, %v16031_v18  ;;  %v16097_v42 = vadd.f32 %v16096_v39, %v16095_v38  ;;  %v18271_v39 = vld [vmem:[#allocation2 + $0x18] sm:$0xff]  }
 0x2e5   : > { %v16033_v6 = vpop.f32.mrf.mxu1  ;;  %v17352_v5 = vpop.f32.mrf.mxu0 }
 0x2e6   : > { %v16034_v8 = vadd.f32 %v16033_v6, %v16032_v58 }
 0x2e7   : > { %v16035_v10 = vpop.f32.mrf.mxu1  ;;  %v4588_v41 = vpop.f32.mrf.mxu0 }
 0x2e8   : > { %v4109_v7 = vadd.f32 %v16062_v11, %v16034_v8 }
 0x2e9   : > { %v16036_v19 = vpop.f32.mrf.mxu1  ;;  %v17353_v49 = vpop.f32.mrf.mxu0 }
 0x2ea   : > { %v16037_v15 = vadd.f32 %v16036_v19, %v16035_v10 }
 0x2eb   : > { %v17344_v16 = vpop.f32.mrf.mxu1  ;;  %v4591_v28 = vpop.f32.mrf.mxu0 }
 0x2ec   : > { %v4158_v22 = vadd.f32 %v17344_v16, %v4109_v7  ;;  %v4112_v29 = vadd.f32 %v16065_v17, %v16037_v15  ;;  %v18263_v15 = vld [vmem:[#allocation2 + $0x38] sm:$0xff]  }
 0x2ed   : > { %v4149_v24 = vpop.f32.mrf.mxu1 }
 0x2ee   : > { %v15424_v27 = vpack.c.bf16 %v4158_v22, %v4158_v22  ;;  %v4150_v20 = vadd.f32 %v4149_v24, %v4101_v47  ;;  %v18265_v22 = vld [vmem:[#allocation2 + $0x30] sm:$0xff]  }
 0x2ef   : > { %v17345_v2 = vpop.f32.mrf.mxu1 }
 0x2f0   : > { %4182 = vst.msk [vmem:[#allocation2 + $0x68] sm:$0xf] %vm1545_vm3, %v15424_v27  ;;  %v15422_v31 = vpack.c.bf16 %v4150_v20, %v4150_v20  ;;  %v4161_v32 = vadd.f32 %v17345_v2, %v4112_v29  ;;  %v18267_v27 = vld [vmem:[#allocation2 + $0x28] sm:$0xff]  }
 0x2f1   : > { %v4152_v35 = vpop.f32.mrf.mxu1 }
 0x2f2   : > { %4180 = vst.msk [vmem:[#allocation2 + $0x60] sm:$0xf] %vm1545_vm3, %v15422_v31  ;;  %v15425_v63 = vpack.c.bf16 %v4161_v32, %v4161_v32  ;;  %v4153_v37 = vadd.f32 %v4152_v35, %v4104_v33  ;;  %v18269_v33 = vld [vmem:[#allocation2 + $0x20] sm:$0xff]   ;;  %v18270_v35 = vld [vmem:[#allocation2 + $0x58] sm:$0xff]  }
 0x2f4   : > { %4183 = vst.msk [vmem:[#allocation2 + $0x6c] sm:$0xf] %vm1545_vm3, %v15425_v63  ;;  %v15423_v30 = vpack.c.bf16 %v4153_v37, %v4153_v37 }
 0x2f6   : > { %4181 = vst.msk [vmem:[#allocation2 + $0x64] sm:$0xf] %vm1545_vm3, %v15423_v30 }
 0x2fb   : > { %v18266_v1 = vld [vmem:[#allocation2 + $0x68] sm:$0xff]  }
 0x2fd   : > { %v18268_v29 = vld [vmem:[#allocation2 + $0x60] sm:$0xff]  }
 0x305   : > { %v16174_v9 = vpop.f32.mrf.mxu0 }
 0x307   : > { %v16175_v12 = vpop.f32.mrf.mxu0 }
 0x308   : > { %v16176_v21 = vadd.f32 %v16175_v12, %v16174_v9  ;;  %v18283_v9 = vld [vmem:[%s22815_s4 + $0x1c] ss:$12 sps:$4 sm:$0xff]  }
 0x309   : > { %v16177_v13 = vpop.f32.mrf.mxu0  ;;  %v18296_v12 = vld [vmem:[%s22817_s6 + $0x38] sm:$0x1f]  }
 0x30b   : > { %v16114_v40 = vpop.f32.mrf.mxu1  ;;  %v16178_v19 = vpop.f32.mrf.mxu0 }
 0x30d   : > { %v16115_v26 = vpop.f32.mrf.mxu1  ;;  %v16180_v17 = vpop.f32.mrf.mxu0 }
 0x30e   : > { %v16116_v50 = vadd.f32 %v16115_v26, %v16114_v40  ;;  %v18272_v40 = vld [vmem:[#allocation2 + $0x50] sm:$0xff]  }
 0x30f   : > { %v16117_v52 = vpop.f32.mrf.mxu1  ;;  %v16181_v24 = vpop.f32.mrf.mxu0 }
 0x310   : > { %v4540_v53 = vadd.f32 %v16116_v50, %v16088_v48  ;;  %v16182_v63 = vadd.f32 %v16181_v24, %v16180_v17  ;;  %v18298_v17 = vld [vmem:[%s22817_s6 + $0x30] sm:$0xff]   ;;  %v18300_v24 = vld [vmem:[%s22817_s6 + $0x28] sm:$0xff]  }
 0x311   : > { %v16118_v54 = vpop.f32.mrf.mxu1  ;;  %v16183_v2 = vpop.f32.mrf.mxu0 }
 0x312   : > { %v4589_v55 = vadd.f32 %v4588_v41, %v4540_v53  ;;  %v16119_v56 = vadd.f32 %v16118_v54, %v16117_v52  ;;  %v16179_v53 = vadd.f32 %v16178_v19, %v16177_v13  ;;  %v18285_v19 = vld [vmem:[%s22815_s4 + $0x18] ss:$12 sps:$4 sm:$0xff]  }
 0x313   : > { %v16120_v36 = vpop.f32.mrf.mxu1  ;;  %v16184_v30 = vpop.f32.mrf.mxu0 }
 0x314   : > { %v15426_v23 = vpack.c.bf16 %v4589_v55, %v4589_v55  ;;  %v4543_v57 = vadd.f32 %v16119_v56, %v16091_v59  ;;  %v16185_v41 = vadd.f32 %v16184_v30, %v16183_v2  ;;  %v18273_v55 = vld [vmem:[#allocation2 + $0x10] sm:$0xff]   ;;  %v18305_v2 = vld [vmem:[%s22817_s6 + $0x58] sm:$0xff]  }
 0x315   : > { %v16121_v46 = vpop.f32.mrf.mxu1  ;;  %v18313_v30 = vld [vmem:[%s22817_s6 + $0xf8] sm:$0x1f]  }
 0x316   : > { %4619 = vst.msk [vmem:[#allocation2 + $0x70] sm:$0xf] %vm1545_vm3, %v15426_v23  ;;  %v4592_v60 = vadd.f32 %v4591_v28, %v4543_v57  ;;  %v16122_v61 = vadd.f32 %v16121_v46, %v16120_v36  ;;  %v18274_v36 = vld [vmem:[#allocation2 + $0x48] sm:$0xff]   ;;  %v18849_v23 = vmov 65535  }
 0x317   : > { %v16123_v62 = vpop.f32.mrf.mxu1  ;;  %v5563_v57 = vsel %vm5561_vm5, 4294967295, %v18849_v23 }
 0x318   : > { %v15427_v0 = vpack.c.bf16 %v4592_v60, %v4592_v60  ;;  %v4548_v3 = vadd.f32 %v16122_v61, %v16094_v44  ;;  %v18297_v61 = vld [vmem:[%s22817_s6 + $0x78] sm:$0x1f]  }
 0x319   : > { %v16124_v4 = vpop.f32.mrf.mxu1 }
 0x31a   : > { %4620 = vst.msk [vmem:[#allocation2 + $0x74] sm:$0xf] %vm1545_vm3, %v15427_v0  ;;  %v4597_v51 = vadd.f32 %v17352_v5, %v4548_v3  ;;  %v16125_v58 = vadd.f32 %v16124_v4, %v16123_v62  ;;  %v18275_v3 = vld [vmem:[#allocation2 + $0x8] sm:$0xff]   ;;  %v20431_v4 = vsel %vm5562_vm6, %v5563_v57, 0 }
 0x31c   : > { %v15428_v6 = vpack.c.bf16 %v4597_v51, %v4597_v51  ;;  %v4551_v8 = vadd.f32 %v16125_v58, %v16097_v42  ;;  %v18276_v42 = vld [vmem:[#allocation2 + $0x40] sm:$0xff]   ;;  %v5739_v58 = vand.u32 %v18297_v61, %v20431_v4 }
 0x31e   : > { %4621 = vst.msk [vmem:[#allocation2 + $0x78] sm:$0xf] %vm1545_vm3, %v15428_v6  ;;  %v4600_v10 = vadd.f32 %v17353_v49, %v4551_v8  ;;  %v18277_v6 = vld [vmem:[#allocation2] sm:$0xff]  }
 0x31f   : > { %v18278_v8 = vld [vmem:[%s22815_s4] ss:$12 sps:$4 sm:$0xff]  }
 0x320   : > { %v15429_v11 = vpack.c.bf16 %v4600_v10, %v4600_v10  ;;  %v18299_v10 = vld [vmem:[%s22817_s6 + $0x70] sm:$0xff]  }
 0x321   : > { %v18264_v16 = vld [vmem:[#allocation2 + $0x70] sm:$0xff]  }
 0x322   : > { %4622 = vst.msk [vmem:[#allocation2 + $0x7c] sm:$0xf] %vm1545_vm3, %v15429_v11 }
 0x329   : > { %v18262_v14 = vld [vmem:[#allocation2 + $0x78] sm:$0xff]  }
 0x32a   : > { %16190 = vmatprep.subr.bf16.mxu0 %v18262_v14  ;;  %v5566_v14 = vand.u32 %v18296_v12, %v20431_v4 }
 0x32b   : > { %v16146_v7 = vpop.f32.mrf.mxu1  ;;  %16191 = vmatpush3.bf16.msra.mxu0 %v18263_v15  ;;  %v18288_v15 = vld [vmem:[%s22815_s4 + $0x34] ss:$12 sps:$4 sm:$0xff]  }
 0x32c   : > { %16192 = vmatprep.subr.bf16.mxu0 %v18264_v16  ;;  %v18291_v16 = vld [vmem:[%s22815_s4 + $0x38] ss:$12 sps:$4 sm:$0xff]  }
 0x32d   : > { %v16147_v18 = vpop.f32.mrf.mxu1 }
 0x32e   : > { %v16148_v37 = vadd.f32 %v16147_v18, %v16146_v7  ;;  %v18287_v7 = vld [vmem:[%s22815_s4 + $0x20] ss:$12 sps:$4 sm:$0xff]   ;;  %v18290_v18 = vld [vmem:[%s22815_s4 + $0x30] ss:$12 sps:$4 sm:$0xff]  }
 0x32f   : > { %v16149_v47 = vpop.f32.mrf.mxu1  ;;  %16193 = vmatpush3.bf16.msra.mxu0 %v18265_v22  ;;  %v18293_v22 = vld [vmem:[%s22815_s4 + $0x4c] ss:$12 sps:$4 sm:$0xff]  }
 0x330   : > { %16194 = vmatprep.subr.bf16.mxu0 %v18266_v1  ;;  %v4979_v50 = vadd.f32 %v16176_v21, %v16148_v37  ;;  %v18295_v1 = vld [vmem:[%s22815_s4 + $0x48] ss:$12 sps:$4 sm:$0xff]   ;;  %v18312_v37 = vld [vmem:[%s22817_s6 + $0xb8] sm:$0x1f]   ;;  %v6083_v21 = vand.u32 %v18313_v30, %v20431_v4 }
 0x331   : > { %v16150_v25 = vpop.f32.mrf.mxu1 }
 0x332   : > { %v16151_v26 = vadd.f32 %v16150_v25, %v16149_v47  ;;  %v18292_v47 = vld [vmem:[%s22815_s4 + $0x50] ss:$12 sps:$4 sm:$0xff]   ;;  %v18301_v25 = vld [vmem:[%s22817_s6 + $0x68] sm:$0xff]  }
 0x333   : > { %v16152_v20 = vpop.f32.mrf.mxu1  ;;  %16195 = vmatpush3.bf16.msra.mxu0 %v18267_v27  ;;  %v18302_v27 = vld [vmem:[%s22817_s6 + $0x20] sm:$0xff]  }
 0x334   : > { %16196 = vmatprep.subr.bf16.mxu0 %v18268_v29  ;;  %v4982_v44 = vadd.f32 %v16179_v53, %v16151_v26  ;;  %v18304_v29 = vld [vmem:[%s22817_s6 + $0x18] sm:$0xff]   ;;  %v5130_v26 = vpop.permute.xlu1 %5129 }
 0x335   : > { %v16153_v31 = vpop.f32.mrf.mxu1 }
 0x336   : > { %v16154_v32 = vadd.f32 %v16153_v31, %v16152_v20  ;;  %v18303_v20 = vld [vmem:[%s22817_s6 + $0x60] sm:$0xff]   ;;  %v18306_v31 = vld [vmem:[%s22817_s6 + $0x10] sm:$0xff]  }
 0x337   : > { %v16155_v34 = vpop.f32.mrf.mxu1  ;;  %16197 = vmatpush3.bf16.msra.mxu0 %v18269_v33  ;;  %v18308_v33 = vld [vmem:[%s22817_s6 + $0x8] sm:$0xff]  }
 0x338   : > { %16198 = vmatprep.subr.bf16.mxu0 %v18270_v35  ;;  %v4987_v38 = vadd.f32 %v16182_v63, %v16154_v32  ;;  %v18307_v32 = vld [vmem:[%s22817_s6 + $0x50] sm:$0xff]   ;;  %v18310_v35 = vld [vmem:[%s22817_s6] sm:$0xff]  }
 0x339   : > { %v16156_v45 = vpop.f32.mrf.mxu1  ;;  %v18311_v63 = vld [vmem:[%s22817_s6 + $0x40] sm:$0xff]  }
 0x33a   : > { %v16157_v43 = vadd.f32 %v16156_v45, %v16155_v34  ;;  %v18309_v34 = vld [vmem:[%s22817_s6 + $0x48] sm:$0xff]   ;;  %v5911_v45 = vand.u32 %v18312_v37, %v20431_v4 }
 0x33b   : > { %v17360_v5 = vpop.f32.mrf.mxu1  ;;  %16199 = vmatpush3.bf16.msra.mxu0 %v18271_v39 }
 0x33c   : > { %v5036_v48 = vadd.f32 %v17360_v5, %v4987_v38  ;;  %16200 = vmatprep.subr.bf16.mxu0 %v18272_v40  ;;  %v4990_v59 = vadd.f32 %v16185_v41, %v16157_v43  ;;  %v5125_v5 = vpop.permute.xlu0 %5124 }
 0x33d   : > { %v5027_v52 = vpop.f32.mrf.mxu1 }
 0x33e   : > { %v15432_v49 = vpack.c.bf16 %v5036_v48, %v5036_v48  ;;  %v5028_v54 = vadd.f32 %v5027_v52, %v4979_v50 }
 0x33f   : > { %v17361_v56 = vpop.f32.mrf.mxu1  ;;  %16201 = vmatpush3.bf16.msra.mxu0 %v18273_v55 }
 0x340   : > { %5060 = vst.msk [vmem:[#allocation2 + $0x88] sm:$0xf] %vm1545_vm3, %v15432_v49  ;;  %v15430_v28 = vpack.c.bf16 %v5028_v54, %v5028_v54  ;;  %v5039_v46 = vadd.f32 %v17361_v56, %v4990_v59  ;;  %16202 = vmatprep.subr.bf16.mxu0 %v18274_v36  ;;  %v5135_v53 = vpop.permute.xlu0 %5134 }
 0x341   : > { %v5030_v60 = vpop.f32.mrf.mxu1 }
 0x342   : > { %5058 = vst.msk [vmem:[#allocation2 + $0x80] sm:$0xf] %vm1545_vm3, %v15430_v28  ;;  %v15433_v62 = vpack.c.bf16 %v5039_v46, %v5039_v46  ;;  %v5031_v0 = vadd.f32 %v5030_v60, %v4982_v44  ;;  %v5140_v28 = vpop.permute.xlu1 %5139 }
 0x343   : > { %16203 = vmatpush3.bf16.msra.mxu0 %v18275_v3 }
 0x344   : > { %5061 = vst.msk [vmem:[#allocation2 + $0x8c] sm:$0xf] %vm1545_vm3, %v15433_v62  ;;  %v15431_v51 = vpack.c.bf16 %v5031_v0, %v5031_v0  ;;  %16204 = vmatprep.subr.bf16.mxu0 %v18276_v42 }
 0x346   : > { %5059 = vst.msk [vmem:[#allocation2 + $0x84] sm:$0xf] %vm1545_vm3, %v15431_v51 }
 0x347   : > { %16205 = vmatpush3.bf16.msra.mxu0 %v18277_v6  ;;  %v5145_v6 = vpop.permute.xlu0 %5144 }
 0x348   : > { %17398 = vmatprep.subr.bf16.mxu0 %v5739_v58 }
 0x34a   : > { %5376 = vmatmul.mubr.bf16.vlgmr.msra.gmra.mxu0 %v18278_v8 }
 0x34b   : > { %v18281_v11 = vld [vmem:[#allocation2 + $0x88] sm:$0xff]   ;;  %5383 = vmatprep.mubr.bf16.mxu0 %v18283_v9  ;;  %17399 = vmatpush3.bf16.msra.mxu0 %v5739_v58 }
 0x34c   : > { %17362 = vmatprep.subr.bf16.mxu1 %v18281_v11  ;;  %17400 = vmatprep.subr.bf16.mxu0 %v18299_v10 }
 0x34d   : > { %v18282_v13 = vld [vmem:[#allocation2 + $0x80] sm:$0xff]   ;;  %17363 = vmatpush3.bf16.msra.mxu1 %v18281_v11 }
 0x34e   : > { %17364 = vmatprep.subr.bf16.mxu1 %v18282_v13 }
 0x34f   : > { %17401 = vmatpush3.bf16.msra.mxu0 %v18299_v10 }
 0x350   : > { %17402 = vmatprep.subr.bf16.mxu0 %v18301_v25 }
 0x351   : > { %17365 = vmatpush3.bf16.msra.mxu1 %v18282_v13 }
 0x352   : > { %5384 = vmatmul.mubr.bf16.gmra.mxu0 %v18285_v19  ;;  %17374 = vmatprep.subr.bf16.mxu1 %v5566_v14 }
 0x353   : > { %5391 = vmatprep.mubr.bf16.mxu0 %v18288_v15  ;;  %17403 = vmatpush3.bf16.msra.mxu0 %v18301_v25 }
 0x354   : > { %17367 = vmatmul.mubr.msk.bf16.vlgmr.msra.gmra.mxu1 %vm5330_vm4, %v18287_v7  ;;  %17404 = vmatprep.subr.bf16.mxu0 %v18303_v20 }
 0x355   : > { %17370 = vmatprep.mubr.msk.bf16.mxu1 %vm5330_vm4, %v18291_v16  ;;  %17375 = vmatpush3.bf16.msra.mxu1 %v5566_v14 }
 0x356   : > { %17376 = vmatprep.subr.bf16.mxu1 %v18298_v17 }
 0x357   : > { %17405 = vmatpush3.bf16.msra.mxu0 %v18303_v20 }
 0x358   : > { %17406 = vmatprep.subr.bf16.mxu0 %v18305_v2 }
 0x359   : > { %17377 = vmatpush3.bf16.msra.mxu1 %v18298_v17 }
 0x35a   : > { %5392 = vmatmul.mubr.bf16.gmra.mxu0 %v18290_v18  ;;  %17378 = vmatprep.subr.bf16.mxu1 %v18300_v24  ;;  %v5150_v18 = vpop.permute.xlu1 %5149 }
 0x35b   : > { %5399 = vmatprep.mubr.bf16.mxu0 %v18293_v22  ;;  %17407 = vmatpush3.bf16.msra.mxu0 %v18305_v2 }
 0x35c   : > { %17371 = vmatmul.mubr.msk.bf16.gmra.mxu1 %vm5330_vm4, %v18292_v47  ;;  %17408 = vmatprep.subr.bf16.mxu0 %v18307_v32 }
 0x35d   : > { %17379 = vmatpush3.bf16.msra.mxu1 %v18300_v24  ;;  %v18315_v24 = vld [vmem:[%s22817_s6 + $0xf0] sm:$0xff]  }
 0x35e   : > { %17380 = vmatprep.subr.bf16.mxu1 %v18302_v27 }
 0x35f   : > { %17409 = vmatpush3.bf16.msra.mxu0 %v18307_v32 }
 0x360   : > { %17410 = vmatprep.subr.bf16.mxu0 %v18309_v34 }
 0x361   : > { %17381 = vmatpush3.bf16.msra.mxu1 %v18302_v27 }
 0x362   : > { %5400 = vmatmul.mubr.bf16.gmra.mxu0 %v18295_v1  ;;  %17382 = vmatprep.subr.bf16.mxu1 %v18304_v29  ;;  %v18314_v1 = vld [vmem:[%s22817_s6 + $0xb0] sm:$0xff]  }
 0x363   : > { %17411 = vmatpush3.bf16.msra.mxu0 %v18309_v34  ;;  %v18317_v34 = vld [vmem:[%s22817_s6 + $0xe8] sm:$0xff]  }
 0x364   : > { %17412 = vmatprep.subr.bf16.mxu0 %v18311_v63 }
 0x365   : > { %17383 = vmatpush3.bf16.msra.mxu1 %v18304_v29 }
 0x366   : > { %17384 = vmatprep.subr.bf16.mxu1 %v18306_v31 }
 0x367   : > { %17413 = vmatpush3.bf16.msra.mxu0 %v18311_v63 }
 0x368   : > { %17446 = vmatprep.subr.bf16.mxu0 %v6083_v21 }
 0x369   : > { %17385 = vmatpush3.bf16.msra.mxu1 %v18306_v31 }
 0x36a   : > { %17386 = vmatprep.subr.bf16.mxu1 %v18308_v33 }
 0x36d   : > { %17387 = vmatpush3.bf16.msra.mxu1 %v18308_v33  ;;  %v18316_v33 = vld [vmem:[%s22817_s6 + $0xa8] sm:$0xff]  }
 0x36e   : > { %17388 = vmatprep.subr.bf16.mxu1 %v18310_v35 }
 0x371   : > { %17389 = vmatpush3.bf16.msra.mxu1 %v18310_v35  ;;  %v5155_v35 = vpop.permute.xlu0 %5154 }
 0x372   : > { %17422 = vmatprep.subr.bf16.mxu1 %v5911_v45 }
 0x40a   : > { %v16206_v43 = vpop.f32.mrf.mxu0 }
 0x40c   : > { %v16207_v38 = vpop.f32.mrf.mxu0 }
 0x40d   : > { %v16208_v48 = vadd.f32 %v16207_v38, %v16206_v43 }
 0x40e   : > { %v16209_v39 = vpop.f32.mrf.mxu0 }
 0x40f   : > { %v5378_v36 = vadd.f32 %v16208_v48, %v5125_v5  ;;  %v18319_v5 = vld [vmem:[%s22817_s6 + $0xe0] sm:$0xff]  }
 0x410   : > { %v16210_v40 = vpop.f32.mrf.mxu0 }
 0x411   : > { %v16211_v49 = vadd.f32 %v16210_v40, %v16209_v39  ;;  %v18318_v39 = vld [vmem:[%s22817_s6 + $0xa0] sm:$0xff]   ;;  %v5160_v40 = vpop.permute.xlu1 %5159 }
 0x412   : > { %v16212_v41 = vpop.f32.mrf.mxu0 }
 0x413   : > { %v5381_v60 = vadd.f32 %v16211_v49, %v5130_v26 }
 0x414   : > { %v16213_v50 = vpop.f32.mrf.mxu0  ;;  %v17368_v52 = vpop.f32.mrf.mxu1 }
 0x415   : > { %v16214_v54 = vadd.f32 %v16213_v50, %v16212_v41  ;;  %v18320_v50 = vld [vmem:[%s22817_s6 + $0x98] sm:$0xff]  }
 0x416   : > { %v16215_v59 = vpop.f32.mrf.mxu0  ;;  %v5442_v55 = vpop.f32.mrf.mxu1 }
 0x417   : > { %v5386_v56 = vadd.f32 %v16214_v54, %v5135_v53  ;;  %v5443_v46 = vadd.f32 %v5442_v55, %v5378_v36  ;;  %v18323_v55 = vld [vmem:[%s22817_s6 + $0xd0] sm:$0xff]   ;;  %v18325_v36 = vld [vmem:[%s22817_s6 + $0xc8] sm:$0xff]  }
 0x418   : > { %v16216_v23 = vpop.f32.mrf.mxu0  ;;  %v17369_v57 = vpop.f32.mrf.mxu1 }
 0x419   : > { %v16217_v44 = vadd.f32 %v16216_v23, %v16215_v59  ;;  %v5451_v0 = vadd.f32 %v17368_v52, %v5386_v56  ;;  %v5473_v8 = vmax.f32 %v5443_v46, 0.0  ;;  %v18321_v52 = vld [vmem:[%s22817_s6 + $0xd8] sm:$0xff]   ;;  %v18322_v59 = vld [vmem:[%s22817_s6 + $0x90] sm:$0xff]   ;;  %v18324_v56 = vld [vmem:[%s22817_s6 + $0x88] sm:$0xff]  }
 0x41a   : > { %v16218_v61 = vpop.f32.mrf.mxu0  ;;  %v5445_v62 = vpop.f32.mrf.mxu1  ;;  %v18326_v23 = vld [vmem:[%s22817_s6 + $0x80] sm:$0xff]   ;;  %v18329_v46 = vld [vmem:[%s22817_s6 + $0x178] sm:$0x1f]  }
 0x41b   : > { %v5389_v3 = vadd.f32 %v16217_v44, %v5140_v28  ;;  %v5446_v42 = vadd.f32 %v5445_v62, %v5381_v60  ;;  %v5475_v19 = vmax.f32 %v5451_v0, 0.0  ;;  %v18328_v28 = vld [vmem:[%s22817_s6 + $0x138] sm:$0x1f]   ;;  %v6427_v60 = vand.u32 %v18329_v46, %v20431_v4  ;;  %v18331_v62 = vld [vmem:[%s22817_s6 + $0x170] sm:$0xff]   ;;  %v18332_v0 = vld [vmem:[%s22817_s6 + $0x128] sm:$0xff]  }
 0x41c   : > { %v16219_v51 = vpop.f32.mrf.mxu0  ;;  %v17372_v58 = vpop.f32.mrf.mxu1  ;;  %v6255_v44 = vand.u32 %v18328_v28, %v20431_v4 }
 0x41d   : > { %v5454_v9 = vadd.f32 %v17369_v57, %v5389_v3  ;;  %v5474_v10 = vmax.f32 %v5446_v42, 0.0  ;;  %v16220_v11 = vadd.f32 %v16219_v51, %v16218_v61  ;;  %v18327_v57 = vld [vmem:[%s22817_s6 + $0xc0] sm:$0xff]   ;;  %v18330_v61 = vld [vmem:[%s22817_s6 + $0x130] sm:$0xff]   ;;  %v18333_v3 = vld [vmem:[%s22817_s6 + $0x168] sm:$0xff]  }
 0x41e   : > { %v16221_v12 = vpop.f32.mrf.mxu0  ;;  %v5458_v13 = vpop.f32.mrf.mxu1  ;;  %v18334_v42 = vld [vmem:[%s22817_s6 + $0x120] sm:$0xff]  }
 0x41f   : > { %v5476_v14 = vmax.f32 %v5454_v9, 0.0  ;;  %v20523_v15 = vpack.c.bf16 %v5474_v10, %v5473_v8  ;;  %v5394_v7 = vadd.f32 %v16220_v11, %v5145_v6  ;;  %v18335_v51 = vld [vmem:[%s22817_s6 + $0x160] sm:$0xff]   ;;  %v18337_v6 = vld [vmem:[%s22817_s6 + $0x158] sm:$0xff]   ;;  %v18338_v8 = vld [vmem:[%s22817_s6 + $0x110] sm:$0xff]  }
 0x420   : > { %v16222_v16 = vpop.f32.mrf.mxu0  ;;  %v17373_v17 = vpop.f32.mrf.mxu1  ;;  %v18339_v9 = vld [vmem:[%s22817_s6 + $0x150] sm:$0xff]   ;;  %v18340_v10 = vld [vmem:[%s22817_s6 + $0x108] sm:$0xff]  }
 0x421   : > { %v20525_v22 = vpack.c.bf16 %v5476_v14, %v5475_v19  ;;  %v16223_v47 = vadd.f32 %v16222_v16, %v16221_v12  ;;  %17390 = vmatprep.mubr.msk.bf16.mxu1 %vm5548_vm7, %v20523_v15  ;;  %17414 = vmatprep.mubr.msk.bf16.mxu0 %vm5548_vm7, %v20523_v15  ;;  %v5459_v20 = vadd.f32 %v5458_v13, %v5394_v7  ;;  %v18341_v11 = vld [vmem:[%s22817_s6 + $0x148] sm:$0xff]   ;;  %v18342_v12 = vld [vmem:[%s22817_s6 + $0x100] sm:$0xff]   ;;  %v18344_v19 = vld [vmem:[%s22817_s6 + $0x1b8] sm:$0x1f]  }
 0x422   : > { %v16224_v25 = vpop.f32.mrf.mxu0  ;;  %v5461_v27 = vpop.f32.mrf.mxu1  ;;  %v18343_v13 = vld [vmem:[%s22817_s6 + $0x140] sm:$0xff]   ;;  %v18345_v14 = vld [vmem:[%s22817_s6 + $0x1f8] sm:$0x1f]   ;;  %v6599_v7 = vand.u32 %v18344_v19, %v20431_v4 }
 0x423   : > { %17391 = vmatmul.mubr.msk.bf16.vlgmr.msra.gmra.mxu1 %vm5548_vm7, %v20525_v22  ;;  %17415 = vmatmul.mubr.msk.bf16.vlgmr.msra.gmra.mxu0 %vm5548_vm7, %v20525_v22  ;;  %v5397_v29 = vadd.f32 %v16223_v47, %v5150_v18  ;;  %v5477_v37 = vmax.f32 %v5459_v20, 0.0  ;;  %v6771_v16 = vand.u32 %v18345_v14, %v20431_v4  ;;  %v18347_v18 = vld [vmem:[%s22817_s6 + $0x1f0] sm:$0xff]   ;;  %v18348_v47 = vld [vmem:[%s22817_s6 + $0x1a8] sm:$0xff]   ;;  %v18353_v20 = vld [vmem:[%s22817_s6 + $0x1d8] sm:$0xff]  }
 0x424   : > { %17423 = vmatpush3.bf16.msra.mxu1 %v5911_v45  ;;  %17447 = vmatpush3.bf16.msra.mxu0 %v6083_v21  ;;  %v16225_v2 = vpop.f32.mrf.mxu0 }
 0x425   : > { %v16226_v31 = vadd.f32 %v16225_v2, %v16224_v25  ;;  %v5462_v32 = vadd.f32 %v5461_v27, %v5397_v29  ;;  %17424 = vmatprep.subr.bf16.mxu1 %v18314_v1  ;;  %17448 = vmatprep.subr.bf16.mxu0 %v18315_v24  ;;  %v18351_v25 = vld [vmem:[%s22817_s6 + $0x1e0] sm:$0xff]   ;;  %v18352_v27 = vld [vmem:[%s22817_s6 + $0x198] sm:$0xff]   ;;  %v18354_v29 = vld [vmem:[%s22817_s6 + $0x190] sm:$0xff]  }
 0x426   : > { %v16227_v63 = vpop.f32.mrf.mxu0  ;;  %v18355_v2 = vld [vmem:[%s22817_s6 + $0x1d0] sm:$0xff]  }
 0x427   : > { %v5402_v30 = vadd.f32 %v16226_v31, %v5155_v35  ;;  %v5478_v43 = vmax.f32 %v5462_v32, 0.0  ;;  %v18356_v31 = vld [vmem:[%s22817_s6 + $0x188] sm:$0xff]   ;;  %v18360_v35 = vld [vmem:[%s22817_s6 + $0x238] sm:$0x1f]  }
 0x428   : > { %17425 = vmatpush3.bf16.msra.mxu1 %v18314_v1  ;;  %17449 = vmatpush3.bf16.msra.mxu0 %v18315_v24  ;;  %v16228_v45 = vpop.f32.mrf.mxu0  ;;  %v18349_v1 = vld [vmem:[%s22817_s6 + $0x1e8] sm:$0xff]   ;;  %v18350_v24 = vld [vmem:[%s22817_s6 + $0x1a0] sm:$0xff]  }
 0x429   : > { %v20547_v21 = vpack.c.bf16 %v5478_v43, %v5477_v37  ;;  %v16229_v38 = vadd.f32 %v16228_v45, %v16227_v63  ;;  %17426 = vmatprep.subr.bf16.mxu1 %v18316_v33  ;;  %17450 = vmatprep.subr.bf16.mxu0 %v18317_v34  ;;  %v5467_v41 = vadd.f32 %v17372_v58, %v5402_v30  ;;  %v18336_v58 = vld [vmem:[%s22817_s6 + $0x118] sm:$0xff]   ;;  %v18357_v32 = vld [vmem:[%s22817_s6 + $0x1c8] sm:$0xff]   ;;  %v18361_v37 = vld [vmem:[%s22817_s6 + $0x230] sm:$0xff]  }
 0x42a   : > { %v6943_v63 = vand.u32 %v18360_v35, %v20431_v4  ;;  %v18362_v30 = vld [vmem:[%s22817_s6 + $0x228] sm:$0xff]   ;;  %v18363_v43 = vld [vmem:[%s22817_s6 + $0x220] sm:$0xff]   ;;  %v18364_v45 = vld [vmem:[%s22817_s6 + $0x218] sm:$0xff]  }
 0x42b   : > { %v5405_v26 = vadd.f32 %v16229_v38, %v5160_v40  ;;  %17394 = vmatprep.mubr.msk.bf16.mxu1 %vm5548_vm7, %v20547_v21  ;;  %17418 = vmatprep.mubr.msk.bf16.mxu0 %vm5548_vm7, %v20547_v21  ;;  %v5479_v53 = vmax.f32 %v5467_v41, 0.0  ;;  %v18365_v38 = vld [vmem:[%s22817_s6 + $0x210] sm:$0xff]  }
 0x42c   : > { %17427 = vmatpush3.bf16.msra.mxu1 %v18316_v33  ;;  %17451 = vmatpush3.bf16.msra.mxu0 %v18317_v34  ;;  %v18358_v33 = vld [vmem:[%s22817_s6 + $0x180] sm:$0xff]  }
 0x42d   : > { %v5470_v48 = vadd.f32 %v17373_v17, %v5405_v26  ;;  %17428 = vmatprep.subr.bf16.mxu1 %v18318_v39  ;;  %17452 = vmatprep.subr.bf16.mxu0 %v18319_v5  ;;  %v18346_v17 = vld [vmem:[%s22817_s6 + $0x1b0] sm:$0xff]   ;;  %v18359_v34 = vld [vmem:[%s22817_s6 + $0x1c0] sm:$0xff]  }
 0x42f   : > { %v5480_v49 = vmax.f32 %v5470_v48, 0.0 }
 0x430   : > { %17429 = vmatpush3.bf16.msra.mxu1 %v18318_v39  ;;  %17453 = vmatpush3.bf16.msra.mxu0 %v18319_v5  ;;  %v18366_v39 = vld [vmem:[%s22817_s6 + $0x208] sm:$0xff]   ;;  %v18386_v5 = vld [vmem:[%s22818_s7 + $0x4] ss:$20 sps:$4 sm:$0xff]  }
 0x431   : > { %v20565_v54 = vpack.c.bf16 %v5480_v49, %v5479_v53  ;;  %17430 = vmatprep.subr.bf16.mxu1 %v18320_v50  ;;  %17454 = vmatprep.subr.bf16.mxu0 %v18321_v52 }
 0x433   : > { %17395 = vmatmul.mubr.msk.bf16.gmra.mxu1 %vm5548_vm7, %v20565_v54  ;;  %17419 = vmatmul.mubr.msk.bf16.gmra.mxu0 %vm5548_vm7, %v20565_v54 }
 0x434   : > { %17431 = vmatpush3.bf16.msra.mxu1 %v18320_v50  ;;  %17455 = vmatpush3.bf16.msra.mxu0 %v18321_v52 }
 0x435   : > { %17438 = vmatprep.mubr.msk.bf16.mxu1 %vm5548_vm7, %v20523_v15  ;;  %17462 = vmatprep.mubr.msk.bf16.mxu0 %vm5548_vm7, %v20523_v15 }
 0x436   : > { %17432 = vmatprep.subr.bf16.mxu1 %v18322_v59  ;;  %17456 = vmatprep.subr.bf16.mxu0 %v18323_v55 }
 0x438   : > { %17433 = vmatpush3.bf16.msra.mxu1 %v18322_v59  ;;  %17457 = vmatpush3.bf16.msra.mxu0 %v18323_v55 }
 0x439   : > { %17434 = vmatprep.subr.bf16.mxu1 %v18324_v56  ;;  %17458 = vmatprep.subr.bf16.mxu0 %v18325_v36 }
 0x43c   : > { %17435 = vmatpush3.bf16.msra.mxu1 %v18324_v56  ;;  %17459 = vmatpush3.bf16.msra.mxu0 %v18325_v36 }
 0x43d   : > { %17436 = vmatprep.subr.bf16.mxu1 %v18326_v23  ;;  %17460 = vmatprep.subr.bf16.mxu0 %v18327_v57 }
 0x440   : > { %17437 = vmatpush3.bf16.msra.mxu1 %v18326_v23  ;;  %17461 = vmatpush3.bf16.msra.mxu0 %v18327_v57 }
 0x441   : > { %17470 = vmatprep.subr.bf16.mxu1 %v6255_v44  ;;  %17494 = vmatprep.subr.bf16.mxu0 %v6427_v60 }
 0x443   : > { %17439 = vmatmul.mubr.msk.bf16.vlgmr.msra.gmra.mxu1 %vm5548_vm7, %v20525_v22  ;;  %17463 = vmatmul.mubr.msk.bf16.vlgmr.msra.gmra.mxu0 %vm5548_vm7, %v20525_v22 }
 0x444   : > { %17442 = vmatprep.mubr.msk.bf16.mxu1 %vm5548_vm7, %v20547_v21  ;;  %17466 = vmatprep.mubr.msk.bf16.mxu0 %vm5548_vm7, %v20547_v21 }
 0x445   : > { %17471 = vmatpush3.bf16.msra.mxu1 %v6255_v44  ;;  %17495 = vmatpush3.bf16.msra.mxu0 %v6427_v60 }
 0x446   : > { %17472 = vmatprep.subr.bf16.mxu1 %v18330_v61  ;;  %17496 = vmatprep.subr.bf16.mxu0 %v18331_v62 }
 0x449   : > { %17473 = vmatpush3.bf16.msra.mxu1 %v18330_v61  ;;  %17497 = vmatpush3.bf16.msra.mxu0 %v18331_v62 }
 0x44a   : > { %17474 = vmatprep.subr.bf16.mxu1 %v18332_v0  ;;  %17498 = vmatprep.subr.bf16.mxu0 %v18333_v3 }
 0x44b   : > { %17443 = vmatmul.mubr.msk.bf16.gmra.mxu1 %vm5548_vm7, %v20565_v54  ;;  %17467 = vmatmul.mubr.msk.bf16.gmra.mxu0 %vm5548_vm7, %v20565_v54 }
 0x44c   : > { %17486 = vmatprep.mubr.msk.bf16.mxu1 %vm5548_vm7, %v20523_v15  ;;  %17510 = vmatprep.mubr.msk.bf16.mxu0 %vm5548_vm7, %v20523_v15 }
 0x44d   : > { %17475 = vmatpush3.bf16.msra.mxu1 %v18332_v0  ;;  %17499 = vmatpush3.bf16.msra.mxu0 %v18333_v3 }
 0x44e   : > { %17476 = vmatprep.subr.bf16.mxu1 %v18334_v42  ;;  %17500 = vmatprep.subr.bf16.mxu0 %v18335_v51 }
 0x451   : > { %17477 = vmatpush3.bf16.msra.mxu1 %v18334_v42  ;;  %17501 = vmatpush3.bf16.msra.mxu0 %v18335_v51 }
 0x452   : > { %17478 = vmatprep.subr.bf16.mxu1 %v18336_v58  ;;  %17502 = vmatprep.subr.bf16.mxu0 %v18337_v6 }
 0x455   : > { %17479 = vmatpush3.bf16.msra.mxu1 %v18336_v58  ;;  %17503 = vmatpush3.bf16.msra.mxu0 %v18337_v6 }
 0x456   : > { %17480 = vmatprep.subr.bf16.mxu1 %v18338_v8  ;;  %17504 = vmatprep.subr.bf16.mxu0 %v18339_v9 }
 0x459   : > { %17481 = vmatpush3.bf16.msra.mxu1 %v18338_v8  ;;  %17505 = vmatpush3.bf16.msra.mxu0 %v18339_v9 }
 0x45a   : > { %17482 = vmatprep.subr.bf16.mxu1 %v18340_v10  ;;  %17506 = vmatprep.subr.bf16.mxu0 %v18341_v11 }
 0x45d   : > { %17483 = vmatpush3.bf16.msra.mxu1 %v18340_v10  ;;  %17507 = vmatpush3.bf16.msra.mxu0 %v18341_v11  ;;  %v18426_v11 = vld [vmem:[%s22818_s7 + $0xc] ss:$20 sps:$4 sm:$0xff]  }
 0x45e   : > { %17484 = vmatprep.subr.bf16.mxu1 %v18342_v12  ;;  %17508 = vmatprep.subr.bf16.mxu0 %v18343_v13 }
 0x461   : > { %17485 = vmatpush3.bf16.msra.mxu1 %v18342_v12  ;;  %17509 = vmatpush3.bf16.msra.mxu0 %v18343_v13 }
 0x462   : > { %17518 = vmatprep.subr.bf16.mxu1 %v6599_v7  ;;  %17542 = vmatprep.subr.bf16.mxu0 %v6771_v16 }
 0x464   : > { %17487 = vmatmul.mubr.msk.bf16.vlgmr.msra.gmra.mxu1 %vm5548_vm7, %v20525_v22  ;;  %17511 = vmatmul.mubr.msk.bf16.vlgmr.msra.gmra.mxu0 %vm5548_vm7, %v20525_v22 }
 0x465   : > { %17490 = vmatprep.mubr.msk.bf16.mxu1 %vm5548_vm7, %v20547_v21  ;;  %17514 = vmatprep.mubr.msk.bf16.mxu0 %vm5548_vm7, %v20547_v21 }
 0x466   : > { %17519 = vmatpush3.bf16.msra.mxu1 %v6599_v7  ;;  %17543 = vmatpush3.bf16.msra.mxu0 %v6771_v16 }
 0x467   : > { %17520 = vmatprep.subr.bf16.mxu1 %v18346_v17  ;;  %17544 = vmatprep.subr.bf16.mxu0 %v18347_v18 }
 0x46a   : > { %17521 = vmatpush3.bf16.msra.mxu1 %v18346_v17  ;;  %17545 = vmatpush3.bf16.msra.mxu0 %v18347_v18 }
 0x46b   : > { %17522 = vmatprep.subr.bf16.mxu1 %v18348_v47  ;;  %17546 = vmatprep.subr.bf16.mxu0 %v18349_v1 }
 0x46c   : > { %17491 = vmatmul.mubr.msk.bf16.gmra.mxu1 %vm5548_vm7, %v20565_v54  ;;  %17515 = vmatmul.mubr.msk.bf16.gmra.mxu0 %vm5548_vm7, %v20565_v54 }
 0x46d   : > { %17534 = vmatprep.mubr.msk.bf16.mxu1 %vm5548_vm7, %v20523_v15  ;;  %17558 = vmatprep.mubr.msk.bf16.mxu0 %vm5548_vm7, %v20523_v15 }
 0x46e   : > { %17523 = vmatpush3.bf16.msra.mxu1 %v18348_v47  ;;  %17547 = vmatpush3.bf16.msra.mxu0 %v18349_v1 }
 0x46f   : > { %17524 = vmatprep.subr.bf16.mxu1 %v18350_v24  ;;  %17548 = vmatprep.subr.bf16.mxu0 %v18351_v25 }
 0x472   : > { %17525 = vmatpush3.bf16.msra.mxu1 %v18350_v24  ;;  %17549 = vmatpush3.bf16.msra.mxu0 %v18351_v25 }
 0x473   : > { %17526 = vmatprep.subr.bf16.mxu1 %v18352_v27  ;;  %17550 = vmatprep.subr.bf16.mxu0 %v18353_v20 }
 0x476   : > { %17527 = vmatpush3.bf16.msra.mxu1 %v18352_v27  ;;  %17551 = vmatpush3.bf16.msra.mxu0 %v18353_v20 }
 0x477   : > { %17528 = vmatprep.subr.bf16.mxu1 %v18354_v29  ;;  %17552 = vmatprep.subr.bf16.mxu0 %v18355_v2 }
 0x47a   : > { %17529 = vmatpush3.bf16.msra.mxu1 %v18354_v29  ;;  %17553 = vmatpush3.bf16.msra.mxu0 %v18355_v2 }
 0x47b   : > { %17530 = vmatprep.subr.bf16.mxu1 %v18356_v31  ;;  %17554 = vmatprep.subr.bf16.mxu0 %v18357_v32 }
 0x47e   : > { %17531 = vmatpush3.bf16.msra.mxu1 %v18356_v31  ;;  %17555 = vmatpush3.bf16.msra.mxu0 %v18357_v32 }
 0x47f   : > { %17532 = vmatprep.subr.bf16.mxu1 %v18358_v33  ;;  %17556 = vmatprep.subr.bf16.mxu0 %v18359_v34 }
 0x482   : > { %17533 = vmatpush3.bf16.msra.mxu1 %v18358_v33  ;;  %17557 = vmatpush3.bf16.msra.mxu0 %v18359_v34 }
 0x483   : > { %17566 = vmatprep.subr.bf16.mxu1 %v6943_v63 }
 0x485   : > { %17535 = vmatmul.mubr.msk.bf16.vlgmr.msra.gmra.mxu1 %vm5548_vm7, %v20525_v22  ;;  %17559 = vmatmul.mubr.msk.bf16.vlgmr.msra.gmra.mxu0 %vm5548_vm7, %v20525_v22 }
 0x486   : > { %17538 = vmatprep.mubr.msk.bf16.mxu1 %vm5548_vm7, %v20547_v21  ;;  %17562 = vmatprep.mubr.msk.bf16.mxu0 %vm5548_vm7, %v20547_v21 }
 0x487   : > { %17567 = vmatpush3.bf16.msra.mxu1 %v6943_v63 }
 0x488   : > { %17568 = vmatprep.subr.bf16.mxu1 %v18361_v37 }
 0x48b   : > { %17569 = vmatpush3.bf16.msra.mxu1 %v18361_v37 }
 0x48c   : > { %17570 = vmatprep.subr.bf16.mxu1 %v18362_v30 }
 0x48d   : > { %17539 = vmatmul.mubr.msk.bf16.gmra.mxu1 %vm5548_vm7, %v20565_v54  ;;  %17563 = vmatmul.mubr.msk.bf16.gmra.mxu0 %vm5548_vm7, %v20565_v54 }
 0x48e   : > { %17582 = vmatprep.mubr.msk.bf16.mxu1 %vm5548_vm7, %v20523_v15  ;;  %v18367_v15 = vld [vmem:[%s22817_s6 + $0x200] sm:$0xff]   ;;  %7739 = vmatprep.mubr.bf16.mxu0 %v18386_v5 }
 0x48f   : > { %17571 = vmatpush3.bf16.msra.mxu1 %v18362_v30 }
 0x490   : > { %17572 = vmatprep.subr.bf16.mxu1 %v18363_v43 }
 0x493   : > { %17573 = vmatpush3.bf16.msra.mxu1 %v18363_v43 }
 0x494   : > { %17574 = vmatprep.subr.bf16.mxu1 %v18364_v45 }
 0x497   : > { %17575 = vmatpush3.bf16.msra.mxu1 %v18364_v45 }
 0x498   : > { %17576 = vmatprep.subr.bf16.mxu1 %v18365_v38 }
 0x49b   : > { %17577 = vmatpush3.bf16.msra.mxu1 %v18365_v38 }
 0x49c   : > { %17578 = vmatprep.subr.bf16.mxu1 %v18366_v39 }
 0x49f   : > { %17579 = vmatpush3.bf16.msra.mxu1 %v18366_v39 }
 0x4a0   : > { %17580 = vmatprep.subr.bf16.mxu1 %v18367_v15 }
 0x4a3   : > { %17581 = vmatpush3.bf16.msra.mxu1 %v18367_v15 }
 0x4a6   : > { %17583 = vmatmul.mubr.msk.bf16.vlgmr.msra.gmra.mxu1 %vm5548_vm7, %v20525_v22 }
 0x4a7   : > { %17586 = vmatprep.mubr.msk.bf16.mxu1 %vm5548_vm7, %v20547_v21 }
 0x4ae   : > { %17587 = vmatmul.mubr.msk.bf16.gmra.mxu1 %vm5548_vm7, %v20565_v54 }
 0x4af   : > { %7836 = vmatprep.mubr.bf16.mxu1 %v18426_v11 }
 0x4e3   : > { %v17392_v40 = vpop.f32.mrf.mxu1  ;;  %v17416_v41 = vpop.f32.mrf.mxu0 }
 0x4e4   : > { %v15436_v26 = vpack.c.bf16 %v17392_v40, %v17392_v40  ;;  %v15444_v48 = vpack.c.bf16 %v17416_v41, %v17416_v41 }
 0x4e5   : > { %v5602_v50 = vpop.f32.mrf.mxu1  ;;  %v5775_v52 = vpop.f32.mrf.mxu0 }
 0x4e6   : > { %5668 = vst.msk [vmem:[#allocation3 + $0x8] sm:$0xf] %vm5665_vm8, %v15436_v26  ;;  %5840 = vst.msk [vmem:[#allocation3 + $0x28] sm:$0xf] %vm5665_vm8, %v15444_v48  ;;  %v15434_v22 = vpack.c.bf16 %v5602_v50, %v5602_v50  ;;  %v15442_v21 = vpack.c.bf16 %v5775_v52, %v5775_v52 }
 0x4e7   : > { %v17393_v53 = vpop.f32.mrf.mxu1  ;;  %v17417_v49 = vpop.f32.mrf.mxu0 }
 0x4e8   : > { %5666 = vst.msk [vmem:[#allocation3] sm:$0xf] %vm5665_vm8, %v15434_v22  ;;  %5838 = vst.msk [vmem:[#allocation3 + $0x20] sm:$0xf] %vm5665_vm8, %v15442_v21  ;;  %v15437_v54 = vpack.c.bf16 %v17393_v53, %v17393_v53  ;;  %v15445_v59 = vpack.c.bf16 %v17417_v49, %v17417_v49 }
 0x4e9   : > { %v5605_v55 = vpop.f32.mrf.mxu1  ;;  %v5778_v56 = vpop.f32.mrf.mxu0 }
 0x4ea   : > { %5669 = vst.msk [vmem:[#allocation3 + $0xc] sm:$0xf] %vm5665_vm8, %v15437_v54  ;;  %5841 = vst.msk [vmem:[#allocation3 + $0x2c] sm:$0xf] %vm5665_vm8, %v15445_v59  ;;  %v15435_v36 = vpack.c.bf16 %v5605_v55, %v5605_v55  ;;  %v15443_v23 = vpack.c.bf16 %v5778_v56, %v5778_v56 }
 0x4ec   : > { %5667 = vst.msk [vmem:[#allocation3 + $0x4] sm:$0xf] %vm5665_vm8, %v15435_v36  ;;  %5839 = vst.msk [vmem:[#allocation3 + $0x24] sm:$0xf] %vm5665_vm8, %v15443_v23 }
 0x4f1   : > { %v18373_v21 = vld [vmem:[#allocation3 + $0x28] sm:$0xff]  }
 0x4f3   : > { %v17396_v57 = vpop.f32.mrf.mxu1  ;;  %v17420_v28 = vpop.f32.mrf.mxu0  ;;  %v18375_v23 = vld [vmem:[#allocation3 + $0x20] sm:$0xff]  }
 0x4f4   : > { %v15440_v46 = vpack.c.bf16 %v17396_v57, %v17396_v57  ;;  %v15448_v44 = vpack.c.bf16 %v17420_v28, %v17420_v28 }
 0x4f5   : > { %v5618_v60 = vpop.f32.mrf.mxu1  ;;  %v5791_v61 = vpop.f32.mrf.mxu0 }
 0x4f6   : > { %5672 = vst.msk [vmem:[#allocation3 + $0x18] sm:$0xf] %vm5665_vm8, %v15440_v46  ;;  %5844 = vst.msk [vmem:[#allocation3 + $0x38] sm:$0xf] %vm5665_vm8, %v15448_v44  ;;  %v15438_v62 = vpack.c.bf16 %v5618_v60, %v5618_v60  ;;  %v15446_v0 = vpack.c.bf16 %v5791_v61, %v5791_v61 }
 0x4f7   : > { %v17397_v3 = vpop.f32.mrf.mxu1  ;;  %v17421_v42 = vpop.f32.mrf.mxu0 }
 0x4f8   : > { %5670 = vst.msk [vmem:[#allocation3 + $0x10] sm:$0xf] %vm5665_vm8, %v15438_v62  ;;  %5842 = vst.msk [vmem:[#allocation3 + $0x30] sm:$0xf] %vm5665_vm8, %v15446_v0  ;;  %v15441_v51 = vpack.c.bf16 %v17397_v3, %v17397_v3  ;;  %v15449_v58 = vpack.c.bf16 %v17421_v42, %v17421_v42 }
 0x4f9   : > { %v5621_v6 = vpop.f32.mrf.mxu1  ;;  %v5794_v8 = vpop.f32.mrf.mxu0 }
 0x4fa   : > { %5673 = vst.msk [vmem:[#allocation3 + $0x1c] sm:$0xf] %vm5665_vm8, %v15441_v51  ;;  %5845 = vst.msk [vmem:[#allocation3 + $0x3c] sm:$0xf] %vm5665_vm8, %v15449_v58  ;;  %v15439_v9 = vpack.c.bf16 %v5621_v6, %v5621_v6  ;;  %v15447_v10 = vpack.c.bf16 %v5794_v8, %v5794_v8 }
 0x4fc   : > { %5671 = vst.msk [vmem:[#allocation3 + $0x14] sm:$0xf] %vm5665_vm8, %v15439_v9  ;;  %5843 = vst.msk [vmem:[#allocation3 + $0x34] sm:$0xf] %vm5665_vm8, %v15447_v10 }
 0x501   : > { %v18369_v48 = vld [vmem:[#allocation3 + $0x38] sm:$0xff]  }
 0x502   : > { %v18377_v42 = vld [vmem:[#allocation3 + $0x18] sm:$0xff]  }
 0x503   : > { %v17440_v12 = vpop.f32.mrf.mxu1  ;;  %v17464_v13 = vpop.f32.mrf.mxu0  ;;  %v18371_v52 = vld [vmem:[#allocation3 + $0x30] sm:$0xff]  }
 0x504   : > { %v15452_v19 = vpack.c.bf16 %v17440_v12, %v17440_v12  ;;  %v15460_v14 = vpack.c.bf16 %v17464_v13, %v17464_v13 }
 0x505   : > { %v5947_v7 = vpop.f32.mrf.mxu1  ;;  %v6119_v16 = vpop.f32.mrf.mxu0 }
 0x506   : > { %6012 = vst.msk [vmem:[#allocation3 + $0x48] sm:$0xf] %vm5665_vm8, %v15452_v19  ;;  %6184 = vst.msk [vmem:[#allocation3 + $0x68] sm:$0xf] %vm5665_vm8, %v15460_v14  ;;  %v15450_v17 = vpack.c.bf16 %v5947_v7, %v5947_v7  ;;  %v15458_v18 = vpack.c.bf16 %v6119_v16, %v6119_v16  ;;  %v18379_v19 = vld [vmem:[#allocation3 + $0x10] sm:$0xff]  }
 0x507   : > { %v17441_v47 = vpop.f32.mrf.mxu1  ;;  %v17465_v1 = vpop.f32.mrf.mxu0 }
 0x508   : > { %6010 = vst.msk [vmem:[#allocation3 + $0x40] sm:$0xf] %vm5665_vm8, %v15450_v17  ;;  %6182 = vst.msk [vmem:[#allocation3 + $0x60] sm:$0xf] %vm5665_vm8, %v15458_v18  ;;  %v15453_v24 = vpack.c.bf16 %v17441_v47, %v17441_v47  ;;  %v15461_v25 = vpack.c.bf16 %v17465_v1, %v17465_v1 }
 0x509   : > { %v5950_v27 = vpop.f32.mrf.mxu1  ;;  %v6122_v20 = vpop.f32.mrf.mxu0 }
 0x50a   : > { %6013 = vst.msk [vmem:[#allocation3 + $0x4c] sm:$0xf] %vm5665_vm8, %v15453_v24  ;;  %6185 = vst.msk [vmem:[#allocation3 + $0x6c] sm:$0xf] %vm5665_vm8, %v15461_v25  ;;  %v15451_v29 = vpack.c.bf16 %v5950_v27, %v5950_v27  ;;  %v15459_v2 = vpack.c.bf16 %v6122_v20, %v6122_v20  ;;  %v18381_v27 = vld [vmem:[#allocation3 + $0x8] sm:$0xff]  }
 0x50b   : > { %v17444_v31 = vpop.f32.mrf.mxu1  ;;  %v17468_v32 = vpop.f32.mrf.mxu0 }
 0x50c   : > { %6011 = vst.msk [vmem:[#allocation3 + $0x44] sm:$0xf] %vm5665_vm8, %v15451_v29  ;;  %6183 = vst.msk [vmem:[#allocation3 + $0x64] sm:$0xf] %vm5665_vm8, %v15459_v2  ;;  %v15456_v33 = vpack.c.bf16 %v17444_v31, %v17444_v31  ;;  %v15464_v34 = vpack.c.bf16 %v17468_v32, %v17468_v32  ;;  %v18383_v31 = vld [vmem:[#allocation3] sm:$0xff]  }
 0x50d   : > { %v5963_v35 = vpop.f32.mrf.mxu1  ;;  %v6135_v63 = vpop.f32.mrf.mxu0  ;;  %v18384_v32 = vld [vmem:[%s22818_s7] ss:$20 sps:$4 sm:$0xff]  }
 0x50e   : > { %6016 = vst.msk [vmem:[#allocation3 + $0x58] sm:$0xf] %vm5665_vm8, %v15456_v33  ;;  %6188 = vst.msk [vmem:[#allocation3 + $0x78] sm:$0xf] %vm5665_vm8, %v15464_v34  ;;  %v15454_v37 = vpack.c.bf16 %v5963_v35, %v5963_v35  ;;  %v15462_v30 = vpack.c.bf16 %v6135_v63, %v6135_v63  ;;  %v18389_v33 = vld [vmem:[%s22818_s7 + $0x2c] ss:$20 sps:$4 sm:$0xff]  }
 0x50f   : > { %v17445_v43 = vpop.f32.mrf.mxu1  ;;  %v17469_v45 = vpop.f32.mrf.mxu0  ;;  %v18387_v34 = vld [vmem:[%s22818_s7 + $0x28] ss:$20 sps:$4 sm:$0xff]  }
 0x510   : > { %6014 = vst.msk [vmem:[#allocation3 + $0x50] sm:$0xf] %vm5665_vm8, %v15454_v37  ;;  %6186 = vst.msk [vmem:[#allocation3 + $0x70] sm:$0xf] %vm5665_vm8, %v15462_v30  ;;  %v15457_v38 = vpack.c.bf16 %v17445_v43, %v17445_v43  ;;  %v15465_v39 = vpack.c.bf16 %v17469_v45, %v17469_v45  ;;  %v18392_v35 = vld [vmem:[%s22818_s7 + $0x54] ss:$20 sps:$4 sm:$0xff]  }
 0x511   : > { %v5966_v15 = vpop.f32.mrf.mxu1  ;;  %v6138_v5 = vpop.f32.mrf.mxu0  ;;  %v18372_v22 = vld [vmem:[#allocation3 + $0x68] sm:$0xff]  }
 0x512   : > { %6017 = vst.msk [vmem:[#allocation3 + $0x5c] sm:$0xf] %vm5665_vm8, %v15457_v38  ;;  %6189 = vst.msk [vmem:[#allocation3 + $0x7c] sm:$0xf] %vm5665_vm8, %v15465_v39  ;;  %v15455_v40 = vpack.c.bf16 %v5966_v15, %v5966_v15  ;;  %v15463_v41 = vpack.c.bf16 %v6138_v5, %v6138_v5  ;;  %v18380_v16 = vld [vmem:[#allocation3 + $0x48] sm:$0xff]  }
 0x513   : > { %v18374_v53 = vld [vmem:[#allocation3 + $0x60] sm:$0xff]  }
 0x514   : > { %6015 = vst.msk [vmem:[#allocation3 + $0x54] sm:$0xf] %vm5665_vm8, %v15455_v40  ;;  %6187 = vst.msk [vmem:[#allocation3 + $0x74] sm:$0xf] %vm5665_vm8, %v15463_v41  ;;  %v18382_v2 = vld [vmem:[#allocation3 + $0x40] sm:$0xff]  }
 0x515   : > { %v18390_v39 = vld [vmem:[%s22818_s7 + $0x50] ss:$20 sps:$4 sm:$0xff]  }
 0x516   : > { %v18395_v40 = vld [vmem:[%s22818_s7 + $0x7c] ss:$20 sps:$4 sm:$0xff]  }
 0x519   : > { %v18368_v26 = vld [vmem:[#allocation3 + $0x78] sm:$0xff]  }
 0x51a   : > { %16344 = vmatprep.subr.bf16.mxu0 %v18368_v26  ;;  %v18376_v46 = vld [vmem:[#allocation3 + $0x58] sm:$0xff]  }
 0x51b   : > { %v18370_v50 = vld [vmem:[#allocation3 + $0x70] sm:$0xff]   ;;  %16345 = vmatpush3.bf16.msra.mxu0 %v18369_v48 }
 0x51c   : > { %16346 = vmatprep.subr.bf16.mxu0 %v18370_v50  ;;  %v18378_v6 = vld [vmem:[#allocation3 + $0x50] sm:$0xff]  }
 0x51f   : > { %16347 = vmatpush3.bf16.msra.mxu0 %v18371_v52 }
 0x520   : > { %16348 = vmatprep.subr.bf16.mxu0 %v18372_v22 }
 0x523   : > { %16349 = vmatpush3.bf16.msra.mxu0 %v18373_v21 }
 0x524   : > { %v17488_v49 = vpop.f32.mrf.mxu1  ;;  %v17512_v54 = vpop.f32.mrf.mxu0  ;;  %16350 = vmatprep.subr.bf16.mxu0 %v18374_v53 }
 0x525   : > { %v15468_v59 = vpack.c.bf16 %v17488_v49, %v17488_v49  ;;  %v15476_v55 = vpack.c.bf16 %v17512_v54, %v17512_v54 }
 0x526   : > { %v6291_v56 = vpop.f32.mrf.mxu1  ;;  %v6463_v36 = vpop.f32.mrf.mxu0 }
 0x527   : > { %6356 = vst.msk [vmem:[#allocation3 + $0x88] sm:$0xf] %vm5665_vm8, %v15468_v59  ;;  %6528 = vst.msk [vmem:[#allocation3 + $0xa8] sm:$0xf] %vm5665_vm8, %v15476_v55  ;;  %v15466_v57 = vpack.c.bf16 %v6291_v56, %v6291_v56  ;;  %v15474_v28 = vpack.c.bf16 %v6463_v36, %v6463_v36  ;;  %16351 = vmatpush3.bf16.msra.mxu0 %v18375_v23  ;;  %v18393_v23 = vld [vmem:[%s22818_s7 + $0x78] ss:$20 sps:$4 sm:$0xff]  }
 0x528   : > { %v17489_v44 = vpop.f32.mrf.mxu1  ;;  %v17513_v60 = vpop.f32.mrf.mxu0  ;;  %16352 = vmatprep.subr.bf16.mxu0 %v18376_v46  ;;  %v18398_v46 = vld [vmem:[%s22818_s7 + $0xa4] ss:$20 sps:$4 sm:$0xff]  }
 0x529   : > { %6354 = vst.msk [vmem:[#allocation3 + $0x80] sm:$0xf] %vm5665_vm8, %v15466_v57  ;;  %6526 = vst.msk [vmem:[#allocation3 + $0xa0] sm:$0xf] %vm5665_vm8, %v15474_v28  ;;  %v15469_v61 = vpack.c.bf16 %v17489_v44, %v17489_v44  ;;  %v15477_v62 = vpack.c.bf16 %v17513_v60, %v17513_v60 }
 0x52a   : > { %v6294_v0 = vpop.f32.mrf.mxu1  ;;  %v6466_v3 = vpop.f32.mrf.mxu0 }
 0x52b   : > { %6357 = vst.msk [vmem:[#allocation3 + $0x8c] sm:$0xf] %vm5665_vm8, %v15469_v61  ;;  %6529 = vst.msk [vmem:[#allocation3 + $0xac] sm:$0xf] %vm5665_vm8, %v15477_v62  ;;  %v15467_v51 = vpack.c.bf16 %v6294_v0, %v6294_v0  ;;  %v15475_v58 = vpack.c.bf16 %v6466_v3, %v6466_v3  ;;  %16353 = vmatpush3.bf16.msra.mxu0 %v18377_v42 }
 0x52c   : > { %v17492_v8 = vpop.f32.mrf.mxu1  ;;  %v17516_v9 = vpop.f32.mrf.mxu0  ;;  %16354 = vmatprep.subr.bf16.mxu0 %v18378_v6  ;;  %v18406_v6 = vld [vmem:[%s22818_s7 + $0xcc] ss:$20 sps:$4 sm:$0xff]  }
 0x52d   : > { %6355 = vst.msk [vmem:[#allocation3 + $0x84] sm:$0xf] %vm5665_vm8, %v15467_v51  ;;  %6527 = vst.msk [vmem:[#allocation3 + $0xa4] sm:$0xf] %vm5665_vm8, %v15475_v58  ;;  %v15472_v10 = vpack.c.bf16 %v17492_v8, %v17492_v8  ;;  %v15480_v11 = vpack.c.bf16 %v17516_v9, %v17516_v9  ;;  %v18396_v58 = vld [vmem:[%s22818_s7 + $0xa0] ss:$20 sps:$4 sm:$0xff]  }
 0x52e   : > { %v6307_v12 = vpop.f32.mrf.mxu1  ;;  %v6479_v13 = vpop.f32.mrf.mxu0 }
 0x52f   : > { %6360 = vst.msk [vmem:[#allocation3 + $0x98] sm:$0xf] %vm5665_vm8, %v15472_v10  ;;  %6532 = vst.msk [vmem:[#allocation3 + $0xb8] sm:$0xf] %vm5665_vm8, %v15480_v11  ;;  %v15470_v14 = vpack.c.bf16 %v6307_v12, %v6307_v12  ;;  %v15478_v7 = vpack.c.bf16 %v6479_v13, %v6479_v13  ;;  %16355 = vmatpush3.bf16.msra.mxu0 %v18379_v19  ;;  %v18404_v11 = vld [vmem:[%s22818_s7 + $0xc8] ss:$20 sps:$4 sm:$0xff]  }
 0x530   : > { %v17493_v17 = vpop.f32.mrf.mxu1  ;;  %v17517_v18 = vpop.f32.mrf.mxu0  ;;  %16356 = vmatprep.subr.bf16.mxu0 %v18380_v16  ;;  %v18413_v13 = vld [vmem:[%s22818_s7 + $0xf4] ss:$20 sps:$4 sm:$0xff]  }
 0x531   : > { %6358 = vst.msk [vmem:[#allocation3 + $0x90] sm:$0xf] %vm5665_vm8, %v15470_v14  ;;  %6530 = vst.msk [vmem:[#allocation3 + $0xb0] sm:$0xf] %vm5665_vm8, %v15478_v7  ;;  %v15473_v47 = vpack.c.bf16 %v17493_v17, %v17493_v17  ;;  %v15481_v1 = vpack.c.bf16 %v17517_v18, %v17517_v18  ;;  %v18411_v18 = vld [vmem:[%s22818_s7 + $0xf0] ss:$20 sps:$4 sm:$0xff]  }
 0x532   : > { %v6310_v24 = vpop.f32.mrf.mxu1  ;;  %v6482_v25 = vpop.f32.mrf.mxu0  ;;  %v18407_v14 = vld [vmem:[#allocation3 + $0xa8] sm:$0xff]  }
 0x533   : > { %6361 = vst.msk [vmem:[#allocation3 + $0x9c] sm:$0xf] %vm5665_vm8, %v15473_v47  ;;  %6533 = vst.msk [vmem:[#allocation3 + $0xbc] sm:$0xf] %vm5665_vm8, %v15481_v1  ;;  %v15471_v20 = vpack.c.bf16 %v6310_v24, %v6310_v24  ;;  %v15479_v29 = vpack.c.bf16 %v6482_v25, %v6482_v25  ;;  %16357 = vmatpush3.bf16.msra.mxu0 %v18381_v27  ;;  %v18420_v24 = vld [vmem:[%s22818_s7 + $0x11c] ss:$20 sps:$4 sm:$0xff]  }
 0x534   : > { %16358 = vmatprep.subr.bf16.mxu0 %v18382_v2  ;;  %v18409_v1 = vld [vmem:[#allocation3 + $0xa0] sm:$0xff]  }
 0x535   : > { %6359 = vst.msk [vmem:[#allocation3 + $0x94] sm:$0xf] %vm5665_vm8, %v15471_v20  ;;  %6531 = vst.msk [vmem:[#allocation3 + $0xb4] sm:$0xf] %vm5665_vm8, %v15479_v29 }
 0x537   : > { %16359 = vmatpush3.bf16.msra.mxu0 %v18383_v31 }
 0x53a   : > { %7740 = vmatmul.mubr.bf16.vlgmr.msra.gmra.mxu0 %v18384_v32  ;;  %v18400_v9 = vld [vmem:[#allocation3 + $0xb8] sm:$0xff]  }
 0x53b   : > { %7747 = vmatprep.mubr.bf16.mxu0 %v18389_v33  ;;  %v18414_v31 = vld [vmem:[#allocation3 + $0x98] sm:$0xff]  }
 0x53c   : > { %v18402_v12 = vld [vmem:[#allocation3 + $0xb0] sm:$0xff]  }
 0x542   : > { %7748 = vmatmul.mubr.bf16.gmra.mxu0 %v18387_v34 }
 0x543   : > { %7755 = vmatprep.mubr.bf16.mxu0 %v18392_v35 }
 0x545   : > { %v17536_v63 = vpop.f32.mrf.mxu1  ;;  %v17560_v37 = vpop.f32.mrf.mxu0 }
 0x546   : > { %v15484_v30 = vpack.c.bf16 %v17536_v63, %v17536_v63  ;;  %v15492_v43 = vpack.c.bf16 %v17560_v37, %v17560_v37  ;;  %v18418_v63 = vld [vmem:[%s22818_s7 + $0x118] ss:$20 sps:$4 sm:$0xff]  }
 0x547   : > { %v6635_v45 = vpop.f32.mrf.mxu1  ;;  %v6807_v38 = vpop.f32.mrf.mxu0 }
 0x548   : > { %6700 = vst.msk [vmem:[#allocation3 + $0xc8] sm:$0xf] %vm5665_vm8, %v15484_v30  ;;  %6872 = vst.msk [vmem:[#allocation3 + $0xe8] sm:$0xf] %vm5665_vm8, %v15492_v43  ;;  %v15482_v15 = vpack.c.bf16 %v6635_v45, %v6635_v45  ;;  %v15490_v5 = vpack.c.bf16 %v6807_v38, %v6807_v38  ;;  %v18416_v30 = vld [vmem:[#allocation3 + $0x90] sm:$0xff]  }
 0x549   : > { %v17537_v41 = vpop.f32.mrf.mxu1  ;;  %v17561_v26 = vpop.f32.mrf.mxu0  ;;  %v18437_v43 = vld [vmem:[%s22818_s7 + $0x10] ss:$20 sps:$4 sm:$0xff]  }
 0x54a   : > { %6698 = vst.msk [vmem:[#allocation3 + $0xc0] sm:$0xf] %vm5665_vm8, %v15482_v15  ;;  %6870 = vst.msk [vmem:[#allocation3 + $0xe0] sm:$0xf] %vm5665_vm8, %v15490_v5  ;;  %v15485_v48 = vpack.c.bf16 %v17537_v41, %v17537_v41  ;;  %v15493_v50 = vpack.c.bf16 %v17561_v26, %v17561_v26  ;;  %7756 = vmatmul.mubr.bf16.gmra.mxu0 %v18390_v39 }
 0x54b   : > { %v6638_v52 = vpop.f32.mrf.mxu1  ;;  %v6810_v22 = vpop.f32.mrf.mxu0  ;;  %7763 = vmatprep.mubr.bf16.mxu0 %v18395_v40  ;;  %v18421_v40 = vld [vmem:[#allocation3 + $0x88] sm:$0xff]  }
 0x54c   : > { %6701 = vst.msk [vmem:[#allocation3 + $0xcc] sm:$0xf] %vm5665_vm8, %v15485_v48  ;;  %6873 = vst.msk [vmem:[#allocation3 + $0xec] sm:$0xf] %vm5665_vm8, %v15493_v50  ;;  %v15483_v21 = vpack.c.bf16 %v6638_v52, %v6638_v52  ;;  %v15491_v53 = vpack.c.bf16 %v6810_v22, %v6810_v22  ;;  %v18423_v48 = vld [vmem:[#allocation3 + $0x80] sm:$0xff]  }
 0x54d   : > { %v17540_v49 = vpop.f32.mrf.mxu1  ;;  %v17564_v54 = vpop.f32.mrf.mxu0  ;;  %v18424_v50 = vld [vmem:[%s22818_s7 + $0x8] ss:$20 sps:$4 sm:$0xff]  }
 0x54e   : > { %6699 = vst.msk [vmem:[#allocation3 + $0xc4] sm:$0xf] %vm5665_vm8, %v15483_v21  ;;  %6871 = vst.msk [vmem:[#allocation3 + $0xe4] sm:$0xf] %vm5665_vm8, %v15491_v53  ;;  %v15488_v59 = vpack.c.bf16 %v17540_v49, %v17540_v49  ;;  %v15496_v55 = vpack.c.bf16 %v17564_v54, %v17564_v54  ;;  %v18432_v52 = vld [vmem:[%s22818_s7 + $0x34] ss:$20 sps:$4 sm:$0xff]  }
 0x54f   : > { %v6651_v56 = vpop.f32.mrf.mxu1  ;;  %v6823_v36 = vpop.f32.mrf.mxu0  ;;  %v18430_v53 = vld [vmem:[%s22818_s7 + $0x30] ss:$20 sps:$4 sm:$0xff]  }
 0x550   : > { %6704 = vst.msk [vmem:[#allocation3 + $0xd8] sm:$0xf] %vm5665_vm8, %v15488_v59  ;;  %6876 = vst.msk [vmem:[#allocation3 + $0xf8] sm:$0xf] %vm5665_vm8, %v15496_v55  ;;  %v15486_v57 = vpack.c.bf16 %v6651_v56, %v6651_v56  ;;  %v15494_v28 = vpack.c.bf16 %v6823_v36, %v6823_v36  ;;  %v18436_v54 = vld [vmem:[%s22818_s7 + $0x5c] ss:$20 sps:$4 sm:$0xff]  }
 0x551   : > { %v17541_v44 = vpop.f32.mrf.mxu1  ;;  %v17565_v60 = vpop.f32.mrf.mxu0  ;;  %v18434_v55 = vld [vmem:[%s22818_s7 + $0x58] ss:$20 sps:$4 sm:$0xff]  }
 0x552   : > { %6702 = vst.msk [vmem:[#allocation3 + $0xd0] sm:$0xf] %vm5665_vm8, %v15486_v57  ;;  %6874 = vst.msk [vmem:[#allocation3 + $0xf0] sm:$0xf] %vm5665_vm8, %v15494_v28  ;;  %v15489_v61 = vpack.c.bf16 %v17541_v44, %v17541_v44  ;;  %v15497_v62 = vpack.c.bf16 %v17565_v60, %v17565_v60  ;;  %7764 = vmatmul.mubr.bf16.gmra.mxu0 %v18393_v23  ;;  %v18438_v56 = vld [vmem:[%s22818_s7 + $0x38] ss:$20 sps:$4 sm:$0xff]  }
 0x553   : > { %v6654_v0 = vpop.f32.mrf.mxu1  ;;  %v6826_v3 = vpop.f32.mrf.mxu0  ;;  %7771 = vmatprep.mubr.bf16.mxu0 %v18398_v46  ;;  %v18403_v19 = vld [vmem:[#allocation3 + $0xe8] sm:$0xff]   ;;  %v18442_v23 = vld [vmem:[%s22818_s7 + $0x60] ss:$20 sps:$4 sm:$0xff]   ;;  %v18447_v44 = vld [vmem:[%s22818_s7 + $0xb0] ss:$20 sps:$4 sm:$0xff]  }
 0x554   : > { %6705 = vst.msk [vmem:[#allocation3 + $0xdc] sm:$0xf] %vm5665_vm8, %v15489_v61  ;;  %6877 = vst.msk [vmem:[#allocation3 + $0xfc] sm:$0xf] %vm5665_vm8, %v15497_v62  ;;  %v15487_v42 = vpack.c.bf16 %v6654_v0, %v6654_v0  ;;  %v15495_v51 = vpack.c.bf16 %v6826_v3, %v6826_v3  ;;  %v18417_v38 = vld [vmem:[#allocation3 + $0xc8] sm:$0xff]  }
 0x555   : > { %v18408_v7 = vld [vmem:[#allocation3 + $0xe0] sm:$0xff]   ;;  %v18441_v36 = vld [vmem:[%s22818_s7 + $0x84] ss:$20 sps:$4 sm:$0xff]   ;;  %v18443_v28 = vld [vmem:[%s22818_s7 + $0x88] ss:$20 sps:$4 sm:$0xff]  }
 0x556   : > { %6703 = vst.msk [vmem:[#allocation3 + $0xd4] sm:$0xf] %vm5665_vm8, %v15487_v42  ;;  %6875 = vst.msk [vmem:[#allocation3 + $0xf4] sm:$0xf] %vm5665_vm8, %v15495_v51  ;;  %v18422_v26 = vld [vmem:[#allocation3 + $0xc0] sm:$0xff]  }
 0x557   : > { %v18439_v57 = vld [vmem:[%s22818_s7 + $0x80] ss:$20 sps:$4 sm:$0xff]   ;;  %v18444_v60 = vld [vmem:[%s22818_s7 + $0xa8] ss:$20 sps:$4 sm:$0xff]   ;;  %v18448_v61 = vld [vmem:[%s22818_s7 + $0xd8] ss:$20 sps:$4 sm:$0xff]  }
 0x558   : > { %v18446_v46 = vld [vmem:[%s22818_s7 + $0xac] ss:$20 sps:$4 sm:$0xff]   ;;  %v18451_v62 = vld [vmem:[%s22818_s7 + $0xd4] ss:$20 sps:$4 sm:$0xff]   ;;  %v18449_v3 = vld [vmem:[%s22818_s7 + $0xd0] ss:$20 sps:$4 sm:$0xff]  }
 0x559   : > { %v18455_v0 = vld [vmem:[%s22818_s7 + $0x100] ss:$20 sps:$4 sm:$0xff]   ;;  %v18454_v42 = vld [vmem:[%s22818_s7 + $0xfc] ss:$20 sps:$4 sm:$0xff]  }
 0x55a   : > { %7772 = vmatmul.mubr.bf16.gmra.mxu0 %v18396_v58  ;;  %v18456_v51 = vld [vmem:[%s22818_s7 + $0x128] ss:$20 sps:$4 sm:$0xff]   ;;  %v18452_v58 = vld [vmem:[%s22818_s7 + $0xf8] ss:$20 sps:$4 sm:$0xff]  }
 0x55b   : > { %v18399_v8 = vld [vmem:[#allocation3 + $0xf8] sm:$0xff]   ;;  %7779 = vmatprep.mubr.bf16.mxu0 %v18406_v6  ;;  %v18459_v6 = vld [vmem:[%s22818_s7 + $0x124] ss:$20 sps:$4 sm:$0xff]  }
 0x55c   : > { %16408 = vmatprep.subr.bf16.mxu1 %v18399_v8  ;;  %v18410_v27 = vld [vmem:[#allocation3 + $0xd8] sm:$0xff]   ;;  %v18457_v8 = vld [vmem:[%s22818_s7 + $0x120] ss:$20 sps:$4 sm:$0xff]  }
 0x55d   : > { %v18401_v10 = vld [vmem:[#allocation3 + $0xf0] sm:$0xff]   ;;  %16409 = vmatpush3.bf16.msra.mxu1 %v18400_v9  ;;  %v18460_v9 = vld [vmem:[%s22820_s9 + $0x8] sm:$0x1f]  }
 0x55e   : > { %16410 = vmatprep.subr.bf16.mxu1 %v18401_v10  ;;  %v18415_v33 = vld [vmem:[#allocation3 + $0xd0] sm:$0xff]   ;;  %v18461_v10 = vld [vmem:[%s22820_s9 + $0x18] sm:$0x1f]  }
 0x561   : > { %16411 = vmatpush3.bf16.msra.mxu1 %v18402_v12  ;;  %v8260_v12 = vand.u32 %v18461_v10, %v20431_v4 }
 0x562   : > { %16412 = vmatprep.subr.bf16.mxu1 %v18403_v19  ;;  %7780 = vmatmul.mubr.bf16.gmra.mxu0 %v18404_v11  ;;  %v8063_v11 = vand.u32 %v18460_v9, %v20431_v4  ;;  %v18463_v19 = vld [vmem:[%s22820_s9 + $0x10] sm:$0xff]  }
 0x563   : > { %7787 = vmatprep.mubr.bf16.mxu0 %v18413_v13  ;;  %v18462_v13 = vld [vmem:[%s22820_s9] sm:$0xff]  }
 0x565   : > { %16413 = vmatpush3.bf16.msra.mxu1 %v18407_v14 }
 0x566   : > { %v17584_v16 = vpop.f32.mrf.mxu1  ;;  %16414 = vmatprep.subr.bf16.mxu1 %v18408_v7 }
 0x567   : > { %v15500_v17 = vpack.c.bf16 %v17584_v16, %v17584_v16 }
 0x568   : > { %v6979_v47 = vpop.f32.mrf.mxu1 }
 0x569   : > { %7044 = vst.msk [vmem:[#allocation3 + $0x108] sm:$0xf] %vm5665_vm8, %v15500_v17  ;;  %v15498_v25 = vpack.c.bf16 %v6979_v47, %v6979_v47  ;;  %16415 = vmatpush3.bf16.msra.mxu1 %v18409_v1  ;;  %v18464_v47 = vld [vmem:[%s22820_s9 + $0x28] sm:$0x1f]   ;;  %v18465_v1 = vld [vmem:[%s22820_s9 + $0x38] sm:$0x1f]  }
 0x56a   : > { %v17585_v20 = vpop.f32.mrf.mxu1  ;;  %16416 = vmatprep.subr.bf16.mxu1 %v18410_v27  ;;  %7788 = vmatmul.mubr.bf16.gmra.mxu0 %v18411_v18  ;;  %v20994_v27 = vand.u32 %v18465_v1, %v20431_v4 }
 0x56b   : > { %7042 = vst.msk [vmem:[#allocation3 + $0x100] sm:$0xf] %vm5665_vm8, %v15498_v25  ;;  %v15501_v29 = vpack.c.bf16 %v17585_v20, %v17585_v20  ;;  %7795 = vmatprep.mubr.bf16.mxu0 %v18420_v24  ;;  %v20991_v25 = vand.u32 %v18464_v47, %v20431_v4 }
 0x56c   : > { %v6982_v2 = vpop.f32.mrf.mxu1 }
 0x56d   : > { %7045 = vst.msk [vmem:[#allocation3 + $0x10c] sm:$0xf] %vm5665_vm8, %v15501_v29  ;;  %v15499_v32 = vpack.c.bf16 %v6982_v2, %v6982_v2  ;;  %16417 = vmatpush3.bf16.msra.mxu1 %v18414_v31 }
 0x56e   : > { %v17588_v34 = vpop.f32.mrf.mxu1  ;;  %16418 = vmatprep.subr.bf16.mxu1 %v18415_v33 }
 0x56f   : > { %7043 = vst.msk [vmem:[#allocation3 + $0x104] sm:$0xf] %vm5665_vm8, %v15499_v32  ;;  %v15504_v35 = vpack.c.bf16 %v17588_v34, %v17588_v34 }
 0x570   : > { %v6995_v37 = vpop.f32.mrf.mxu1 }
 0x571   : > { %7048 = vst.msk [vmem:[#allocation3 + $0x118] sm:$0xf] %vm5665_vm8, %v15504_v35  ;;  %v15502_v45 = vpack.c.bf16 %v6995_v37, %v6995_v37  ;;  %16419 = vmatpush3.bf16.msra.mxu1 %v18416_v30 }
 0x572   : > { %v17589_v39 = vpop.f32.mrf.mxu1  ;;  %16420 = vmatprep.subr.bf16.mxu1 %v18417_v38  ;;  %7796 = vmatmul.mubr.bf16.gmra.mxu0 %v18418_v63 }
 0x573   : > { %7046 = vst.msk [vmem:[#allocation3 + $0x110] sm:$0xf] %vm5665_vm8, %v15502_v45  ;;  %v15505_v15 = vpack.c.bf16 %v17589_v39, %v17589_v39  ;;  %17598 = vmatprep.mubr.msk.bf16.mxu0 %vm7682_vm9, %v18437_v43 }
 0x574   : > { %v6998_v5 = vpop.f32.mrf.mxu1  ;;  %v18429_v49 = vld [vmem:[#allocation3 + $0x108] sm:$0xff]  }
 0x575   : > { %7049 = vst.msk [vmem:[#allocation3 + $0x11c] sm:$0xf] %vm5665_vm8, %v15505_v15  ;;  %v15503_v41 = vpack.c.bf16 %v6998_v5, %v6998_v5  ;;  %16421 = vmatpush3.bf16.msra.mxu1 %v18421_v40 }
 0x576   : > { %16422 = vmatprep.subr.bf16.mxu1 %v18422_v26  ;;  %v18433_v59 = vld [vmem:[#allocation3 + $0x100] sm:$0xff]  }
 0x577   : > { %7047 = vst.msk [vmem:[#allocation3 + $0x114] sm:$0xf] %vm5665_vm8, %v15503_v41 }
 0x579   : > { %16423 = vmatpush3.bf16.msra.mxu1 %v18423_v48 }
 0x57a   : > { %17614 = vmatprep.subr.bf16.mxu1 %v8063_v11 }
 0x57c   : > { %v18427_v22 = vld [vmem:[#allocation3 + $0x118] sm:$0xff]   ;;  %7837 = vmatmul.mubr.bf16.vlgmr.msra.gmra.mxu1 %v18424_v50 }
 0x57d   : > { %17590 = vmatprep.subr.bf16.mxu0 %v18427_v22  ;;  %7844 = vmatprep.mubr.bf16.mxu1 %v18432_v52 }
 0x57e   : > { %v18428_v21 = vld [vmem:[#allocation3 + $0x110] sm:$0xff]   ;;  %17591 = vmatpush3.bf16.msra.mxu0 %v18427_v22  ;;  %17615 = vmatpush3.bf16.msra.mxu1 %v8063_v11 }
 0x57f   : > { %17592 = vmatprep.subr.bf16.mxu0 %v18428_v21  ;;  %17616 = vmatprep.subr.bf16.mxu1 %v18462_v13 }
 0x582   : > { %17593 = vmatpush3.bf16.msra.mxu0 %v18428_v21  ;;  %17617 = vmatpush3.bf16.msra.mxu1 %v18462_v13 }
 0x583   : > { %17594 = vmatprep.subr.bf16.mxu0 %v18429_v49  ;;  %17654 = vmatprep.subr.bf16.mxu1 %v20991_v25 }
 0x584   : > { %7845 = vmatmul.mubr.bf16.gmra.mxu1 %v18430_v53 }
 0x585   : > { %7852 = vmatprep.mubr.bf16.mxu1 %v18436_v54 }
 0x586   : > { %17595 = vmatpush3.bf16.msra.mxu0 %v18429_v49 }
 0x587   : > { %17596 = vmatprep.subr.bf16.mxu0 %v18433_v59 }
 0x58a   : > { %17597 = vmatpush3.bf16.msra.mxu0 %v18433_v59  ;;  %v7189_v59 = vpop.permute.xlu0 %7188 }
 0x58b   : > { %17634 = vmatprep.subr.bf16.mxu0 %v8260_v12 }
 0x58c   : > { %7853 = vmatmul.mubr.bf16.gmra.mxu1 %v18434_v55 }
 0x58d   : > { %17599 = vmatmul.mubr.msk.bf16.vlgmr.msra.gmra.mxu0 %vm7682_vm9, %v18438_v56  ;;  %7860 = vmatprep.mubr.bf16.mxu1 %v18441_v36  ;;  %v7194_v36 = vpop.permute.xlu1 %7193 }
 0x58e   : > { %17602 = vmatprep.mubr.msk.bf16.mxu0 %vm7682_vm9, %v18442_v23  ;;  %17635 = vmatpush3.bf16.msra.mxu0 %v8260_v12 }
 0x58f   : > { %17636 = vmatprep.subr.bf16.mxu0 %v18463_v19 }
 0x592   : > { %17637 = vmatpush3.bf16.msra.mxu0 %v18463_v19 }
 0x593   : > { %17674 = vmatprep.subr.bf16.mxu0 %v20994_v27 }
 0x594   : > { %7861 = vmatmul.mubr.bf16.gmra.mxu1 %v18439_v57 }
 0x595   : > { %17603 = vmatmul.mubr.msk.bf16.gmra.mxu0 %vm7682_vm9, %v18443_v28  ;;  %7868 = vmatprep.mubr.bf16.mxu1 %v18446_v46  ;;  %v7199_v28 = vpop.permute.xlu0 %7198 }
 0x596   : > { %17606 = vmatprep.mubr.msk.bf16.mxu0 %vm7682_vm9, %v18447_v44 }
 0x599   : > { %v7209_v47 = vpop.permute.xlu0 %7208 }
 0x59c   : > { %7869 = vmatmul.mubr.bf16.gmra.mxu1 %v18444_v60 }
 0x59d   : > { %17607 = vmatmul.mubr.msk.bf16.gmra.mxu0 %vm7682_vm9, %v18448_v61  ;;  %7876 = vmatprep.mubr.bf16.mxu1 %v18451_v62 }
 0x59e   : > { %17610 = vmatprep.mubr.msk.bf16.mxu0 %vm7682_vm9, %v18455_v0 }
 0x5a4   : > { %7877 = vmatmul.mubr.bf16.gmra.mxu1 %v18449_v3 }
 0x5a5   : > { %7884 = vmatprep.mubr.bf16.mxu1 %v18454_v42  ;;  %17611 = vmatmul.mubr.msk.bf16.gmra.mxu0 %vm7682_vm9, %v18456_v51 }
 0x5ac   : > { %7885 = vmatmul.mubr.bf16.gmra.mxu1 %v18452_v58  ;;  %v7204_v58 = vpop.permute.xlu1 %7203 }
 0x5ad   : > { %7892 = vmatprep.mubr.bf16.mxu1 %v18459_v6 }
 0x5b4   : > { %7893 = vmatmul.mubr.bf16.gmra.mxu1 %v18457_v8 }
 0x5fa   : > { %v16360_v14 = vpop.f32.mrf.mxu0 }
 0x5fc   : > { %v16361_v7 = vpop.f32.mrf.mxu0 }
 0x5fd   : > { %v16362_v46 = vadd.f32 %v16361_v7, %v16360_v14 }
 0x5fe   : > { %v16363_v16 = vpop.f32.mrf.mxu0 }
 0x5ff   : > { %v7742_v9 = vadd.f32 %v16362_v46, %v7189_v59 }
 0x600   : > { %v16364_v17 = vpop.f32.mrf.mxu0 }
 0x601   : > { %v16365_v0 = vadd.f32 %v16364_v17, %v16363_v16 }
 0x602   : > { %v16366_v18 = vpop.f32.mrf.mxu0 }
 0x603   : > { %v7745_v14 = vadd.f32 %v16365_v0, %v7194_v36 }
 0x604   : > { %v16367_v24 = vpop.f32.mrf.mxu0 }
 0x605   : > { %v16368_v61 = vadd.f32 %v16367_v24, %v16366_v18 }
 0x606   : > { %v16369_v20 = vpop.f32.mrf.mxu0 }
 0x607   : > { %v7750_v13 = vadd.f32 %v16368_v61, %v7199_v28 }
 0x608   : > { %v16370_v29 = vpop.f32.mrf.mxu0 }
 0x609   : > { %v16371_v44 = vadd.f32 %v16370_v29, %v16369_v20 }
 0x60a   : > { %v16372_v2 = vpop.f32.mrf.mxu0 }
 0x60b   : > { %v7753_v10 = vadd.f32 %v16371_v44, %v7204_v58 }
 0x60c   : > { %v16373_v31 = vpop.f32.mrf.mxu0 }
 0x60d   : > { %v16374_v16 = vadd.f32 %v16373_v31, %v16372_v2 }
 0x60e   : > { %v20998_v32 = vpop.f32.mrf.mxu0 }
 0x60f   : > { %v7758_v61 = vadd.f32 %v16374_v16, %v7209_v47 }
 0x610   : > { %v21000_v33 = vpop.f32.mrf.mxu0 }
 0x612   : > { %v16378_v34 = vpop.f32.mrf.mxu0 }
 0x614   : > { %v16379_v35 = vpop.f32.mrf.mxu0 }
 0x616   : > { %v21002_v63 = vpop.f32.mrf.mxu0 }
 0x618   : > { %v21004_v37 = vpop.f32.mrf.mxu0 }
 0x61a   : > { %v21006_v30 = vpop.f32.mrf.mxu0 }
 0x61c   : > { %v21008_v43 = vpop.f32.mrf.mxu0 }
 0x61e   : > { %v21010_v45 = vpop.f32.mrf.mxu0 }
 0x620   : > { %v21012_v38 = vpop.f32.mrf.mxu0 }
 0x622   : > { %v21014_v39 = vpop.f32.mrf.mxu0 }
 0x624   : > { %v21016_v15 = vpop.f32.mrf.mxu0 }
 0x626   : > { %v21018_v5 = vpop.f32.mrf.mxu0 }
 0x628   : > { %v21020_v40 = vpop.f32.mrf.mxu0 }
 0x62a   : > { %v21022_v41 = vpop.f32.mrf.mxu0 }
 0x62c   : > { %v21024_v26 = vpop.f32.mrf.mxu0 }
 0x62e   : > { %v21026_v48 = vpop.f32.mrf.mxu0 }
 0x630   : > { %v21028_v50 = vpop.f32.mrf.mxu0 }
 0x632   : > { %v21030_v21 = vpop.f32.mrf.mxu0 }
 0x634   : > { %v21032_v54 = vpop.f32.mrf.mxu0 }
 0x636   : > { %v21034_v23 = vpop.f32.mrf.mxu0 }
 0x638   : > { %v21036_v62 = vpop.f32.mrf.mxu0 }
 0x63c   : > { %v16424_v52 = vpop.f32.mrf.mxu1 }
 0x63e   : > { %v16425_v22 = vpop.f32.mrf.mxu1 }
 0x63f   : > { %v16426_v3 = vadd.f32 %v16425_v22, %v16424_v52 }
 0x640   : > { %v16427_v53 = vpop.f32.mrf.mxu1 }
 0x641   : > { %v7839_v7 = vadd.f32 %v16426_v3, %v7742_v9  ;;  %v18468_v9 = vld [vmem:[%s22820_s9 + $0x48] sm:$0x1f]  }
 0x642   : > { %v16428_v49 = vpop.f32.mrf.mxu1 }
 0x643   : > { %v16429_v11 = vadd.f32 %v16428_v49, %v16427_v53  ;;  %v16377_v53 = vadd.f32 %v21000_v33, %v20998_v32 }
 0x644   : > { %v16430_v55 = vpop.f32.mrf.mxu1 }
 0x645   : > { %v7842_v22 = vadd.f32 %v16429_v11, %v7745_v14 }
 0x646   : > { %v16431_v56 = vpop.f32.mrf.mxu1 }
 0x647   : > { %v16432_v6 = vadd.f32 %v16431_v56, %v16430_v55  ;;  %v16380_v55 = vadd.f32 %v16379_v35, %v16378_v34  ;;  %v16383_v34 = vadd.f32 %v21004_v37, %v21002_v63  ;;  %v18466_v63 = vld [vmem:[%s22820_s9 + $0x20] sm:$0xff]   ;;  %v18467_v37 = vld [vmem:[%s22820_s9 + $0x30] sm:$0xff]  }
 0x648   : > { %v16433_v57 = vpop.f32.mrf.mxu1 }
 0x649   : > { %v7847_v24 = vadd.f32 %v16432_v6, %v7750_v13  ;;  %v18469_v13 = vld [vmem:[%s22820_s9 + $0x58] sm:$0x1f]  }
 0x64a   : > { %v16434_v60 = vpop.f32.mrf.mxu1 }
 0x64b   : > { %v16435_v42 = vadd.f32 %v16434_v60, %v16433_v57  ;;  %v7214_v57 = vpop.permute.xlu1 %7213  ;;  %v7219_v60 = vpop.permute.xlu0 %7218 }
 0x64c   : > { %v16436_v51 = vpop.f32.mrf.mxu1  ;;  %v7761_v32 = vadd.f32 %v16377_v53, %v7214_v57 }
 0x64d   : > { %v17600_v8 = vpop.f32.mrf.mxu0  ;;  %v7850_v18 = vadd.f32 %v16435_v42, %v7753_v10  ;;  %v7766_v42 = vadd.f32 %v16380_v55, %v7219_v60 }
 0x64e   : > { %v16437_v12 = vpop.f32.mrf.mxu1  ;;  %v7944_v56 = vadd.f32 %v17600_v8, %v7847_v24 }
 0x64f   : > { %v7935_v19 = vpop.f32.mrf.mxu0  ;;  %v16438_v49 = vadd.f32 %v16437_v12, %v16436_v51  ;;  %v7229_v55 = vpop.permute.xlu0 %7228 }
 0x650   : > { %v16439_v1 = vpop.f32.mrf.mxu1  ;;  %v7936_v17 = vadd.f32 %v7935_v19, %v7839_v7  ;;  %v8000_v35 = vmax.f32 %v7944_v56, 0.0  ;;  %v7224_v19 = vpop.permute.xlu1 %7223 }
 0x651   : > { %v17601_v20 = vpop.f32.mrf.mxu0  ;;  %v7855_v51 = vadd.f32 %v16438_v49, %v7758_v61 }
 0x652   : > { %v7947_v29 = vadd.f32 %v17601_v20, %v7850_v18  ;;  %v16440_v52 = vpop.f32.mrf.mxu1  ;;  %v7998_v2 = vmax.f32 %v7936_v17, 0.0  ;;  %v16386_v18 = vadd.f32 %v21008_v43, %v21006_v30  ;;  %v21074_v43 = vand.u32 %v18469_v13, %v20431_v4 }
 0x653   : > { %v7938_v59 = vpop.f32.mrf.mxu0  ;;  %v16441_v31 = vadd.f32 %v16440_v52, %v16439_v1  ;;  %v7769_v1 = vadd.f32 %v16383_v34, %v7224_v19 }
 0x654   : > { %v7939_v28 = vadd.f32 %v7938_v59, %v7842_v22  ;;  %v16442_v36 = vpop.f32.mrf.mxu1  ;;  %v8001_v46 = vmax.f32 %v7947_v29, 0.0  ;;  %v21071_v29 = vand.u32 %v18468_v9, %v20431_v4  ;;  %v7774_v53 = vadd.f32 %v16386_v18, %v7229_v55 }
 0x655   : > { %v17604_v44 = vpop.f32.mrf.mxu0  ;;  %v7858_v7 = vadd.f32 %v16441_v31, %v7761_v32  ;;  %v7234_v31 = vpop.permute.xlu1 %7233  ;;  %v16395_v9 = vadd.f32 %v21020_v40, %v21018_v5 }
 0x656   : > { %v7999_v0 = vmax.f32 %v7939_v28, 0.0  ;;  %v16443_v3 = vpop.f32.mrf.mxu1  ;;  %v21047_v10 = vpack.c.bf16 %v8001_v46, %v8000_v35  ;;  %v7239_v32 = vpop.permute.xlu0 %7238 }
 0x657   : > { %v16444_v58 = vadd.f32 %v16443_v3, %v16442_v36  ;;  %v7951_v6 = vpop.f32.mrf.mxu0 }
 0x658   : > { %v21042_v33 = vpack.c.bf16 %v7999_v0, %v7998_v2  ;;  %v16445_v8 = vpop.f32.mrf.mxu1  ;;  %v7952_v47 = vadd.f32 %v7951_v6, %v7855_v51  ;;  %v16392_v0 = vadd.f32 %v21016_v15, %v21014_v39 }
 0x659   : > { %v7863_v11 = vadd.f32 %v16444_v58, %v7766_v42  ;;  %v17605_v12 = vpop.f32.mrf.mxu0  ;;  %v7244_v19 = vpop.permute.xlu1 %7243 }
 0x65a   : > { %17618 = vmatprep.mubr.msk.bf16.mxu1 %vm8037_vm10, %v21042_v33  ;;  %17638 = vmatprep.mubr.msk.bf16.mxu0 %vm8037_vm10, %v21042_v33  ;;  %v16446_v14 = vpop.f32.mrf.mxu1  ;;  %v8002_v56 = vmax.f32 %v7952_v47, 0.0  ;;  %v7249_v40 = vpop.permute.xlu0 %7248 }
 0x65b   : > { %v16447_v24 = vadd.f32 %v16446_v14, %v16445_v8  ;;  %v7954_v20 = vpop.f32.mrf.mxu0  ;;  %17619 = vmatmul.mubr.msk.bf16.vlgmr.msra.gmra.mxu1 %vm8037_vm10, %v21047_v10  ;;  %17639 = vmatmul.mubr.msk.bf16.vlgmr.msra.gmra.mxu0 %vm8037_vm10, %v21047_v10  ;;  %v7960_v52 = vadd.f32 %v17604_v44, %v7863_v11  ;;  %v7782_v8 = vadd.f32 %v16392_v0, %v7239_v32 }
 0x65c   : > { %v7955_v16 = vadd.f32 %v7954_v20, %v7858_v7  ;;  %v16448_v17 = vpop.f32.mrf.mxu1  ;;  %17655 = vmatpush3.bf16.msra.mxu1 %v20991_v25  ;;  %17675 = vmatpush3.bf16.msra.mxu0 %v20994_v27  ;;  %v16389_v25 = vadd.f32 %v21012_v38, %v21010_v45  ;;  %v7785_v14 = vadd.f32 %v16395_v9, %v7244_v19 }
 0x65d   : > { %v7866_v22 = vadd.f32 %v16447_v24, %v7769_v1  ;;  %v17608_v30 = vpop.f32.mrf.mxu0  ;;  %17656 = vmatprep.subr.bf16.mxu1 %v18466_v63  ;;  %17676 = vmatprep.subr.bf16.mxu0 %v18467_v37  ;;  %v8004_v44 = vmax.f32 %v7960_v52, 0.0  ;;  %v16398_v7 = vadd.f32 %v21024_v26, %v21022_v41 }
 0x65e   : > { %v8003_v59 = vmax.f32 %v7955_v16, 0.0  ;;  %v16449_v57 = vpop.f32.mrf.mxu1  ;;  %v7777_v38 = vadd.f32 %v16389_v25, %v7234_v31 }
 0x65f   : > { %v7963_v27 = vadd.f32 %v17605_v12, %v7866_v22  ;;  %v16450_v49 = vadd.f32 %v16449_v57, %v16448_v17  ;;  %v7967_v28 = vpop.f32.mrf.mxu0  ;;  %v7790_v52 = vadd.f32 %v16398_v7, %v7249_v40  ;;  %v16401_v22 = vadd.f32 %v21028_v50, %v21026_v48  ;;  %v7259_v50 = vpop.permute.xlu0 %7258  ;;  %v18496_v7 = vld [vmem:[%s22821_s10 + $0x4] ss:$36 sps:$4 sm:$0xff]  }
 0x660   : > { %v21078_v36 = vpack.c.bf16 %v8003_v59, %v8002_v56  ;;  %v16451_v46 = vpop.f32.mrf.mxu1  ;;  %17657 = vmatpush3.bf16.msra.mxu1 %v18466_v63  ;;  %17677 = vmatpush3.bf16.msra.mxu0 %v18467_v37 }
 0x661   : > { %v8005_v60 = vmax.f32 %v7963_v27, 0.0  ;;  %v7871_v61 = vadd.f32 %v16450_v49, %v7774_v53  ;;  %v17609_v2 = vpop.f32.mrf.mxu0  ;;  %17694 = vmatprep.subr.bf16.mxu1 %v21071_v29  ;;  %17714 = vmatprep.subr.bf16.mxu0 %v21074_v43  ;;  %v7254_v53 = vpop.permute.xlu1 %7253  ;;  %v16404_v49 = vadd.f32 %v21032_v54, %v21030_v21 }
 0x662   : > { %17622 = vmatprep.mubr.msk.bf16.mxu1 %vm8037_vm10, %v21078_v36  ;;  %17642 = vmatprep.mubr.msk.bf16.mxu0 %vm8037_vm10, %v21078_v36  ;;  %v16452_v45 = vpop.f32.mrf.mxu1  ;;  %v7793_v27 = vadd.f32 %v16401_v22, %v7254_v53 }
 0x663   : > { %v21088_v3 = vpack.c.bf16 %v8005_v60, %v8004_v44  ;;  %v16453_v42 = vadd.f32 %v16452_v45, %v16451_v46  ;;  %v7970_v35 = vpop.f32.mrf.mxu0  ;;  %v7968_v58 = vadd.f32 %v7967_v28, %v7871_v61  ;;  %v7798_v31 = vadd.f32 %v16404_v49, %v7259_v50 }
 0x664   : > { %v16454_v34 = vpop.f32.mrf.mxu1  ;;  %v16407_v45 = vadd.f32 %v21036_v62, %v21034_v23 }
 0x665   : > { %17623 = vmatmul.mubr.msk.bf16.gmra.mxu1 %vm8037_vm10, %v21088_v3  ;;  %17643 = vmatmul.mubr.msk.bf16.gmra.mxu0 %vm8037_vm10, %v21088_v3  ;;  %v7874_v6 = vadd.f32 %v16453_v42, %v7777_v38  ;;  %v17612_v12 = vpop.f32.mrf.mxu0  ;;  %v8006_v63 = vmax.f32 %v7968_v58, 0.0 }
 0x666   : > { %v16455_v51 = vpop.f32.mrf.mxu1 }
 0x667   : > { %v16456_v39 = vadd.f32 %v16455_v51, %v16454_v34  ;;  %v7971_v15 = vadd.f32 %v7970_v35, %v7874_v6  ;;  %v7983_v20 = vpop.f32.mrf.mxu0  ;;  %v7264_v35 = vpop.permute.xlu1 %7263 }
 0x668   : > { %v16457_v11 = vpop.f32.mrf.mxu1  ;;  %v7801_v6 = vadd.f32 %v16407_v45, %v7264_v35 }
 0x669   : > { %v7879_v37 = vadd.f32 %v16456_v39, %v7782_v8  ;;  %v8007_v13 = vmax.f32 %v7971_v15, 0.0  ;;  %v17613_v56 = vpop.f32.mrf.mxu0 }
 0x66a   : > { %v16458_v47 = vpop.f32.mrf.mxu1 }
 0x66b   : > { %v21098_v1 = vpack.c.bf16 %v8007_v13, %v8006_v63  ;;  %v16459_v18 = vadd.f32 %v16458_v47, %v16457_v11  ;;  %v7976_v16 = vadd.f32 %v17608_v30, %v7879_v37  ;;  %v7986_v60 = vpop.f32.mrf.mxu0  ;;  %v18470_v11 = vld [vmem:[%s22820_s9 + $0x40] sm:$0xff]   ;;  %v18472_v63 = vld [vmem:[%s22820_s9 + $0x68] sm:$0x1f]   ;;  %v18473_v37 = vld [vmem:[%s22820_s9 + $0x78] sm:$0x1f]  }
 0x66c   : > { %v16460_v24 = vpop.f32.mrf.mxu1  ;;  %v9240_v13 = vand.u32 %v18472_v63, %v20431_v4  ;;  %v9436_v19 = vand.u32 %v18473_v37, %v20431_v4  ;;  %v18476_v47 = vld [vmem:[%s22820_s9 + $0x88] sm:$0x1f]  }
 0x66d   : > { %v7882_v5 = vadd.f32 %v16459_v18, %v7785_v14  ;;  %17626 = vmatprep.mubr.msk.bf16.mxu1 %vm8037_vm10, %v21098_v1  ;;  %17646 = vmatprep.mubr.msk.bf16.mxu0 %vm8037_vm10, %v21098_v1  ;;  %v8008_v59 = vmax.f32 %v7976_v16, 0.0  ;;  %v9632_v14 = vand.u32 %v18476_v47, %v20431_v4  ;;  %v18477_v4 = vld [vmem:[%s22820_s9 + $0x80] sm:$0xff]  }
 0x66e   : > { %v16461_v17 = vpop.f32.mrf.mxu1 }
 0x66f   : > { %v7979_v41 = vadd.f32 %v17609_v2, %v7882_v5  ;;  %v16462_v26 = vadd.f32 %v16461_v17, %v16460_v24 }
 0x670   : > { %v16463_v55 = vpop.f32.mrf.mxu1 }
 0x671   : > { %v8009_v57 = vmax.f32 %v7979_v41, 0.0  ;;  %v7887_v30 = vadd.f32 %v16462_v26, %v7790_v52 }
 0x672   : > { %v16464_v25 = vpop.f32.mrf.mxu1 }
 0x673   : > { %v21108_v28 = vpack.c.bf16 %v8009_v57, %v8008_v59  ;;  %v16465_v46 = vadd.f32 %v16464_v25, %v16463_v55  ;;  %v7984_v61 = vadd.f32 %v7983_v20, %v7887_v30 }
 0x674   : > { %v16466_v44 = vpop.f32.mrf.mxu1 }
 0x675   : > { %17627 = vmatmul.mubr.msk.bf16.gmra.mxu1 %vm8037_vm10, %v21108_v28  ;;  %17647 = vmatmul.mubr.msk.bf16.gmra.mxu0 %vm8037_vm10, %v21108_v28  ;;  %v7890_v48 = vadd.f32 %v16465_v46, %v7793_v27  ;;  %v8010_v0 = vmax.f32 %v7984_v61, 0.0 }
 0x676   : > { %v16467_v2 = vpop.f32.mrf.mxu1 }
 0x677   : > { %v16468_v21 = vadd.f32 %v16467_v2, %v16466_v44  ;;  %v7987_v54 = vadd.f32 %v7986_v60, %v7890_v48 }
 0x678   : > { %v16469_v38 = vpop.f32.mrf.mxu1 }
 0x679   : > { %v7895_v42 = vadd.f32 %v16468_v21, %v7798_v31  ;;  %v8011_v34 = vmax.f32 %v7987_v54, 0.0 }
 0x67a   : > { %v16470_v58 = vpop.f32.mrf.mxu1 }
 0x67b   : > { %v21116_v32 = vpack.c.bf16 %v8011_v34, %v8010_v0  ;;  %v16471_v51 = vadd.f32 %v16470_v58, %v16469_v38  ;;  %v7992_v8 = vadd.f32 %v17612_v12, %v7895_v42  ;;  %v18471_v12 = vld [vmem:[%s22820_s9 + $0x50] sm:$0xff]  }
 0x67d   : > { %v7898_v9 = vadd.f32 %v16471_v51, %v7801_v6  ;;  %17630 = vmatprep.mubr.msk.bf16.mxu1 %vm8037_vm10, %v21116_v32  ;;  %17650 = vmatprep.mubr.msk.bf16.mxu0 %vm8037_vm10, %v21116_v32  ;;  %v8012_v62 = vmax.f32 %v7992_v8, 0.0 }
 0x67f   : > { %v7995_v23 = vadd.f32 %v17613_v56, %v7898_v9 }
 0x681   : > { %v8013_v39 = vmax.f32 %v7995_v23, 0.0 }
 0x683   : > { %v21122_v15 = vpack.c.bf16 %v8013_v39, %v8012_v62 }
 0x685   : > { %17631 = vmatmul.mubr.msk.bf16.gmra.mxu1 %vm8037_vm10, %v21122_v15  ;;  %17651 = vmatmul.mubr.msk.bf16.gmra.mxu0 %vm8037_vm10, %v21122_v15 }
 0x686   : > { %17658 = vmatprep.mubr.msk.bf16.mxu1 %vm8037_vm10, %v21042_v33  ;;  %17678 = vmatprep.mubr.msk.bf16.mxu0 %vm8037_vm10, %v21042_v33 }
 0x68d   : > { %17659 = vmatmul.mubr.msk.bf16.vlgmr.msra.gmra.mxu1 %vm8037_vm10, %v21047_v10  ;;  %17679 = vmatmul.mubr.msk.bf16.vlgmr.msra.gmra.mxu0 %vm8037_vm10, %v21047_v10 }
 0x68e   : > { %17662 = vmatprep.mubr.msk.bf16.mxu1 %vm8037_vm10, %v21078_v36  ;;  %17682 = vmatprep.mubr.msk.bf16.mxu0 %vm8037_vm10, %v21078_v36 }
 0x68f   : > { %17695 = vmatpush3.bf16.msra.mxu1 %v21071_v29  ;;  %17715 = vmatpush3.bf16.msra.mxu0 %v21074_v43  ;;  %v18474_v29 = vld [vmem:[%s22820_s9 + $0x60] sm:$0xff]   ;;  %v18475_v43 = vld [vmem:[%s22820_s9 + $0x70] sm:$0xff]  }
 0x690   : > { %17696 = vmatprep.subr.bf16.mxu1 %v18470_v11  ;;  %17716 = vmatprep.subr.bf16.mxu0 %v18471_v12 }
 0x693   : > { %17697 = vmatpush3.bf16.msra.mxu1 %v18470_v11  ;;  %17717 = vmatpush3.bf16.msra.mxu0 %v18471_v12 }
 0x694   : > { %17734 = vmatprep.subr.bf16.mxu1 %v9240_v13  ;;  %17754 = vmatprep.subr.bf16.mxu0 %v9436_v19 }
 0x695   : > { %17663 = vmatmul.mubr.msk.bf16.gmra.mxu1 %vm8037_vm10, %v21088_v3  ;;  %17683 = vmatmul.mubr.msk.bf16.gmra.mxu0 %vm8037_vm10, %v21088_v3 }
 0x696   : > { %17666 = vmatprep.mubr.msk.bf16.mxu1 %vm8037_vm10, %v21098_v1  ;;  %17686 = vmatprep.mubr.msk.bf16.mxu0 %vm8037_vm10, %v21098_v1 }
 0x69d   : > { %17667 = vmatmul.mubr.msk.bf16.gmra.mxu1 %vm8037_vm10, %v21108_v28  ;;  %17687 = vmatmul.mubr.msk.bf16.gmra.mxu0 %vm8037_vm10, %v21108_v28 }
 0x69e   : > { %17670 = vmatprep.mubr.msk.bf16.mxu1 %vm8037_vm10, %v21116_v32  ;;  %17690 = vmatprep.mubr.msk.bf16.mxu0 %vm8037_vm10, %v21116_v32 }
 0x6a5   : > { %17671 = vmatmul.mubr.msk.bf16.gmra.mxu1 %vm8037_vm10, %v21122_v15  ;;  %17691 = vmatmul.mubr.msk.bf16.gmra.mxu0 %vm8037_vm10, %v21122_v15 }
 0x6a6   : > { %17698 = vmatprep.mubr.msk.bf16.mxu1 %vm8037_vm10, %v21042_v33  ;;  %17718 = vmatprep.mubr.msk.bf16.mxu0 %vm8037_vm10, %v21042_v33 }
 0x6ad   : > { %17699 = vmatmul.mubr.msk.bf16.vlgmr.msra.gmra.mxu1 %vm8037_vm10, %v21047_v10  ;;  %17719 = vmatmul.mubr.msk.bf16.vlgmr.msra.gmra.mxu0 %vm8037_vm10, %v21047_v10 }
 0x6ae   : > { %17702 = vmatprep.mubr.msk.bf16.mxu1 %vm8037_vm10, %v21078_v36  ;;  %17722 = vmatprep.mubr.msk.bf16.mxu0 %vm8037_vm10, %v21078_v36 }
 0x6af   : > { %17735 = vmatpush3.bf16.msra.mxu1 %v9240_v13  ;;  %17755 = vmatpush3.bf16.msra.mxu0 %v9436_v19 }
 0x6b0   : > { %17736 = vmatprep.subr.bf16.mxu1 %v18474_v29  ;;  %17756 = vmatprep.subr.bf16.mxu0 %v18475_v43 }
 0x6b3   : > { %17737 = vmatpush3.bf16.msra.mxu1 %v18474_v29  ;;  %17757 = vmatpush3.bf16.msra.mxu0 %v18475_v43 }
 0x6b4   : > { %17774 = vmatprep.subr.bf16.mxu1 %v9632_v14 }
 0x6b5   : > { %17703 = vmatmul.mubr.msk.bf16.gmra.mxu1 %vm8037_vm10, %v21088_v3  ;;  %17723 = vmatmul.mubr.msk.bf16.gmra.mxu0 %vm8037_vm10, %v21088_v3 }
 0x6b6   : > { %17706 = vmatprep.mubr.msk.bf16.mxu1 %vm8037_vm10, %v21098_v1  ;;  %17726 = vmatprep.mubr.msk.bf16.mxu0 %vm8037_vm10, %v21098_v1 }
 0x6bd   : > { %17707 = vmatmul.mubr.msk.bf16.gmra.mxu1 %vm8037_vm10, %v21108_v28  ;;  %17727 = vmatmul.mubr.msk.bf16.gmra.mxu0 %vm8037_vm10, %v21108_v28 }
 0x6be   : > { %17710 = vmatprep.mubr.msk.bf16.mxu1 %vm8037_vm10, %v21116_v32  ;;  %17730 = vmatprep.mubr.msk.bf16.mxu0 %vm8037_vm10, %v21116_v32 }
 0x6c5   : > { %17711 = vmatmul.mubr.msk.bf16.gmra.mxu1 %vm8037_vm10, %v21122_v15  ;;  %17731 = vmatmul.mubr.msk.bf16.gmra.mxu0 %vm8037_vm10, %v21122_v15 }
 0x6c6   : > { %17738 = vmatprep.mubr.msk.bf16.mxu1 %vm8037_vm10, %v21042_v33  ;;  %17758 = vmatprep.mubr.msk.bf16.mxu0 %vm8037_vm10, %v21042_v33 }
 0x6cd   : > { %17739 = vmatmul.mubr.msk.bf16.vlgmr.msra.gmra.mxu1 %vm8037_vm10, %v21047_v10  ;;  %17759 = vmatmul.mubr.msk.bf16.vlgmr.msra.gmra.mxu0 %vm8037_vm10, %v21047_v10 }
 0x6ce   : > { %17742 = vmatprep.mubr.msk.bf16.mxu1 %vm8037_vm10, %v21078_v36  ;;  %17762 = vmatprep.mubr.msk.bf16.mxu0 %vm8037_vm10, %v21078_v36 }
 0x6cf   : > { %17775 = vmatpush3.bf16.msra.mxu1 %v9632_v14 }
 0x6d0   : > { %17776 = vmatprep.subr.bf16.mxu1 %v18477_v4 }
 0x6d3   : > { %17777 = vmatpush3.bf16.msra.mxu1 %v18477_v4 }
 0x6d5   : > { %17743 = vmatmul.mubr.msk.bf16.gmra.mxu1 %vm8037_vm10, %v21088_v3  ;;  %17763 = vmatmul.mubr.msk.bf16.gmra.mxu0 %vm8037_vm10, %v21088_v3 }
 0x6d6   : > { %17746 = vmatprep.mubr.msk.bf16.mxu1 %vm8037_vm10, %v21098_v1  ;;  %17766 = vmatprep.mubr.msk.bf16.mxu0 %vm8037_vm10, %v21098_v1 }
 0x6dd   : > { %17747 = vmatmul.mubr.msk.bf16.gmra.mxu1 %vm8037_vm10, %v21108_v28  ;;  %17767 = vmatmul.mubr.msk.bf16.gmra.mxu0 %vm8037_vm10, %v21108_v28 }
 0x6de   : > { %17750 = vmatprep.mubr.msk.bf16.mxu1 %vm8037_vm10, %v21116_v32  ;;  %17770 = vmatprep.mubr.msk.bf16.mxu0 %vm8037_vm10, %v21116_v32 }
 0x6e5   : > { %17751 = vmatmul.mubr.msk.bf16.gmra.mxu1 %vm8037_vm10, %v21122_v15  ;;  %17771 = vmatmul.mubr.msk.bf16.gmra.mxu0 %vm8037_vm10, %v21122_v15 }
 0x6e6   : > { %17778 = vmatprep.mubr.msk.bf16.mxu1 %vm8037_vm10, %v21042_v33  ;;  %11507 = vmatprep.mubr.bf16.mxu0 %v18496_v7  ;;  %v18527_v33 = vld [vmem:[%s22821_s10 + $0xc] ss:$36 sps:$4 sm:$0xff]  }
 0x6ed   : > { %17779 = vmatmul.mubr.msk.bf16.vlgmr.msra.gmra.mxu1 %vm8037_vm10, %v21047_v10 }
 0x6ee   : > { %17782 = vmatprep.mubr.msk.bf16.mxu1 %vm8037_vm10, %v21078_v36 }
 0x6f5   : > { %17783 = vmatmul.mubr.msk.bf16.gmra.mxu1 %vm8037_vm10, %v21088_v3 }
 0x6f6   : > { %17786 = vmatprep.mubr.msk.bf16.mxu1 %vm8037_vm10, %v21098_v1 }
 0x6fd   : > { %17787 = vmatmul.mubr.msk.bf16.gmra.mxu1 %vm8037_vm10, %v21108_v28 }
 0x6fe   : > { %17790 = vmatprep.mubr.msk.bf16.mxu1 %vm8037_vm10, %v21116_v32 }
 0x705   : > { %17791 = vmatmul.mubr.msk.bf16.gmra.mxu1 %vm8037_vm10, %v21122_v15 }
 0x706   : > { %11668 = vmatprep.mubr.bf16.mxu1 %v18527_v33 }
 0x71b   : > { %v17620_v10 = vpop.f32.mrf.mxu1  ;;  %v17640_v36 = vpop.f32.mrf.mxu0 }
 0x71c   : > { %v15508_v3 = vpack.c.bf16 %v17620_v10, %v17620_v10  ;;  %v15524_v1 = vpack.c.bf16 %v17640_v36, %v17640_v36 }
 0x71d   : > { %v8099_v18 = vpop.f32.mrf.mxu1  ;;  %v8296_v24 = vpop.f32.mrf.mxu0 }
 0x71e   : > { %8229 = vst.msk [vmem:[#allocation4 + $0x8] sm:$0xf] %vm8226_vm11, %v15508_v3  ;;  %8425 = vst.msk [vmem:[#allocation4 + $0x48] sm:$0xf] %vm8226_vm11, %v15524_v1  ;;  %v15506_v20 = vpack.c.bf16 %v8099_v18, %v8099_v18  ;;  %v15522_v16 = vpack.c.bf16 %v8296_v24, %v8296_v24 }
 0x71f   : > { %v17621_v5 = vpop.f32.mrf.mxu1  ;;  %v17641_v40 = vpop.f32.mrf.mxu0 }
 0x720   : > { %8227 = vst.msk [vmem:[#allocation4] sm:$0xf] %vm8226_vm11, %v15506_v20  ;;  %8423 = vst.msk [vmem:[#allocation4 + $0x40] sm:$0xf] %vm8226_vm11, %v15522_v16  ;;  %v15509_v17 = vpack.c.bf16 %v17621_v5, %v17621_v5  ;;  %v15525_v52 = vpack.c.bf16 %v17641_v40, %v17641_v40 }
 0x721   : > { %v8102_v22 = vpop.f32.mrf.mxu1  ;;  %v8299_v41 = vpop.f32.mrf.mxu0 }
 0x722   : > { %8230 = vst.msk [vmem:[#allocation4 + $0xc] sm:$0xf] %vm8226_vm11, %v15509_v17  ;;  %8426 = vst.msk [vmem:[#allocation4 + $0x4c] sm:$0xf] %vm8226_vm11, %v15525_v52  ;;  %v15507_v26 = vpack.c.bf16 %v8102_v22, %v8102_v22  ;;  %v15523_v55 = vpack.c.bf16 %v8299_v41, %v8299_v41 }
 0x724   : > { %8228 = vst.msk [vmem:[#allocation4 + $0x4] sm:$0xf] %vm8226_vm11, %v15507_v26  ;;  %8424 = vst.msk [vmem:[#allocation4 + $0x44] sm:$0xf] %vm8226_vm11, %v15523_v55 }
 0x725   : > { %v17624_v56 = vpop.f32.mrf.mxu1  ;;  %v17644_v59 = vpop.f32.mrf.mxu0 }
 0x726   : > { %v15512_v57 = vpack.c.bf16 %v17624_v56, %v17624_v56  ;;  %v15528_v30 = vpack.c.bf16 %v17644_v59, %v17644_v59 }
 0x727   : > { %v8115_v53 = vpop.f32.mrf.mxu1  ;;  %v8312_v25 = vpop.f32.mrf.mxu0 }
 0x728   : > { %8233 = vst.msk [vmem:[#allocation4 + $0x18] sm:$0xf] %vm8226_vm11, %v15512_v57  ;;  %8429 = vst.msk [vmem:[#allocation4 + $0x58] sm:$0xf] %vm8226_vm11, %v15528_v30  ;;  %v15510_v27 = vpack.c.bf16 %v8115_v53, %v8115_v53  ;;  %v15526_v49 = vpack.c.bf16 %v8312_v25, %v8312_v25 }
 0x729   : > { %v17625_v28 = vpop.f32.mrf.mxu1  ;;  %v17645_v46 = vpop.f32.mrf.mxu0 }
 0x72a   : > { %8231 = vst.msk [vmem:[#allocation4 + $0x10] sm:$0xf] %vm8226_vm11, %v15510_v27  ;;  %8427 = vst.msk [vmem:[#allocation4 + $0x50] sm:$0xf] %vm8226_vm11, %v15526_v49  ;;  %v15513_v44 = vpack.c.bf16 %v17625_v28, %v17625_v28  ;;  %v15529_v60 = vpack.c.bf16 %v17645_v46, %v17645_v46 }
 0x72b   : > { %v8118_v61 = vpop.f32.mrf.mxu1  ;;  %v8315_v48 = vpop.f32.mrf.mxu0 }
 0x72c   : > { %8234 = vst.msk [vmem:[#allocation4 + $0x1c] sm:$0xf] %vm8226_vm11, %v15513_v44  ;;  %8430 = vst.msk [vmem:[#allocation4 + $0x5c] sm:$0xf] %vm8226_vm11, %v15529_v60  ;;  %v15511_v50 = vpack.c.bf16 %v8118_v61, %v8118_v61  ;;  %v15527_v2 = vpack.c.bf16 %v8315_v48, %v8315_v48 }
 0x72e   : > { %8232 = vst.msk [vmem:[#allocation4 + $0x14] sm:$0xf] %vm8226_vm11, %v15511_v50  ;;  %8428 = vst.msk [vmem:[#allocation4 + $0x54] sm:$0xf] %vm8226_vm11, %v15527_v2 }
 0x735   : > { %v17628_v31 = vpop.f32.mrf.mxu1  ;;  %v17648_v45 = vpop.f32.mrf.mxu0 }
 0x736   : > { %v15516_v21 = vpack.c.bf16 %v17628_v31, %v17628_v31  ;;  %v15532_v54 = vpack.c.bf16 %v17648_v45, %v17648_v45 }
 0x737   : > { %v8131_v38 = vpop.f32.mrf.mxu1  ;;  %v8328_v0 = vpop.f32.mrf.mxu0 }
 0x738   : > { %8237 = vst.msk [vmem:[#allocation4 + $0x28] sm:$0xf] %vm8226_vm11, %v15516_v21  ;;  %8433 = vst.msk [vmem:[#allocation4 + $0x68] sm:$0xf] %vm8226_vm11, %v15532_v54  ;;  %v15514_v42 = vpack.c.bf16 %v8131_v38, %v8131_v38  ;;  %v15530_v34 = vpack.c.bf16 %v8328_v0, %v8328_v0 }
 0x739   : > { %v17629_v35 = vpop.f32.mrf.mxu1  ;;  %v17649_v58 = vpop.f32.mrf.mxu0 }
 0x73a   : > { %8235 = vst.msk [vmem:[#allocation4 + $0x20] sm:$0xf] %vm8226_vm11, %v15514_v42  ;;  %8431 = vst.msk [vmem:[#allocation4 + $0x60] sm:$0xf] %vm8226_vm11, %v15530_v34  ;;  %v15517_v6 = vpack.c.bf16 %v17629_v35, %v17629_v35  ;;  %v15533_v32 = vpack.c.bf16 %v17649_v58, %v17649_v58 }
 0x73b   : > { %v8134_v51 = vpop.f32.mrf.mxu1  ;;  %v8331_v8 = vpop.f32.mrf.mxu0 }
 0x73c   : > { %8238 = vst.msk [vmem:[#allocation4 + $0x2c] sm:$0xf] %vm8226_vm11, %v15517_v6  ;;  %8434 = vst.msk [vmem:[#allocation4 + $0x6c] sm:$0xf] %vm8226_vm11, %v15533_v32  ;;  %v15515_v9 = vpack.c.bf16 %v8134_v51, %v8134_v51  ;;  %v15531_v23 = vpack.c.bf16 %v8331_v8, %v8331_v8 }
 0x73e   : > { %8236 = vst.msk [vmem:[#allocation4 + $0x24] sm:$0xf] %vm8226_vm11, %v15515_v9  ;;  %8432 = vst.msk [vmem:[#allocation4 + $0x64] sm:$0xf] %vm8226_vm11, %v15531_v23 }
 0x743   : > { %v18482_v50 = vld [vmem:[#allocation4 + $0x68] sm:$0xff]  }
 0x744   : > { %v18483_v0 = vld [vmem:[#allocation4 + $0x28] sm:$0xff]  }
 0x745   : > { %v17632_v62 = vpop.f32.mrf.mxu1  ;;  %v17652_v39 = vpop.f32.mrf.mxu0  ;;  %v18484_v35 = vld [vmem:[#allocation4 + $0x60] sm:$0xff]  }
 0x746   : > { %v15520_v15 = vpack.c.bf16 %v17632_v62, %v17632_v62  ;;  %v15536_v11 = vpack.c.bf16 %v17652_v39, %v17652_v39  ;;  %v18485_v23 = vld [vmem:[#allocation4 + $0x20] sm:$0xff]  }
 0x747   : > { %v8147_v12 = vpop.f32.mrf.mxu1  ;;  %v8344_v63 = vpop.f32.mrf.mxu0 }
 0x748   : > { %8241 = vst.msk [vmem:[#allocation4 + $0x38] sm:$0xf] %vm8226_vm11, %v15520_v15  ;;  %8437 = vst.msk [vmem:[#allocation4 + $0x78] sm:$0xf] %vm8226_vm11, %v15536_v11  ;;  %v15518_v37 = vpack.c.bf16 %v8147_v12, %v8147_v12  ;;  %v15534_v13 = vpack.c.bf16 %v8344_v63, %v8344_v63  ;;  %v18486_v15 = vld [vmem:[#allocation4 + $0x58] sm:$0xff]  }
 0x749   : > { %v17633_v19 = vpop.f32.mrf.mxu1  ;;  %v17653_v29 = vpop.f32.mrf.mxu0 }
 0x74a   : > { %8239 = vst.msk [vmem:[#allocation4 + $0x30] sm:$0xf] %vm8226_vm11, %v15518_v37  ;;  %8435 = vst.msk [vmem:[#allocation4 + $0x70] sm:$0xf] %vm8226_vm11, %v15534_v13  ;;  %v15521_v43 = vpack.c.bf16 %v17633_v19, %v17633_v19  ;;  %v15537_v47 = vpack.c.bf16 %v17653_v29, %v17653_v29  ;;  %v18487_v29 = vld [vmem:[#allocation4 + $0x18] sm:$0xff]  }
 0x74b   : > { %v8150_v14 = vpop.f32.mrf.mxu1  ;;  %v8347_v4 = vpop.f32.mrf.mxu0 }
 0x74c   : > { %8242 = vst.msk [vmem:[#allocation4 + $0x3c] sm:$0xf] %vm8226_vm11, %v15521_v43  ;;  %8438 = vst.msk [vmem:[#allocation4 + $0x7c] sm:$0xf] %vm8226_vm11, %v15537_v47  ;;  %v15519_v7 = vpack.c.bf16 %v8150_v14, %v8150_v14  ;;  %v15535_v33 = vpack.c.bf16 %v8347_v4, %v8347_v4  ;;  %v18488_v14 = vld [vmem:[#allocation4 + $0x50] sm:$0xff]  }
 0x74d   : > { %v17660_v10 = vpop.f32.mrf.mxu1  ;;  %v17680_v36 = vpop.f32.mrf.mxu0 }
 0x74e   : > { %8240 = vst.msk [vmem:[#allocation4 + $0x34] sm:$0xf] %vm8226_vm11, %v15519_v7  ;;  %8436 = vst.msk [vmem:[#allocation4 + $0x74] sm:$0xf] %vm8226_vm11, %v15535_v33  ;;  %v15540_v3 = vpack.c.bf16 %v17660_v10, %v17660_v10  ;;  %v15556_v1 = vpack.c.bf16 %v17680_v36, %v17680_v36 }
 0x74f   : > { %v8492_v18 = vpop.f32.mrf.mxu1  ;;  %v8688_v24 = vpop.f32.mrf.mxu0 }
 0x750   : > { %8621 = vst.msk [vmem:[#allocation4 + $0x88] sm:$0xf] %vm8226_vm11, %v15540_v3  ;;  %8817 = vst.msk [vmem:[#allocation4 + $0xc8] sm:$0xf] %vm8226_vm11, %v15556_v1  ;;  %v15538_v20 = vpack.c.bf16 %v8492_v18, %v8492_v18  ;;  %v15554_v16 = vpack.c.bf16 %v8688_v24, %v8688_v24  ;;  %v18489_v1 = vld [vmem:[#allocation4 + $0x10] sm:$0xff]  }
 0x751   : > { %v17661_v5 = vpop.f32.mrf.mxu1  ;;  %v17681_v40 = vpop.f32.mrf.mxu0 }
 0x752   : > { %8619 = vst.msk [vmem:[#allocation4 + $0x80] sm:$0xf] %vm8226_vm11, %v15538_v20  ;;  %8815 = vst.msk [vmem:[#allocation4 + $0xc0] sm:$0xf] %vm8226_vm11, %v15554_v16  ;;  %v15541_v17 = vpack.c.bf16 %v17661_v5, %v17661_v5  ;;  %v15557_v52 = vpack.c.bf16 %v17681_v40, %v17681_v40  ;;  %v18490_v20 = vld [vmem:[#allocation4 + $0x48] sm:$0xff]  }
 0x753   : > { %v8495_v22 = vpop.f32.mrf.mxu1  ;;  %v8691_v41 = vpop.f32.mrf.mxu0  ;;  %v18478_v26 = vld [vmem:[#allocation4 + $0x78] sm:$0xff]  }
 0x754   : > { %8622 = vst.msk [vmem:[#allocation4 + $0x8c] sm:$0xf] %vm8226_vm11, %v15541_v17  ;;  %8818 = vst.msk [vmem:[#allocation4 + $0xcc] sm:$0xf] %vm8226_vm11, %v15557_v52  ;;  %v15539_v55 = vpack.c.bf16 %v8495_v22, %v8495_v22  ;;  %v15555_v56 = vpack.c.bf16 %v8691_v41, %v8691_v41  ;;  %v18479_v59 = vld [vmem:[#allocation4 + $0x38] sm:$0xff]   ;;  %16574 = vmatprep.subr.bf16.mxu0 %v18478_v26  ;;  %v18491_v41 = vld [vmem:[#allocation4 + $0x8] sm:$0xff]  }
 0x755   : > { %v17664_v57 = vpop.f32.mrf.mxu1  ;;  %v17684_v30 = vpop.f32.mrf.mxu0  ;;  %v18480_v53 = vld [vmem:[#allocation4 + $0x70] sm:$0xff]   ;;  %16575 = vmatpush3.bf16.msra.mxu0 %v18479_v59 }
 0x756   : > { %8620 = vst.msk [vmem:[#allocation4 + $0x84] sm:$0xf] %vm8226_vm11, %v15539_v55  ;;  %8816 = vst.msk [vmem:[#allocation4 + $0xc4] sm:$0xf] %vm8226_vm11, %v15555_v56  ;;  %v15544_v25 = vpack.c.bf16 %v17664_v57, %v17664_v57  ;;  %v15560_v27 = vpack.c.bf16 %v17684_v30, %v17684_v30  ;;  %16576 = vmatprep.subr.bf16.mxu0 %v18480_v53  ;;  %v18481_v60 = vld [vmem:[#allocation4 + $0x30] sm:$0xff]   ;;  %v18492_v56 = vld [vmem:[#allocation4 + $0x40] sm:$0xff]  }
 0x757   : > { %v8508_v49 = vpop.f32.mrf.mxu1  ;;  %v8704_v28 = vpop.f32.mrf.mxu0 }
 0x758   : > { %8625 = vst.msk [vmem:[#allocation4 + $0x98] sm:$0xf] %vm8226_vm11, %v15544_v25  ;;  %8821 = vst.msk [vmem:[#allocation4 + $0xd8] sm:$0xf] %vm8226_vm11, %v15560_v27  ;;  %v15542_v46 = vpack.c.bf16 %v8508_v49, %v8508_v49  ;;  %v15558_v44 = vpack.c.bf16 %v8704_v28, %v8704_v28  ;;  %v18493_v49 = vld [vmem:[#allocation4] sm:$0xff]  }
 0x759   : > { %v17665_v61 = vpop.f32.mrf.mxu1  ;;  %v17685_v48 = vpop.f32.mrf.mxu0  ;;  %16577 = vmatpush3.bf16.msra.mxu0 %v18481_v60 }
 0x75a   : > { %8623 = vst.msk [vmem:[#allocation4 + $0x90] sm:$0xf] %vm8226_vm11, %v15542_v46  ;;  %8819 = vst.msk [vmem:[#allocation4 + $0xd0] sm:$0xf] %vm8226_vm11, %v15558_v44  ;;  %v15545_v2 = vpack.c.bf16 %v17665_v61, %v17665_v61  ;;  %v15561_v31 = vpack.c.bf16 %v17685_v48, %v17685_v48  ;;  %16578 = vmatprep.subr.bf16.mxu0 %v18482_v50  ;;  %v18494_v44 = vld [vmem:[%s22821_s10] ss:$36 sps:$4 sm:$0xff]  }
 0x75b   : > { %v8511_v45 = vpop.f32.mrf.mxu1  ;;  %v8707_v21 = vpop.f32.mrf.mxu0  ;;  %v18504_v48 = vld [vmem:[%s22821_s10 + $0x4c] ss:$36 sps:$4 sm:$0xff]  }
 0x75c   : > { %8626 = vst.msk [vmem:[#allocation4 + $0x9c] sm:$0xf] %vm8226_vm11, %v15545_v2  ;;  %8822 = vst.msk [vmem:[#allocation4 + $0xdc] sm:$0xf] %vm8226_vm11, %v15561_v31  ;;  %v15543_v54 = vpack.c.bf16 %v8511_v45, %v8511_v45  ;;  %v15559_v38 = vpack.c.bf16 %v8707_v21, %v8707_v21 }
 0x75d   : > { %v17668_v42 = vpop.f32.mrf.mxu1  ;;  %v17688_v34 = vpop.f32.mrf.mxu0  ;;  %16579 = vmatpush3.bf16.msra.mxu0 %v18483_v0 }
 0x75e   : > { %8624 = vst.msk [vmem:[#allocation4 + $0x94] sm:$0xf] %vm8226_vm11, %v15543_v54  ;;  %8820 = vst.msk [vmem:[#allocation4 + $0xd4] sm:$0xf] %vm8226_vm11, %v15559_v38  ;;  %v15548_v58 = vpack.c.bf16 %v17668_v42, %v17668_v42  ;;  %v15564_v6 = vpack.c.bf16 %v17688_v34, %v17688_v34  ;;  %16580 = vmatprep.subr.bf16.mxu0 %v18484_v35 }
 0x75f   : > { %v8524_v32 = vpop.f32.mrf.mxu1  ;;  %v8720_v51 = vpop.f32.mrf.mxu0 }
 0x760   : > { %8629 = vst.msk [vmem:[#allocation4 + $0xa8] sm:$0xf] %vm8226_vm11, %v15548_v58  ;;  %8825 = vst.msk [vmem:[#allocation4 + $0xe8] sm:$0xf] %vm8226_vm11, %v15564_v6  ;;  %v15546_v8 = vpack.c.bf16 %v8524_v32, %v8524_v32  ;;  %v15562_v9 = vpack.c.bf16 %v8720_v51, %v8720_v51 }
 0x761   : > { %v17669_v62 = vpop.f32.mrf.mxu1  ;;  %v17689_v39 = vpop.f32.mrf.mxu0  ;;  %16581 = vmatpush3.bf16.msra.mxu0 %v18485_v23 }
 0x762   : > { %8627 = vst.msk [vmem:[#allocation4 + $0xa0] sm:$0xf] %vm8226_vm11, %v15546_v8  ;;  %8823 = vst.msk [vmem:[#allocation4 + $0xe0] sm:$0xf] %vm8226_vm11, %v15562_v9  ;;  %v15549_v11 = vpack.c.bf16 %v17669_v62, %v17669_v62  ;;  %v15565_v12 = vpack.c.bf16 %v17689_v39, %v17689_v39  ;;  %16582 = vmatprep.subr.bf16.mxu0 %v18486_v15  ;;  %v18502_v9 = vld [vmem:[%s22821_s10 + $0x48] ss:$36 sps:$4 sm:$0xff]  }
 0x763   : > { %v8527_v63 = vpop.f32.mrf.mxu1  ;;  %v8723_v37 = vpop.f32.mrf.mxu0 }
 0x764   : > { %8630 = vst.msk [vmem:[#allocation4 + $0xac] sm:$0xf] %vm8226_vm11, %v15549_v11  ;;  %8826 = vst.msk [vmem:[#allocation4 + $0xec] sm:$0xf] %vm8226_vm11, %v15565_v12  ;;  %v15547_v13 = vpack.c.bf16 %v8527_v63, %v8527_v63  ;;  %v15563_v19 = vpack.c.bf16 %v8723_v37, %v8723_v37  ;;  %v18511_v12 = vld [vmem:[%s22821_s10 + $0x94] ss:$36 sps:$4 sm:$0xff]  }
 0x765   : > { %v17672_v43 = vpop.f32.mrf.mxu1  ;;  %v17692_v47 = vpop.f32.mrf.mxu0  ;;  %16583 = vmatpush3.bf16.msra.mxu0 %v18487_v29 }
 0x766   : > { %8628 = vst.msk [vmem:[#allocation4 + $0xa4] sm:$0xf] %vm8226_vm11, %v15547_v13  ;;  %8824 = vst.msk [vmem:[#allocation4 + $0xe4] sm:$0xf] %vm8226_vm11, %v15563_v19  ;;  %v15552_v4 = vpack.c.bf16 %v17672_v43, %v17672_v43  ;;  %v15568_v7 = vpack.c.bf16 %v17692_v47, %v17692_v47  ;;  %16584 = vmatprep.subr.bf16.mxu0 %v18488_v14 }
 0x767   : > { %v8540_v33 = vpop.f32.mrf.mxu1  ;;  %v8736_v10 = vpop.f32.mrf.mxu0 }
 0x768   : > { %8633 = vst.msk [vmem:[#allocation4 + $0xb8] sm:$0xf] %vm8226_vm11, %v15552_v4  ;;  %8829 = vst.msk [vmem:[#allocation4 + $0xf8] sm:$0xf] %vm8226_vm11, %v15568_v7  ;;  %v15550_v36 = vpack.c.bf16 %v8540_v33, %v8540_v33  ;;  %v15566_v3 = vpack.c.bf16 %v8736_v10, %v8736_v10 }
 0x769   : > { %v17673_v18 = vpop.f32.mrf.mxu1  ;;  %v17693_v24 = vpop.f32.mrf.mxu0  ;;  %16585 = vmatpush3.bf16.msra.mxu0 %v18489_v1 }
 0x76a   : > { %8631 = vst.msk [vmem:[#allocation4 + $0xb0] sm:$0xf] %vm8226_vm11, %v15550_v36  ;;  %8827 = vst.msk [vmem:[#allocation4 + $0xf0] sm:$0xf] %vm8226_vm11, %v15566_v3  ;;  %v15553_v16 = vpack.c.bf16 %v17673_v18, %v17673_v18  ;;  %v15569_v5 = vpack.c.bf16 %v17693_v24, %v17693_v24  ;;  %16586 = vmatprep.subr.bf16.mxu0 %v18490_v20  ;;  %v18509_v18 = vld [vmem:[%s22821_s10 + $0x90] ss:$36 sps:$4 sm:$0xff]  }
 0x76b   : > { %v8543_v40 = vpop.f32.mrf.mxu1  ;;  %v8739_v17 = vpop.f32.mrf.mxu0  ;;  %v18501_v39 = vld [vmem:[#allocation4 + $0xe8] sm:$0xff]  }
 0x76c   : > { %8634 = vst.msk [vmem:[#allocation4 + $0xbc] sm:$0xf] %vm8226_vm11, %v15553_v16  ;;  %8830 = vst.msk [vmem:[#allocation4 + $0xfc] sm:$0xf] %vm8226_vm11, %v15569_v5  ;;  %v15551_v52 = vpack.c.bf16 %v8543_v40, %v8543_v40  ;;  %v15567_v22 = vpack.c.bf16 %v8739_v17, %v8739_v17  ;;  %v18505_v29 = vld [vmem:[#allocation4 + $0xa8] sm:$0xff]   ;;  %v18508_v16 = vld [vmem:[#allocation4 + $0xd8] sm:$0xff]  }
 0x76d   : > { %v17700_v26 = vpop.f32.mrf.mxu1  ;;  %v17720_v55 = vpop.f32.mrf.mxu0  ;;  %16587 = vmatpush3.bf16.msra.mxu0 %v18491_v41  ;;  %v18506_v14 = vld [vmem:[#allocation4 + $0xe0] sm:$0xff]   ;;  %v18518_v17 = vld [vmem:[%s22821_s10 + $0xdc] ss:$36 sps:$4 sm:$0xff]  }
 0x76e   : > { %8632 = vst.msk [vmem:[#allocation4 + $0xb4] sm:$0xf] %vm8226_vm11, %v15551_v52  ;;  %8828 = vst.msk [vmem:[#allocation4 + $0xf4] sm:$0xf] %vm8226_vm11, %v15567_v22  ;;  %v15572_v59 = vpack.c.bf16 %v17700_v26, %v17700_v26  ;;  %v15588_v57 = vpack.c.bf16 %v17720_v55, %v17720_v55  ;;  %16588 = vmatprep.subr.bf16.mxu0 %v18492_v56  ;;  %v18507_v1 = vld [vmem:[#allocation4 + $0xa0] sm:$0xff]   ;;  %v18512_v55 = vld [vmem:[#allocation4 + $0x98] sm:$0xff]  }
 0x76f   : > { %v8884_v30 = vpop.f32.mrf.mxu1  ;;  %v9080_v53 = vpop.f32.mrf.mxu0 }
 0x770   : > { %9013 = vst.msk [vmem:[#allocation4 + $0x108] sm:$0xf] %vm8226_vm11, %v15572_v59  ;;  %9209 = vst.msk [vmem:[#allocation4 + $0x148] sm:$0xf] %vm8226_vm11, %v15588_v57  ;;  %v15570_v25 = vpack.c.bf16 %v8884_v30, %v8884_v30  ;;  %v15586_v27 = vpack.c.bf16 %v9080_v53, %v9080_v53  ;;  %v18513_v57 = vld [vmem:[#allocation4 + $0xd0] sm:$0xff]  }
 0x771   : > { %v17701_v28 = vpop.f32.mrf.mxu1  ;;  %v17721_v46 = vpop.f32.mrf.mxu0  ;;  %16589 = vmatpush3.bf16.msra.mxu0 %v18493_v49 }
 0x772   : > { %9011 = vst.msk [vmem:[#allocation4 + $0x100] sm:$0xf] %vm8226_vm11, %v15570_v25  ;;  %9207 = vst.msk [vmem:[#allocation4 + $0x140] sm:$0xf] %vm8226_vm11, %v15586_v27  ;;  %v15573_v60 = vpack.c.bf16 %v17701_v28, %v17701_v28  ;;  %v15589_v61 = vpack.c.bf16 %v17721_v46, %v17721_v46  ;;  %v18514_v46 = vld [vmem:[#allocation4 + $0x90] sm:$0xff]  }
 0x773   : > { %v8887_v50 = vpop.f32.mrf.mxu1  ;;  %v9083_v2 = vpop.f32.mrf.mxu0  ;;  %v18497_v31 = vld [vmem:[#allocation4 + $0xf8] sm:$0xff]  }
 0x774   : > { %9014 = vst.msk [vmem:[#allocation4 + $0x10c] sm:$0xf] %vm8226_vm11, %v15573_v60  ;;  %9210 = vst.msk [vmem:[#allocation4 + $0x14c] sm:$0xf] %vm8226_vm11, %v15589_v61  ;;  %v15571_v45 = vpack.c.bf16 %v8887_v50, %v8887_v50  ;;  %v15587_v21 = vpack.c.bf16 %v9083_v2, %v9083_v2  ;;  %v18498_v54 = vld [vmem:[#allocation4 + $0xb8] sm:$0xff]   ;;  %11508 = vmatmul.mubr.bf16.vlgmr.msra.gmra.mxu0 %v18494_v44  ;;  %16686 = vmatprep.subr.bf16.mxu1 %v18497_v31 }
 0x775   : > { %v17704_v38 = vpop.f32.mrf.mxu1  ;;  %v17724_v0 = vpop.f32.mrf.mxu0  ;;  %v18499_v42 = vld [vmem:[#allocation4 + $0xf0] sm:$0xff]   ;;  %16687 = vmatpush3.bf16.msra.mxu1 %v18498_v54  ;;  %11515 = vmatprep.mubr.bf16.mxu0 %v18504_v48  ;;  %v18516_v44 = vld [vmem:[%s22821_s10 + $0xd8] ss:$36 sps:$4 sm:$0xff]  }
 0x776   : > { %9012 = vst.msk [vmem:[#allocation4 + $0x104] sm:$0xf] %vm8226_vm11, %v15571_v45  ;;  %9208 = vst.msk [vmem:[#allocation4 + $0x144] sm:$0xf] %vm8226_vm11, %v15587_v21  ;;  %v15576_v34 = vpack.c.bf16 %v17704_v38, %v17704_v38  ;;  %v15592_v35 = vpack.c.bf16 %v17724_v0, %v17724_v0  ;;  %16688 = vmatprep.subr.bf16.mxu1 %v18499_v42  ;;  %v18500_v8 = vld [vmem:[#allocation4 + $0xb0] sm:$0xff]   ;;  %v18515_v48 = vld [vmem:[#allocation4 + $0xc8] sm:$0xff]  }
 0x777   : > { %v8900_v58 = vpop.f32.mrf.mxu1  ;;  %v9096_v6 = vpop.f32.mrf.mxu0  ;;  %v18524_v31 = vld [vmem:[%s22821_s10 + $0x124] ss:$36 sps:$4 sm:$0xff]   ;;  %v18519_v0 = vld [vmem:[#allocation4 + $0x88] sm:$0xff]  }
 0x778   : > { %9017 = vst.msk [vmem:[#allocation4 + $0x118] sm:$0xf] %vm8226_vm11, %v15576_v34  ;;  %9213 = vst.msk [vmem:[#allocation4 + $0x158] sm:$0xf] %vm8226_vm11, %v15592_v35  ;;  %v15574_v32 = vpack.c.bf16 %v8900_v58, %v8900_v58  ;;  %v15590_v51 = vpack.c.bf16 %v9096_v6, %v9096_v6  ;;  %v18520_v35 = vld [vmem:[#allocation4 + $0xc0] sm:$0xff]  }
 0x779   : > { %v17705_v23 = vpop.f32.mrf.mxu1  ;;  %v17725_v62 = vpop.f32.mrf.mxu0  ;;  %16689 = vmatpush3.bf16.msra.mxu1 %v18500_v8 }
 0x77a   : > { %9015 = vst.msk [vmem:[#allocation4 + $0x110] sm:$0xf] %vm8226_vm11, %v15574_v32  ;;  %9211 = vst.msk [vmem:[#allocation4 + $0x150] sm:$0xf] %vm8226_vm11, %v15590_v51  ;;  %v15577_v15 = vpack.c.bf16 %v17705_v23, %v17705_v23  ;;  %v15593_v11 = vpack.c.bf16 %v17725_v62, %v17725_v62  ;;  %16690 = vmatprep.subr.bf16.mxu1 %v18501_v39  ;;  %v18521_v23 = vld [vmem:[#allocation4 + $0x80] sm:$0xff]  }
 0x77b   : > { %v8903_v63 = vpop.f32.mrf.mxu1  ;;  %v9099_v37 = vpop.f32.mrf.mxu0  ;;  %v18522_v62 = vld [vmem:[%s22821_s10 + $0x120] ss:$36 sps:$4 sm:$0xff]  }
 0x77c   : > { %9018 = vst.msk [vmem:[#allocation4 + $0x11c] sm:$0xf] %vm8226_vm11, %v15577_v15  ;;  %9214 = vst.msk [vmem:[#allocation4 + $0x15c] sm:$0xf] %vm8226_vm11, %v15593_v11  ;;  %v15575_v13 = vpack.c.bf16 %v8903_v63, %v8903_v63  ;;  %v15591_v19 = vpack.c.bf16 %v9099_v37, %v9099_v37  ;;  %11516 = vmatmul.mubr.bf16.gmra.mxu0 %v18502_v9  ;;  %v18525_v11 = vld [vmem:[%s22821_s10 + $0x8] ss:$36 sps:$4 sm:$0xff]  }
 0x77d   : > { %v17708_v43 = vpop.f32.mrf.mxu1  ;;  %v17728_v47 = vpop.f32.mrf.mxu0  ;;  %16691 = vmatpush3.bf16.msra.mxu1 %v18505_v29  ;;  %11523 = vmatprep.mubr.bf16.mxu0 %v18511_v12  ;;  %v18535_v37 = vld [vmem:[%s22821_s10 + $0x16c] ss:$36 sps:$4 sm:$0xff]  }
 0x77e   : > { %9016 = vst.msk [vmem:[#allocation4 + $0x114] sm:$0xf] %vm8226_vm11, %v15575_v13  ;;  %9212 = vst.msk [vmem:[#allocation4 + $0x154] sm:$0xf] %vm8226_vm11, %v15591_v19  ;;  %v15580_v4 = vpack.c.bf16 %v17708_v43, %v17708_v43  ;;  %v15596_v7 = vpack.c.bf16 %v17728_v47, %v17728_v47  ;;  %16692 = vmatprep.subr.bf16.mxu1 %v18506_v14  ;;  %v18538_v13 = vld [vmem:[%s22821_s10 + $0x54] ss:$36 sps:$4 sm:$0xff]  }
 0x77f   : > { %v8916_v33 = vpop.f32.mrf.mxu1  ;;  %v9112_v10 = vpop.f32.mrf.mxu0 }
 0x780   : > { %9021 = vst.msk [vmem:[#allocation4 + $0x128] sm:$0xf] %vm8226_vm11, %v15580_v4  ;;  %9217 = vst.msk [vmem:[#allocation4 + $0x168] sm:$0xf] %vm8226_vm11, %v15596_v7  ;;  %v15578_v36 = vpack.c.bf16 %v8916_v33, %v8916_v33  ;;  %v15594_v3 = vpack.c.bf16 %v9112_v10, %v9112_v10 }
 0x781   : > { %v17709_v24 = vpop.f32.mrf.mxu1  ;;  %v17729_v20 = vpop.f32.mrf.mxu0  ;;  %16693 = vmatpush3.bf16.msra.mxu1 %v18507_v1 }
 0x782   : > { %9019 = vst.msk [vmem:[#allocation4 + $0x120] sm:$0xf] %vm8226_vm11, %v15578_v36  ;;  %9215 = vst.msk [vmem:[#allocation4 + $0x160] sm:$0xf] %vm8226_vm11, %v15594_v3  ;;  %v15581_v5 = vpack.c.bf16 %v17709_v24, %v17709_v24  ;;  %v15597_v40 = vpack.c.bf16 %v17729_v20, %v17729_v20  ;;  %16694 = vmatprep.subr.bf16.mxu1 %v18508_v16  ;;  %v18533_v16 = vld [vmem:[%s22821_s10 + $0x168] ss:$36 sps:$4 sm:$0xff]  }
 0x783   : > { %v8919_v52 = vpop.f32.mrf.mxu1  ;;  %v9115_v22 = vpop.f32.mrf.mxu0 }
 0x784   : > { %9022 = vst.msk [vmem:[#allocation4 + $0x12c] sm:$0xf] %vm8226_vm11, %v15581_v5  ;;  %9218 = vst.msk [vmem:[#allocation4 + $0x16c] sm:$0xf] %vm8226_vm11, %v15597_v40  ;;  %v15579_v41 = vpack.c.bf16 %v8919_v52, %v8919_v52  ;;  %v15595_v26 = vpack.c.bf16 %v9115_v22, %v9115_v22  ;;  %11524 = vmatmul.mubr.bf16.gmra.mxu0 %v18509_v18  ;;  %v18536_v5 = vld [vmem:[%s22821_s10 + $0x50] ss:$36 sps:$4 sm:$0xff]  }
 0x785   : > { %v17712_v56 = vpop.f32.mrf.mxu1  ;;  %v17732_v59 = vpop.f32.mrf.mxu0  ;;  %16695 = vmatpush3.bf16.msra.mxu1 %v18512_v55  ;;  %11531 = vmatprep.mubr.bf16.mxu0 %v18518_v17  ;;  %v18545_v55 = vld [vmem:[%s22821_s10 + $0x1b4] ss:$36 sps:$4 sm:$0xff]  }
 0x786   : > { %9020 = vst.msk [vmem:[#allocation4 + $0x124] sm:$0xf] %vm8226_vm11, %v15579_v41  ;;  %9216 = vst.msk [vmem:[#allocation4 + $0x164] sm:$0xf] %vm8226_vm11, %v15595_v26  ;;  %v15584_v30 = vpack.c.bf16 %v17712_v56, %v17712_v56  ;;  %v15600_v53 = vpack.c.bf16 %v17732_v59, %v17732_v59  ;;  %16696 = vmatprep.subr.bf16.mxu1 %v18513_v57  ;;  %v18548_v56 = vld [vmem:[%s22821_s10 + $0x9c] ss:$36 sps:$4 sm:$0xff]  }
 0x787   : > { %v8932_v25 = vpop.f32.mrf.mxu1  ;;  %v9128_v27 = vpop.f32.mrf.mxu0 }
 0x788   : > { %9025 = vst.msk [vmem:[#allocation4 + $0x138] sm:$0xf] %vm8226_vm11, %v15584_v30  ;;  %9221 = vst.msk [vmem:[#allocation4 + $0x178] sm:$0xf] %vm8226_vm11, %v15600_v53  ;;  %v15582_v49 = vpack.c.bf16 %v8932_v25, %v8932_v25  ;;  %v15598_v28 = vpack.c.bf16 %v9128_v27, %v9128_v27 }
 0x789   : > { %v17713_v60 = vpop.f32.mrf.mxu1  ;;  %v17733_v61 = vpop.f32.mrf.mxu0  ;;  %16697 = vmatpush3.bf16.msra.mxu1 %v18514_v46 }
 0x78a   : > { %9023 = vst.msk [vmem:[#allocation4 + $0x130] sm:$0xf] %vm8226_vm11, %v15582_v49  ;;  %9219 = vst.msk [vmem:[#allocation4 + $0x170] sm:$0xf] %vm8226_vm11, %v15598_v28  ;;  %v15585_v50 = vpack.c.bf16 %v17713_v60, %v17713_v60  ;;  %v15601_v2 = vpack.c.bf16 %v17733_v61, %v17733_v61  ;;  %16698 = vmatprep.subr.bf16.mxu1 %v18515_v48 }
 0x78b   : > { %v8935_v45 = vpop.f32.mrf.mxu1  ;;  %v9131_v21 = vpop.f32.mrf.mxu0  ;;  %v18532_v26 = vld [vmem:[#allocation4 + $0x168] sm:$0xff]  }
 0x78c   : > { %9026 = vst.msk [vmem:[#allocation4 + $0x13c] sm:$0xf] %vm8226_vm11, %v15585_v50  ;;  %9222 = vst.msk [vmem:[#allocation4 + $0x17c] sm:$0xf] %vm8226_vm11, %v15601_v2  ;;  %v15583_v54 = vpack.c.bf16 %v8935_v45, %v8935_v45  ;;  %v15599_v38 = vpack.c.bf16 %v9131_v21, %v9131_v21  ;;  %11532 = vmatmul.mubr.bf16.gmra.mxu0 %v18516_v44  ;;  %v18539_v49 = vld [vmem:[#allocation4 + $0x128] sm:$0xff]  }
 0x78d   : > { %v17740_v42 = vpop.f32.mrf.mxu1  ;;  %v17760_v34 = vpop.f32.mrf.mxu0  ;;  %16699 = vmatpush3.bf16.msra.mxu1 %v18519_v0  ;;  %11539 = vmatprep.mubr.bf16.mxu0 %v18524_v31  ;;  %v18540_v44 = vld [vmem:[#allocation4 + $0x160] sm:$0xff]   ;;  %v18546_v31 = vld [vmem:[%s22821_s10 + $0x98] ss:$36 sps:$4 sm:$0xff]  }
 0x78e   : > { %9024 = vst.msk [vmem:[#allocation4 + $0x134] sm:$0xf] %vm8226_vm11, %v15583_v54  ;;  %9220 = vst.msk [vmem:[#allocation4 + $0x174] sm:$0xf] %vm8226_vm11, %v15599_v38  ;;  %v15604_v58 = vpack.c.bf16 %v17740_v42, %v17740_v42  ;;  %v15620_v6 = vpack.c.bf16 %v17760_v34, %v17760_v34  ;;  %16700 = vmatprep.subr.bf16.mxu1 %v18520_v35  ;;  %v18543_v2 = vld [vmem:[%s22821_s10 + $0x1b0] ss:$36 sps:$4 sm:$0xff]  }
 0x78f   : > { %v9276_v32 = vpop.f32.mrf.mxu1  ;;  %v9472_v51 = vpop.f32.mrf.mxu0  ;;  %v18541_v54 = vld [vmem:[#allocation4 + $0x120] sm:$0xff]   ;;  %v18542_v42 = vld [vmem:[#allocation4 + $0x158] sm:$0xff]   ;;  %v18555_v34 = vld [vmem:[%s22821_s10 + $0x1fc] ss:$36 sps:$4 sm:$0xff]  }
 0x790   : > { %9405 = vst.msk [vmem:[#allocation4 + $0x188] sm:$0xf] %vm8226_vm11, %v15604_v58  ;;  %9601 = vst.msk [vmem:[#allocation4 + $0x1c8] sm:$0xf] %vm8226_vm11, %v15620_v6  ;;  %v15602_v8 = vpack.c.bf16 %v9276_v32, %v9276_v32  ;;  %v15618_v9 = vpack.c.bf16 %v9472_v51, %v9472_v51  ;;  %v18558_v35 = vld [vmem:[%s22821_s10 + $0xe4] ss:$36 sps:$4 sm:$0xff]  }
 0x791   : > { %v17741_v39 = vpop.f32.mrf.mxu1  ;;  %v17761_v15 = vpop.f32.mrf.mxu0  ;;  %16701 = vmatpush3.bf16.msra.mxu1 %v18521_v23  ;;  %v18549_v23 = vld [vmem:[#allocation4 + $0x118] sm:$0xff]  }
 0x792   : > { %9403 = vst.msk [vmem:[#allocation4 + $0x180] sm:$0xf] %vm8226_vm11, %v15602_v8  ;;  %9599 = vst.msk [vmem:[#allocation4 + $0x1c0] sm:$0xf] %vm8226_vm11, %v15618_v9  ;;  %v15605_v12 = vpack.c.bf16 %v17741_v39, %v17741_v39  ;;  %v15621_v63 = vpack.c.bf16 %v17761_v15, %v17761_v15  ;;  %v18550_v15 = vld [vmem:[#allocation4 + $0x150] sm:$0xff]  }
 0x793   : > { %v9279_v19 = vpop.f32.mrf.mxu1  ;;  %v9475_v29 = vpop.f32.mrf.mxu0  ;;  %v18528_v43 = vld [vmem:[#allocation4 + $0x178] sm:$0xff]  }
 0x794   : > { %9406 = vst.msk [vmem:[#allocation4 + $0x18c] sm:$0xf] %vm8226_vm11, %v15605_v12  ;;  %9602 = vst.msk [vmem:[#allocation4 + $0x1cc] sm:$0xf] %vm8226_vm11, %v15621_v63  ;;  %v15603_v47 = vpack.c.bf16 %v9279_v19, %v9279_v19  ;;  %v15619_v14 = vpack.c.bf16 %v9475_v29, %v9475_v29  ;;  %v18529_v4 = vld [vmem:[#allocation4 + $0x138] sm:$0xff]   ;;  %11540 = vmatmul.mubr.bf16.gmra.mxu0 %v18522_v62  ;;  %11669 = vmatmul.mubr.bf16.vlgmr.msra.gmra.mxu1 %v18525_v11 }
 0x795   : > { %v17744_v7 = vpop.f32.mrf.mxu1  ;;  %v17764_v33 = vpop.f32.mrf.mxu0  ;;  %v18530_v10 = vld [vmem:[#allocation4 + $0x170] sm:$0xff]   ;;  %16798 = vmatprep.subr.bf16.mxu0 %v18528_v43  ;;  %11547 = vmatprep.mubr.bf16.mxu0 %v18535_v37 }
 0x796   : > { %9404 = vst.msk [vmem:[#allocation4 + $0x184] sm:$0xf] %vm8226_vm11, %v15603_v47  ;;  %9600 = vst.msk [vmem:[#allocation4 + $0x1c4] sm:$0xf] %vm8226_vm11, %v15619_v14  ;;  %v15608_v36 = vpack.c.bf16 %v17744_v7, %v17744_v7  ;;  %v15624_v3 = vpack.c.bf16 %v17764_v33, %v17764_v33  ;;  %16799 = vmatpush3.bf16.msra.mxu0 %v18529_v4  ;;  %11676 = vmatprep.mubr.bf16.mxu1 %v18538_v13  ;;  %v18531_v52 = vld [vmem:[#allocation4 + $0x130] sm:$0xff]   ;;  %v18552_v7 = vld [vmem:[#allocation4 + $0x148] sm:$0xff]  }
 0x797   : > { %v9292_v1 = vpop.f32.mrf.mxu1  ;;  %v9488_v18 = vpop.f32.mrf.mxu0  ;;  %16800 = vmatprep.subr.bf16.mxu0 %v18530_v10  ;;  %v18553_v13 = vld [vmem:[%s22821_s10 + $0x1f8] ss:$36 sps:$4 sm:$0xff]   ;;  %v18556_v19 = vld [vmem:[%s22821_s10 + $0xe0] ss:$36 sps:$4 sm:$0xff]   ;;  %v18567_v10 = vld [vmem:[%s22821_s10 + $0x12c] ss:$36 sps:$4 sm:$0xff]  }
 0x798   : > { %9409 = vst.msk [vmem:[#allocation4 + $0x198] sm:$0xf] %vm8226_vm11, %v15608_v36  ;;  %9605 = vst.msk [vmem:[#allocation4 + $0x1d8] sm:$0xf] %vm8226_vm11, %v15624_v3  ;;  %v15606_v24 = vpack.c.bf16 %v9292_v1, %v9292_v1  ;;  %v15622_v20 = vpack.c.bf16 %v9488_v18, %v9488_v18  ;;  %v18551_v47 = vld [vmem:[#allocation4 + $0x110] sm:$0xff]  }
 0x799   : > { %v17745_v40 = vpop.f32.mrf.mxu1  ;;  %v17765_v17 = vpop.f32.mrf.mxu0  ;;  %v18564_v33 = vld [vmem:[%s22821_s10 + $0x244] ss:$36 sps:$4 sm:$0xff]  }
 0x79a   : > { %9407 = vst.msk [vmem:[#allocation4 + $0x190] sm:$0xf] %vm8226_vm11, %v15606_v24  ;;  %9603 = vst.msk [vmem:[#allocation4 + $0x1d0] sm:$0xf] %vm8226_vm11, %v15622_v20  ;;  %v15609_v22 = vpack.c.bf16 %v17745_v40, %v17745_v40  ;;  %v15625_v41 = vpack.c.bf16 %v17765_v17, %v17765_v17  ;;  %16801 = vmatpush3.bf16.msra.mxu0 %v18531_v52  ;;  %v18559_v20 = vld [vmem:[#allocation4 + $0x108] sm:$0xff]  }
 0x79b   : > { %v9295_v59 = vpop.f32.mrf.mxu1  ;;  %v9491_v57 = vpop.f32.mrf.mxu0  ;;  %16802 = vmatprep.subr.bf16.mxu0 %v18532_v26  ;;  %v18562_v52 = vld [vmem:[%s22821_s10 + $0x240] ss:$36 sps:$4 sm:$0xff]   ;;  %v18561_v26 = vld [vmem:[#allocation4 + $0x100] sm:$0xff]  }
 0x79c   : > { %9410 = vst.msk [vmem:[#allocation4 + $0x19c] sm:$0xf] %vm8226_vm11, %v15609_v22  ;;  %9606 = vst.msk [vmem:[#allocation4 + $0x1dc] sm:$0xf] %vm8226_vm11, %v15625_v41  ;;  %v15607_v30 = vpack.c.bf16 %v9295_v59, %v9295_v59  ;;  %v15623_v53 = vpack.c.bf16 %v9491_v57, %v9491_v57  ;;  %11548 = vmatmul.mubr.bf16.gmra.mxu0 %v18533_v16  ;;  %11677 = vmatmul.mubr.bf16.gmra.mxu1 %v18536_v5  ;;  %v18560_v5 = vld [vmem:[#allocation4 + $0x140] sm:$0xff]  }
 0x79d   : > { %v17748_v25 = vpop.f32.mrf.mxu1  ;;  %v17768_v27 = vpop.f32.mrf.mxu0  ;;  %11555 = vmatprep.mubr.bf16.mxu0 %v18545_v55  ;;  %11684 = vmatprep.mubr.bf16.mxu1 %v18548_v56  ;;  %v18565_v22 = vld [vmem:[%s22821_s10 + $0x128] ss:$36 sps:$4 sm:$0xff]   ;;  %v18578_v59 = vld [vmem:[%s22821_s10 + $0x174] ss:$36 sps:$4 sm:$0xff]  }
 0x79e   : > { %9408 = vst.msk [vmem:[#allocation4 + $0x194] sm:$0xf] %vm8226_vm11, %v15607_v30  ;;  %9604 = vst.msk [vmem:[#allocation4 + $0x1d4] sm:$0xf] %vm8226_vm11, %v15623_v53  ;;  %v15612_v28 = vpack.c.bf16 %v17748_v25, %v17748_v25  ;;  %v15628_v46 = vpack.c.bf16 %v17768_v27, %v17768_v27  ;;  %16803 = vmatpush3.bf16.msra.mxu0 %v18539_v49  ;;  %v18575_v56 = vld [vmem:[%s22821_s10 + $0x28c] ss:$36 sps:$4 sm:$0xff]  }
 0x79f   : > { %v9308_v60 = vpop.f32.mrf.mxu1  ;;  %v9504_v61 = vpop.f32.mrf.mxu0  ;;  %16804 = vmatprep.subr.bf16.mxu0 %v18540_v44 }
 0x7a0   : > { %9413 = vst.msk [vmem:[#allocation4 + $0x1a8] sm:$0xf] %vm8226_vm11, %v15612_v28  ;;  %9609 = vst.msk [vmem:[#allocation4 + $0x1e8] sm:$0xf] %vm8226_vm11, %v15628_v46  ;;  %v15610_v48 = vpack.c.bf16 %v9308_v60, %v9308_v60  ;;  %v15626_v50 = vpack.c.bf16 %v9504_v61, %v9504_v61  ;;  %v18573_v60 = vld [vmem:[%s22821_s10 + $0x288] ss:$36 sps:$4 sm:$0xff]  }
 0x7a1   : > { %v17749_v45 = vpop.f32.mrf.mxu1  ;;  %v17769_v21 = vpop.f32.mrf.mxu0 }
 0x7a2   : > { %9411 = vst.msk [vmem:[#allocation4 + $0x1a0] sm:$0xf] %vm8226_vm11, %v15610_v48  ;;  %9607 = vst.msk [vmem:[#allocation4 + $0x1e0] sm:$0xf] %vm8226_vm11, %v15626_v50  ;;  %v15613_v38 = vpack.c.bf16 %v17749_v45, %v17749_v45  ;;  %v15629_v0 = vpack.c.bf16 %v17769_v21, %v17769_v21  ;;  %16805 = vmatpush3.bf16.msra.mxu0 %v18541_v54  ;;  %v18576_v50 = vld [vmem:[%s22821_s10 + $0x170] ss:$36 sps:$4 sm:$0xff]  }
 0x7a3   : > { %v9311_v58 = vpop.f32.mrf.mxu1  ;;  %v9507_v6 = vpop.f32.mrf.mxu0  ;;  %16806 = vmatprep.subr.bf16.mxu0 %v18542_v42  ;;  %v18585_v45 = vld [vmem:[%s22821_s10 + $0x2d4] ss:$36 sps:$4 sm:$0xff]   ;;  %v18588_v21 = vld [vmem:[%s22821_s10 + $0x1bc] ss:$36 sps:$4 sm:$0xff]  }
 0x7a4   : > { %9414 = vst.msk [vmem:[#allocation4 + $0x1ac] sm:$0xf] %vm8226_vm11, %v15613_v38  ;;  %9610 = vst.msk [vmem:[#allocation4 + $0x1ec] sm:$0xf] %vm8226_vm11, %v15629_v0  ;;  %v15611_v32 = vpack.c.bf16 %v9311_v58, %v9311_v58  ;;  %v15627_v51 = vpack.c.bf16 %v9507_v6, %v9507_v6  ;;  %11556 = vmatmul.mubr.bf16.gmra.mxu0 %v18543_v2  ;;  %11685 = vmatmul.mubr.bf16.gmra.mxu1 %v18546_v31 }
 0x7a5   : > { %v17752_v8 = vpop.f32.mrf.mxu1  ;;  %v17772_v9 = vpop.f32.mrf.mxu0  ;;  %11563 = vmatprep.mubr.bf16.mxu0 %v18555_v34  ;;  %11692 = vmatprep.mubr.bf16.mxu1 %v18558_v35 }
 0x7a6   : > { %9412 = vst.msk [vmem:[#allocation4 + $0x1a4] sm:$0xf] %vm8226_vm11, %v15611_v32  ;;  %9608 = vst.msk [vmem:[#allocation4 + $0x1e4] sm:$0xf] %vm8226_vm11, %v15627_v51  ;;  %v15616_v62 = vpack.c.bf16 %v17752_v8, %v17752_v8  ;;  %v15632_v39 = vpack.c.bf16 %v17772_v9, %v17772_v9  ;;  %16807 = vmatpush3.bf16.msra.mxu0 %v18549_v23  ;;  %v18583_v32 = vld [vmem:[%s22821_s10 + $0x2d0] ss:$36 sps:$4 sm:$0xff]  }
 0x7a7   : > { %v9324_v11 = vpop.f32.mrf.mxu1  ;;  %v9520_v12 = vpop.f32.mrf.mxu0  ;;  %16808 = vmatprep.subr.bf16.mxu0 %v18550_v15  ;;  %v18586_v9 = vld [vmem:[%s22821_s10 + $0x1b8] ss:$36 sps:$4 sm:$0xff]   ;;  %v18598_v15 = vld [vmem:[%s22821_s10 + $0x204] ss:$36 sps:$4 sm:$0xff]  }
 0x7a8   : > { %9417 = vst.msk [vmem:[#allocation4 + $0x1b8] sm:$0xf] %vm8226_vm11, %v15616_v62  ;;  %9613 = vst.msk [vmem:[#allocation4 + $0x1f8] sm:$0xf] %vm8226_vm11, %v15632_v39  ;;  %v15614_v63 = vpack.c.bf16 %v9324_v11, %v9324_v11  ;;  %v15630_v37 = vpack.c.bf16 %v9520_v12, %v9520_v12  ;;  %v18582_v62 = vld [vmem:[#allocation4 + $0x1d8] sm:$0xff]  }
 0x7a9   : > { %v17753_v29 = vpop.f32.mrf.mxu1  ;;  %v17773_v43 = vpop.f32.mrf.mxu0  ;;  %v18595_v39 = vld [vmem:[%s22821_s10 + $0x31c] ss:$36 sps:$4 sm:$0xff]  }
 0x7aa   : > { %9415 = vst.msk [vmem:[#allocation4 + $0x1b0] sm:$0xf] %vm8226_vm11, %v15614_v63  ;;  %9611 = vst.msk [vmem:[#allocation4 + $0x1f0] sm:$0xf] %vm8226_vm11, %v15630_v37  ;;  %v15617_v14 = vpack.c.bf16 %v17753_v29, %v17753_v29  ;;  %v15633_v4 = vpack.c.bf16 %v17773_v43, %v17773_v43  ;;  %16809 = vmatpush3.bf16.msra.mxu0 %v18551_v47  ;;  %v18589_v37 = vld [vmem:[#allocation4 + $0x198] sm:$0xff]  }
 0x7ab   : > { %v9327_v36 = vpop.f32.mrf.mxu1  ;;  %v9523_v3 = vpop.f32.mrf.mxu0  ;;  %16810 = vmatprep.subr.bf16.mxu0 %v18552_v7  ;;  %v18572_v31 = vld [vmem:[#allocation4 + $0x1e8] sm:$0xff]   ;;  %v18596_v7 = vld [vmem:[%s22821_s10 + $0x200] ss:$36 sps:$4 sm:$0xff]  }
 0x7ac   : > { %9418 = vst.msk [vmem:[#allocation4 + $0x1bc] sm:$0xf] %vm8226_vm11, %v15617_v14  ;;  %9614 = vst.msk [vmem:[#allocation4 + $0x1fc] sm:$0xf] %vm8226_vm11, %v15633_v4  ;;  %v15615_v1 = vpack.c.bf16 %v9327_v36, %v9327_v36  ;;  %v15631_v18 = vpack.c.bf16 %v9523_v3, %v9523_v3  ;;  %11564 = vmatmul.mubr.bf16.gmra.mxu0 %v18553_v13  ;;  %11693 = vmatmul.mubr.bf16.gmra.mxu1 %v18556_v19  ;;  %v18579_v42 = vld [vmem:[#allocation4 + $0x1a8] sm:$0xff]   ;;  %v18590_v19 = vld [vmem:[#allocation4 + $0x1d0] sm:$0xff]  }
 0x7ad   : > { %v17780_v24 = vpop.f32.mrf.mxu1  ;;  %11571 = vmatprep.mubr.bf16.mxu0 %v18564_v33  ;;  %11700 = vmatprep.mubr.bf16.mxu1 %v18567_v10  ;;  %v18580_v35 = vld [vmem:[#allocation4 + $0x1e0] sm:$0xff]   ;;  %v18593_v47 = vld [vmem:[%s22821_s10 + $0x318] ss:$36 sps:$4 sm:$0xff]   ;;  %v18591_v4 = vld [vmem:[#allocation4 + $0x190] sm:$0xff]  }
 0x7ae   : > { %9416 = vst.msk [vmem:[#allocation4 + $0x1b4] sm:$0xf] %vm8226_vm11, %v15615_v1  ;;  %9612 = vst.msk [vmem:[#allocation4 + $0x1f4] sm:$0xf] %vm8226_vm11, %v15631_v18  ;;  %v15636_v16 = vpack.c.bf16 %v17780_v24, %v17780_v24  ;;  %16811 = vmatpush3.bf16.msra.mxu0 %v18559_v20  ;;  %v18581_v8 = vld [vmem:[#allocation4 + $0x1a0] sm:$0xff]   ;;  %v18592_v10 = vld [vmem:[#allocation4 + $0x1c8] sm:$0xff]  }
 0x7af   : > { %v9668_v40 = vpop.f32.mrf.mxu1  ;;  %16812 = vmatprep.subr.bf16.mxu0 %v18560_v5  ;;  %v18604_v36 = vld [vmem:[%s22821_s10 + $0x364] ss:$36 sps:$4 sm:$0xff]   ;;  %v18607_v3 = vld [vmem:[%s22821_s10 + $0x24c] ss:$36 sps:$4 sm:$0xff]   ;;  %v18599_v24 = vld [vmem:[#allocation4 + $0x188] sm:$0xff]  }
 0x7b0   : > { %9797 = vst.msk [vmem:[#allocation4 + $0x208] sm:$0xf] %vm8226_vm11, %v15636_v16  ;;  %v15634_v17 = vpack.c.bf16 %v9668_v40, %v9668_v40  ;;  %v18600_v20 = vld [vmem:[#allocation4 + $0x1c0] sm:$0xff]   ;;  %v18602_v16 = vld [vmem:[%s22821_s10 + $0x360] ss:$36 sps:$4 sm:$0xff]  }
 0x7b1   : > { %v17781_v41 = vpop.f32.mrf.mxu1  ;;  %v18601_v5 = vld [vmem:[#allocation4 + $0x180] sm:$0xff]   ;;  %v18605_v40 = vld [vmem:[%s22821_s10 + $0x248] ss:$36 sps:$4 sm:$0xff]  }
 0x7b2   : > { %9795 = vst.msk [vmem:[#allocation4 + $0x200] sm:$0xf] %vm8226_vm11, %v15634_v17  ;;  %v15637_v55 = vpack.c.bf16 %v17781_v41, %v17781_v41  ;;  %16813 = vmatpush3.bf16.msra.mxu0 %v18561_v26  ;;  %v18611_v17 = vld [vmem:[%s22821_s10 + $0x3ac] ss:$36 sps:$4 sm:$0xff]  }
 0x7b3   : > { %v9671_v57 = vpop.f32.mrf.mxu1  ;;  %v18568_v30 = vld [vmem:[#allocation4 + $0x1f8] sm:$0xff]   ;;  %v18612_v26 = vld [vmem:[%s22821_s10 + $0x290] ss:$36 sps:$4 sm:$0xff]  }
 0x7b4   : > { %9798 = vst.msk [vmem:[#allocation4 + $0x20c] sm:$0xf] %vm8226_vm11, %v15637_v55  ;;  %v15635_v53 = vpack.c.bf16 %v9671_v57, %v9671_v57  ;;  %v18569_v25 = vld [vmem:[#allocation4 + $0x1b8] sm:$0xff]   ;;  %11572 = vmatmul.mubr.bf16.gmra.mxu0 %v18562_v52  ;;  %11701 = vmatmul.mubr.bf16.gmra.mxu1 %v18565_v22  ;;  %v18614_v22 = vld [vmem:[%s22821_s10 + $0x294] ss:$36 sps:$4 sm:$0xff]  }
 0x7b5   : > { %v17784_v27 = vpop.f32.mrf.mxu1  ;;  %v18570_v49 = vld [vmem:[#allocation4 + $0x1f0] sm:$0xff]   ;;  %16910 = vmatprep.subr.bf16.mxu1 %v18568_v30  ;;  %11579 = vmatprep.mubr.bf16.mxu0 %v18575_v56  ;;  %v18609_v41 = vld [vmem:[%s22821_s10 + $0x3a8] ss:$36 sps:$4 sm:$0xff]   ;;  %v18617_v55 = vld [vmem:[%s22821_s10 + $0x3f4] ss:$36 sps:$4 sm:$0xff]  }
 0x7b6   : > { %9796 = vst.msk [vmem:[#allocation4 + $0x204] sm:$0xf] %vm8226_vm11, %v15635_v53  ;;  %v15640_v28 = vpack.c.bf16 %v17784_v27, %v17784_v27  ;;  %16911 = vmatpush3.bf16.msra.mxu1 %v18569_v25  ;;  %11708 = vmatprep.mubr.bf16.mxu1 %v18578_v59  ;;  %v18571_v48 = vld [vmem:[#allocation4 + $0x1b0] sm:$0xff]   ;;  %v18615_v59 = vld [vmem:[%s22821_s10 + $0x3f0] ss:$36 sps:$4 sm:$0xff]  }
 0x7b7   : > { %v9684_v46 = vpop.f32.mrf.mxu1  ;;  %16912 = vmatprep.subr.bf16.mxu1 %v18570_v49  ;;  %v18620_v56 = vld [vmem:[%s22821_s10 + $0x2dc] ss:$36 sps:$4 sm:$0xff]   ;;  %v18626_v53 = vld [vmem:[%s22821_s10 + $0x324] ss:$36 sps:$4 sm:$0xff]   ;;  %v18629_v49 = vld [vmem:[%s22821_s10 + $0x36c] ss:$36 sps:$4 sm:$0xff]  }
 0x7b8   : > { %9801 = vst.msk [vmem:[#allocation4 + $0x218] sm:$0xf] %vm8226_vm11, %v15640_v28  ;;  %v15638_v44 = vpack.c.bf16 %v9684_v46, %v9684_v46  ;;  %v18618_v57 = vld [vmem:[%s22821_s10 + $0x2d8] ss:$36 sps:$4 sm:$0xff]   ;;  %v18624_v27 = vld [vmem:[%s22821_s10 + $0x320] ss:$36 sps:$4 sm:$0xff]  }
 0x7b9   : > { %v17785_v61 = vpop.f32.mrf.mxu1  ;;  %v18623_v30 = vld [vmem:[%s22821_s10 + $0x43c] ss:$36 sps:$4 sm:$0xff]   ;;  %v18632_v28 = vld [vmem:[%s22821_s10 + $0x14] ss:$36 sps:$4 sm:$0xff]   ;;  %v18627_v46 = vld [vmem:[%s22821_s10 + $0x368] ss:$36 sps:$4 sm:$0xff]  }
 0x7ba   : > { %9799 = vst.msk [vmem:[#allocation4 + $0x210] sm:$0xf] %vm8226_vm11, %v15638_v44  ;;  %v15641_v2 = vpack.c.bf16 %v17785_v61, %v17785_v61  ;;  %16913 = vmatpush3.bf16.msra.mxu1 %v18571_v48  ;;  %v18621_v25 = vld [vmem:[%s22821_s10 + $0x438] ss:$36 sps:$4 sm:$0xff]   ;;  %v18630_v44 = vld [vmem:[%s22821_s10 + $0x10] ss:$36 sps:$4 sm:$0xff]  }
 0x7bb   : > { %v9687_v54 = vpop.f32.mrf.mxu1  ;;  %16914 = vmatprep.subr.bf16.mxu1 %v18572_v31  ;;  %v18640_v61 = vld [vmem:[%s22821_s10 + $0x5c] ss:$36 sps:$4 sm:$0xff]  }
 0x7bc   : > { %9802 = vst.msk [vmem:[#allocation4 + $0x21c] sm:$0xf] %vm8226_vm11, %v15641_v2  ;;  %v15639_v38 = vpack.c.bf16 %v9687_v54, %v9687_v54  ;;  %11580 = vmatmul.mubr.bf16.gmra.mxu0 %v18573_v60  ;;  %11709 = vmatmul.mubr.bf16.gmra.mxu1 %v18576_v50  ;;  %v18637_v60 = vld [vmem:[%s22821_s10 + $0x3b4] ss:$36 sps:$4 sm:$0xff]   ;;  %v21611_v54 = vpop.permute.xlu0 %10299 }
 0x7bd   : > { %v17788_v0 = vpop.f32.mrf.mxu1  ;;  %11587 = vmatprep.mubr.bf16.mxu0 %v18585_v45  ;;  %11716 = vmatprep.mubr.bf16.mxu1 %v18588_v21  ;;  %v18635_v2 = vld [vmem:[%s22821_s10 + $0x3b0] ss:$36 sps:$4 sm:$0xff]   ;;  %v18638_v31 = vld [vmem:[%s22821_s10 + $0x58] ss:$36 sps:$4 sm:$0xff]   ;;  %v18648_v21 = vld [vmem:[%s22821_s10 + $0xa4] ss:$36 sps:$4 sm:$0xff]  }
 0x7be   : > { %9800 = vst.msk [vmem:[#allocation4 + $0x214] sm:$0xf] %vm8226_vm11, %v15639_v38  ;;  %v15644_v34 = vpack.c.bf16 %v17788_v0, %v17788_v0  ;;  %16915 = vmatpush3.bf16.msra.mxu1 %v18579_v42  ;;  %v18645_v45 = vld [vmem:[%s22821_s10 + $0x3fc] ss:$36 sps:$4 sm:$0xff]   ;;  %v21613_v0 = vpop.permute.xlu1 %10304 }
 0x7bf   : > { %v9700_v58 = vpop.f32.mrf.mxu1  ;;  %16916 = vmatprep.subr.bf16.mxu1 %v18580_v35  ;;  %v18646_v35 = vld [vmem:[%s22821_s10 + $0xa0] ss:$36 sps:$4 sm:$0xff]  }
 0x7c0   : > { %9805 = vst.msk [vmem:[#allocation4 + $0x228] sm:$0xf] %vm8226_vm11, %v15644_v34  ;;  %v15642_v6 = vpack.c.bf16 %v9700_v58, %v9700_v58  ;;  %v18643_v34 = vld [vmem:[%s22821_s10 + $0x3f8] ss:$36 sps:$4 sm:$0xff]   ;;  %v21621_v58 = vpop.permute.xlu0 %10219 }
 0x7c1   : > { %v17789_v51 = vpop.f32.mrf.mxu1 }
 0x7c2   : > { %9803 = vst.msk [vmem:[#allocation4 + $0x220] sm:$0xf] %vm8226_vm11, %v15642_v6  ;;  %v15645_v23 = vpack.c.bf16 %v17789_v51, %v17789_v51  ;;  %16917 = vmatpush3.bf16.msra.mxu1 %v18581_v8  ;;  %v18653_v6 = vld [vmem:[%s22821_s10 + $0x444] ss:$36 sps:$4 sm:$0xff]   ;;  %v21629_v8 = vpop.permute.xlu1 %10224 }
 0x7c3   : > { %v9703_v11 = vpop.f32.mrf.mxu1  ;;  %16918 = vmatprep.subr.bf16.mxu1 %v18582_v62  ;;  %v18642_v42 = vld [vmem:[#allocation4 + $0x218] sm:$0xff]   ;;  %v18651_v62 = vld [vmem:[%s22821_s10 + $0x440] ss:$36 sps:$4 sm:$0xff]  }
 0x7c4   : > { %9806 = vst.msk [vmem:[#allocation4 + $0x22c] sm:$0xf] %vm8226_vm11, %v15645_v23  ;;  %v15643_v12 = vpack.c.bf16 %v9703_v11, %v9703_v11  ;;  %11588 = vmatmul.mubr.bf16.gmra.mxu0 %v18583_v32  ;;  %11717 = vmatmul.mubr.bf16.gmra.mxu1 %v18586_v9  ;;  %v18656_v32 = vld [vmem:[%s22821_s10 + $0xec] ss:$36 sps:$4 sm:$0xff]   ;;  %v21631_v9 = vpop.permute.xlu0 %10289  ;;  %v18650_v23 = vld [vmem:[#allocation4 + $0x208] sm:$0xff]  }
 0x7c5   : > { %v17792_v63 = vpop.f32.mrf.mxu1  ;;  %11595 = vmatprep.mubr.bf16.mxu0 %v18595_v39  ;;  %11724 = vmatprep.mubr.bf16.mxu1 %v18598_v15  ;;  %v18649_v51 = vld [vmem:[#allocation4 + $0x210] sm:$0xff]   ;;  %v18654_v39 = vld [vmem:[%s22821_s10 + $0xe8] ss:$36 sps:$4 sm:$0xff]   ;;  %v18660_v15 = vld [vmem:[%s22821_s10 + $0x134] ss:$36 sps:$4 sm:$0xff]  }
 0x7c6   : > { %9804 = vst.msk [vmem:[#allocation4 + $0x224] sm:$0xf] %vm8226_vm11, %v15643_v12  ;;  %v15648_v13 = vpack.c.bf16 %v17792_v63, %v17792_v63  ;;  %16919 = vmatpush3.bf16.msra.mxu1 %v18589_v37  ;;  %v18663_v11 = vld [vmem:[%s22821_s10 + $0x1c] ss:$36 sps:$4 sm:$0xff]   ;;  %v21645_v12 = vpop.permute.xlu1 %10294  ;;  %v18657_v63 = vld [vmem:[#allocation4 + $0x200] sm:$0xff]  }
 0x7c7   : > { %v9716_v29 = vpop.f32.mrf.mxu1  ;;  %16920 = vmatprep.subr.bf16.mxu1 %v18590_v19  ;;  %v18661_v19 = vld [vmem:[%s22821_s10 + $0x18] ss:$36 sps:$4 sm:$0xff]  }
 0x7c8   : > { %9809 = vst.msk [vmem:[#allocation4 + $0x238] sm:$0xf] %vm8226_vm11, %v15648_v13  ;;  %v15646_v43 = vpack.c.bf16 %v9716_v29, %v9716_v29  ;;  %v21647_v37 = vpop.permute.xlu0 %10209  ;;  %v18658_v13 = vld [vmem:[%s22821_s10 + $0x130] ss:$36 sps:$4 sm:$0xff]  }
 0x7c9   : > { %v17793_v14 = vpop.f32.mrf.mxu1 }
 0x7ca   : > { %9807 = vst.msk [vmem:[#allocation4 + $0x230] sm:$0xf] %vm8226_vm11, %v15646_v43  ;;  %v15649_v33 = vpack.c.bf16 %v17793_v14, %v17793_v14  ;;  %16921 = vmatpush3.bf16.msra.mxu1 %v18591_v4  ;;  %v21655_v29 = vpop.permute.xlu1 %10214  ;;  %v18666_v43 = vld [vmem:[%s22821_s10 + $0x17c] ss:$36 sps:$4 sm:$0xff]  }
 0x7cb   : > { %v9719_v1 = vpop.f32.mrf.mxu1  ;;  %16922 = vmatprep.subr.bf16.mxu1 %v18592_v10  ;;  %v18634_v50 = vld [vmem:[#allocation4 + $0x228] sm:$0xff]  }
 0x7cc   : > { %9810 = vst.msk [vmem:[#allocation4 + $0x23c] sm:$0xf] %vm8226_vm11, %v15649_v33  ;;  %v15647_v18 = vpack.c.bf16 %v9719_v1, %v9719_v1  ;;  %11596 = vmatmul.mubr.bf16.gmra.mxu0 %v18593_v47  ;;  %11725 = vmatmul.mubr.bf16.gmra.mxu1 %v18596_v7  ;;  %v18669_v47 = vld [vmem:[%s22821_s10 + $0x64] ss:$36 sps:$4 sm:$0xff]   ;;  %v21663_v14 = vpop.permute.xlu0 %10279  ;;  %v18664_v7 = vld [vmem:[%s22821_s10 + $0x178] ss:$36 sps:$4 sm:$0xff]  }
 0x7cd   : > { %11603 = vmatprep.mubr.bf16.mxu0 %v18604_v36  ;;  %11732 = vmatprep.mubr.bf16.mxu1 %v18607_v3  ;;  %v18641_v38 = vld [vmem:[#allocation4 + $0x220] sm:$0xff]   ;;  %v18667_v33 = vld [vmem:[%s22821_s10 + $0x60] ss:$36 sps:$4 sm:$0xff]  }
 0x7ce   : > { %9808 = vst.msk [vmem:[#allocation4 + $0x234] sm:$0xf] %vm8226_vm11, %v15647_v18  ;;  %16923 = vmatpush3.bf16.msra.mxu1 %v18599_v24  ;;  %v21665_v4 = vpop.permute.xlu1 %10284  ;;  %v18672_v36 = vld [vmem:[%s22821_s10 + $0x1c4] ss:$36 sps:$4 sm:$0xff]   ;;  %v18675_v3 = vld [vmem:[%s22821_s10 + $0xac] ss:$36 sps:$4 sm:$0xff]  }
 0x7cf   : > { %16924 = vmatprep.subr.bf16.mxu1 %v18600_v20  ;;  %v18670_v24 = vld [vmem:[%s22821_s10 + $0x1c0] ss:$36 sps:$4 sm:$0xff]   ;;  %v18673_v20 = vld [vmem:[%s22821_s10 + $0xa8] ss:$36 sps:$4 sm:$0xff]  }
 0x7d0   : > { %v21673_v10 = vpop.permute.xlu0 %10199 }
 0x7d2   : > { %16925 = vmatpush3.bf16.msra.mxu1 %v18601_v5  ;;  %v21681_v1 = vpop.permute.xlu1 %10204  ;;  %v18681_v5 = vld [vmem:[%s22821_s10 + $0xf4] ss:$36 sps:$4 sm:$0xff]  }
 0x7d3   : > { %v18608_v52 = vld [vmem:[#allocation4 + $0x238] sm:$0xff]  }
 0x7d4   : > { %11604 = vmatmul.mubr.bf16.gmra.mxu0 %v18602_v16  ;;  %11733 = vmatmul.mubr.bf16.gmra.mxu1 %v18605_v40  ;;  %v21683_v18 = vpop.permute.xlu0 %10269  ;;  %v18678_v16 = vld [vmem:[%s22821_s10 + $0x20c] ss:$36 sps:$4 sm:$0xff]  }
 0x7d5   : > { %17794 = vmatprep.subr.bf16.mxu0 %v18608_v52  ;;  %11611 = vmatprep.mubr.bf16.mxu0 %v18611_v17  ;;  %v18633_v48 = vld [vmem:[#allocation4 + $0x230] sm:$0xff]  }
 0x7d6   : > { %11740 = vmatprep.mubr.bf16.mxu1 %v18614_v22  ;;  %v21697_v40 = vpop.permute.xlu1 %10274  ;;  %v18679_v22 = vld [vmem:[%s22821_s10 + $0xf0] ss:$36 sps:$4 sm:$0xff]  }
 0x7d8   : > { %v21699_v17 = vpop.permute.xlu0 %10189 }
 0x7dc   : > { %11612 = vmatmul.mubr.bf16.gmra.mxu0 %v18609_v41  ;;  %11741 = vmatmul.mubr.bf16.gmra.mxu1 %v18612_v26  ;;  %v21707_v41 = vpop.permute.xlu1 %10194  ;;  %v18684_v26 = vld [vmem:[%s22821_s10 + $0x254] ss:$36 sps:$4 sm:$0xff]  }
 0x7dd   : > { %11619 = vmatprep.mubr.bf16.mxu0 %v18617_v55  ;;  %11748 = vmatprep.mubr.bf16.mxu1 %v18620_v56  ;;  %v18687_v55 = vld [vmem:[%s22821_s10 + $0x13c] ss:$36 sps:$4 sm:$0xff]   ;;  %v21715_v56 = vpop.permute.xlu0 %10259 }
 0x7e4   : > { %11620 = vmatmul.mubr.bf16.gmra.mxu0 %v18615_v59  ;;  %11749 = vmatmul.mubr.bf16.gmra.mxu1 %v18618_v57  ;;  %v21717_v59 = vpop.permute.xlu1 %10264  ;;  %v18682_v57 = vld [vmem:[%s22821_s10 + $0x250] ss:$36 sps:$4 sm:$0xff]  }
 0x7e5   : > { %11627 = vmatprep.mubr.bf16.mxu0 %v18623_v30  ;;  %11756 = vmatprep.mubr.bf16.mxu1 %v18626_v53  ;;  %v18685_v30 = vld [vmem:[%s22821_s10 + $0x138] ss:$36 sps:$4 sm:$0xff]   ;;  %v21725_v53 = vpop.permute.xlu0 %10179 }
 0x7ec   : > { %11628 = vmatmul.mubr.bf16.gmra.mxu0 %v18621_v25  ;;  %11757 = vmatmul.mubr.bf16.gmra.mxu1 %v18624_v27  ;;  %v18690_v25 = vld [vmem:[%s22821_s10 + $0x29c] ss:$36 sps:$4 sm:$0xff]   ;;  %v18693_v27 = vld [vmem:[%s22821_s10 + $0x184] ss:$36 sps:$4 sm:$0xff]  }
 0x7ed   : > { %11764 = vmatprep.mubr.bf16.mxu1 %v18629_v49  ;;  %11829 = vmatprep.mubr.bf16.mxu0 %v18632_v28  ;;  %v21733_v28 = vpop.permute.xlu1 %10184 }
 0x7f4   : > { %11765 = vmatmul.mubr.bf16.gmra.mxu1 %v18627_v46  ;;  %11830 = vmatmul.mubr.bf16.vlgmr.msra.gmra.mxu0 %v18630_v44  ;;  %v21735_v44 = vpop.permute.xlu0 %10249 }
 0x7f5   : > { %17795 = vmatpush3.bf16.msra.mxu0 %v18608_v52  ;;  %11772 = vmatprep.mubr.bf16.mxu1 %v18637_v60  ;;  %v18676_v52 = vld [vmem:[%s22821_s10 + $0x208] ss:$36 sps:$4 sm:$0xff]  }
 0x7f6   : > { %17796 = vmatprep.subr.bf16.mxu0 %v18633_v48  ;;  %11837 = vmatprep.mubr.bf16.mxu0 %v18640_v61 }
 0x7f9   : > { %17797 = vmatpush3.bf16.msra.mxu0 %v18633_v48  ;;  %v18688_v48 = vld [vmem:[%s22821_s10 + $0x298] ss:$36 sps:$4 sm:$0xff]  }
 0x7fa   : > { %17798 = vmatprep.subr.bf16.mxu0 %v18634_v50 }
 0x7fc   : > { %11773 = vmatmul.mubr.bf16.gmra.mxu1 %v18635_v2  ;;  %11838 = vmatmul.mubr.bf16.gmra.mxu0 %v18638_v31  ;;  %v18696_v2 = vld [vmem:[%s22821_s10 + $0x2e4] ss:$36 sps:$4 sm:$0xff]   ;;  %v18699_v31 = vld [vmem:[%s22821_s10 + $0x1cc] ss:$36 sps:$4 sm:$0xff]  }
 0x7fd   : > { %17799 = vmatpush3.bf16.msra.mxu0 %v18634_v50  ;;  %11780 = vmatprep.mubr.bf16.mxu1 %v18645_v45  ;;  %v18691_v50 = vld [vmem:[%s22821_s10 + $0x180] ss:$36 sps:$4 sm:$0xff]  }
 0x7fe   : > { %17800 = vmatprep.subr.bf16.mxu0 %v18641_v38  ;;  %11845 = vmatprep.mubr.bf16.mxu0 %v18648_v21  ;;  %v21751_v21 = vpop.permute.xlu1 %10254 }
 0x801   : > { %17801 = vmatpush3.bf16.msra.mxu0 %v18641_v38 }
 0x802   : > { %17802 = vmatprep.subr.bf16.mxu0 %v18642_v42 }
 0x804   : > { %11781 = vmatmul.mubr.bf16.gmra.mxu1 %v18643_v34  ;;  %11846 = vmatmul.mubr.bf16.gmra.mxu0 %v18646_v35  ;;  %v21755_v34 = vpop.permute.xlu0 %10169 }
 0x805   : > { %17803 = vmatpush3.bf16.msra.mxu0 %v18642_v42  ;;  %11788 = vmatprep.mubr.bf16.mxu1 %v18653_v6 }
 0x806   : > { %17804 = vmatprep.subr.bf16.mxu0 %v18649_v51  ;;  %11853 = vmatprep.mubr.bf16.mxu0 %v18656_v32 }
 0x809   : > { %17805 = vmatpush3.bf16.msra.mxu0 %v18649_v51  ;;  %v18694_v51 = vld [vmem:[%s22821_s10 + $0x2e0] ss:$36 sps:$4 sm:$0xff]  }
 0x80a   : > { %17806 = vmatprep.subr.bf16.mxu0 %v18650_v23 }
 0x80c   : > { %11789 = vmatmul.mubr.bf16.gmra.mxu1 %v18651_v62  ;;  %11854 = vmatmul.mubr.bf16.gmra.mxu0 %v18654_v39  ;;  %v21765_v62 = vpop.permute.xlu1 %10174  ;;  %v18702_v39 = vld [vmem:[%s22821_s10 + $0x32c] ss:$36 sps:$4 sm:$0xff]  }
 0x80d   : > { %17807 = vmatpush3.bf16.msra.mxu0 %v18650_v23  ;;  %11861 = vmatprep.mubr.bf16.mxu0 %v18660_v15  ;;  %v18697_v23 = vld [vmem:[%s22821_s10 + $0x1c8] ss:$36 sps:$4 sm:$0xff]   ;;  %v18705_v15 = vld [vmem:[%s22821_s10 + $0x214] ss:$36 sps:$4 sm:$0xff]  }
 0x80e   : > { %17808 = vmatprep.subr.bf16.mxu0 %v18657_v63  ;;  %11990 = vmatprep.mubr.bf16.mxu1 %v18663_v11 }
 0x811   : > { %17809 = vmatpush3.bf16.msra.mxu0 %v18657_v63  ;;  %v21773_v63 = vpop.permute.xlu0 %10239 }
 0x814   : > { %11862 = vmatmul.mubr.bf16.gmra.mxu0 %v18658_v13  ;;  %11991 = vmatmul.mubr.bf16.vlgmr.msra.gmra.mxu1 %v18661_v19 }
 0x815   : > { %11869 = vmatprep.mubr.bf16.mxu0 %v18666_v43  ;;  %11998 = vmatprep.mubr.bf16.mxu1 %v18669_v47  ;;  %v21777_v47 = vpop.permute.xlu1 %10244 }
 0x81c   : > { %11870 = vmatmul.mubr.bf16.gmra.mxu0 %v18664_v7  ;;  %11999 = vmatmul.mubr.bf16.gmra.mxu1 %v18667_v33 }
 0x81d   : > { %11877 = vmatprep.mubr.bf16.mxu0 %v18672_v36  ;;  %12006 = vmatprep.mubr.bf16.mxu1 %v18675_v3  ;;  %v18700_v36 = vld [vmem:[%s22821_s10 + $0x328] ss:$36 sps:$4 sm:$0xff]   ;;  %v18703_v3 = vld [vmem:[%s22821_s10 + $0x210] ss:$36 sps:$4 sm:$0xff]  }
 0x824   : > { %11878 = vmatmul.mubr.bf16.gmra.mxu0 %v18670_v24  ;;  %12007 = vmatmul.mubr.bf16.gmra.mxu1 %v18673_v20  ;;  %v10160_v24 = vpop.permute.xlu0 %10159  ;;  %v18708_v20 = vld [vmem:[%s22821_s10 + $0x374] ss:$36 sps:$4 sm:$0xff]  }
 0x825   : > { %11885 = vmatprep.mubr.bf16.mxu0 %v18678_v16  ;;  %12014 = vmatprep.mubr.bf16.mxu1 %v18681_v5  ;;  %v18711_v16 = vld [vmem:[%s22821_s10 + $0x25c] ss:$36 sps:$4 sm:$0xff]  }
 0x82c   : > { %11886 = vmatmul.mubr.bf16.gmra.mxu0 %v18676_v52  ;;  %12015 = vmatmul.mubr.bf16.gmra.mxu1 %v18679_v22 }
 0x82d   : > { %11893 = vmatprep.mubr.bf16.mxu0 %v18684_v26  ;;  %12022 = vmatprep.mubr.bf16.mxu1 %v18687_v55  ;;  %v10165_v26 = vpop.permute.xlu1 %10164 }
 0x834   : > { %v16590_v49 = vpop.f32.mrf.mxu0  ;;  %11894 = vmatmul.mubr.bf16.gmra.mxu0 %v18682_v57  ;;  %12023 = vmatmul.mubr.bf16.gmra.mxu1 %v18685_v30  ;;  %v21795_v57 = vpop.permute.xlu0 %10229 }
 0x835   : > { %11901 = vmatprep.mubr.bf16.mxu0 %v18690_v25  ;;  %12030 = vmatprep.mubr.bf16.mxu1 %v18693_v27  ;;  %v18706_v27 = vld [vmem:[%s22821_s10 + $0x370] ss:$36 sps:$4 sm:$0xff]  }
 0x836   : > { %v16591_v46 = vpop.f32.mrf.mxu0 }
 0x837   : > { %v21737_v60 = vadd.f32 %v16591_v46, %v16590_v49  ;;  %v18709_v49 = vld [vmem:[%s22821_s10 + $0x258] ss:$36 sps:$4 sm:$0xff]  }
 0x838   : > { %v16593_v61 = vpop.f32.mrf.mxu0  ;;  %v18714_v46 = vld [vmem:[%s22821_s10 + $0x3bc] ss:$36 sps:$4 sm:$0xff]  }
 0x83a   : > { %v16594_v45 = vpop.f32.mrf.mxu0 }
 0x83b   : > { %v21753_v38 = vadd.f32 %v16594_v45, %v16593_v61  ;;  %v18717_v61 = vld [vmem:[%s22821_s10 + $0x2a4] ss:$36 sps:$4 sm:$0xff]  }
 0x83c   : > { %v16596_v42 = vpop.f32.mrf.mxu0  ;;  %11902 = vmatmul.mubr.bf16.gmra.mxu0 %v18688_v48  ;;  %12031 = vmatmul.mubr.bf16.gmra.mxu1 %v18691_v50  ;;  %v21811_v50 = vpop.permute.xlu1 %10234 }
 0x83d   : > { %11909 = vmatprep.mubr.bf16.mxu0 %v18696_v2  ;;  %12038 = vmatprep.mubr.bf16.mxu1 %v18699_v31 }
 0x83e   : > { %v16597_v35 = vpop.f32.mrf.mxu0 }
 0x83f   : > { %v21757_v6 = vadd.f32 %v16597_v35, %v16596_v42  ;;  %v10150_v42 = vpop.permute.xlu0 %10149 }
 0x840   : > { %v16599_v32 = vpop.f32.mrf.mxu0 }
 0x842   : > { %v16600_v11 = vpop.f32.mrf.mxu0 }
 0x843   : > { %v21775_v13 = vadd.f32 %v16600_v11, %v16599_v32 }
 0x844   : > { %v16602_v19 = vpop.f32.mrf.mxu0  ;;  %11910 = vmatmul.mubr.bf16.gmra.mxu0 %v18694_v51  ;;  %12039 = vmatmul.mubr.bf16.gmra.mxu1 %v18697_v23  ;;  %v11510_v51 = vadd.f32 %v21737_v60, %v10150_v42  ;;  %v18720_v60 = vld [vmem:[%s22821_s10 + $0x404] ss:$36 sps:$4 sm:$0xff]  }
 0x845   : > { %11917 = vmatprep.mubr.bf16.mxu0 %v18702_v39  ;;  %12046 = vmatprep.mubr.bf16.mxu1 %v18705_v15 }
 0x846   : > { %v16603_v43 = vpop.f32.mrf.mxu0 }
 0x847   : > { %v21779_v7 = vadd.f32 %v16603_v43, %v16602_v19  ;;  %v18712_v19 = vld [vmem:[%s22821_s10 + $0x3b8] ss:$36 sps:$4 sm:$0xff]   ;;  %v18715_v43 = vld [vmem:[%s22821_s10 + $0x2a0] ss:$36 sps:$4 sm:$0xff]  }
 0x848   : > { %v16605_v33 = vpop.f32.mrf.mxu0 }
 0x84a   : > { %v16606_v5 = vpop.f32.mrf.mxu0 }
 0x84b   : > { %v21793_v52 = vadd.f32 %v16606_v5, %v16605_v33  ;;  %v10155_v33 = vpop.permute.xlu1 %10154 }
 0x84c   : > { %v16608_v22 = vpop.f32.mrf.mxu0  ;;  %11918 = vmatmul.mubr.bf16.gmra.mxu0 %v18700_v36  ;;  %12047 = vmatmul.mubr.bf16.gmra.mxu1 %v18703_v3  ;;  %v18723_v3 = vld [vmem:[%s22821_s10 + $0x2ec] ss:$36 sps:$4 sm:$0xff]   ;;  %v11513_v5 = vadd.f32 %v21753_v38, %v10155_v33 }
 0x84d   : > { %11925 = vmatprep.mubr.bf16.mxu0 %v18708_v20  ;;  %12054 = vmatprep.mubr.bf16.mxu1 %v18711_v16 }
 0x84e   : > { %v16609_v55 = vpop.f32.mrf.mxu0 }
 0x84f   : > { %v21797_v30 = vadd.f32 %v16609_v55, %v16608_v22 }
 0x850   : > { %v16611_v25 = vpop.f32.mrf.mxu0 }
 0x852   : > { %v16612_v48 = vpop.f32.mrf.mxu0 }
 0x853   : > { %v21813_v2 = vadd.f32 %v16612_v48, %v16611_v25  ;;  %v11518_v48 = vadd.f32 %v21757_v6, %v10160_v24  ;;  %v18729_v6 = vld [vmem:[%s22821_s10 + $0x334] ss:$36 sps:$4 sm:$0xff]  }
 0x854   : > { %v16614_v31 = vpop.f32.mrf.mxu0  ;;  %v16702_v45 = vpop.f32.mrf.mxu1  ;;  %11926 = vmatmul.mubr.bf16.gmra.mxu0 %v18706_v27  ;;  %12055 = vmatmul.mubr.bf16.gmra.mxu1 %v18709_v49 }
 0x855   : > { %11933 = vmatprep.mubr.bf16.mxu0 %v18714_v46  ;;  %12062 = vmatprep.mubr.bf16.mxu1 %v18717_v61 }
 0x856   : > { %v16615_v35 = vpop.f32.mrf.mxu0  ;;  %v16703_v32 = vpop.f32.mrf.mxu1 }
 0x857   : > { %v21816_v23 = vadd.f32 %v16615_v35, %v16614_v31  ;;  %v16704_v39 = vadd.f32 %v16703_v32, %v16702_v45  ;;  %v18718_v35 = vld [vmem:[%s22821_s10 + $0x400] ss:$36 sps:$4 sm:$0xff]   ;;  %v18721_v32 = vld [vmem:[%s22821_s10 + $0x2e8] ss:$36 sps:$4 sm:$0xff]  }
 0x858   : > { %v16617_v15 = vpop.f32.mrf.mxu0  ;;  %v16705_v11 = vpop.f32.mrf.mxu1 }
 0x859   : > { %v21824_v36 = vadd.f32 %v16704_v39, %v11510_v51  ;;  %v18726_v39 = vld [vmem:[%s22821_s10 + $0x44c] ss:$36 sps:$4 sm:$0xff]  }
 0x85a   : > { %v16618_v20 = vpop.f32.mrf.mxu0  ;;  %v16706_v16 = vpop.f32.mrf.mxu1 }
 0x85b   : > { %v21833_v22 = vadd.f32 %v16618_v20, %v16617_v15  ;;  %v16707_v55 = vadd.f32 %v16706_v16, %v16705_v11  ;;  %v11521_v11 = vadd.f32 %v21775_v13, %v10165_v26 }
 0x85c   : > { %v16620_v25 = vpop.f32.mrf.mxu0  ;;  %v16708_v27 = vpop.f32.mrf.mxu1  ;;  %11934 = vmatmul.mubr.bf16.gmra.mxu0 %v18712_v19  ;;  %12063 = vmatmul.mubr.bf16.gmra.mxu1 %v18715_v43 }
 0x85d   : > { %v21835_v49 = vadd.f32 %v16707_v55, %v11513_v5  ;;  %11941 = vmatprep.mubr.bf16.mxu0 %v18720_v60  ;;  %12070 = vmatprep.mubr.bf16.mxu1 %v18723_v3  ;;  %v11526_v5 = vadd.f32 %v21779_v7, %v21755_v34  ;;  %v18733_v34 = vld [vmem:[%s22821_s10 + $0x20] ss:$36 sps:$4 sm:$0xff]  }
 0x85e   : > { %v16621_v46 = vpop.f32.mrf.mxu0  ;;  %v16709_v61 = vpop.f32.mrf.mxu1 }
 0x85f   : > { %v21838_v31 = vadd.f32 %v16621_v46, %v16620_v25  ;;  %v16710_v45 = vadd.f32 %v16709_v61, %v16708_v27  ;;  %v18724_v27 = vld [vmem:[%s22821_s10 + $0x448] ss:$36 sps:$4 sm:$0xff]   ;;  %v18727_v46 = vld [vmem:[%s22821_s10 + $0x330] ss:$36 sps:$4 sm:$0xff]  }
 0x860   : > { %v16623_v42 = vpop.f32.mrf.mxu0  ;;  %v16711_v38 = vpop.f32.mrf.mxu1 }
 0x861   : > { %v21846_v51 = vadd.f32 %v16710_v45, %v11518_v48  ;;  %v18732_v48 = vld [vmem:[%s22821_s10 + $0x37c] ss:$36 sps:$4 sm:$0xff]  }
 0x862   : > { %v16624_v24 = vpop.f32.mrf.mxu0  ;;  %v16712_v15 = vpop.f32.mrf.mxu1 }
 0x863   : > { %v21855_v19 = vadd.f32 %v16624_v24, %v16623_v42  ;;  %v16713_v43 = vadd.f32 %v16712_v15, %v16711_v38  ;;  %v11529_v42 = vadd.f32 %v21793_v52, %v21765_v62 }
 0x864   : > { %v16626_v33 = vpop.f32.mrf.mxu0  ;;  %v16714_v60 = vpop.f32.mrf.mxu1  ;;  %11942 = vmatmul.mubr.bf16.gmra.mxu0 %v18718_v35  ;;  %12071 = vmatmul.mubr.bf16.gmra.mxu1 %v18721_v32 }
 0x865   : > { %v21857_v3 = vadd.f32 %v16713_v43, %v11521_v11  ;;  %11949 = vmatprep.mubr.bf16.mxu0 %v18726_v39  ;;  %12078 = vmatprep.mubr.bf16.mxu1 %v18729_v6  ;;  %v11534_v11 = vadd.f32 %v21797_v30, %v21725_v53  ;;  %v18738_v53 = vld [vmem:[%s22821_s10 + $0xb0] ss:$36 sps:$4 sm:$0xff]  }
 0x866   : > { %v16627_v20 = vpop.f32.mrf.mxu0  ;;  %v16715_v16 = vpop.f32.mrf.mxu1 }
 0x867   : > { %v21861_v55 = vadd.f32 %v16627_v20, %v16626_v33  ;;  %v16716_v25 = vadd.f32 %v16715_v16, %v16714_v60  ;;  %v18730_v60 = vld [vmem:[%s22821_s10 + $0x378] ss:$36 sps:$4 sm:$0xff]   ;;  %v18734_v20 = vld [vmem:[%s22821_s10 + $0x68] ss:$36 sps:$4 sm:$0xff]  }
 0x868   : > { %v16629_v13 = vpop.f32.mrf.mxu0  ;;  %v16717_v26 = vpop.f32.mrf.mxu1 }
 0x869   : > { %v21869_v61 = vadd.f32 %v16716_v25, %v11526_v5  ;;  %v18737_v5 = vld [vmem:[%s22821_s10 + $0x3c4] ss:$36 sps:$4 sm:$0xff]  }
 0x86a   : > { %v16630_v7 = vpop.f32.mrf.mxu0  ;;  %v16718_v45 = vpop.f32.mrf.mxu1 }
 0x86b   : > { %v21879_v38 = vadd.f32 %v16630_v7, %v16629_v13  ;;  %v16719_v35 = vadd.f32 %v16718_v45, %v16717_v26  ;;  %v11537_v13 = vadd.f32 %v21813_v2, %v21733_v28 }
 0x86c   : > { %v16632_v32 = vpop.f32.mrf.mxu0  ;;  %v16720_v39 = vpop.f32.mrf.mxu1  ;;  %11950 = vmatmul.mubr.bf16.gmra.mxu0 %v18724_v27  ;;  %12079 = vmatmul.mubr.bf16.gmra.mxu1 %v18727_v46 }
 0x86d   : > { %v21881_v6 = vadd.f32 %v16719_v35, %v11529_v42  ;;  %12086 = vmatprep.mubr.bf16.mxu1 %v18732_v48  ;;  %17810 = vmatprep.mubr.bf16.mxu0 %v18733_v34  ;;  %v11542_v42 = vadd.f32 %v21816_v23, %v21699_v17  ;;  %v18743_v17 = vld [vmem:[%s22821_s10 + $0x140] ss:$36 sps:$4 sm:$0xff]  }
 0x86e   : > { %v16633_v24 = vpop.f32.mrf.mxu0  ;;  %v16721_v15 = vpop.f32.mrf.mxu1 }
 0x86f   : > { %v21885_v43 = vadd.f32 %v16633_v24, %v16632_v32  ;;  %v16722_v33 = vadd.f32 %v16721_v15, %v16720_v39  ;;  %v18735_v39 = vld [vmem:[%s22821_s10 + $0x3c0] ss:$36 sps:$4 sm:$0xff]   ;;  %v18739_v24 = vld [vmem:[%s22821_s10 + $0xf8] ss:$36 sps:$4 sm:$0xff]  }
 0x870   : > { %v16635_v62 = vpop.f32.mrf.mxu0  ;;  %v16723_v52 = vpop.f32.mrf.mxu1 }
 0x871   : > { %v21893_v16 = vadd.f32 %v16722_v33, %v11534_v11  ;;  %v18742_v11 = vld [vmem:[%s22821_s10 + $0x40c] ss:$36 sps:$4 sm:$0xff]  }
 0x872   : > { %v16636_v30 = vpop.f32.mrf.mxu0  ;;  %v16724_v25 = vpop.f32.mrf.mxu1 }
 0x873   : > { %v21903_v26 = vadd.f32 %v16636_v30, %v16635_v62  ;;  %v16725_v27 = vadd.f32 %v16724_v25, %v16723_v52  ;;  %v11545_v62 = vadd.f32 %v21833_v22, %v21707_v41 }
 0x874   : > { %v16638_v46 = vpop.f32.mrf.mxu0  ;;  %v16726_v48 = vpop.f32.mrf.mxu1  ;;  %12087 = vmatmul.mubr.bf16.gmra.mxu1 %v18730_v60  ;;  %17811 = vmatmul.mubr.bf16.vlgmr.msra.gmra.mxu0 %v18734_v20 }
 0x875   : > { %v21905_v34 = vadd.f32 %v16725_v27, %v11537_v13  ;;  %12094 = vmatprep.mubr.bf16.mxu1 %v18737_v5  ;;  %17814 = vmatprep.mubr.bf16.mxu0 %v18738_v53  ;;  %v11550_v13 = vadd.f32 %v21838_v31, %v21673_v10  ;;  %v18748_v10 = vld [vmem:[%s22821_s10 + $0x1d0] ss:$36 sps:$4 sm:$0xff]  }
 0x876   : > { %v16639_v7 = vpop.f32.mrf.mxu0  ;;  %v16727_v45 = vpop.f32.mrf.mxu1 }
 0x877   : > { %v21909_v35 = vadd.f32 %v16639_v7, %v16638_v46  ;;  %v16728_v32 = vadd.f32 %v16727_v45, %v16726_v48  ;;  %v18740_v48 = vld [vmem:[%s22821_s10 + $0x408] ss:$36 sps:$4 sm:$0xff]  }
 0x878   : > { %v16641_v28 = vpop.f32.mrf.mxu0  ;;  %v16729_v2 = vpop.f32.mrf.mxu1  ;;  %v18744_v7 = vld [vmem:[%s22821_s10 + $0x188] ss:$36 sps:$4 sm:$0xff]  }
 0x879   : > { %v21917_v15 = vadd.f32 %v16728_v32, %v11542_v42  ;;  %v18747_v42 = vld [vmem:[%s22821_s10 + $0x454] ss:$36 sps:$4 sm:$0xff]  }
 0x87a   : > { %v16642_v23 = vpop.f32.mrf.mxu0  ;;  %v16730_v33 = vpop.f32.mrf.mxu1 }
 0x87b   : > { %v21927_v52 = vadd.f32 %v16642_v23, %v16641_v28  ;;  %v16731_v60 = vadd.f32 %v16730_v33, %v16729_v2  ;;  %v11553_v28 = vadd.f32 %v21855_v19, %v21681_v1 }
 0x87c   : > { %v16644_v20 = vpop.f32.mrf.mxu0  ;;  %v16732_v5 = vpop.f32.mrf.mxu1  ;;  %12095 = vmatmul.mubr.bf16.gmra.mxu1 %v18735_v39  ;;  %17815 = vmatmul.mubr.bf16.gmra.mxu0 %v18739_v24 }
 0x87d   : > { %v21929_v53 = vadd.f32 %v16731_v60, %v11545_v62  ;;  %12102 = vmatprep.mubr.bf16.mxu1 %v18742_v11  ;;  %17818 = vmatprep.mubr.bf16.mxu0 %v18743_v17  ;;  %v11558_v62 = vadd.f32 %v21861_v55, %v21647_v37 }
 0x87e   : > { %v16645_v30 = vpop.f32.mrf.mxu0  ;;  %v16733_v25 = vpop.f32.mrf.mxu1 }
 0x87f   : > { %v21933_v27 = vadd.f32 %v16645_v30, %v16644_v20  ;;  %v16734_v46 = vadd.f32 %v16733_v25, %v16732_v5  ;;  %v18745_v5 = vld [vmem:[%s22821_s10 + $0x450] ss:$36 sps:$4 sm:$0xff]   ;;  %v18749_v30 = vld [vmem:[%s22821_s10 + $0x218] ss:$36 sps:$4 sm:$0xff]  }
 0x880   : > { %v16647_v41 = vpop.f32.mrf.mxu0  ;;  %v16735_v22 = vpop.f32.mrf.mxu1 }
 0x881   : > { %v21941_v45 = vadd.f32 %v16734_v46, %v11550_v13  ;;  %v18750_v13 = vld [vmem:[%s22821_s10 + $0x260] ss:$36 sps:$4 sm:$0xff]   ;;  %v11561_v46 = vadd.f32 %v21879_v38, %v21655_v29  ;;  %v18751_v38 = vld [vmem:[%s22821_s10 + $0x2a8] ss:$36 sps:$4 sm:$0xff]  }
 0x882   : > { %v16648_v31 = vpop.f32.mrf.mxu0  ;;  %v16736_v32 = vpop.f32.mrf.mxu1 }
 0x883   : > { %v21951_v2 = vadd.f32 %v16648_v31, %v16647_v41  ;;  %v16737_v39 = vadd.f32 %v16736_v32, %v16735_v22  ;;  %v11566_v32 = vadd.f32 %v21885_v43, %v21621_v58  ;;  %v11569_v58 = vadd.f32 %v21903_v26, %v21629_v8  ;;  %v18753_v26 = vld [vmem:[%s22821_s10 + $0x338] ss:$36 sps:$4 sm:$0xff]  }
 0x884   : > { %v16650_v24 = vpop.f32.mrf.mxu0  ;;  %v16738_v11 = vpop.f32.mrf.mxu1  ;;  %12103 = vmatmul.mubr.bf16.gmra.mxu1 %v18740_v48  ;;  %17819 = vmatmul.mubr.bf16.gmra.mxu0 %v18744_v7 }
 0x885   : > { %v21953_v17 = vadd.f32 %v16737_v39, %v11553_v28  ;;  %12110 = vmatprep.mubr.bf16.mxu1 %v18747_v42  ;;  %17822 = vmatprep.mubr.bf16.mxu0 %v18748_v10 }
 0x886   : > { %v16651_v23 = vpop.f32.mrf.mxu0  ;;  %v16739_v33 = vpop.f32.mrf.mxu1 }
 0x887   : > { %v21957_v60 = vadd.f32 %v16651_v23, %v16650_v24  ;;  %v16740_v20 = vadd.f32 %v16739_v33, %v16738_v11  ;;  %v18752_v23 = vld [vmem:[%s22821_s10 + $0x2f0] ss:$36 sps:$4 sm:$0xff]  }
 0x888   : > { %v16653_v1 = vpop.f32.mrf.mxu0  ;;  %v16741_v19 = vpop.f32.mrf.mxu1 }
 0x889   : > { %v21965_v25 = vadd.f32 %v16740_v20, %v11558_v62 }
 0x88a   : > { %v16654_v37 = vpop.f32.mrf.mxu0  ;;  %v16742_v55 = vpop.f32.mrf.mxu1 }
 0x88b   : > { %v21972_v41 = vadd.f32 %v16654_v37, %v16653_v1  ;;  %v16743_v22 = vadd.f32 %v16742_v55, %v16741_v19  ;;  %v11574_v37 = vadd.f32 %v21909_v35, %v21795_v57  ;;  %v11577_v57 = vadd.f32 %v21927_v52, %v21811_v50  ;;  %v18755_v50 = vld [vmem:[%s22821_s10 + $0x3c8] ss:$36 sps:$4 sm:$0xff]  }
 0x88c   : > { %v16656_v48 = vpop.f32.mrf.mxu0  ;;  %v16744_v7 = vpop.f32.mrf.mxu1  ;;  %12111 = vmatmul.mubr.bf16.gmra.mxu1 %v18745_v5  ;;  %17823 = vmatmul.mubr.bf16.gmra.mxu0 %v18749_v30 }
 0x88d   : > { %v21974_v42 = vadd.f32 %v16743_v22, %v11561_v46  ;;  %17826 = vmatprep.mubr.bf16.mxu0 %v18750_v13 }
 0x88e   : > { %v16657_v10 = vpop.f32.mrf.mxu0  ;;  %v16745_v31 = vpop.f32.mrf.mxu1 }
 0x88f   : > { %v21978_v28 = vadd.f32 %v16657_v10, %v16656_v48  ;;  %v16746_v39 = vadd.f32 %v16745_v31, %v16744_v7  ;;  %v18754_v7 = vld [vmem:[%s22821_s10 + $0x380] ss:$36 sps:$4 sm:$0xff]  }
 0x890   : > { %v16659_v24 = vpop.f32.mrf.mxu0  ;;  %v16747_v29 = vpop.f32.mrf.mxu1 }
 0x891   : > { %v21983_v11 = vadd.f32 %v16746_v39, %v11566_v32 }
 0x892   : > { %v16660_v33 = vpop.f32.mrf.mxu0  ;;  %v16748_v62 = vpop.f32.mrf.mxu1 }
 0x893   : > { %v21990_v43 = vadd.f32 %v16660_v33, %v16659_v24  ;;  %v16749_v20 = vadd.f32 %v16748_v62, %v16747_v29 }
 0x894   : > { %v16662_v1 = vpop.f32.mrf.mxu0  ;;  %v16750_v19 = vpop.f32.mrf.mxu1  ;;  %17827 = vmatmul.mubr.bf16.gmra.mxu0 %v18751_v38 }
 0x895   : > { %v21992_v5 = vadd.f32 %v16749_v20, %v11569_v58  ;;  %17830 = vmatprep.mubr.bf16.mxu0 %v18752_v23  ;;  %v11582_v23 = vadd.f32 %v21933_v27, %v21773_v63  ;;  %v11585_v63 = vadd.f32 %v21951_v2, %v21777_v47  ;;  %v18757_v47 = vld [vmem:[%s22821_s10 + $0x458] ss:$36 sps:$4 sm:$0xff]  }
 0x896   : > { %v16663_v30 = vpop.f32.mrf.mxu0  ;;  %v16751_v13 = vpop.f32.mrf.mxu1 }
 0x897   : > { %v21996_v55 = vadd.f32 %v16663_v30, %v16662_v1  ;;  %v16752_v46 = vadd.f32 %v16751_v13, %v16750_v19  ;;  %v18756_v1 = vld [vmem:[%s22821_s10 + $0x410] ss:$36 sps:$4 sm:$0xff]  }
 0x898   : > { %v21998_v22 = vpop.f32.mrf.mxu0  ;;  %v16753_v8 = vpop.f32.mrf.mxu1 }
 0x899   : > { %v22003_v48 = vadd.f32 %v16752_v46, %v11574_v37 }
 0x89a   : > { %v22008_v10 = vpop.f32.mrf.mxu0  ;;  %v16754_v31 = vpop.f32.mrf.mxu1 }
 0x89b   : > { %v16755_v35 = vadd.f32 %v16754_v31, %v16753_v8 }
 0x89c   : > { %v16668_v32 = vpop.f32.mrf.mxu0  ;;  %v16756_v39 = vpop.f32.mrf.mxu1  ;;  %17831 = vmatmul.mubr.bf16.gmra.mxu0 %v18753_v26 }
 0x89d   : > { %v22012_v24 = vadd.f32 %v16755_v35, %v11577_v57  ;;  %17834 = vmatprep.mubr.bf16.mxu0 %v18754_v7  ;;  %v11590_v7 = vadd.f32 %v21957_v60, %v21735_v44 }
 0x89e   : > { %v16669_v29 = vpop.f32.mrf.mxu0  ;;  %v16757_v38 = vpop.f32.mrf.mxu1 }
 0x89f   : > { %v22016_v33 = vadd.f32 %v16669_v29, %v16668_v32  ;;  %v16758_v62 = vadd.f32 %v16757_v38, %v16756_v39 }
 0x8a0   : > { %v22018_v58 = vpop.f32.mrf.mxu0  ;;  %v16759_v20 = vpop.f32.mrf.mxu1 }
 0x8a1   : > { %v22023_v52 = vadd.f32 %v16758_v62, %v11582_v23  ;;  %v11593_v23 = vadd.f32 %v21972_v41, %v21751_v21 }
 0x8a2   : > { %v22028_v19 = vpop.f32.mrf.mxu0  ;;  %v16760_v30 = vpop.f32.mrf.mxu1 }
 0x8a3   : > { %v16761_v27 = vadd.f32 %v16760_v30, %v16759_v20 }
 0x8a4   : > { %v16674_v13 = vpop.f32.mrf.mxu0  ;;  %v16762_v37 = vpop.f32.mrf.mxu1  ;;  %17835 = vmatmul.mubr.bf16.gmra.mxu0 %v18755_v50 }
 0x8a5   : > { %v22032_v46 = vadd.f32 %v16761_v27, %v11585_v63  ;;  %17838 = vmatprep.mubr.bf16.mxu0 %v18756_v1  ;;  %v11598_v63 = vadd.f32 %v21978_v28, %v21715_v56 }
 0x8a6   : > { %v16675_v8 = vpop.f32.mrf.mxu0  ;;  %v16763_v26 = vpop.f32.mrf.mxu1 }
 0x8a7   : > { %v16676_v31 = vadd.f32 %v16675_v8, %v16674_v13  ;;  %v16764_v57 = vadd.f32 %v16763_v26, %v16762_v37 }
 0x8a8   : > { %v16677_v35 = vpop.f32.mrf.mxu0  ;;  %v16765_v32 = vpop.f32.mrf.mxu1 }
 0x8a9   : > { %v22040_v2 = vadd.f32 %v16676_v31, %v21631_v9  ;;  %v22042_v39 = vadd.f32 %v16764_v57, %v11590_v7 }
 0x8aa   : > { %v16678_v29 = vpop.f32.mrf.mxu0  ;;  %v16766_v38 = vpop.f32.mrf.mxu1 }
 0x8ab   : > { %v16679_v62 = vadd.f32 %v16678_v29, %v16677_v35  ;;  %v16767_v44 = vadd.f32 %v16766_v38, %v16765_v32  ;;  %v11606_v32 = vadd.f32 %v21996_v55, %v21683_v18 }
 0x8ac   : > { %v16680_v60 = vpop.f32.mrf.mxu0  ;;  %v16768_v20 = vpop.f32.mrf.mxu1  ;;  %17839 = vmatmul.mubr.bf16.gmra.mxu0 %v18757_v47  ;;  %v16667_v47 = vadd.f32 %v22008_v10, %v21998_v22 }
 0x8ad   : > { %v22047_v50 = vadd.f32 %v16679_v62, %v21645_v12  ;;  %v22049_v1 = vadd.f32 %v16767_v44, %v11593_v23  ;;  %v11601_v12 = vadd.f32 %v21990_v43, %v21717_v59 }
 0x8ae   : > { %v16681_v30 = vpop.f32.mrf.mxu0  ;;  %v16769_v9 = vpop.f32.mrf.mxu1 }
 0x8af   : > { %v22053_v27 = vadd.f32 %v16681_v30, %v16680_v60  ;;  %v16770_v13 = vadd.f32 %v16769_v9, %v16768_v20  ;;  %v11609_v20 = vadd.f32 %v16667_v47, %v21697_v40 }
 0x8b0   : > { %v22055_v37 = vpop.f32.mrf.mxu0  ;;  %v16771_v21 = vpop.f32.mrf.mxu1 }
 0x8b1   : > { %v22057_v41 = vadd.f32 %v16770_v13, %v11598_v63 }
 0x8b2   : > { %v22059_v8 = vpop.f32.mrf.mxu0  ;;  %v16772_v26 = vpop.f32.mrf.mxu1 }
 0x8b3   : > { %v16773_v7 = vadd.f32 %v16772_v26, %v16771_v21  ;;  %v11614_v21 = vadd.f32 %v22016_v33, %v21663_v14 }
 0x8b4   : > { %v16774_v31 = vpop.f32.mrf.mxu1  ;;  %v16814_v57 = vpop.f32.mrf.mxu0 }
 0x8b5   : > { %v22063_v35 = vadd.f32 %v16773_v7, %v11601_v12 }
 0x8b6   : > { %v16775_v56 = vpop.f32.mrf.mxu1  ;;  %v16815_v28 = vpop.f32.mrf.mxu0 }
 0x8b7   : > { %v16776_v29 = vadd.f32 %v16775_v56, %v16774_v31  ;;  %v16816_v38 = vadd.f32 %v16815_v28, %v16814_v57 }
 0x8b8   : > { %v16777_v23 = vpop.f32.mrf.mxu1  ;;  %v16817_v62 = vpop.f32.mrf.mxu0 }
 0x8b9   : > { %v22069_v44 = vadd.f32 %v16776_v29, %v11606_v32  ;;  %v22072_v59 = vadd.f32 %v16816_v38, %v21824_v36  ;;  %v16673_v36 = vadd.f32 %v22028_v19, %v22018_v58 }
 0x8ba   : > { %v16778_v43 = vpop.f32.mrf.mxu1  ;;  %v16818_v60 = vpop.f32.mrf.mxu0 }
 0x8bb   : > { %v16779_v30 = vadd.f32 %v16778_v43, %v16777_v23  ;;  %v16819_v9 = vadd.f32 %v16818_v60, %v16817_v62  ;;  %v11617_v28 = vadd.f32 %v16673_v36, %v21665_v4 }
 0x8bc   : > { %v16780_v63 = vpop.f32.mrf.mxu1  ;;  %v16820_v18 = vpop.f32.mrf.mxu0 }
 0x8bd   : > { %v22075_v55 = vadd.f32 %v16779_v30, %v11609_v20  ;;  %v22078_v22 = vadd.f32 %v16819_v9, %v21835_v49 }
 0x8be   : > { %v16781_v10 = vpop.f32.mrf.mxu1  ;;  %v16821_v13 = vpop.f32.mrf.mxu0 }
 0x8bf   : > { %v16782_v26 = vadd.f32 %v16781_v10, %v16780_v63  ;;  %v16822_v12 = vadd.f32 %v16821_v13, %v16820_v18 }
 0x8c0   : > { %v16783_v40 = vpop.f32.mrf.mxu1  ;;  %v16823_v7 = vpop.f32.mrf.mxu0 }
 0x8c1   : > { %v22084_v31 = vadd.f32 %v16782_v26, %v11614_v21  ;;  %v22087_v57 = vadd.f32 %v16822_v12, %v21846_v51 }
 0x8c2   : > { %v16784_v56 = vpop.f32.mrf.mxu1  ;;  %v16824_v49 = vpop.f32.mrf.mxu0 }
 0x8c3   : > { %v16785_v32 = vadd.f32 %v16784_v56, %v16783_v40  ;;  %v16825_v47 = vadd.f32 %v16824_v49, %v16823_v7 }
 0x8c4   : > { %v16786_v29 = vpop.f32.mrf.mxu1  ;;  %v16826_v14 = vpop.f32.mrf.mxu0 }
 0x8c5   : > { %v22090_v33 = vadd.f32 %v16785_v32, %v11617_v28  ;;  %v22093_v58 = vadd.f32 %v16825_v47, %v21857_v3 }
 0x8c6   : > { %v16787_v19 = vpop.f32.mrf.mxu1  ;;  %v16827_v38 = vpop.f32.mrf.mxu0 }
 0x8c7   : > { %v16788_v23 = vadd.f32 %v16787_v19, %v16786_v29  ;;  %v16828_v62 = vadd.f32 %v16827_v38, %v16826_v14 }
 0x8c8   : > { %v16789_v43 = vpop.f32.mrf.mxu1  ;;  %v16829_v51 = vpop.f32.mrf.mxu0 }
 0x8c9   : > { %v22096_v60 = vadd.f32 %v16788_v23, %v22040_v2  ;;  %v22099_v4 = vadd.f32 %v16828_v62, %v21869_v61  ;;  %v11630_v2 = vadd.f32 %v22053_v27, %v21611_v54  ;;  %v16685_v61 = vadd.f32 %v22059_v8, %v22055_v37 }
 0x8ca   : > { %v16790_v20 = vpop.f32.mrf.mxu1  ;;  %v16830_v30 = vpop.f32.mrf.mxu0 }
 0x8cb   : > { %v16791_v9 = vadd.f32 %v16790_v20, %v16789_v43  ;;  %v16831_v63 = vadd.f32 %v16830_v30, %v16829_v51  ;;  %v11633_v28 = vadd.f32 %v16685_v61, %v21613_v0 }
 0x8cc   : > { %v16792_v18 = vpop.f32.mrf.mxu1  ;;  %v16832_v10 = vpop.f32.mrf.mxu0 }
 0x8cd   : > { %v22102_v3 = vadd.f32 %v16791_v9, %v22047_v50  ;;  %v22105_v13 = vadd.f32 %v16831_v63, %v21881_v6 }
 0x8ce   : > { %v16793_v21 = vpop.f32.mrf.mxu1  ;;  %v16833_v36 = vpop.f32.mrf.mxu0 }
 0x8cf   : > { %v16794_v26 = vadd.f32 %v16793_v21, %v16792_v18  ;;  %v16834_v12 = vadd.f32 %v16833_v36, %v16832_v10 }
 0x8d0   : > { %v16795_v40 = vpop.f32.mrf.mxu1  ;;  %v16835_v7 = vpop.f32.mrf.mxu0 }
 0x8d1   : > { %v22111_v56 = vadd.f32 %v16794_v26, %v11630_v2  ;;  %v22114_v50 = vadd.f32 %v16834_v12, %v21893_v16 }
 0x8d2   : > { %v16796_v49 = vpop.f32.mrf.mxu1  ;;  %v16836_v6 = vpop.f32.mrf.mxu0 }
 0x8d3   : > { %22838 = vst [vmem:[#allocation6_spill] sm:$0xff] %v22111_v56  ;;  %v16797_v32 = vadd.f32 %v16796_v49, %v16795_v40  ;;  %v16837_v47 = vadd.f32 %v16836_v6, %v16835_v7 }
 0x8d4   : > { %v16838_v29 = vpop.f32.mrf.mxu0  ;;  %v16926_v54 = vpop.f32.mrf.mxu1 }
 0x8d5   : > { %v22117_v27 = vadd.f32 %v16797_v32, %v11633_v28  ;;  %v22120_v37 = vadd.f32 %v16837_v47, %v21905_v34 }
 0x8d6   : > { %v16839_v8 = vpop.f32.mrf.mxu0  ;;  %v16927_v14 = vpop.f32.mrf.mxu1 }
 0x8d7   : > { %22839 = vst [vmem:[#allocation7_spill] sm:$0xff] %v22117_v27  ;;  %v16840_v19 = vadd.f32 %v16839_v8, %v16838_v29  ;;  %v16928_v38 = vadd.f32 %v16927_v14, %v16926_v54 }
 0x8d8   : > { %v16841_v23 = vpop.f32.mrf.mxu0  ;;  %v16929_v16 = vpop.f32.mrf.mxu1 }
 0x8d9   : > { %v22123_v62 = vadd.f32 %v16840_v19, %v21917_v15  ;;  %v22126_v0 = vadd.f32 %v16928_v38, %v22072_v59 }
 0x8da   : > { %v16842_v43 = vpop.f32.mrf.mxu0  ;;  %v16930_v51 = vpop.f32.mrf.mxu1 }
 0x8db   : > { %v16843_v20 = vadd.f32 %v16842_v43, %v16841_v23  ;;  %v16931_v30 = vadd.f32 %v16930_v51, %v16929_v16 }
 0x8dc   : > { %v16844_v9 = vpop.f32.mrf.mxu0  ;;  %v16932_v63 = vpop.f32.mrf.mxu1 }
 0x8dd   : > { %v22129_v34 = vadd.f32 %v16843_v20, %v21929_v53  ;;  %v22132_v18 = vadd.f32 %v16931_v30, %v22078_v22 }
 0x8de   : > { %v16845_v10 = vpop.f32.mrf.mxu0  ;;  %v16933_v21 = vpop.f32.mrf.mxu1 }
 0x8df   : > { %v16846_v36 = vadd.f32 %v16845_v10, %v16844_v9  ;;  %v16934_v15 = vadd.f32 %v16933_v21, %v16932_v63 }
 0x8e0   : > { %v16847_v2 = vpop.f32.mrf.mxu0  ;;  %v16935_v61 = vpop.f32.mrf.mxu1 }
 0x8e1   : > { %v22135_v59 = vadd.f32 %v16846_v36, %v21941_v45  ;;  %v22138_v26 = vadd.f32 %v16934_v15, %v22087_v57 }
 0x8e2   : > { %v16848_v12 = vpop.f32.mrf.mxu0  ;;  %v16936_v40 = vpop.f32.mrf.mxu1 }
 0x8e3   : > { %v16849_v7 = vadd.f32 %v16848_v12, %v16847_v2  ;;  %v16937_v53 = vadd.f32 %v16936_v40, %v16935_v61 }
 0x8e4   : > { %v16850_v49 = vpop.f32.mrf.mxu0  ;;  %v16938_v6 = vpop.f32.mrf.mxu1 }
 0x8e5   : > { %v22141_v22 = vadd.f32 %v16849_v7, %v21953_v17  ;;  %v22144_v28 = vadd.f32 %v16937_v53, %v22093_v58 }
 0x8e6   : > { %v16851_v32 = vpop.f32.mrf.mxu0  ;;  %v16939_v47 = vpop.f32.mrf.mxu1 }
 0x8e7   : > { %v16852_v29 = vadd.f32 %v16851_v32, %v16850_v49  ;;  %v16940_v45 = vadd.f32 %v16939_v47, %v16938_v6 }
 0x8e8   : > { %v16853_v54 = vpop.f32.mrf.mxu0  ;;  %v16941_v8 = vpop.f32.mrf.mxu1 }
 0x8e9   : > { %v22147_v57 = vadd.f32 %v16852_v29, %v21965_v25  ;;  %v22150_v14 = vadd.f32 %v16940_v45, %v22099_v4 }
 0x8ea   : > { %v16854_v19 = vpop.f32.mrf.mxu0  ;;  %v16942_v38 = vpop.f32.mrf.mxu1 }
 0x8eb   : > { %v16855_v23 = vadd.f32 %v16854_v19, %v16853_v54  ;;  %v16943_v17 = vadd.f32 %v16942_v38, %v16941_v8 }
 0x8ec   : > { %v16856_v16 = vpop.f32.mrf.mxu0  ;;  %v16944_v43 = vpop.f32.mrf.mxu1 }
 0x8ed   : > { %v22153_v58 = vadd.f32 %v16855_v23, %v21974_v42  ;;  %v22156_v51 = vadd.f32 %v16943_v17, %v22105_v13 }
 0x8ee   : > { %v16857_v20 = vpop.f32.mrf.mxu0  ;;  %v16945_v30 = vpop.f32.mrf.mxu1 }
 0x8ef   : > { %v16858_v9 = vadd.f32 %v16857_v20, %v16856_v16  ;;  %v16946_v25 = vadd.f32 %v16945_v30, %v16944_v43 }
 0x8f0   : > { %v16859_v63 = vpop.f32.mrf.mxu0  ;;  %v16947_v10 = vpop.f32.mrf.mxu1 }
 0x8f1   : > { %v22159_v4 = vadd.f32 %v16858_v9, %v21983_v11  ;;  %v22162_v21 = vadd.f32 %v16946_v25, %v22114_v50 }
 0x8f2   : > { %v16860_v36 = vpop.f32.mrf.mxu0  ;;  %v16948_v15 = vpop.f32.mrf.mxu1 }
 0x8f3   : > { %v16861_v2 = vadd.f32 %v16860_v36, %v16859_v63  ;;  %v16949_v42 = vadd.f32 %v16948_v15, %v16947_v10 }
 0x8f4   : > { %v16862_v61 = vpop.f32.mrf.mxu0  ;;  %v22164_v12 = vpop.f32.mrf.mxu1 }
 0x8f5   : > { %v22167_v13 = vadd.f32 %v16861_v2, %v21992_v5  ;;  %v22170_v40 = vadd.f32 %v16949_v42, %v22120_v37 }
 0x8f6   : > { %v16863_v7 = vpop.f32.mrf.mxu0  ;;  %v22172_v53 = vpop.f32.mrf.mxu1 }
 0x8f7   : > { %v16864_v11 = vadd.f32 %v16863_v7, %v16862_v61 }
 0x8f8   : > { %v16865_v49 = vpop.f32.mrf.mxu0  ;;  %v22174_v50 = vpop.f32.mrf.mxu1 }
 0x8f9   : > { %v11896_v6 = vadd.f32 %v16864_v11, %v22003_v48 }
 0x8fa   : > { %v16866_v32 = vpop.f32.mrf.mxu0  ;;  %v22177_v47 = vpop.f32.mrf.mxu1 }
 0x8fb   : > { %v16867_v29 = vadd.f32 %v16866_v32, %v16865_v49 }
 0x8fc   : > { %v16868_v45 = vpop.f32.mrf.mxu0  ;;  %v22179_v54 = vpop.f32.mrf.mxu1 }
 0x8fd   : > { %v11899_v5 = vadd.f32 %v16867_v29, %v22012_v24 }
 0x8fe   : > { %v16869_v37 = vpop.f32.mrf.mxu0  ;;  %v22182_v8 = vpop.f32.mrf.mxu1 }
 0x8ff   : > { %v16870_v19 = vadd.f32 %v16869_v37, %v16868_v45 }
 0x900   : > { %v16871_v38 = vpop.f32.mrf.mxu0  ;;  %v22184_v23 = vpop.f32.mrf.mxu1 }
 0x901   : > { %v11904_v17 = vadd.f32 %v16870_v19, %v22023_v52 }
 0x902   : > { %v16872_v16 = vpop.f32.mrf.mxu0  ;;  %v22187_v48 = vpop.f32.mrf.mxu1 }
 0x903   : > { %v16873_v43 = vadd.f32 %v16872_v16, %v16871_v38 }
 0x904   : > { %v16874_v20 = vpop.f32.mrf.mxu0  ;;  %v22189_v30 = vpop.f32.mrf.mxu1 }
 0x905   : > { %v11907_v9 = vadd.f32 %v16873_v43, %v22032_v46 }
 0x906   : > { %v16875_v25 = vpop.f32.mrf.mxu0  ;;  %v22192_v24 = vpop.f32.mrf.mxu1 }
 0x907   : > { %v16876_v63 = vadd.f32 %v16875_v25, %v16874_v20 }
 0x908   : > { %v16877_v10 = vpop.f32.mrf.mxu0  ;;  %v22194_v36 = vpop.f32.mrf.mxu1 }
 0x909   : > { %v22197_v15 = vadd.f32 %v16876_v63, %v22042_v39 }
 0x90a   : > { %v16878_v52 = vpop.f32.mrf.mxu0  ;;  %v22199_v2 = vpop.f32.mrf.mxu1 }
 0x90b   : > { %v16879_v42 = vadd.f32 %v16878_v52, %v16877_v10 }
 0x90c   : > { %v16880_v61 = vpop.f32.mrf.mxu0  ;;  %v22201_v7 = vpop.f32.mrf.mxu1 }
 0x90d   : > { %v22204_v11 = vadd.f32 %v16879_v42, %v22049_v1 }
 0x90e   : > { %v16881_v46 = vpop.f32.mrf.mxu0  ;;  %v22206_v49 = vpop.f32.mrf.mxu1 }
 0x90f   : > { %22840 = vst [vmem:[#allocation8_spill] sm:$0xff] %v22204_v11  ;;  %v16882_v32 = vadd.f32 %v16881_v46, %v16880_v61 }
 0x910   : > { %v16883_v29 = vpop.f32.mrf.mxu0  ;;  %v22208_v45 = vpop.f32.mrf.mxu1 }
 0x911   : > { %v22211_v39 = vadd.f32 %v16882_v32, %v22057_v41 }
 0x912   : > { %v16884_v37 = vpop.f32.mrf.mxu0  ;;  %v22213_v19 = vpop.f32.mrf.mxu1 }
 0x913   : > { %v16885_v38 = vadd.f32 %v16884_v37, %v16883_v29 }
 0x914   : > { %v16886_v16 = vpop.f32.mrf.mxu0  ;;  %v16974_v43 = vpop.f32.mrf.mxu1 }
 0x915   : > { %v22216_v20 = vadd.f32 %v16885_v38, %v22063_v35 }
 0x916   : > { %v16887_v1 = vpop.f32.mrf.mxu0  ;;  %v16975_v25 = vpop.f32.mrf.mxu1 }
 0x917   : > { %v16888_v63 = vadd.f32 %v16887_v1, %v16886_v16  ;;  %v16976_v10 = vadd.f32 %v16975_v25, %v16974_v43 }
 0x918   : > { %v16889_v52 = vpop.f32.mrf.mxu0  ;;  %v16977_v42 = vpop.f32.mrf.mxu1 }
 0x919   : > { %v22219_v61 = vadd.f32 %v16888_v63, %v22069_v44  ;;  %v22221_v41 = vadd.f32 %v16976_v10, %v11896_v6 }
 0x91a   : > { %v16890_v46 = vpop.f32.mrf.mxu0  ;;  %v16978_v32 = vpop.f32.mrf.mxu1 }
 0x91b   : > { %22841 = vst [vmem:[#allocation9_spill] sm:$0xff] %v22219_v61  ;;  %v16891_v27 = vadd.f32 %v16890_v46, %v16889_v52  ;;  %v16979_v29 = vadd.f32 %v16978_v32, %v16977_v42 }
 0x91c   : > { %v16892_v37 = vpop.f32.mrf.mxu0  ;;  %v16980_v56 = vpop.f32.mrf.mxu1 }
 0x91d   : > { %v22224_v35 = vadd.f32 %v16891_v27, %v22075_v55  ;;  %v22226_v38 = vadd.f32 %v16979_v29, %v11899_v5 }
 0x91e   : > { %v16893_v16 = vpop.f32.mrf.mxu0  ;;  %v16981_v43 = vpop.f32.mrf.mxu1 }
 0x91f   : > { %22842 = vst [vmem:[#allocation10_spill] sm:$0xff] %v22224_v35  ;;  %v16894_v1 = vadd.f32 %v16893_v16, %v16892_v37  ;;  %v16982_v25 = vadd.f32 %v16981_v43, %v16980_v56 }
 0x920   : > { %v16895_v11 = vpop.f32.mrf.mxu0  ;;  %v16983_v44 = vpop.f32.mrf.mxu1 }
 0x921   : > { %v22229_v6 = vadd.f32 %v16894_v1, %v22084_v31  ;;  %v22231_v63 = vadd.f32 %v16982_v25, %v11904_v17 }
 0x922   : > { %v16896_v10 = vpop.f32.mrf.mxu0  ;;  %v16984_v52 = vpop.f32.mrf.mxu1 }
 0x923   : > { %22843 = vst [vmem:[#allocation11_spill] sm:$0xff] %v22229_v6  ;;  %v16897_v42 = vadd.f32 %v16896_v10, %v16895_v11  ;;  %v16985_v46 = vadd.f32 %v16984_v52, %v16983_v44 }
 0x924   : > { %v16898_v32 = vpop.f32.mrf.mxu0  ;;  %v22233_v55 = vpop.f32.mrf.mxu1 }
 0x925   : > { %v22236_v27 = vadd.f32 %v16897_v42, %v22090_v33  ;;  %v22238_v5 = vadd.f32 %v16985_v46, %v11907_v9 }
 0x926   : > { %v16899_v56 = vpop.f32.mrf.mxu0  ;;  %v22240_v29 = vpop.f32.mrf.mxu1 }
 0x927   : > { %22844 = vst [vmem:[#allocation12_spill] sm:$0xff] %v22236_v27  ;;  %v16900_v37 = vadd.f32 %v16899_v56, %v16898_v32 }
 0x928   : > { %v16901_v31 = vpop.f32.mrf.mxu0  ;;  %v22242_v16 = vpop.f32.mrf.mxu1 }
 0x929   : > { %v22245_v17 = vadd.f32 %v16900_v37, %v22096_v60 }
 0x92a   : > { %v16902_v11 = vpop.f32.mrf.mxu0  ;;  %v22247_v43 = vpop.f32.mrf.mxu1 }
 0x92b   : > { %22845 = vst [vmem:[#allocation13_spill] sm:$0xff] %v22245_v17  ;;  %v16903_v1 = vadd.f32 %v16902_v11, %v16901_v31 }
 0x92c   : > { %v22249_v25 = vpop.f32.mrf.mxu0  ;;  %v22251_v33 = vpop.f32.mrf.mxu1 }
 0x92d   : > { %22846 = vst [vmem:[#allocation14_spill] sm:$0xff] %v22249_v25  ;;  %v22254_v9 = vadd.f32 %v16903_v1, %v22102_v3 }
 0x92e   : > { %v22256_v44 = vpop.f32.mrf.mxu0  ;;  %v22258_v10 = vpop.f32.mrf.mxu1 }
 0x92f   : > { %22847 = vst [vmem:[#allocation15_spill] sm:$0xff] %v22254_v9  ;;  %22848 = vst [vmem:[#allocation16_spill] sm:$0xff] %v22256_v44 }
 0x930   : > { %v22260_v52 = vpop.f32.mrf.mxu0  ;;  %v22262_v42 = vpop.f32.mrf.mxu1 }
 0x931   : > { %22849 = vst [vmem:[#allocation17_spill] sm:$0xff] %v22260_v52 }
 0x932   : > { %v22264_v60 = vpop.f32.mrf.mxu0  ;;  %v22266_v46 = vpop.f32.mrf.mxu1 }
 0x933   : > { %22850 = vst [vmem:[#allocation18_spill] sm:$0xff] %v22264_v60 }
 0x934   : > { %v22268_v32 = vpop.f32.mrf.mxu1  ;;  %v17812_v56 = vpop.f32.mrf.mxu0 }
 0x935   : > { %v12162_v3 = vadd.f32 %v17812_v56, %v22138_v26 }
 0x936   : > { %v22270_v37 = vpop.f32.mrf.mxu1  ;;  %v12153_v31 = vpop.f32.mrf.mxu0 }
 0x937   : > { %22851 = vst [vmem:[#allocation19_spill] sm:$0xff] %v22270_v37  ;;  %v12154_v9 = vadd.f32 %v12153_v31, %v22126_v0  ;;  %v12282_v52 = vmax.f32 %v12162_v3, 0.0 }
 0x938   : > { %v22273_v11 = vpop.f32.mrf.mxu1  ;;  %v17813_v1 = vpop.f32.mrf.mxu0 }
 0x939   : > { %22852 = vst [vmem:[#allocation20_spill] sm:$0xff] %v22273_v11  ;;  %v12165_v17 = vadd.f32 %v17813_v1, %v22144_v28  ;;  %v12280_v6 = vmax.f32 %v12154_v9, 0.0 }
 0x93a   : > { %v22277_v35 = vpop.f32.mrf.mxu1  ;;  %v12156_v60 = vpop.f32.mrf.mxu0 }
 0x93b   : > { %v12283_v27 = vmax.f32 %v12165_v17, 0.0  ;;  %v12157_v61 = vadd.f32 %v12156_v60, %v22132_v18  ;;  %v16958_v17 = vadd.f32 %v22182_v8, %v22179_v54 }
 0x93c   : > { %v22280_v44 = vpop.f32.mrf.mxu1  ;;  %v17816_v25 = vpop.f32.mrf.mxu0 }
 0x93d   : > { %v22282_v37 = vpack.c.bf16 %v12283_v27, %v12282_v52  ;;  %v12281_v26 = vmax.f32 %v12157_v61, 0.0  ;;  %v12178_v0 = vadd.f32 %v17816_v25, %v22162_v21  ;;  %v16952_v27 = vadd.f32 %v22172_v53, %v22164_v12 }
 0x93e   : > { %v12169_v56 = vpop.f32.mrf.mxu0  ;;  %v22287_v28 = vpop.f32.mrf.mxu1  ;;  %v16961_v61 = vadd.f32 %v22187_v48, %v22184_v23  ;;  %v16955_v25 = vadd.f32 %v22177_v47, %v22174_v50  ;;  %v12033_v12 = vadd.f32 %v16958_v17, %v22135_v59  ;;  %v16970_v47 = vadd.f32 %v22206_v49, %v22201_v7 }
 0x93f   : > { %v22284_v11 = vpack.c.bf16 %v12281_v26, %v12280_v6  ;;  %v12170_v18 = vadd.f32 %v12169_v56, %v22150_v14  ;;  %v12286_v6 = vmax.f32 %v12178_v0, 0.0  ;;  %v12025_v48 = vadd.f32 %v16952_v27, %v22123_v62 }
 0x940   : > { %v17817_v31 = vpop.f32.mrf.mxu0  ;;  %v22300_v3 = vpop.f32.mrf.mxu1  ;;  %v16964_v59 = vadd.f32 %v22192_v24, %v22189_v30  ;;  %v16967_v27 = vadd.f32 %v22199_v2, %v22194_v36 }
 0x941   : > { %v12181_v60 = vadd.f32 %v17817_v31, %v22170_v40  ;;  %v12284_v14 = vmax.f32 %v12170_v18, 0.0  ;;  %v12028_v31 = vadd.f32 %v16955_v25, %v22129_v34  ;;  %v16973_v18 = vadd.f32 %v22213_v19, %v22208_v45 }
 0x942   : > { %v12172_v9 = vpop.f32.mrf.mxu0  ;;  %v22309_v26 = vpop.f32.mrf.mxu1  ;;  %v12041_v45 = vadd.f32 %v16964_v59, %v22147_v57 }
 0x943   : > { %v12287_v52 = vmax.f32 %v12181_v60, 0.0  ;;  %v12173_v21 = vadd.f32 %v12172_v9, %v22156_v51  ;;  %v12036_v51 = vadd.f32 %v16961_v61, %v22141_v22  ;;  %v12052_v36 = vadd.f32 %v16973_v18, %v22167_v13 }
 0x944   : > { %v17820_v54 = vpop.f32.mrf.mxu0  ;;  %v22320_v9 = vpop.f32.mrf.mxu1 }
 0x945   : > { %v22302_v8 = vpack.c.bf16 %v12287_v52, %v12286_v6  ;;  %v12285_v40 = vmax.f32 %v12173_v21, 0.0  ;;  %v12194_v23 = vadd.f32 %v17820_v54, %v12033_v12  ;;  %v12049_v6 = vadd.f32 %v16970_v47, %v22159_v4 }
 0x946   : > { %v12185_v53 = vpop.f32.mrf.mxu0  ;;  %v22331_v2 = vpop.f32.mrf.mxu1  ;;  %v12044_v54 = vadd.f32 %v16967_v27, %v22153_v58 }
 0x947   : > { %v22305_v1 = vpack.c.bf16 %v12285_v40, %v12284_v14  ;;  %v12186_v56 = vadd.f32 %v12185_v53, %v12025_v48  ;;  %v12290_v62 = vmax.f32 %v12194_v23, 0.0 }
 0x948   : > { %v17821_v50 = vpop.f32.mrf.mxu0  ;;  %v22336_v57 = vpop.f32.mrf.mxu1 }
 0x949   : > { %v12197_v0 = vadd.f32 %v17821_v50, %v12036_v51  ;;  %v12288_v49 = vmax.f32 %v12186_v56, 0.0 }
 0x94a   : > { %v12188_v17 = vpop.f32.mrf.mxu0  ;;  %v22345_v58 = vpop.f32.mrf.mxu1 }
 0x94b   : > { %v12291_v60 = vmax.f32 %v12197_v0, 0.0  ;;  %v12189_v22 = vadd.f32 %v12188_v17, %v12028_v31  ;;  %v16994_v0 = vadd.f32 %v22258_v10, %v22251_v33  ;;  %v16988_v17 = vadd.f32 %v22240_v29, %v22233_v55 }
 0x94c   : > { %v17824_v7 = vpop.f32.mrf.mxu0  ;;  %v16991_v33 = vadd.f32 %v22247_v43, %v22242_v16 }
 0x94d   : > { %v22322_v61 = vpack.c.bf16 %v12291_v60, %v12290_v62  ;;  %v12289_v34 = vmax.f32 %v12189_v22, 0.0  ;;  %v12210_v52 = vadd.f32 %v17824_v7, %v12049_v6  ;;  %v12081_v29 = vadd.f32 %v16994_v0, %v22211_v39 }
 0x94e   : > { %v12201_v30 = vpop.f32.mrf.mxu0 }
 0x94f   : > { %v22325_v24 = vpack.c.bf16 %v12289_v34, %v12288_v49  ;;  %12629 = vrot.lane.b32.xlu1 %v22322_v61, %s18850_s20  ;;  %v12202_v21 = vadd.f32 %v12201_v30, %v12041_v45  ;;  %v12294_v14 = vmax.f32 %v12210_v52, 0.0  ;;  %v17006_v34 = vadd.f32 %v22287_v28, %v22280_v44  ;;  %v22853_v52 = vld [vmem:[#allocation8_spill] sm:$0xff]  ;;  %v22854_v45 = vld [vmem:[#allocation19_spill] sm:$0xff] }
 0x950   : > { %v17825_v19 = vpop.f32.mrf.mxu0  ;;  %v12076_v39 = vadd.f32 %v16991_v33, %v22853_v52 }
 0x951   : > { %v12213_v25 = vadd.f32 %v17825_v19, %v12052_v36  ;;  %v12292_v23 = vmax.f32 %v12202_v21, 0.0  ;;  %v17000_v36 = vadd.f32 %v22854_v45, %v22268_v32  ;;  %v22856_v32 = vld [vmem:[#allocation11_spill] sm:$0xff] }
 0x952   : > { %v12204_v4 = vpop.f32.mrf.mxu0 }
 0x953   : > { %v12295_v40 = vmax.f32 %v12213_v25, 0.0  ;;  %v12205_v12 = vadd.f32 %v12204_v4, %v12044_v54  ;;  %12627 = vrot.lane.b32.xlu1 %v22325_v24, %s18850_s20 }
 0x954   : > { %v17828_v53 = vpop.f32.mrf.mxu0 }
 0x955   : > { %v22338_v48 = vpack.c.bf16 %v12295_v40, %v12294_v14  ;;  %v12293_v13 = vmax.f32 %v12205_v12, 0.0  ;;  %v12226_v47 = vadd.f32 %v17828_v53, %v22231_v63  ;;  %v16997_v63 = vadd.f32 %v22266_v46, %v22262_v42 }
 0x956   : > { %v12217_v51 = vpop.f32.mrf.mxu0  ;;  %v12097_v53 = vadd.f32 %v17006_v34, %v22856_v32 }
 0x957   : > { %v22340_v50 = vpack.c.bf16 %v12293_v13, %v12292_v23  ;;  %12633 = vrot.lane.b32.xlu1 %v22338_v48, %s18850_s20  ;;  %v12218_v31 = vadd.f32 %v12217_v51, %v22221_v41  ;;  %v12298_v62 = vmax.f32 %v12226_v47, 0.0  ;;  %v17016_v41 = vpop.f32.mrf.mxu1  ;;  %v12084_v49 = vadd.f32 %v16997_v63, %v22216_v20  ;;  %v22855_v20 = vld [vmem:[#allocation20_spill] sm:$0xff]  ;;  %v22857_v23 = vld [vmem:[#allocation14_spill] sm:$0xff] }
 0x958   : > { %v17829_v56 = vpop.f32.mrf.mxu0  ;;  %v17003_v44 = vadd.f32 %v22277_v35, %v22855_v20  ;;  %v22858_v13 = vld [vmem:[#allocation16_spill] sm:$0xff]  ;;  %v22867_v20 = vld [vmem:[#allocation15_spill] sm:$0xff] }
 0x959   : > { %v12229_v59 = vadd.f32 %v17829_v56, %v22238_v5  ;;  %v12296_v5 = vmax.f32 %v12218_v31, 0.0  ;;  %v17017_v16 = vpop.f32.mrf.mxu1  ;;  %v22859_v56 = vld [vmem:[#allocation9_spill] sm:$0xff]  ;;  %v22860_v35 = vld [vmem:[#allocation12_spill] sm:$0xff] }
 0x95a   : > { %v12220_v18 = vpop.f32.mrf.mxu0  ;;  %v12089_v0 = vadd.f32 %v17000_v36, %v22859_v56  ;;  %v12353_v56 = vld [vmem:[%s22823_s12 + $0x60] sm:$0x33] }
 0x95b   : > { %v12299_v60 = vmax.f32 %v12229_v59, 0.0  ;;  %v12221_v22 = vadd.f32 %v12220_v18, %v22226_v38  ;;  %12631 = vrot.lane.b32.xlu1 %v22340_v50, %s18850_s20  ;;  %v12073_v38 = vadd.f32 %v16988_v17, %v22197_v15  ;;  %v17009_v15 = vadd.f32 %v22309_v26, %v22300_v3  ;;  %v17019_v28 = vpop.f32.mrf.mxu1  ;;  %v22861_v59 = vld [vmem:[#allocation17_spill] sm:$0xff]  ;;  %v22862_v17 = vld [vmem:[#allocation18_spill] sm:$0xff] }
 0x95c   : > { %v17832_v10 = vpop.f32.mrf.mxu0  ;;  %v16906_v3 = vadd.f32 %v22858_v13, %v22857_v23  ;;  %v16909_v18 = vadd.f32 %v22862_v17, %v22861_v59  ;;  %v15308_v59 = vcombine.low %v12353_v56, %v12353_v56  ;;  %v18800_v17 = vld [vmem:[%s22823_s12 + $0xd4] ss:$8 sps:$4 sm:$0xff]  }
 0x95d   : > { %v22360_v27 = vpack.c.bf16 %v12299_v60, %v12298_v62  ;;  %v12297_v55 = vmax.f32 %v12221_v22, 0.0  ;;  %v12242_v46 = vadd.f32 %v17832_v10, %v12081_v29  ;;  %v12100_v31 = vadd.f32 %v17009_v15, %v22860_v35  ;;  %v17020_v63 = vpop.f32.mrf.mxu1  ;;  %v22863_v10 = vld [vmem:[#allocation10_spill] sm:$0xff] }
 0x95e   : > { %v12233_v7 = vpop.f32.mrf.mxu0  ;;  %v17018_v60 = vadd.f32 %v17017_v16, %v17016_v41  ;;  %v17015_v41 = vadd.f32 %v22345_v58, %v22336_v57  ;;  %v15309_v35 = vcombine.high %v12353_v56, %v12353_v56  ;;  %v18803_v56 = vld [vmem:[%s22823_s12 + $0x13c] ss:$8 sps:$4 sm:$0xff]  }
 0x95f   : > { %v22363_v42 = vpack.c.bf16 %v12297_v55, %v12296_v5  ;;  %12625 = vrot.lane.b32.xlu1 %v22302_v8, %s18850_s20  ;;  %v12234_v6 = vadd.f32 %v12233_v7, %v12073_v38  ;;  %v12302_v21 = vmax.f32 %v12242_v46, 0.0  ;;  %v12092_v5 = vadd.f32 %v17003_v44, %v22863_v10  ;;  %v22864_v55 = vld [vmem:[#allocation6_spill] sm:$0xff] }
 0x960   : > { %v17833_v43 = vpop.f32.mrf.mxu0  ;;  %v11952_v29 = vadd.f32 %v16906_v3, %v22864_v55  ;;  %v17012_v7 = vadd.f32 %v22331_v2, %v22320_v9  ;;  %v17021_v38 = vadd.f32 %v17020_v63, %v17019_v28  ;;  %v22866_v9 = vld [vmem:[#allocation13_spill] sm:$0xff]  ;;  %v12108_v44 = vadd.f32 %v17015_v41, %v22867_v20 }
 0x961   : > { %v12245_v30 = vadd.f32 %v17833_v43, %v12084_v49  ;;  %v12300_v14 = vmax.f32 %v12234_v6, 0.0  ;;  %v22865_v6 = vld [vmem:[#allocation7_spill] sm:$0xff]  ;;  %v18772_v3 = vld [vmem:[%s22823_s12 + $0x24] ss:$8 sps:$4 sm:$0xff]  }
 0x962   : > { %v12236_v19 = vpop.f32.mrf.mxu0  ;;  %v12113_v36 = vadd.f32 %v17018_v60, %v11952_v29  ;;  %v12105_v2 = vadd.f32 %v17012_v7, %v22866_v9 }
 0x963   : > { %v12303_v25 = vmax.f32 %v12245_v30, 0.0  ;;  %v12237_v54 = vadd.f32 %v12236_v19, %v12076_v39  ;;  %12623 = vrot.lane.b32.xlu1 %v22305_v1, %s18850_s20  ;;  %v11955_v30 = vadd.f32 %v16909_v18, %v22865_v6 }
 0x964   : > { %v17836_v4 = vpop.f32.mrf.mxu0 }
 0x965   : > { %v22380_v40 = vpack.c.bf16 %v12303_v25, %v12302_v21  ;;  %v12301_v12 = vmax.f32 %v12237_v54, 0.0  ;;  %v12258_v47 = vadd.f32 %v17836_v4, %v12097_v53  ;;  %v12116_v57 = vadd.f32 %v17021_v38, %v11955_v30 }
 0x966   : > { %v12249_v26 = vpop.f32.mrf.mxu0 }
 0x967   : > { %v22385_v51 = vpack.c.bf16 %v12301_v12, %v12300_v14  ;;  %12621 = vrot.lane.b32.xlu1 %v22282_v37, %s18850_s20  ;;  %v12250_v22 = vadd.f32 %v12249_v26, %v12089_v0  ;;  %v12306_v49 = vmax.f32 %v12258_v47, 0.0  ;;  %v18770_v26 = vld [vmem:[%s22823_s12 + $0x20] ss:$8 sps:$4 sm:$0xff]   ;;  %v18776_v47 = vld [vmem:[%s22823_s12 + $0x30] ss:$8 sps:$4 sm:$0xff]  }
 0x968   : > { %v17837_v62 = vpop.f32.mrf.mxu0  ;;  %v18788_v0 = vld [vmem:[%s22823_s12 + $0x50] ss:$8 sps:$4 sm:$0xff]  }
 0x969   : > { %v12261_v33 = vadd.f32 %v17837_v62, %v12100_v31  ;;  %v12304_v52 = vmax.f32 %v12250_v22, 0.0 }
 0x96a   : > { %v12252_v46 = vpop.f32.mrf.mxu0 }
 0x96b   : > { %v12307_v43 = vmax.f32 %v12261_v33, 0.0  ;;  %v12253_v34 = vadd.f32 %v12252_v46, %v12092_v5  ;;  %12619 = vrot.lane.b32.xlu1 %v22284_v11, %s18850_s20 }
 0x96c   : > { %v17840_v16 = vpop.f32.mrf.mxu0 }
 0x96d   : > { %v22402_v39 = vpack.c.bf16 %v12307_v43, %v12306_v49  ;;  %v12305_v45 = vmax.f32 %v12253_v34, 0.0  ;;  %v12274_v21 = vadd.f32 %v17840_v16, %v12113_v36 }
 0x96e   : > { %v12265_v19 = vpop.f32.mrf.mxu0 }
 0x96f   : > { %v22405_v15 = vpack.c.bf16 %v12305_v45, %v12304_v52  ;;  %12645 = vrot.lane.b32.xlu0 %v22402_v39, %s18850_s20  ;;  %12863 = vrot.lane.b32.xlu1 %v22338_v48, %s18851_s22  ;;  %v12266_v25 = vadd.f32 %v12265_v19, %v12105_v2  ;;  %v12310_v4 = vmax.f32 %v12274_v21, 0.0  ;;  %v18761_v52 = vld [vmem:[%s22823_s12 + $0x68] ss:$8 sps:$4 sm:$0xff]   ;;  %v18767_v19 = vld [vmem:[%s22823_s12 + $0x78] ss:$8 sps:$4 sm:$0xff]  }
 0x970   : > { %v17841_v58 = vpop.f32.mrf.mxu0 }
 0x971   : > { %v12277_v54 = vadd.f32 %v17841_v58, %v12116_v57  ;;  %v12308_v32 = vmax.f32 %v12266_v25, 0.0  ;;  %v18773_v25 = vld [vmem:[%s22823_s12 + $0x88] ss:$8 sps:$4 sm:$0xff]  }
 0x972   : > { %v12268_v28 = vpop.f32.mrf.mxu0 }
 0x973   : > { %v12311_v14 = vmax.f32 %v12277_v54, 0.0  ;;  %v12269_v12 = vadd.f32 %v12268_v28, %v12108_v44  ;;  %12643 = vrot.lane.b32.xlu0 %v22405_v15, %s18850_s20  ;;  %13093 = vrot.lane.b32.xlu1 %v22338_v48, %s18852_s19  ;;  %v18781_v54 = vld [vmem:[%s22823_s12 + $0x9c] ss:$8 sps:$4 sm:$0xff]  }
 0x975   : > { %v12327_v53 = vpack.c.bf16 %v12311_v14, %v12310_v4  ;;  %v12309_v23 = vmax.f32 %v12269_v12, 0.0  ;;  %v18779_v4 = vld [vmem:[%s22823_s12 + $0x98] ss:$8 sps:$4 sm:$0xff]   ;;  %v18787_v14 = vld [vmem:[%s22823_s12 + $0xac] ss:$8 sps:$4 sm:$0xff]  }
 0x977   : > { %v22416_v13 = vpack.c.bf16 %v12309_v23, %v12308_v32  ;;  %17046 = vmatprep.subr.bf16.mxu1 %v12327_v53  ;;  %12649 = vrot.lane.b32.xlu0 %v12327_v53, %s18850_s20 }
 0x978   : > { %12861 = vrot.lane.b32.xlu1 %v22340_v50, %s18851_s22  ;;  %17047 = vmatpush3.bf16.msra.mxu1 %v22338_v48  ;;  %v18760_v48 = vld [vmem:[%s22823_s12 + $0x4] ss:$8 sps:$4 sm:$0xff]  }
 0x979   : > { %17048 = vmatprep.subr.bf16.mxu1 %v22416_v13  ;;  %12453 = vmatprep.mubr.bf16.mxu1 %v18760_v48 }
 0x97b   : > { %12647 = vrot.lane.b32.xlu0 %v22416_v13, %s18850_s20 }
 0x97c   : > { %13091 = vrot.lane.b32.xlu1 %v22340_v50, %s18852_s19  ;;  %17049 = vmatpush3.bf16.msra.mxu1 %v22340_v50  ;;  %v18763_v50 = vld [vmem:[%s22823_s12 + $0x6c] ss:$8 sps:$4 sm:$0xff]  }
 0x97d   : > { %17050 = vmatprep.subr.bf16.mxu1 %v22402_v39  ;;  %12699 = vmatprep.mubr.bf16.mxu0 %v18763_v50  ;;  %v18793_v50 = vld [vmem:[%s22823_s12 + $0xbc] ss:$8 sps:$4 sm:$0xff]  }
 0x97f   : > { %12641 = vrot.lane.b32.xlu0 %v22380_v40, %s18850_s20 }
 0x980   : > { %12859 = vrot.lane.b32.xlu1 %v22322_v61, %s18851_s22  ;;  %17051 = vmatpush3.bf16.msra.mxu1 %v22322_v61 }
 0x981   : > { %17052 = vmatprep.subr.bf16.mxu1 %v22405_v15 }
 0x983   : > { %12639 = vrot.lane.b32.xlu0 %v22385_v51, %s18850_s20 }
 0x984   : > { %13089 = vrot.lane.b32.xlu1 %v22322_v61, %s18852_s19  ;;  %17053 = vmatpush3.bf16.msra.mxu1 %v22325_v24  ;;  %v18758_v61 = vld [vmem:[%s22823_s12] ss:$8 sps:$4 sm:$0xff]  }
 0x985   : > { %17054 = vmatprep.subr.bf16.mxu1 %v22380_v40 }
 0x987   : > { %12637 = vrot.lane.b32.xlu0 %v22360_v27, %s18850_s20 }
 0x988   : > { %12857 = vrot.lane.b32.xlu1 %v22325_v24, %s18851_s22  ;;  %17055 = vmatpush3.bf16.msra.mxu1 %v22302_v8 }
 0x989   : > { %17056 = vmatprep.subr.bf16.mxu1 %v22385_v51 }
 0x98b   : > { %12635 = vrot.lane.b32.xlu0 %v22363_v42, %s18850_s20 }
 0x98c   : > { %13087 = vrot.lane.b32.xlu1 %v22325_v24, %s18852_s19  ;;  %17057 = vmatpush3.bf16.msra.mxu1 %v22305_v1  ;;  %v18766_v24 = vld [vmem:[%s22823_s12 + $0x14] ss:$8 sps:$4 sm:$0xff]  }
 0x98d   : > { %17058 = vmatprep.subr.bf16.mxu1 %v22360_v27 }
 0x98f   : > { %12879 = vrot.lane.b32.xlu0 %v12327_v53, %s18851_s22 }
 0x990   : > { %12855 = vrot.lane.b32.xlu1 %v22302_v8, %s18851_s22  ;;  %17059 = vmatpush3.bf16.msra.mxu1 %v22282_v37 }
 0x991   : > { %17060 = vmatprep.subr.bf16.mxu1 %v22363_v42 }
 0x993   : > { %13109 = vrot.lane.b32.xlu0 %v12327_v53, %s18852_s19 }
 0x994   : > { %13085 = vrot.lane.b32.xlu1 %v22302_v8, %s18852_s19  ;;  %17061 = vmatpush3.bf16.msra.mxu1 %v22284_v11  ;;  %v18764_v8 = vld [vmem:[%s22823_s12 + $0x10] ss:$8 sps:$4 sm:$0xff]  }
 0x997   : > { %12875 = vrot.lane.b32.xlu0 %v22402_v39, %s18851_s22  ;;  %12454 = vmatmul.mubr.bf16.vlgmr.msra.gmra.mxu1 %v18758_v61 }
 0x998   : > { %12853 = vrot.lane.b32.xlu1 %v22305_v1, %s18851_s22  ;;  %12461 = vmatprep.mubr.bf16.mxu1 %v18766_v24 }
 0x99b   : > { %13105 = vrot.lane.b32.xlu0 %v22402_v39, %s18852_s19  ;;  %v18769_v39 = vld [vmem:[%s22823_s12 + $0x7c] ss:$8 sps:$4 sm:$0xff]  }
 0x99c   : > { %13083 = vrot.lane.b32.xlu1 %v22305_v1, %s18852_s19  ;;  %v18778_v1 = vld [vmem:[%s22823_s12 + $0x34] ss:$8 sps:$4 sm:$0xff]  }
 0x99f   : > { %12873 = vrot.lane.b32.xlu0 %v22405_v15, %s18851_s22  ;;  %12462 = vmatmul.mubr.bf16.gmra.mxu1 %v18764_v8  ;;  %v18791_v8 = vld [vmem:[%s22823_s12 + $0xb8] ss:$8 sps:$4 sm:$0xff]  }
 0x9a0   : > { %12851 = vrot.lane.b32.xlu1 %v22282_v37, %s18851_s22  ;;  %12469 = vmatprep.mubr.bf16.mxu1 %v18772_v3  ;;  %v15322_v3 = vld [vmem:[%s22823_s12 + $0xc8] sm:$0x33] }
 0x9a3   : > { %13103 = vrot.lane.b32.xlu0 %v22405_v15, %s18852_s19  ;;  %v18775_v15 = vld [vmem:[%s22823_s12 + $0x8c] ss:$8 sps:$4 sm:$0xff]  }
 0x9a4   : > { %13081 = vrot.lane.b32.xlu1 %v22282_v37, %s18852_s19  ;;  %v18784_v37 = vld [vmem:[%s22823_s12 + $0x44] ss:$8 sps:$4 sm:$0xff]  }
 0x9a7   : > { %12871 = vrot.lane.b32.xlu0 %v22380_v40, %s18851_s22  ;;  %12470 = vmatmul.mubr.bf16.gmra.mxu1 %v18770_v26 }
 0x9a8   : > { %12849 = vrot.lane.b32.xlu1 %v22284_v11, %s18851_s22  ;;  %12477 = vmatprep.mubr.bf16.mxu1 %v18778_v1  ;;  %v15336_v1 = vcombine.high %v15322_v3, %v15322_v3 }
 0x9ab   : > { %13101 = vrot.lane.b32.xlu0 %v22380_v40, %s18852_s19  ;;  %v18782_v40 = vld [vmem:[%s22823_s12 + $0x40] ss:$8 sps:$4 sm:$0xff]  }
 0x9ac   : > { %13079 = vrot.lane.b32.xlu1 %v22284_v11, %s18852_s19  ;;  %v18790_v11 = vld [vmem:[%s22823_s12 + $0x54] ss:$8 sps:$4 sm:$0xff]  }
 0x9af   : > { %12877 = vrot.lane.b32.xlu0 %v22416_v13, %s18851_s22  ;;  %12478 = vmatmul.mubr.bf16.gmra.mxu1 %v18776_v47 }
 0x9b0   : > { %12485 = vmatprep.mubr.bf16.mxu1 %v18784_v37 }
 0x9b3   : > { %13107 = vrot.lane.b32.xlu0 %v22416_v13, %s18852_s19  ;;  %v18785_v13 = vld [vmem:[%s22823_s12 + $0xa8] ss:$8 sps:$4 sm:$0xff]  }
 0x9b7   : > { %12869 = vrot.lane.b32.xlu0 %v22385_v51, %s18851_s22  ;;  %12486 = vmatmul.mubr.bf16.gmra.mxu1 %v18782_v40  ;;  %v15335_v40 = vcombine.low %v15322_v3, %v15322_v3 }
 0x9b8   : > { %12493 = vmatprep.mubr.bf16.mxu1 %v18790_v11 }
 0x9bb   : > { %13099 = vrot.lane.b32.xlu0 %v22385_v51, %s18852_s19 }
 0x9bf   : > { %12867 = vrot.lane.b32.xlu0 %v22360_v27, %s18851_s22  ;;  %12494 = vmatmul.mubr.bf16.gmra.mxu1 %v18788_v0 }
 0x9c0   : > { %12501 = vmatprep.mubr.bf16.mxu1 %v15309_v35  ;;  %v18798_v35 = vld [vmem:[%s22823_s12 + $0xd0] ss:$8 sps:$4 sm:$0xff]  }
 0x9c1   : > { %v12630_v31 = vpop.permute.xlu1 %12629 }
 0x9c3   : > { %13097 = vrot.lane.b32.xlu0 %v22360_v27, %s18852_s19 }
 0x9c5   : > { %v12628_v51 = vpop.permute.xlu1 %12627 }
 0x9c7   : > { %12865 = vrot.lane.b32.xlu0 %v22363_v42, %s18851_s22  ;;  %12502 = vmatmul.mubr.bf16.gmra.mxu1 %v15308_v59 }
 0x9c8   : > { %12929 = vmatprep.mubr.bf16.mxu1 %v18800_v17 }
 0x9c9   : > { %v12634_v18 = vpop.permute.xlu1 %12633 }
 0x9cb   : > { %13095 = vrot.lane.b32.xlu0 %v22363_v42, %s18852_s19 }
 0x9cd   : > { %v12632_v63 = vpop.permute.xlu1 %12631 }
 0x9d1   : > { %v12626_v62 = vpop.permute.xlu1 %12625 }
 0x9d5   : > { %v12624_v60 = vpop.permute.xlu1 %12623 }
 0x9d9   : > { %v12622_v22 = vpop.permute.xlu1 %12621 }
 0x9dd   : > { %v12620_v27 = vpop.permute.xlu1 %12619 }
 0x9e1   : > { %v12646_v33 = vpop.permute.xlu0 %12645  ;;  %v12864_v10 = vpop.permute.xlu1 %12863 }
 0x9e5   : > { %v12644_v5 = vpop.permute.xlu0 %12643  ;;  %v13094_v29 = vpop.permute.xlu1 %13093 }
 0x9e9   : > { %v12650_v55 = vpop.permute.xlu0 %12649 }
 0x9ea   : > { %17104 = vmatprep.subr.bf16.mxu0 %v12650_v55  ;;  %v12862_v46 = vpop.permute.xlu1 %12861  ;;  %v18816_v55 = vld [vmem:[%s22823_s12 + $0x100] ss:$8 sps:$4 sm:$0xff]  }
 0x9eb   : > { %17105 = vmatpush3.bf16.msra.mxu0 %v12634_v18  ;;  %v18809_v18 = vld [vmem:[%s22823_s12 + $0x14c] ss:$8 sps:$4 sm:$0xff]  }
 0x9ed   : > { %v12648_v7 = vpop.permute.xlu0 %12647 }
 0x9ee   : > { %17106 = vmatprep.subr.bf16.mxu0 %v12648_v7  ;;  %v13092_v49 = vpop.permute.xlu1 %13091  ;;  %v18819_v7 = vld [vmem:[%s22823_s12 + $0x168] ss:$8 sps:$4 sm:$0xff]  }
 0x9ef   : > { %17107 = vmatpush3.bf16.msra.mxu0 %v12632_v63  ;;  %v18804_v63 = vld [vmem:[%s22823_s12 + $0xe0] ss:$8 sps:$4 sm:$0xff]  }
 0x9f0   : > { %17108 = vmatprep.subr.bf16.mxu0 %v12646_v33  ;;  %v18818_v33 = vld [vmem:[%s22823_s12 + $0x104] ss:$8 sps:$4 sm:$0xff]  }
 0x9f1   : > { %v12642_v38 = vpop.permute.xlu0 %12641 }
 0x9f2   : > { %v12860_v34 = vpop.permute.xlu1 %12859 }
 0x9f3   : > { %17109 = vmatpush3.bf16.msra.mxu0 %v12630_v31  ;;  %v18806_v31 = vld [vmem:[%s22823_s12 + $0xe4] ss:$8 sps:$4 sm:$0xff]  }
 0x9f4   : > { %17110 = vmatprep.subr.bf16.mxu0 %v12644_v5  ;;  %v18821_v5 = vld [vmem:[%s22823_s12 + $0x16c] ss:$8 sps:$4 sm:$0xff]  }
 0x9f5   : > { %v12640_v42 = vpop.permute.xlu0 %12639 }
 0x9f6   : > { %v13090_v41 = vpop.permute.xlu1 %13089 }
 0x9f7   : > { %17111 = vmatpush3.bf16.msra.mxu0 %v12628_v51  ;;  %v18801_v51 = vld [vmem:[%s22823_s12 + $0x138] ss:$8 sps:$4 sm:$0xff]  }
 0x9f8   : > { %17112 = vmatprep.subr.bf16.mxu0 %v12642_v38 }
 0x9f9   : > { %v12638_v43 = vpop.permute.xlu0 %12637 }
 0x9fa   : > { %v12858_v45 = vpop.permute.xlu1 %12857 }
 0x9fb   : > { %17113 = vmatpush3.bf16.msra.mxu0 %v12626_v62  ;;  %v18812_v62 = vld [vmem:[%s22823_s12 + $0xf4] ss:$8 sps:$4 sm:$0xff]  }
 0x9fc   : > { %17114 = vmatprep.subr.bf16.mxu0 %v12640_v42 }
 0x9fd   : > { %v12636_v6 = vpop.permute.xlu0 %12635 }
 0x9fe   : > { %v13088_v2 = vpop.permute.xlu1 %13087 }
 0x9ff   : > { %17115 = vmatpush3.bf16.msra.mxu0 %v12624_v60  ;;  %v18807_v60 = vld [vmem:[%s22823_s12 + $0x148] ss:$8 sps:$4 sm:$0xff]  }
 0xa00   : > { %17116 = vmatprep.subr.bf16.mxu0 %v12638_v43 }
 0xa01   : > { %v12880_v30 = vpop.permute.xlu0 %12879 }
 0xa02   : > { %17162 = vmatprep.subr.bf16.mxu1 %v12880_v30  ;;  %v12856_v57 = vpop.permute.xlu1 %12855 }
 0xa03   : > { %17117 = vmatpush3.bf16.msra.mxu0 %v12622_v22  ;;  %17163 = vmatpush3.bf16.msra.mxu1 %v12864_v10  ;;  %v18815_v22 = vld [vmem:[%s22823_s12 + $0x15c] ss:$8 sps:$4 sm:$0xff]   ;;  %v18813_v10 = vld [vmem:[%s22823_s12 + $0x158] ss:$8 sps:$4 sm:$0xff]  }
 0xa04   : > { %17118 = vmatprep.subr.bf16.mxu0 %v12636_v6 }
 0xa05   : > { %v13110_v16 = vpop.permute.xlu0 %13109 }
 0xa06   : > { %v13086_v44 = vpop.permute.xlu1 %13085 }
 0xa07   : > { %17119 = vmatpush3.bf16.msra.mxu0 %v12620_v27  ;;  %v18810_v27 = vld [vmem:[%s22823_s12 + $0xf0] ss:$8 sps:$4 sm:$0xff]  }
 0xa08   : > { %17220 = vmatprep.subr.bf16.mxu0 %v13110_v16 }
 0xa09   : > { %v12876_v36 = vpop.permute.xlu0 %12875 }
 0xa0a   : > { %12700 = vmatmul.mubr.bf16.vlgmr.msra.gmra.mxu0 %v18761_v52  ;;  %v12854_v12 = vpop.permute.xlu1 %12853  ;;  %v18833_v52 = vld [vmem:[%s22823_s12 + $0x18c] ss:$8 sps:$4 sm:$0xff]  }
 0xa0b   : > { %17221 = vmatpush3.bf16.msra.mxu0 %v13094_v29  ;;  %12707 = vmatprep.mubr.bf16.mxu0 %v18769_v39  ;;  %v18824_v29 = vld [vmem:[%s22823_s12 + $0x114] ss:$8 sps:$4 sm:$0xff]  }
 0xa0d   : > { %v13106_v9 = vpop.permute.xlu0 %13105 }
 0xa0e   : > { %v13084_v23 = vpop.permute.xlu1 %13083 }
 0xa11   : > { %v12874_v21 = vpop.permute.xlu0 %12873 }
 0xa12   : > { %12708 = vmatmul.mubr.bf16.gmra.mxu0 %v18767_v19  ;;  %v12852_v61 = vpop.permute.xlu1 %12851 }
 0xa13   : > { %12715 = vmatprep.mubr.bf16.mxu0 %v18775_v15 }
 0xa15   : > { %v13104_v58 = vpop.permute.xlu0 %13103 }
 0xa16   : > { %v13082_v47 = vpop.permute.xlu1 %13081 }
 0xa19   : > { %v12872_v20 = vpop.permute.xlu0 %12871 }
 0xa1a   : > { %12716 = vmatmul.mubr.bf16.gmra.mxu0 %v18773_v25  ;;  %v12850_v11 = vpop.permute.xlu1 %12849 }
 0xa1b   : > { %12723 = vmatprep.mubr.bf16.mxu0 %v18781_v54 }
 0xa1d   : > { %v13102_v28 = vpop.permute.xlu0 %13101 }
 0xa1e   : > { %v13080_v17 = vpop.permute.xlu1 %13079 }
 0xa21   : > { %v12878_v32 = vpop.permute.xlu0 %12877 }
 0xa22   : > { %12724 = vmatmul.mubr.bf16.gmra.mxu0 %v18779_v4  ;;  %17164 = vmatprep.subr.bf16.mxu1 %v12878_v32 }
 0xa23   : > { %17165 = vmatpush3.bf16.msra.mxu1 %v12862_v46  ;;  %12731 = vmatprep.mubr.bf16.mxu0 %v18787_v14  ;;  %v18827_v46 = vld [vmem:[%s22823_s12 + $0x17c] ss:$8 sps:$4 sm:$0xff]  }
 0xa24   : > { %17166 = vmatprep.subr.bf16.mxu1 %v12876_v36 }
 0xa25   : > { %v13108_v53 = vpop.permute.xlu0 %13107 }
 0xa26   : > { %17222 = vmatprep.subr.bf16.mxu0 %v13108_v53 }
 0xa27   : > { %17167 = vmatpush3.bf16.msra.mxu1 %v12860_v34  ;;  %17223 = vmatpush3.bf16.msra.mxu0 %v13092_v49  ;;  %v18822_v49 = vld [vmem:[%s22823_s12 + $0x110] ss:$8 sps:$4 sm:$0xff]   ;;  %v18830_v34 = vld [vmem:[%s22823_s12 + $0x124] ss:$8 sps:$4 sm:$0xff]  }
 0xa28   : > { %17168 = vmatprep.subr.bf16.mxu1 %v12874_v21  ;;  %17224 = vmatprep.subr.bf16.mxu0 %v13106_v9  ;;  %v18828_v9 = vld [vmem:[%s22823_s12 + $0x120] ss:$8 sps:$4 sm:$0xff]   ;;  %v15376_v21 = vld [vmem:[%s22823_s12 + $0x198] sm:$0x33] }
 0xa29   : > { %v12870_v48 = vpop.permute.xlu0 %12869  ;;  %v15390_v54 = vcombine.high %v15376_v21, %v15376_v21  ;;  %v15389_v32 = vcombine.low %v15376_v21, %v15376_v21 }
 0xa2a   : > { %12732 = vmatmul.mubr.bf16.gmra.mxu0 %v18785_v13 }
 0xa2b   : > { %17169 = vmatpush3.bf16.msra.mxu1 %v12858_v45  ;;  %17225 = vmatpush3.bf16.msra.mxu0 %v13090_v41  ;;  %v18825_v41 = vld [vmem:[%s22823_s12 + $0x178] ss:$8 sps:$4 sm:$0xff]   ;;  %v15349_v45 = vld [vmem:[%s22823_s12 + $0x130] sm:$0x33] }
 0xa2c   : > { %17170 = vmatprep.subr.bf16.mxu1 %v12872_v20  ;;  %17226 = vmatprep.subr.bf16.mxu0 %v13104_v58  ;;  %v15363_v19 = vcombine.high %v15349_v45, %v15349_v45  ;;  %v18831_v58 = vld [vmem:[%s22823_s12 + $0x188] ss:$8 sps:$4 sm:$0xff]  }
 0xa2d   : > { %v13100_v24 = vpop.permute.xlu0 %13099  ;;  %12739 = vmatprep.mubr.bf16.mxu0 %v18793_v50 }
 0xa2f   : > { %17171 = vmatpush3.bf16.msra.mxu1 %v12856_v57  ;;  %17227 = vmatpush3.bf16.msra.mxu0 %v13088_v2 }
 0xa30   : > { %17172 = vmatprep.subr.bf16.mxu1 %v12870_v48  ;;  %17228 = vmatprep.subr.bf16.mxu0 %v13102_v28  ;;  %v15362_v28 = vcombine.low %v15349_v45, %v15349_v45 }
 0xa31   : > { %v12868_v26 = vpop.permute.xlu0 %12867 }
 0xa32   : > { %12740 = vmatmul.mubr.bf16.gmra.mxu0 %v18791_v8 }
 0xa33   : > { %17173 = vmatpush3.bf16.msra.mxu1 %v12854_v12  ;;  %17229 = vmatpush3.bf16.msra.mxu0 %v13086_v44 }
 0xa34   : > { %17174 = vmatprep.subr.bf16.mxu1 %v12868_v26  ;;  %17230 = vmatprep.subr.bf16.mxu0 %v13100_v24 }
 0xa35   : > { %v13098_v37 = vpop.permute.xlu0 %13097  ;;  %12747 = vmatprep.mubr.bf16.mxu0 %v15336_v1 }
 0xa37   : > { %17175 = vmatpush3.bf16.msra.mxu1 %v12852_v61  ;;  %17231 = vmatpush3.bf16.msra.mxu0 %v13084_v23 }
 0xa38   : > { %17232 = vmatprep.subr.bf16.mxu0 %v13098_v37 }
 0xa39   : > { %v12866_v0 = vpop.permute.xlu0 %12865 }
 0xa3a   : > { %12748 = vmatmul.mubr.bf16.gmra.mxu0 %v15335_v40  ;;  %17176 = vmatprep.subr.bf16.mxu1 %v12866_v0 }
 0xa3b   : > { %17177 = vmatpush3.bf16.msra.mxu1 %v12850_v11  ;;  %17233 = vmatpush3.bf16.msra.mxu0 %v13082_v47 }
 0xa3c   : > { %13159 = vmatprep.mubr.bf16.mxu0 %v18803_v56 }
 0xa3d   : > { %v13096_v59 = vpop.permute.xlu0 %13095 }
 0xa3e   : > { %12930 = vmatmul.mubr.bf16.vlgmr.msra.gmra.mxu1 %v18798_v35  ;;  %17234 = vmatprep.subr.bf16.mxu0 %v13096_v59 }
 0xa3f   : > { %17235 = vmatpush3.bf16.msra.mxu0 %v13080_v17  ;;  %12937 = vmatprep.mubr.bf16.mxu1 %v18806_v31 }
 0xa42   : > { %13160 = vmatmul.mubr.bf16.vlgmr.msra.gmra.mxu0 %v18801_v51 }
 0xa43   : > { %13167 = vmatprep.mubr.bf16.mxu0 %v18809_v18 }
 0xa46   : > { %12938 = vmatmul.mubr.bf16.gmra.mxu1 %v18804_v63 }
 0xa47   : > { %12945 = vmatprep.mubr.bf16.mxu1 %v18812_v62  ;;  %v12328_v62 = vld [vmem:[%s22824_s13] sm:$0xff] }
 0xa4a   : > { %13168 = vmatmul.mubr.bf16.gmra.mxu0 %v18807_v60 }
 0xa4b   : > { %13175 = vmatprep.mubr.bf16.mxu0 %v18815_v22 }
 0xa4e   : > { %12946 = vmatmul.mubr.bf16.gmra.mxu1 %v18810_v27 }
 0xa4f   : > { %12953 = vmatprep.mubr.bf16.mxu1 %v18818_v33 }
 0xa52   : > { %13176 = vmatmul.mubr.bf16.gmra.mxu0 %v18813_v10  ;;  %v12329_v10 = vld [vmem:[%s22824_s13 + $0x8] sm:$0xff] }
 0xa53   : > { %13183 = vmatprep.mubr.bf16.mxu0 %v18821_v5 }
 0xa56   : > { %12954 = vmatmul.mubr.bf16.gmra.mxu1 %v18816_v55 }
 0xa57   : > { %12961 = vmatprep.mubr.bf16.mxu1 %v18824_v29  ;;  %v17062_v38 = vpop.f32.mrf.mxu1 }
 0xa59   : > { %v17063_v42 = vpop.f32.mrf.mxu1 }
 0xa5a   : > { %13184 = vmatmul.mubr.bf16.gmra.mxu0 %v18819_v7  ;;  %v22637_v43 = vadd.f32 %v17063_v42, %v17062_v38  ;;  %v12330_v38 = vld [vmem:[%s22824_s13 + $0x10] sm:$0xff] }
 0xa5b   : > { %13191 = vmatprep.mubr.bf16.mxu0 %v18827_v46  ;;  %v17065_v6 = vpop.f32.mrf.mxu1 }
 0xa5c   : > { %v12509_v27 = vadd.f32 %v22637_v43, %v12328_v62 }
 0xa5d   : > { %v17066_v30 = vpop.f32.mrf.mxu1 }
 0xa5e   : > { %12962 = vmatmul.mubr.bf16.gmra.mxu1 %v18822_v49  ;;  %v22645_v16 = vadd.f32 %v17066_v30, %v17065_v6  ;;  %v12331_v30 = vld [vmem:[%s22824_s13 + $0x18] sm:$0xff] }
 0xa5f   : > { %12969 = vmatprep.mubr.bf16.mxu1 %v18830_v34  ;;  %v17068_v39 = vpop.f32.mrf.mxu1 }
 0xa60   : > { %v12510_v7 = vadd.f32 %v22645_v16, %v12329_v10  ;;  %v18838_v16 = vld [vmem:[%s22825_s14] sm:$0xff]  }
 0xa61   : > { %v17069_v36 = vpop.f32.mrf.mxu1 }
 0xa62   : > { %13192 = vmatmul.mubr.bf16.gmra.mxu0 %v18825_v41  ;;  %v17070_v2 = vadd.f32 %v17069_v36, %v17068_v39 }
 0xa63   : > { %13199 = vmatprep.mubr.bf16.mxu0 %v18833_v52  ;;  %v17071_v15 = vpop.f32.mrf.mxu1 }
 0xa64   : > { %v12511_v34 = vadd.f32 %v17070_v2, %v12330_v38 }
 0xa65   : > { %v17072_v57 = vpop.f32.mrf.mxu1 }
 0xa66   : > { %12970 = vmatmul.mubr.bf16.gmra.mxu1 %v18828_v9  ;;  %v17073_v25 = vadd.f32 %v17072_v57, %v17071_v15  ;;  %v12332_v9 = vld [vmem:[%s22824_s13 + $0x20] sm:$0xff] }
 0xa67   : > { %12977 = vmatprep.mubr.bf16.mxu1 %v15363_v19  ;;  %v17074_v20 = vpop.f32.mrf.mxu1 }
 0xa68   : > { %v12512_v45 = vadd.f32 %v17073_v25, %v12331_v30 }
 0xa69   : > { %v17075_v44 = vpop.f32.mrf.mxu1 }
 0xa6a   : > { %13200 = vmatmul.mubr.bf16.gmra.mxu0 %v18831_v58  ;;  %v17076_v4 = vadd.f32 %v17075_v44, %v17074_v20  ;;  %v12333_v58 = vld [vmem:[%s22824_s13 + $0x28] sm:$0xff] }
 0xa6b   : > { %13207 = vmatprep.mubr.bf16.mxu0 %v15390_v54  ;;  %v17077_v14 = vpop.f32.mrf.mxu1 }
 0xa6c   : > { %v12513_v21 = vadd.f32 %v17076_v4, %v12332_v9 }
 0xa6d   : > { %v17078_v12 = vpop.f32.mrf.mxu1 }
 0xa6e   : > { %12978 = vmatmul.mubr.bf16.gmra.mxu1 %v15362_v28  ;;  %v17079_v53 = vadd.f32 %v17078_v12, %v17077_v14  ;;  %v12334_v14 = vld [vmem:[%s22824_s13 + $0x30] sm:$0xff] }
 0xa6f   : > { %v17080_v23 = vpop.f32.mrf.mxu1  ;;  %17856 = vmatprep.mubr.msk.bf16.mxu1 %vm13266_vm12, %v18838_v16 }
 0xa70   : > { %v12514_v25 = vadd.f32 %v17079_v53, %v12333_v58 }
 0xa71   : > { %v17081_v13 = vpop.f32.mrf.mxu1 }
 0xa72   : > { %13208 = vmatmul.mubr.bf16.gmra.mxu0 %v15389_v32  ;;  %v22662_v48 = vadd.f32 %v17081_v13, %v17080_v23 }
 0xa73   : > { %v17083_v50 = vpop.f32.mrf.mxu1 }
 0xa74   : > { %v12515_v4 = vadd.f32 %v22662_v48, %v12334_v14 }
 0xa75   : > { %v17084_v61 = vpop.f32.mrf.mxu1 }
 0xa76   : > { %v22664_v24 = vadd.f32 %v17084_v61, %v17083_v50  ;;  %v12335_v50 = vld [vmem:[%s22824_s13 + $0x38] sm:$0xff] }
 0xa77   : > { %v17086_v8 = vpop.f32.mrf.mxu1 }
 0xa79   : > { %v17087_v3 = vpop.f32.mrf.mxu1 }
 0xa7a   : > { %v22666_v26 = vadd.f32 %v17087_v3, %v17086_v8  ;;  %v12516_v3 = vadd.f32 %v22664_v24, %v12335_v50 }
 0xa7b   : > { %v17089_v1 = vpop.f32.mrf.mxu1 }
 0xa7d   : > { %v17090_v47 = vpop.f32.mrf.mxu1 }
 0xa7e   : > { %v22668_v37 = vadd.f32 %v17090_v47, %v17089_v1  ;;  %v12336_v47 = vld [vmem:[%s22824_s13 + $0x40] sm:$0xff] }
 0xa7f   : > { %v17092_v40 = vpop.f32.mrf.mxu1 }
 0xa81   : > { %v17093_v11 = vpop.f32.mrf.mxu1 }
 0xa82   : > { %v22670_v56 = vadd.f32 %v17093_v11, %v17092_v40 }
 0xa83   : > { %v17095_v0 = vpop.f32.mrf.mxu1 }
 0xa85   : > { %v17096_v35 = vpop.f32.mrf.mxu1 }
 0xa86   : > { %v22672_v31 = vadd.f32 %v17096_v35, %v17095_v0  ;;  %v12517_v0 = vadd.f32 %v22666_v26, %v12336_v47 }
 0xa87   : > { %v17098_v59 = vpop.f32.mrf.mxu1 }
 0xa89   : > { %v17099_v17 = vpop.f32.mrf.mxu1 }
 0xa8a   : > { %v22674_v51 = vadd.f32 %v17099_v17, %v17098_v59  ;;  %v12337_v59 = vld [vmem:[%s22824_s13 + $0x48] sm:$0xff] }
 0xa8b   : > { %v17101_v18 = vpop.f32.mrf.mxu1 }
 0xa8d   : > { %v17102_v63 = vpop.f32.mrf.mxu1 }
 0xa8e   : > { %v12518_v63 = vadd.f32 %v22668_v37, %v12337_v59 }
 0xaca   : > { %v17120_v60 = vpop.f32.mrf.mxu0 }
 0xacc   : > { %v17121_v22 = vpop.f32.mrf.mxu0 }
 0xacd   : > { %v17122_v33 = vadd.f32 %v17121_v22, %v17120_v60  ;;  %v12338_v60 = vld [vmem:[%s22824_s13 + $0x50] sm:$0xff] }
 0xace   : > { %v17123_v5 = vpop.f32.mrf.mxu0 }
 0xacf   : > { %v22683_v55 = vadd.f32 %v17122_v33, %v12509_v27  ;;  %v12519_v33 = vadd.f32 %v22670_v56, %v12338_v60 }
 0xad0   : > { %v17124_v29 = vpop.f32.mrf.mxu0 }
 0xad1   : > { %v17125_v46 = vadd.f32 %v17124_v29, %v17123_v5 }
 0xad2   : > { %v17126_v42 = vpop.f32.mrf.mxu0 }
 0xad3   : > { %v22689_v49 = vadd.f32 %v17125_v46, %v12510_v7 }
 0xad4   : > { %v17127_v43 = vpop.f32.mrf.mxu0 }
 0xad5   : > { %v17128_v6 = vadd.f32 %v17127_v43, %v17126_v42 }
 0xad6   : > { %v17129_v41 = vpop.f32.mrf.mxu0 }
 0xad7   : > { %v22697_v52 = vadd.f32 %v17128_v6, %v12511_v34 }
 0xad8   : > { %v17130_v39 = vpop.f32.mrf.mxu0 }
 0xad9   : > { %v17131_v36 = vadd.f32 %v17130_v39, %v17129_v41 }
 0xada   : > { %v17132_v2 = vpop.f32.mrf.mxu0 }
 0xadb   : > { %v22703_v19 = vadd.f32 %v17131_v36, %v12512_v45 }
 0xadc   : > { %v17133_v15 = vpop.f32.mrf.mxu0 }
 0xadd   : > { %v17134_v57 = vadd.f32 %v17133_v15, %v17132_v2 }
 0xade   : > { %v17135_v54 = vpop.f32.mrf.mxu0 }
 0xadf   : > { %v22708_v20 = vadd.f32 %v17134_v57, %v12513_v21 }
 0xae0   : > { %v17136_v44 = vpop.f32.mrf.mxu0 }
 0xae1   : > { %v17137_v28 = vadd.f32 %v17136_v44, %v17135_v54 }
 0xae2   : > { %v17138_v12 = vpop.f32.mrf.mxu0 }
 0xae3   : > { %v22713_v32 = vadd.f32 %v17137_v28, %v12514_v25 }
 0xae4   : > { %v17139_v23 = vpop.f32.mrf.mxu0 }
 0xae5   : > { %v17140_v13 = vadd.f32 %v17139_v23, %v17138_v12 }
 0xae6   : > { %v17141_v61 = vpop.f32.mrf.mxu0 }
 0xae7   : > { %v22719_v8 = vadd.f32 %v17140_v13, %v12515_v4 }
 0xae8   : > { %v17142_v53 = vpop.f32.mrf.mxu0 }
 0xae9   : > { %v17143_v1 = vadd.f32 %v17142_v53, %v17141_v61 }
 0xaea   : > { %v17144_v40 = vpop.f32.mrf.mxu0 }
 0xaeb   : > { %v22725_v11 = vadd.f32 %v17143_v1, %v12516_v3 }
 0xaec   : > { %v17145_v48 = vpop.f32.mrf.mxu0 }
 0xaed   : > { %v17146_v35 = vadd.f32 %v17145_v48, %v17144_v40 }
 0xaee   : > { %v17147_v17 = vpop.f32.mrf.mxu0 }
 0xaef   : > { %v22731_v18 = vadd.f32 %v17146_v35, %v12517_v0 }
 0xaf0   : > { %v17148_v24 = vpop.f32.mrf.mxu0 }
 0xaf1   : > { %v17149_v62 = vadd.f32 %v17148_v24, %v17147_v17 }
 0xaf2   : > { %v17150_v22 = vpop.f32.mrf.mxu0 }
 0xaf3   : > { %v22737_v27 = vadd.f32 %v17149_v62, %v12518_v63 }
 0xaf4   : > { %v17151_v26 = vpop.f32.mrf.mxu0 }
 0xaf5   : > { %v17152_v10 = vadd.f32 %v17151_v26, %v17150_v22 }
 0xaf6   : > { %v22740_v5 = vpop.f32.mrf.mxu0 }
 0xaf7   : > { %v22742_v29 = vadd.f32 %v17152_v10, %v12519_v33 }
 0xaf8   : > { %v22744_v7 = vpop.f32.mrf.mxu0 }
 0xafa   : > { %v22746_v46 = vpop.f32.mrf.mxu0 }
 0xafc   : > { %v22748_v37 = vpop.f32.mrf.mxu0 }
 0xafe   : > { %v17159_v38 = vpop.f32.mrf.mxu0  ;;  %v17178_v42 = vpop.f32.mrf.mxu1 }
 0xb00   : > { %v17160_v43 = vpop.f32.mrf.mxu0  ;;  %v17179_v34 = vpop.f32.mrf.mxu1 }
 0xb01   : > { %v17180_v6 = vadd.f32 %v17179_v34, %v17178_v42 }
 0xb02   : > { %v17181_v30 = vpop.f32.mrf.mxu1  ;;  %v17236_v41 = vpop.f32.mrf.mxu0 }
 0xb03   : > { %v12985_v56 = vadd.f32 %v17180_v6, %v22683_v55 }
 0xb04   : > { %v17182_v16 = vpop.f32.mrf.mxu1  ;;  %v17237_v39 = vpop.f32.mrf.mxu0 }
 0xb05   : > { %v17183_v45 = vadd.f32 %v17182_v16, %v17181_v30  ;;  %v17238_v36 = vadd.f32 %v17237_v39, %v17236_v41 }
 0xb06   : > { %v17184_v9 = vpop.f32.mrf.mxu1  ;;  %v17239_v2 = vpop.f32.mrf.mxu0 }
 0xb07   : > { %v12986_v15 = vadd.f32 %v17183_v45, %v22689_v49  ;;  %v13215_v21 = vadd.f32 %v17238_v36, %v12985_v56 }
 0xb08   : > { %v17185_v57 = vpop.f32.mrf.mxu1  ;;  %v17240_v58 = vpop.f32.mrf.mxu0 }
 0xb09   : > { %v17241_v54 = vadd.f32 %v17240_v58, %v17239_v2  ;;  %v17186_v28 = vadd.f32 %v17185_v57, %v17184_v9  ;;  %v13228_v4 = vmax.f32 %v13215_v21, 0.0 }
 0xb0a   : > { %v17187_v44 = vpop.f32.mrf.mxu1  ;;  %v17242_v25 = vpop.f32.mrf.mxu0 }
 0xb0b   : > { %v13216_v14 = vadd.f32 %v17241_v54, %v12986_v15  ;;  %v12987_v3 = vadd.f32 %v17186_v28, %v22697_v52 }
 0xb0c   : > { %v17188_v12 = vpop.f32.mrf.mxu1  ;;  %v17243_v23 = vpop.f32.mrf.mxu0 }
 0xb0d   : > { %v13229_v55 = vmax.f32 %v13216_v14, 0.0  ;;  %v17189_v13 = vadd.f32 %v17188_v12, %v17187_v44  ;;  %v17244_v50 = vadd.f32 %v17243_v23, %v17242_v25 }
 0xb0e   : > { %v17190_v61 = vpop.f32.mrf.mxu1  ;;  %v17245_v53 = vpop.f32.mrf.mxu0 }
 0xb0f   : > { %v22753_v1 = vpack.c.bf16 %v13229_v55, %v13228_v4  ;;  %v12988_v40 = vadd.f32 %v17189_v13, %v22703_v19  ;;  %v13217_v48 = vadd.f32 %v17244_v50, %v12987_v3 }
 0xb10   : > { %v17191_v49 = vpop.f32.mrf.mxu1  ;;  %v17246_v47 = vpop.f32.mrf.mxu0 }
 0xb11   : > { %v17247_v0 = vadd.f32 %v17246_v47, %v17245_v53  ;;  %v17192_v17 = vadd.f32 %v17191_v49, %v17190_v61  ;;  %v13230_v60 = vmax.f32 %v13217_v48, 0.0 }
 0xb12   : > { %v17193_v35 = vpop.f32.mrf.mxu1  ;;  %v17248_v59 = vpop.f32.mrf.mxu0 }
 0xb13   : > { %v13218_v24 = vadd.f32 %v17247_v0, %v12988_v40  ;;  %v12989_v38 = vadd.f32 %v17192_v17, %v22708_v20 }
 0xb14   : > { %v17194_v63 = vpop.f32.mrf.mxu1  ;;  %v17249_v62 = vpop.f32.mrf.mxu0 }
 0xb15   : > { %v13231_v22 = vmax.f32 %v13218_v24, 0.0  ;;  %v17195_v26 = vadd.f32 %v17194_v63, %v17193_v35  ;;  %v17250_v33 = vadd.f32 %v17249_v62, %v17248_v59 }
 0xb16   : > { %v17196_v10 = vpop.f32.mrf.mxu1  ;;  %v17251_v52 = vpop.f32.mrf.mxu0 }
 0xb17   : > { %v22757_v42 = vpack.c.bf16 %v13231_v22, %v13230_v60  ;;  %v12990_v34 = vadd.f32 %v17195_v26, %v22713_v32  ;;  %v13219_v6 = vadd.f32 %v17250_v33, %v12989_v38  ;;  %v17155_v60 = vadd.f32 %v22744_v7, %v22740_v5 }
 0xb18   : > { %v17197_v43 = vpop.f32.mrf.mxu1  ;;  %v17252_v19 = vpop.f32.mrf.mxu0  ;;  %v17158_v5 = vadd.f32 %v22748_v37, %v22746_v46 }
 0xb19   : > { %v17253_v30 = vadd.f32 %v17252_v19, %v17251_v52  ;;  %v17198_v16 = vadd.f32 %v17197_v43, %v17196_v10  ;;  %v13232_v9 = vmax.f32 %v13219_v6, 0.0  ;;  %v12340_v52 = vld [vmem:[%s22824_s13 + $0x60] sm:$0xf] }
 0xb1a   : > { %v17199_v41 = vpop.f32.mrf.mxu1  ;;  %v17254_v56 = vpop.f32.mrf.mxu0 }
 0xb1b   : > { %v13220_v39 = vadd.f32 %v17253_v30, %v12990_v34  ;;  %v12991_v58 = vadd.f32 %v17198_v16, %v22719_v8 }
 0xb1c   : > { %v17200_v45 = vpop.f32.mrf.mxu1  ;;  %v17255_v36 = vpop.f32.mrf.mxu0 }
 0xb1d   : > { %v13233_v2 = vmax.f32 %v13220_v39, 0.0  ;;  %v17201_v15 = vadd.f32 %v17200_v45, %v17199_v41  ;;  %v17256_v21 = vadd.f32 %v17255_v36, %v17254_v56 }
 0xb1e   : > { %v17202_v57 = vpop.f32.mrf.mxu1  ;;  %v17257_v20 = vpop.f32.mrf.mxu0 }
 0xb1f   : > { %v22761_v54 = vpack.c.bf16 %v13233_v2, %v13232_v9  ;;  %v12992_v25 = vadd.f32 %v17201_v15, %v22725_v11  ;;  %v13221_v28 = vadd.f32 %v17256_v21, %v12991_v58  ;;  %v12339_v11 = vld [vmem:[%s22824_s13 + $0x58] sm:$0xff] }
 0xb20   : > { %v17203_v44 = vpop.f32.mrf.mxu1  ;;  %v17258_v32 = vpop.f32.mrf.mxu0 }
 0xb21   : > { %v17259_v14 = vadd.f32 %v17258_v32, %v17257_v20  ;;  %v17204_v4 = vadd.f32 %v17203_v44, %v17202_v57  ;;  %v13234_v61 = vmax.f32 %v13221_v28, 0.0 }
 0xb22   : > { %v17205_v12 = vpop.f32.mrf.mxu1  ;;  %v17260_v23 = vpop.f32.mrf.mxu0 }
 0xb23   : > { %v13222_v55 = vadd.f32 %v17259_v14, %v12992_v25  ;;  %v12993_v40 = vadd.f32 %v17204_v4, %v22731_v18  ;;  %v12520_v18 = vadd.f32 %v22672_v31, %v12339_v11  ;;  %v12521_v31 = vadd.f32 %v22674_v51, %v12340_v52  ;;  %v18839_v4 = vld [vmem:[%s22825_s14 + $0x8] sm:$0x7f]  }
 0xb24   : > { %v17206_v13 = vpop.f32.mrf.mxu1  ;;  %v17261_v50 = vpop.f32.mrf.mxu0 }
 0xb25   : > { %v13235_v53 = vmax.f32 %v13222_v55, 0.0  ;;  %v17207_v3 = vadd.f32 %v17206_v13, %v17205_v12  ;;  %v17262_v49 = vadd.f32 %v17261_v50, %v17260_v23  ;;  %v12766_v30 = vadd.f32 %v17155_v60, %v12520_v18  ;;  %v13255_v50 = vld [vmem:[%s22826_s15 + $0x18] sm:$0x3f] }
 0xb26   : > { %v17208_v47 = vpop.f32.mrf.mxu1  ;;  %v17263_v8 = vpop.f32.mrf.mxu0  ;;  %v12767_v21 = vadd.f32 %v17158_v5, %v12521_v31  ;;  %v18853_v55 = vmov 0.0  }
 0xb27   : > { %v13244_v48 = vpack.c.bf16 %v13235_v53, %v13234_v61  ;;  %v12994_v59 = vadd.f32 %v17207_v3, %v22737_v27  ;;  %v13223_v17 = vadd.f32 %v17262_v49, %v12993_v40  ;;  %v13252_v3 = vld [vmem:[%s22826_s15] sm:$0xff] }
 0xb28   : > { %v17209_v0 = vpop.f32.mrf.mxu1  ;;  %v17264_v35 = vpop.f32.mrf.mxu0 }
 0xb29   : > { %v17265_v24 = vadd.f32 %v17264_v35, %v17263_v8  ;;  %v17210_v22 = vadd.f32 %v17209_v0, %v17208_v47  ;;  %v13236_v38 = vmax.f32 %v13223_v17, 0.0 }
 0xb2a   : > { %v17211_v63 = vpop.f32.mrf.mxu1  ;;  %v17266_v62 = vpop.f32.mrf.mxu0 }
 0xb2b   : > { %v13224_v26 = vadd.f32 %v17265_v24, %v12994_v59  ;;  %v12995_v7 = vadd.f32 %v17210_v22, %v22742_v29 }
 0xb2c   : > { %v17212_v33 = vpop.f32.mrf.mxu1  ;;  %v17267_v10 = vpop.f32.mrf.mxu0 }
 0xb2d   : > { %v13237_v43 = vmax.f32 %v13224_v26, 0.0  ;;  %v17213_v27 = vadd.f32 %v17212_v33, %v17211_v63  ;;  %v17268_v19 = vadd.f32 %v17267_v10, %v17266_v62  ;;  %v13332_v63 = vld [vmem:[%s22827_s16] sm:$0x1]  ;;  %v13333_v62 = vld [vmem:[#allocation5] sm:$0x1] }
 0xb2e   : > { %v17214_v34 = vpop.f32.mrf.mxu1  ;;  %v17269_v6 = vpop.f32.mrf.mxu0 }
 0xb2f   : > { %v13245_v41 = vpack.c.bf16 %v13237_v43, %v13236_v38  ;;  %v12996_v39 = vadd.f32 %v17213_v27, %v12766_v30  ;;  %v13225_v45 = vadd.f32 %v17268_v19, %v12995_v7 }
 0xb30   : > { %v17215_v56 = vpop.f32.mrf.mxu1  ;;  %v17270_v16 = vpop.f32.mrf.mxu0 }
 0xb31   : > { %v17216_v36 = vadd.f32 %v17215_v56, %v17214_v34  ;;  %v17271_v9 = vadd.f32 %v17270_v16, %v17269_v6  ;;  %v13238_v44 = vmax.f32 %v13225_v45, 0.0 }
 0xb32   : > { %v17217_v2 = vpop.f32.mrf.mxu1  ;;  %v17272_v15 = vpop.f32.mrf.mxu0 }
 0xb33   : > { %v13226_v57 = vadd.f32 %v17271_v9, %v12996_v39  ;;  %v12997_v32 = vadd.f32 %v17216_v36, %v12767_v21 }
 0xb34   : > { %v17218_v20 = vpop.f32.mrf.mxu1  ;;  %v17273_v58 = vpop.f32.mrf.mxu0 }
 0xb35   : > { %v13239_v46 = vmax.f32 %v13226_v57, 0.0  ;;  %v17274_v37 = vadd.f32 %v17273_v58, %v17272_v15 }
 0xb36   : > { %v17275_v29 = vpop.f32.mrf.mxu0 }
 0xb37   : > { %v13227_v25 = vadd.f32 %v17274_v37, %v12997_v32  ;;  %v13246_v28 = vpack.c.bf16 %v13239_v46, %v13238_v44 }
 0xb38   : > { %v17276_v51 = vpop.f32.mrf.mxu0 }
 0xb39   : > { %v13240_v14 = vmax.f32 %v13227_v25, 0.0 }
 0xb3b   : > { %v13247_v12 = vpack.c.bf16 %v13240_v14, %v13240_v14 }
 0xb3d   : > { %17868 = vmatprep.subr.msk.bf16.mxu1 %vm13273_vm13, %v13247_v12  ;;  %v13275_v23 = vsel %vm13273_vm13, %v13247_v12, 0 }
 0xb3e   : > { %17843 = vmatpush3.bf16.msra.mxu1 %v13275_v23 }
 0xb3f   : > { %17844 = vmatprep.subr.bf16.mxu1 %v13246_v28 }
 0xb42   : > { %17845 = vmatpush3.bf16.msra.mxu1 %v13246_v28 }
 0xb43   : > { %17846 = vmatprep.subr.bf16.mxu1 %v13245_v41 }
 0xb46   : > { %17847 = vmatpush3.bf16.msra.mxu1 %v13245_v41 }
 0xb47   : > { %17848 = vmatprep.subr.bf16.mxu1 %v13244_v48 }
 0xb4a   : > { %17849 = vmatpush3.bf16.msra.mxu1 %v13244_v48 }
 0xb4b   : > { %17850 = vmatprep.subr.bf16.mxu1 %v22761_v54 }
 0xb4e   : > { %17851 = vmatpush3.bf16.msra.mxu1 %v22761_v54  ;;  %v13254_v54 = vld [vmem:[%s22826_s15 + $0x10] sm:$0xff] }
 0xb4f   : > { %17852 = vmatprep.subr.bf16.mxu1 %v22757_v42 }
 0xb52   : > { %17853 = vmatpush3.bf16.msra.mxu1 %v22757_v42 }
 0xb53   : > { %17854 = vmatprep.subr.bf16.mxu1 %v22753_v1 }
 0xb56   : > { %17855 = vmatpush3.bf16.msra.mxu1 %v22753_v1  ;;  %v13253_v1 = vld [vmem:[%s22826_s15 + $0x8] sm:$0xff] }
 0xb57   : > { %17860 = vmatprep.subr.bf16.mxu1 %v18853_v55 }
 0xb59   : > { %17857 = vmatmul.mubr.msk.bf16.vlgmr.msra.gmra.mxu1 %vm13266_vm12, %v18839_v4 }
 0xb5a   : > { %17864 = vmatprep.mubr.msk.bf16.mxu1 %vm18854_vm14, %v18853_v55 }
 0xc19   : > { %v17858_v13 = vpop.f32.mrf.mxu1 }
 0xc1a   : > { %v13320_v61 = vadd.f32 %v17858_v13, %v13254_v54 }
 0xc1b   : > { %v13311_v42 = vpop.f32.mrf.mxu1 }
 0xc1c   : > { %v13328_v8 = vmax.f32 %v13320_v61, 0.0  ;;  %v13312_v0 = vadd.f32 %v13311_v42, %v13252_v3 }
 0xc1d   : > { %v17859_v53 = vpop.f32.mrf.mxu1 }
 0xc1e   : > { %v13323_v49 = vadd.f32 %v17859_v53, %v13255_v50  ;;  %v13326_v17 = vmax.f32 %v13312_v0, 0.0 }
 0xc1f   : > { %v13314_v47 = vpop.f32.mrf.mxu1 }
 0xc20   : > { %v13329_v40 = vmax.f32 %v13323_v49, 0.0  ;;  %v13315_v48 = vadd.f32 %v13314_v47, %v13253_v1 }
 0xc22   : > { %v13331_v35 = vpack.c.bf16 %v13329_v40, %v13328_v8  ;;  %v13327_v11 = vmax.f32 %v13315_v48, 0.0 }
 0xc24   : > { %v13340_v59 = vsel %vm13338_vm15, %v13331_v35, 0  ;;  %v13330_v24 = vpack.c.bf16 %v13327_v11, %v13326_v17 }
 0xc25   : > { %17861 = vmatpush3.bf16.msra.mxu1 %v13340_v59 }
 0xc26   : > { %17862 = vmatprep.subr.bf16.mxu1 %v18853_v55 }
 0xc29   : > { %17863 = vmatpush3.bf16.msra.mxu1 %v13330_v24 }
 0xc2c   : > { %17865 = vmatmul.mubr.msk.bf16.vlgmr.msra.gmra.mxu1 %vm13334_vm0, %v13332_v63 }
 0xcec   : > { %v13376_v60 = vpop.f32.mrf.mxu1 }
 0xced   : > { %v13377_v22 = vadd.f32 %v13376_v60, %v13333_v62 }
 0xcee   : > { %v17866_v26 = vpop.f32.mrf.mxu1 }
 0xcef   : > { %13383 = vst.msk [vmem:[%s573_s28] sm:$0x1] %vm13382_vm1, %v13377_v22 }
 0xcf0   : > { %v13379_v18 = vpop.f32.mrf.mxu1 }
 0xcf2   : > { %v17867_v33 = vpop.f32.mrf.mxu1 }
 0xcf3 PF: > { %s30_s29 = sadd.s32 1, %s18846_s29  }
 0xcf4   : > { %p27_p4 = scmp.ge.s32.totalorder %s30_s29, 4  }
 0xcf6   :  { %29 = sbr.rel (!%p27_p4) target bundleno = 4 (0x4), region = 149 }

</bundles_post_ra>
